<compile_context>
chip_gen: v7x
topology: tpu7x:2x2x1
jax: 0.10.0
libtpu: 0.0.40
codegen_flags: <defaults>
</compile_context>

<pallas_src>
import jax
import jax.numpy as jnp
from jax.experimental import pallas as pl
from jax.experimental.pallas import tpu as pltpu


# -----------------------------------------------------------------------------
# Kernel 1: recurrent step.  grid = (T,).  LSTM state lives in VMEM scratch and
# is carried across grid steps; encoder_out / att1 are copied once at t == 0.
# -----------------------------------------------------------------------------
def _recurrent_kernel(
    enc_hbm, att1_hbm,            # (Bp,P,E) / (Bp,P,A) f32, memory_space=pl.ANY (HBM)
    embp_ref,                     # (1,Bp,4D) f32  hoisted emb @ W_ih_emb + b_ih + b_hh, step t
    w_hfused_ref,                 # (D, A+E+4D) bf16  [W_dec_att | W_fbeta | W_hh]
    b_hfused_ref,                 # (1, A+E+4D) f32   [b_dec_att | b_fbeta | 0]
    w_full_ref,                   # (1, A) f32        attention.full_att weight
    w_ih_ctx_ref,                 # (E, 4D) bf16      LSTM W_ih context half
    h_out_ref,                    # (1, Bp, D) bf16   output block at step t
    h_scr, c_scr,                 # (Bp, D) f32       LSTM state (persists across steps)
    enc_vmem, att1_vmem,          # single-buffered VMEM copies of the time-invariant tensors
    dma_sem,                      # DMA semaphores (2,)
):
    t = pl.program_id(0)
    D = h_scr.shape[1]
    A = w_full_ref.shape[1]
    E = enc_vmem.shape[2]

    @pl.when(t == 0)
    def _init():
        # init_hidden_state: h0 = c0 = zeros
        h_scr[...] = jnp.zeros_like(h_scr)
        c_scr[...] = jnp.zeros_like(c_scr)
        # One-time DMA of the time-invariant tensors into single-buffered VMEM scratch.
        # (Waits kept inside the init block: deferring them only hides latency on step 0.)
        cp_enc = pltpu.make_async_copy(enc_hbm, enc_vmem, dma_sem.at[0])
        cp_att = pltpu.make_async_copy(att1_hbm, att1_vmem, dma_sem.at[1])
        cp_enc.start()
        cp_att.start()
        cp_enc.wait()
        cp_att.wait()

    h = h_scr[...]                                  # (Bp, D) f32
    c = c_scr[...]
    h_bf = h.astype(jnp.bfloat16)

    # ---- single fused MXU dot for att2 / f_beta gate / W_hh gates ----------
    fused = jnp.dot(h_bf, w_hfused_ref[...],
                    preferred_element_type=jnp.float32) + b_hfused_ref[...]   # (Bp, A+E+4D)
    att2 = fused[:, :A]                              # (Bp, A)
    gate_pre = fused[:, A:A + E]                     # (Bp, E)
    hh_gates = fused[:, A + E:]                      # (Bp, 4D)

    # ---- Attention (att1 precomputed in the wrapper; full_att bias cancels in softmax) ----
    e = jnp.maximum(att1_vmem[...] + att2[:, None, :], 0.0)                   # (Bp, P, A) f32
    scores = jnp.sum(e * w_full_ref[...][None, :, :], axis=-1)                # (Bp, P)
    m = jnp.max(scores, axis=1, keepdims=True)
    ex = jnp.exp(scores - m)
    alpha = ex * pl.reciprocal(jnp.sum(ex, axis=1, keepdims=True), approx=True)
    # attention-weighted encoding on the VPU/XLU (avoids B independent M=1 MXU matmuls)
    awe = jnp.sum(alpha[:, :, None] * enc_vmem[...], axis=1)                  # (Bp, E) f32

    # ---- Gating --------------------------------------------------------------
    awe = jax.nn.sigmoid(gate_pre) * awe

    # ---- LSTMCell (input-side emb projection hoisted; concat replaced by split dots) ----
    gates = (embp_ref[0]
             + jnp.dot(awe.astype(jnp.bfloat16), w_ih_ctx_ref[...],
                       preferred_element_type=jnp.float32)
             + hh_gates)                                                      # (Bp, 4D)
    i_g = jax.nn.sigmoid(gates[:, 0:D])
    f_g = jax.nn.sigmoid(gates[:, D:2 * D])
    g_g = jnp.tanh(gates[:, 2 * D:3 * D])
    o_g = jax.nn.sigmoid(gates[:, 3 * D:4 * D])
    c_new = f_g * c + i_g * g_g
    h_new = o_g * jnp.tanh(c_new)
    h_scr[...] = h_new
    c_scr[...] = c_new
    h_out_ref[0] = h_new.astype(h_out_ref.dtype)


# -----------------------------------------------------------------------------
# Kernel 2: vocab projection, one big GEMM tiled over vocab.
# -----------------------------------------------------------------------------
def _fc_kernel(h_ref, mask_ref, w_ref, b_ref, out_ref):
    logits = jnp.dot(h_ref[...], w_ref[...],
                     preferred_element_type=jnp.float32) + b_ref[...]
    # "shrinking batch": zero out (t, b) pairs with decode_length <= t (and padded rows).
    out_ref[...] = logits * mask_ref[...]


# -----------------------------------------------------------------------------
# Wrapper: sorting, embedding gather, hoisted GEMMs, padding, param plumbing.
# -----------------------------------------------------------------------------
def decoder_with_attention_forward(params, encoder_out, encoded_captions, caption_lengths,
                                   vocab_tile=128):
    B = encoder_out.shape[0]
    E = encoder_out.shape[-1]
    if encoder_out.ndim == 4:
        encoder_out = encoder_out.reshape(B, -1, E)
    P = encoder_out.shape[1]

    cl = caption_lengths.reshape(B)
    sort_ind = jnp.argsort(-cl)                      # descending, like torch sort
    cl_sorted = cl[sort_ind]
    enc = encoder_out[sort_ind].astype(jnp.float32)
    caps_sorted = encoded_captions[sort_ind]
    decode_lengths = cl_sorted - 1
    # NOTE: host sync + one compile per distinct max caption length (pad T to a bucket in prod).
    T = int(jnp.max(decode_lengths))

    emb_tab = params["embedding"]
    Emb = emb_tab.shape[1]
    D = params["w_hh"].shape[0]
    A = params["w_enc_att"].shape[1]
    V = params["w_fc"].shape[1]
    bf = jnp.bfloat16

    # ---- pad batch to a multiple of 8 (full sublane tiles); pad rows masked out --------
    Bp = ((B + 7) // 8) * 8
    pad = Bp - B
    if pad:
        enc = jnp.pad(enc, ((0, pad), (0, 0), (0, 0)))
        caps_p = jnp.pad(caps_sorted, ((0, pad), (0, 0)))
        dl_p = jnp.pad(decode_lengths, (0, pad))     # padded rows: length 0 -> always masked
    else:
        caps_p, dl_p = caps_sorted, decode_lengths

    # ---- hoisted time-invariant encoder projection att1 = enc @ W_enc + b_enc (f32) ----
    att1 = jnp.einsum("bpe,ea->bpa", enc, params["w_enc_att"],
                      preferred_element_type=jnp.float32) + params["b_enc_att"]

    # ---- hoisted input-side LSTM projection (h-independent): emb @ W_ih_emb + biases ----
    w_ih_emb = params["w_ih"][:Emb]
    w_ih_ctx = params["w_ih"][Emb:].astype(bf)
    emb = emb_tab[caps_p][:, :T, :]                                           # (Bp, T, Emb)
    emb_proj = (jnp.einsum("btm,mg->btg", emb, w_ih_emb,
                           preferred_element_type=jnp.float32)
                + params["b_ih"] + params["b_hh"])                            # (Bp, T, 4D) f32
    emb_proj_t = jnp.transpose(emb_proj, (1, 0, 2))                           # (T, Bp, 4D)

    # ---- fused h-side weight [W_dec_att | W_fbeta | W_hh], bias [b_dec | b_fbeta | 0] ----
    w_hfused = jnp.concatenate(
        [params["w_dec_att"], params["w_fbeta"], params["w_hh"]], axis=1).astype(bf)
    b_hfused = jnp.concatenate(
        [params["b_dec_att"], params["b_fbeta"], jnp.zeros((1, 4 * D), jnp.float32)],
        axis=1).astype(jnp.float32)

    def const(shape):
        return pl.BlockSpec(shape, lambda t: (0,) * len(shape))

    grid_spec = pltpu.PrefetchScalarGridSpec(
        num_scalar_prefetch=0,
        grid=(T,),
        in_specs=[
            pl.BlockSpec(memory_space=pl.ANY),                     # encoder_out (HBM, f32)
            pl.BlockSpec(memory_space=pl.ANY),                     # att1 (HBM, f32)
            pl.BlockSpec((1, Bp, 4 * D), lambda t: (t, 0, 0)),     # hoisted emb projection
            const((D, A + E + 4 * D)),                             # fused h-side weight
            const((1, A + E + 4 * D)),                             # fused h-side bias
            const((1, A)),                                         # full_att weight
            const((E, 4 * D)),                                     # LSTM W_ih context half
        ],
        out_specs=pl.BlockSpec((1, Bp, D), lambda t: (t, 0, 0)),
        scratch_shapes=[
            pltpu.VMEM((Bp, D), jnp.float32),        # h
            pltpu.VMEM((Bp, D), jnp.float32),        # c
            pltpu.VMEM((Bp, P, E), jnp.float32),     # encoder_out, single-buffered copy
            pltpu.VMEM((Bp, P, A), jnp.float32),     # att1, single-buffered copy
            pltpu.SemaphoreType.DMA((2,)),
        ],
    )

    h_all = pl.pallas_call(
        _recurrent_kernel,
        grid_spec=grid_spec,
        out_shape=jax.ShapeDtypeStruct((T, Bp, D), bf),
        compiler_params=pltpu.CompilerParams(
            dimension_semantics=("arbitrary",),      # state carried across t
            vmem_limit_bytes=48 * 1024 * 1024),      # fits v7x's 64 MiB with headroom
    )(
        enc, att1.astype(jnp.float32), emb_proj_t.astype(jnp.float32),
        w_hfused, b_hfused,
        params["w_full"].astype(jnp.float32),
        w_ih_ctx,
    )

    # ---- decoupled vocab projection: one (T*Bp, D) @ (D, V) GEMM, vocab-tiled ----------
    M = T * Bp
    h2d = h_all.reshape(M, D)                                                 # bf16
    mask = (dl_p[None, :] > jnp.arange(T, dtype=jnp.int32)[:, None])          # (T, Bp)
    mask = mask.astype(jnp.float32).reshape(M, 1)

    TV = min(vocab_tile, V)
    assert V % TV == 0
    NV = V // TV

    logits = pl.pallas_call(
        _fc_kernel,
        grid_spec=pltpu.PrefetchScalarGridSpec(
            num_scalar_prefetch=0,
            grid=(NV,),
            in_specs=[
                pl.BlockSpec((M, D), lambda j: (0, 0)),
                pl.BlockSpec((M, 1), lambda j: (0, 0)),
                pl.BlockSpec((D, TV), lambda j: (0, j)),
                pl.BlockSpec((1, TV), lambda j: (0, j)),
            ],
            out_specs=pl.BlockSpec((M, TV), lambda j: (0, j)),
        ),
        out_shape=jax.ShapeDtypeStruct((M, V), jnp.float32),
        compiler_params=pltpu.CompilerParams(
            dimension_semantics=("parallel",),       # vocab tiles are independent
            vmem_limit_bytes=48 * 1024 * 1024),
    )(h2d, mask, params["w_fc"].astype(bf), params["b_fc"].astype(jnp.float32))

    predictions = jnp.transpose(logits.reshape(T, Bp, V), (1, 0, 2))[:B]      # (B, T, V)
    return predictions, caps_sorted, decode_lengths


# -----------------------------------------------------------------------------
# Pure-JAX f32 reference for the correctness check.
# -----------------------------------------------------------------------------
def reference_forward(params, encoder_out, encoded_captions, caption_lengths):
    B = encoder_out.shape[0]
    E = encoder_out.shape[-1]
    enc = encoder_out.reshape(B, -1, E).astype(jnp.float32)
    cl = caption_lengths.reshape(B)
    sort_ind = jnp.argsort(-cl)
    cl = cl[sort_ind]
    enc = enc[sort_ind]
    caps = encoded_captions[sort_ind]
    dl = cl - 1
    T = int(jnp.max(dl))

    emb = params["embedding"][caps]
    D = params["w_hh"].shape[0]
    V = params["w_fc"].shape[1]
    h = jnp.zeros((B, D), jnp.float32)
    c = jnp.zeros((B, D), jnp.float32)
    preds_all = jnp.zeros((B, T, V), jnp.float32)

    for t in range(T):
        att1 = jnp.einsum("bpe,ea->bpa", enc, params["w_enc_att"]) + params["b_enc_att"]
        att2 = h @ params["w_dec_att"] + params["b_dec_att"]
        e = jax.nn.relu(att1 + att2[:, None, :])
        scores = jnp.sum(e * params["w_full"][None, :, :], axis=-1) + params["b_full"]
        alpha = jax.nn.softmax(scores, axis=1)
        awe = jnp.sum(alpha[:, :, None] * enc, axis=1)
        gate = jax.nn.sigmoid(h @ params["w_fbeta"] + params["b_fbeta"])
        awe = gate * awe
        x = jnp.concatenate([emb[:, t, :], awe], axis=1)
        gates = x @ params["w_ih"] + params["b_ih"] + h @ params["w_hh"] + params["b_hh"]
        i_g = jax.nn.sigmoid(gates[:, 0:D])
        f_g = jax.nn.sigmoid(gates[:, D:2 * D])
        g_g = jnp.tanh(gates[:, 2 * D:3 * D])
        o_g = jax.nn.sigmoid(gates[:, 3 * D:4 * D])
        c = f_g * c + i_g * g_g
        h = o_g * jnp.tanh(c)
        p = h @ params["w_fc"] + params["b_fc"]
        mask = (dl > t)[:, None]
        preds_all = preds_all.at[:, t, :].set(jnp.where(mask, p, 0.0))
    return preds_all, caps, dl


# -----------------------------------------------------------------------------
# Deterministic parameter init + demo run.
# -----------------------------------------------------------------------------
def init_params(key, attention_dim, embed_dim, decoder_dim, vocab_size, encoder_dim):
    A, Emb, D, V, E = attention_dim, embed_dim, decoder_dim, vocab_size, encoder_dim
    ks = jax.random.split(key, 16)
    u = lambda k, shape, a: jax.random.uniform(k, shape, jnp.float32, -a, a)
    inv = lambda n: 1.0 / (n ** 0.5)
    return {
        # embedding: uniform(-0.1, 0.1) as in init_weights
        "embedding": u(ks[0], (V, Emb), 0.1),
        # attention linears (stored transposed: (in, out))
        "w_enc_att": u(ks[1], (E, A), inv(E)), "b_enc_att": u(ks[2], (1, A), inv(E)),
        "w_dec_att": u(ks[3], (D, A), inv(D)), "b_dec_att": u(ks[4], (1, A), inv(D)),
        "w_full":    u(ks[5], (1, A), inv(A)), "b_full":    u(ks[6], (1, 1), inv(A)),
        # f_beta
        "w_fbeta": u(ks[7], (D, E), inv(D)), "b_fbeta": u(ks[8], (1, E), inv(D)),
        # LSTMCell (stored transposed: (in, 4*hidden)); biases kept separate like torch
        "w_ih": u(ks[9], (Emb + E, 4 * D), inv(D)), "b_ih": u(ks[10], (1, 4 * D), inv(D)),
        "w_hh": u(ks[11], (D, 4 * D), inv(D)),      "b_hh": u(ks[12], (1, 4 * D), inv(D)),
        # fc: weight uniform(-0.1, 0.1), bias zero (init_weights)
        "w_fc": u(ks[13], (D, V), 0.1), "b_fc": jnp.zeros((1, V), jnp.float32),
    }


if __name__ == "__main__":
    key = jax.random.PRNGKey(0)
    # dims chosen as (8,128)-friendly multiples
    attention_dim, embed_dim, decoder_dim = 128, 128, 128
    vocab_size, encoder_dim = 256, 128
    B, Hh, Ww = 4, 16, 8          # num_pixels = 128
    max_cap_len = 8

    k_param, k_enc, k_cap = jax.random.split(key, 3)
    params = init_params(k_param, attention_dim, embed_dim, decoder_dim, vocab_size, encoder_dim)

    # encoder features channels-last (B, H, W, C), like the PyTorch module's 4D input
    encoder_out = jax.random.normal(k_enc, (B, Hh, Ww, encoder_dim), jnp.float32)
    encoded_captions = jax.random.randint(k_cap, (B, max_cap_len), 0, vocab_size, jnp.int32)
    caption_lengths = jnp.array([[5], [8], [3], [6]], jnp.int32)

    preds, caps_sorted, dec_lens = decoder_with_attention_forward(
        params, encoder_out, encoded_captions, caption_lengths)
    preds = jax.block_until_ready(preds)

    preds_ref, caps_ref, dl_ref = reference_forward(
        params, encoder_out, encoded_captions, caption_lengths)

    assert preds.shape == (B, int(jnp.max(caption_lengths)) - 1, vocab_size)
    assert bool(jnp.all(caps_sorted == caps_ref))
    assert bool(jnp.all(dec_lens == dl_ref))
    max_err = float(jnp.max(jnp.abs(preds - preds_ref)))
    assert bool(jnp.allclose(preds, preds_ref, atol=2e-2, rtol=2e-2)), max_err

    print("KERNEL_OK")
</pallas_src>

<mosaic_0001>
module attributes {stable_mosaic.version = 11 : i64} {
  func.func @_recurrent_kernel(%arg0: i32, %arg1: memref<8x128x128xf32, #tpu.memory_space<any>>, %arg2: memref<8x128x128xf32, #tpu.memory_space<any>>, %arg3: memref<1x8x512xf32, #tpu.memory_space<vmem>>, %arg4: memref<128x768xbf16, #tpu.memory_space<vmem>>, %arg5: memref<1x768xf32, #tpu.memory_space<vmem>>, %arg6: memref<1x128xf32, #tpu.memory_space<vmem>>, %arg7: memref<128x512xbf16, #tpu.memory_space<vmem>>, %arg8: memref<1x8x128xbf16, #tpu.memory_space<vmem>>, %arg9: memref<8x128xf32, #tpu.memory_space<vmem>>, %arg10: memref<8x128xf32, #tpu.memory_space<vmem>>, %arg11: memref<8x128x128xf32, #tpu.memory_space<vmem>>, %arg12: memref<8x128x128xf32, #tpu.memory_space<vmem>>, %arg13: memref<2x!tpu.dma_semaphore, #tpu.memory_space<semaphore_mem>>) attributes {dimension_semantics = [#tpu.dimension_semantics<arbitrary>], iteration_bounds = array<i64: 7>, scalar_prefetch = 0 : i64, scratch_operands = 5 : i64, tpu.core_type = #tpu.core_type<tc>, window_params = [{}, {}, {transform_indices = @transform_2, window_bounds = array<i64: 1, 8, 512>}, {pipeline_mode = #tpu.pipeline_mode<synchronous>, transform_indices = @transform_3, window_bounds = array<i64: 128, 768>}, {pipeline_mode = #tpu.pipeline_mode<synchronous>, transform_indices = @transform_4, window_bounds = array<i64: 1, 768>}, {pipeline_mode = #tpu.pipeline_mode<synchronous>, transform_indices = @transform_5, window_bounds = array<i64: 1, 128>}, {pipeline_mode = #tpu.pipeline_mode<synchronous>, transform_indices = @transform_6, window_bounds = array<i64: 128, 512>}, {transform_indices = @transform_7, window_bounds = array<i64: 1, 8, 128>}]} {
    %c0_i32 = arith.constant 0 : i32
    %0 = arith.cmpi eq, %arg0, %c0_i32 : i32
    %1 = arith.extui %0 : i1 to i32
    %c0_i32_0 = arith.constant 0 : i32
    %2 = arith.cmpi ne, %1, %c0_i32_0 : i32
    scf.if %2 {
      %cst_38 = arith.constant 0.000000e+00 : f32
      %84 = vector.broadcast %cst_38 : f32 to vector<8x128xf32>
      %c0_39 = arith.constant 0 : index
      %c0_40 = arith.constant 0 : index
      %85 = vector.load %arg9[%c0_39, %c0_40] : memref<8x128xf32, #tpu.memory_space<vmem>>, vector<8x128xf32>
      tpu.vector_store %arg9[%c0_39, %c0_40], %84 {strides = array<i32>} : memref<8x128xf32, #tpu.memory_space<vmem>>, vector<8x128xf32>,
      %cst_41 = arith.constant 0.000000e+00 : f32
      %86 = vector.broadcast %cst_41 : f32 to vector<8x128xf32>
      %c0_42 = arith.constant 0 : index
      %c0_43 = arith.constant 0 : index
      %87 = vector.load %arg10[%c0_42, %c0_43] : memref<8x128xf32, #tpu.memory_space<vmem>>, vector<8x128xf32>
      tpu.vector_store %arg10[%c0_42, %c0_43], %86 {strides = array<i32>} : memref<8x128xf32, #tpu.memory_space<vmem>>, vector<8x128xf32>,
      %c0_i32_44 = arith.constant 0 : i32
      %88 = tpu.memref_slice %arg13[%c0_i32_44] : memref<2x!tpu.dma_semaphore, #tpu.memory_space<semaphore_mem>> -> memref<1x!tpu.dma_semaphore, #tpu.memory_space<semaphore_mem>>
      %89 = tpu.memref_squeeze %88 : memref<1x!tpu.dma_semaphore, #tpu.memory_space<semaphore_mem>> -> memref<!tpu.dma_semaphore, #tpu.memory_space<semaphore_mem>>
      tpu.enqueue_dma source(%arg1 : memref<8x128x128xf32, #tpu.memory_space<any>>) target(%arg11 : memref<8x128x128xf32, #tpu.memory_space<vmem>>) target_semaphore(%89 : memref<!tpu.dma_semaphore, #tpu.memory_space<semaphore_mem>>)
      %c1_i32 = arith.constant 1 : i32
      %90 = tpu.memref_slice %arg13[%c1_i32] : memref<2x!tpu.dma_semaphore, #tpu.memory_space<semaphore_mem>> -> memref<1x!tpu.dma_semaphore, #tpu.memory_space<semaphore_mem>>
      %91 = tpu.memref_squeeze %90 : memref<1x!tpu.dma_semaphore, #tpu.memory_space<semaphore_mem>> -> memref<!tpu.dma_semaphore, #tpu.memory_space<semaphore_mem>>
      tpu.enqueue_dma source(%arg2 : memref<8x128x128xf32, #tpu.memory_space<any>>) target(%arg12 : memref<8x128x128xf32, #tpu.memory_space<vmem>>) target_semaphore(%91 : memref<!tpu.dma_semaphore, #tpu.memory_space<semaphore_mem>>)
      %c0_i32_45 = arith.constant 0 : i32
      %92 = tpu.memref_slice %arg13[%c0_i32_45] : memref<2x!tpu.dma_semaphore, #tpu.memory_space<semaphore_mem>> -> memref<1x!tpu.dma_semaphore, #tpu.memory_space<semaphore_mem>>
      %93 = tpu.memref_squeeze %92 : memref<1x!tpu.dma_semaphore, #tpu.memory_space<semaphore_mem>> -> memref<!tpu.dma_semaphore, #tpu.memory_space<semaphore_mem>>
      tpu.wait_dma2 semaphore(%93 : memref<!tpu.dma_semaphore, #tpu.memory_space<semaphore_mem>>) src(%arg1 : memref<8x128x128xf32, #tpu.memory_space<any>>) dst(%arg11 : memref<8x128x128xf32, #tpu.memory_space<vmem>>)
      %c1_i32_46 = arith.constant 1 : i32
      %94 = tpu.memref_slice %arg13[%c1_i32_46] : memref<2x!tpu.dma_semaphore, #tpu.memory_space<semaphore_mem>> -> memref<1x!tpu.dma_semaphore, #tpu.memory_space<semaphore_mem>>
      %95 = tpu.memref_squeeze %94 : memref<1x!tpu.dma_semaphore, #tpu.memory_space<semaphore_mem>> -> memref<!tpu.dma_semaphore, #tpu.memory_space<semaphore_mem>>
      tpu.wait_dma2 semaphore(%95 : memref<!tpu.dma_semaphore, #tpu.memory_space<semaphore_mem>>) src(%arg2 : memref<8x128x128xf32, #tpu.memory_space<any>>) dst(%arg12 : memref<8x128x128xf32, #tpu.memory_space<vmem>>)
    } else {
    }
    %c0 = arith.constant 0 : index
    %c0_1 = arith.constant 0 : index
    %3 = vector.load %arg9[%c0, %c0_1] : memref<8x128xf32, #tpu.memory_space<vmem>>, vector<8x128xf32>
    %c0_2 = arith.constant 0 : index
    %c0_3 = arith.constant 0 : index
    %4 = vector.load %arg10[%c0_2, %c0_3] : memref<8x128xf32, #tpu.memory_space<vmem>>, vector<8x128xf32>
    %5 = arith.truncf %3 : vector<8x128xf32> to vector<8x128xbf16>
    %c0_4 = arith.constant 0 : index
    %c0_5 = arith.constant 0 : index
    %6 = vector.load %arg4[%c0_4, %c0_5] : memref<128x768xbf16, #tpu.memory_space<vmem>>, vector<128x768xbf16>
    %cst = arith.constant dense<0.000000e+00> : vector<8x768xf32>
    %7 = tpu.matmul %5, %6, %cst {dimension_numbers = #tpu.dot_dimension_numbers<[1], [0], [0], [1], [0, 0, 1, 1], [], []>} : vector<8x128xbf16>, vector<128x768xbf16>, vector<8x768xf32> -> vector<8x768xf32>
    %c0_6 = arith.constant 0 : index
    %c0_7 = arith.constant 0 : index
    %8 = vector.load %arg5[%c0_6, %c0_7] : memref<1x768xf32, #tpu.memory_space<vmem>>, vector<1x768xf32>
    %9 = vector.broadcast %8 : vector<1x768xf32> to vector<8x768xf32>
    %10 = arith.addf %7, %9 : vector<8x768xf32>
    %11 = vector.extract_strided_slice %10 {offsets = [0, 0], sizes = [8, 128], strides = [1, 1]} : vector<8x768xf32> to vector<8x128xf32>
    %12 = vector.extract_strided_slice %10 {offsets = [0, 128], sizes = [8, 128], strides = [1, 1]} : vector<8x768xf32> to vector<8x128xf32>
    %13 = vector.extract_strided_slice %10 {offsets = [0, 256], sizes = [8, 512], strides = [1, 1]} : vector<8x768xf32> to vector<8x512xf32>
    %c0_8 = arith.constant 0 : index
    %c0_9 = arith.constant 0 : index
    %c0_10 = arith.constant 0 : index
    %14 = vector.load %arg12[%c0_8, %c0_9, %c0_10] : memref<8x128x128xf32, #tpu.memory_space<vmem>>, vector<8x128x128xf32>
    %15 = vector.shape_cast %11 : vector<8x128xf32> to vector<8x1x128xf32>
    %16 = vector.broadcast %15 : vector<8x1x128xf32> to vector<8x128x128xf32>
    %17 = arith.addf %14, %16 : vector<8x128x128xf32>
    %cst_11 = arith.constant 0.000000e+00 : f32
    %18 = vector.broadcast %cst_11 : f32 to vector<8x128x128xf32>
    %19 = arith.maximumf %17, %18 : vector<8x128x128xf32>
    %c0_12 = arith.constant 0 : index
    %c0_13 = arith.constant 0 : index
    %20 = vector.load %arg6[%c0_12, %c0_13] : memref<1x128xf32, #tpu.memory_space<vmem>>, vector<1x128xf32>
    %21 = vector.shape_cast %20 : vector<1x128xf32> to vector<1x1x128xf32>
    %22 = vector.broadcast %21 : vector<1x1x128xf32> to vector<8x128x128xf32>
    %23 = arith.mulf %19, %22 : vector<8x128x128xf32>
    %cst_14 = arith.constant dense<0.000000e+00> : vector<8x128xf32>
    %24 = vector.multi_reduction <add>, %23, %cst_14 [2] : vector<8x128x128xf32> to vector<8x128xf32>
    %cst_15 = arith.constant dense<0xFF800000> : vector<8xf32>
    %25 = vector.multi_reduction <maximumf>, %24, %cst_15 [1] : vector<8x128xf32> to vector<8xf32>
    %26 = vector.shape_cast %25 : vector<8xf32> to vector<8x1xf32>
    %27 = vector.broadcast %26 : vector<8x1xf32> to vector<8x128xf32>
    %28 = arith.subf %24, %27 : vector<8x128xf32>
    %29 = math.exp %28 : vector<8x128xf32>
    %cst_16 = arith.constant dense<0.000000e+00> : vector<8xf32>
    %30 = vector.multi_reduction <add>, %29, %cst_16 [1] : vector<8x128xf32> to vector<8xf32>
    %31 = vector.shape_cast %30 : vector<8xf32> to vector<8x1xf32>
    %32 = tpu.reciprocal %31 {approx = true} : vector<8x1xf32> -> vector<8x1xf32>
    %33 = vector.broadcast %32 : vector<8x1xf32> to vector<8x128xf32>
    %34 = arith.mulf %29, %33 : vector<8x128xf32>
    %35 = vector.shape_cast %34 : vector<8x128xf32> to vector<8x128x1xf32>
    %c0_17 = arith.constant 0 : index
    %c0_18 = arith.constant 0 : index
    %c0_19 = arith.constant 0 : index
    %36 = vector.load %arg11[%c0_17, %c0_18, %c0_19] : memref<8x128x128xf32, #tpu.memory_space<vmem>>, vector<8x128x128xf32>
    %37 = vector.broadcast %35 : vector<8x128x1xf32> to vector<8x128x128xf32>
    %38 = arith.mulf %37, %36 : vector<8x128x128xf32>
    %cst_20 = arith.constant dense<0.000000e+00> : vector<8x128xf32>
    %39 = vector.multi_reduction <add>, %38, %cst_20 [1] : vector<8x128x128xf32> to vector<8x128xf32>
    %40 = arith.negf %12 : vector<8x128xf32>
    %41 = math.exp %40 : vector<8x128xf32>
    %cst_21 = arith.constant 1.000000e+00 : f32
    %42 = vector.broadcast %cst_21 : f32 to vector<8x128xf32>
    %43 = arith.addf %42, %41 : vector<8x128xf32>
    %44 = arith.divf %42, %43 : vector<8x128xf32>
    %45 = arith.mulf %44, %39 : vector<8x128xf32>
    %c0_22 = arith.constant 0 : index
    %c0_23 = arith.constant 0 : index
    %c0_24 = arith.constant 0 : index
    %46 = vector.load %arg3[%c0_22, %c0_23, %c0_24] : memref<1x8x512xf32, #tpu.memory_space<vmem>>, vector<1x8x512xf32>
    %47 = vector.shape_cast %46 : vector<1x8x512xf32> to vector<8x512xf32>
    %48 = arith.truncf %45 : vector<8x128xf32> to vector<8x128xbf16>
    %c0_25 = arith.constant 0 : index
    %c0_26 = arith.constant 0 : index
    %49 = vector.load %arg7[%c0_25, %c0_26] : memref<128x512xbf16, #tpu.memory_space<vmem>>, vector<128x512xbf16>
    %cst_27 = arith.constant dense<0.000000e+00> : vector<8x512xf32>
    %50 = tpu.matmul %48, %49, %cst_27 {dimension_numbers = #tpu.dot_dimension_numbers<[1], [0], [0], [1], [0, 0, 1, 1], [], []>} : vector<8x128xbf16>, vector<128x512xbf16>, vector<8x512xf32> -> vector<8x512xf32>
    %51 = arith.addf %47, %50 : vector<8x512xf32>
    %52 = arith.addf %51, %13 : vector<8x512xf32>
    %53 = vector.extract_strided_slice %52 {offsets = [0, 0], sizes = [8, 128], strides = [1, 1]} : vector<8x512xf32> to vector<8x128xf32>
    %54 = arith.negf %53 : vector<8x128xf32>
    %55 = math.exp %54 : vector<8x128xf32>
    %cst_28 = arith.constant 1.000000e+00 : f32
    %56 = vector.broadcast %cst_28 : f32 to vector<8x128xf32>
    %57 = arith.addf %56, %55 : vector<8x128xf32>
    %58 = arith.divf %56, %57 : vector<8x128xf32>
    %59 = vector.extract_strided_slice %52 {offsets = [0, 128], sizes = [8, 128], strides = [1, 1]} : vector<8x512xf32> to vector<8x128xf32>
    %60 = arith.negf %59 : vector<8x128xf32>
    %61 = math.exp %60 : vector<8x128xf32>
    %cst_29 = arith.constant 1.000000e+00 : f32
    %62 = vector.broadcast %cst_29 : f32 to vector<8x128xf32>
    %63 = arith.addf %62, %61 : vector<8x128xf32>
    %64 = arith.divf %62, %63 : vector<8x128xf32>
    %65 = vector.extract_strided_slice %52 {offsets = [0, 256], sizes = [8, 128], strides = [1, 1]} : vector<8x512xf32> to vector<8x128xf32>
    %66 = math.tanh %65 : vector<8x128xf32>
    %67 = vector.extract_strided_slice %52 {offsets = [0, 384], sizes = [8, 128], strides = [1, 1]} : vector<8x512xf32> to vector<8x128xf32>
    %68 = arith.negf %67 : vector<8x128xf32>
    %69 = math.exp %68 : vector<8x128xf32>
    %cst_30 = arith.constant 1.000000e+00 : f32
    %70 = vector.broadcast %cst_30 : f32 to vector<8x128xf32>
    %71 = arith.addf %70, %69 : vector<8x128xf32>
    %72 = arith.divf %70, %71 : vector<8x128xf32>
    %73 = arith.mulf %64, %4 : vector<8x128xf32>
    %74 = arith.mulf %58, %66 : vector<8x128xf32>
    %75 = arith.addf %73, %74 : vector<8x128xf32>
    %76 = math.tanh %75 : vector<8x128xf32>
    %77 = arith.mulf %72, %76 : vector<8x128xf32>
    %c0_31 = arith.constant 0 : index
    %c0_32 = arith.constant 0 : index
    %78 = vector.load %arg9[%c0_31, %c0_32] : memref<8x128xf32, #tpu.memory_space<vmem>>, vector<8x128xf32>
    tpu.vector_store %arg9[%c0_31, %c0_32], %77 {strides = array<i32>} : memref<8x128xf32, #tpu.memory_space<vmem>>, vector<8x128xf32>,
    %c0_33 = arith.constant 0 : index
    %c0_34 = arith.constant 0 : index
    %79 = vector.load %arg10[%c0_33, %c0_34] : memref<8x128xf32, #tpu.memory_space<vmem>>, vector<8x128xf32>
    tpu.vector_store %arg10[%c0_33, %c0_34], %75 {strides = array<i32>} : memref<8x128xf32, #tpu.memory_space<vmem>>, vector<8x128xf32>,
    %80 = arith.truncf %77 : vector<8x128xf32> to vector<8x128xbf16>
    %c0_35 = arith.constant 0 : index
    %c0_36 = arith.constant 0 : index
    %c0_37 = arith.constant 0 : index
    %81 = vector.load %arg8[%c0_35, %c0_36, %c0_37] : memref<1x8x128xbf16, #tpu.memory_space<vmem>>, vector<1x8x128xbf16>
    %82 = vector.shape_cast %81 : vector<1x8x128xbf16> to vector<8x128xbf16>
    %83 = vector.shape_cast %80 : vector<8x128xbf16> to vector<1x8x128xbf16>
    tpu.vector_store %arg8[%c0_35, %c0_36, %c0_37], %83 {strides = array<i32>} : memref<1x8x128xbf16, #tpu.memory_space<vmem>>, vector<1x8x128xbf16>,
    return
  }
  func.func @transform_2(%arg0: i32) -> (i32, i32, i32) {
    %c0_i32 = arith.constant 0 : i32
    %c0_i32_0 = arith.constant 0 : i32
    %c0_i32_1 = arith.constant 0 : i32
    return %arg0, %c0_i32, %c0_i32_0 : i32, i32, i32
  }
  func.func @transform_3(%arg0: i32) -> (i32, i32) {
    %c0_i32 = arith.constant 0 : i32
    %c0_i32_0 = arith.constant 0 : i32
    %c0_i32_1 = arith.constant 0 : i32
    return %c0_i32, %c0_i32_0 : i32, i32
  }
  func.func @transform_4(%arg0: i32) -> (i32, i32) {
    %c0_i32 = arith.constant 0 : i32
    %c0_i32_0 = arith.constant 0 : i32
    %c0_i32_1 = arith.constant 0 : i32
    return %c0_i32, %c0_i32_0 : i32, i32
  }
  func.func @transform_5(%arg0: i32) -> (i32, i32) {
    %c0_i32 = arith.constant 0 : i32
    %c0_i32_0 = arith.constant 0 : i32
    %c0_i32_1 = arith.constant 0 : i32
    return %c0_i32, %c0_i32_0 : i32, i32
  }
  func.func @transform_6(%arg0: i32) -> (i32, i32) {
    %c0_i32 = arith.constant 0 : i32
    %c0_i32_0 = arith.constant 0 : i32
    %c0_i32_1 = arith.constant 0 : i32
    return %c0_i32, %c0_i32_0 : i32, i32
  }
  func.func @transform_7(%arg0: i32) -> (i32, i32, i32) {
    %c0_i32 = arith.constant 0 : i32
    %c0_i32_0 = arith.constant 0 : i32
    %c0_i32_1 = arith.constant 0 : i32
    return %arg0, %c0_i32, %c0_i32_0 : i32, i32, i32
  }
}

</mosaic_0001>

<bundles_post_ra>
// kernel: tpu_custom_call.1
= control target key start
LH: loop header
LB: loop body
LE: loop exit
PB: predicated region body
PF: predicated region fallthrough
CT: control target
= control target key end

     0   :  { %s9691_s0 = inlined_call_operand.hbm [shape: f32[8,128,128], index: 0, kind: input, shape index: {}]   ;;  %s9692_s1 = inlined_call_operand.hbm [shape: f32[8,128,128], index: 1, kind: input, shape index: {}]   ;;  %s9693_s2 = inlined_call_operand.hbm [shape: f32[7,8,512], index: 2, kind: input, shape index: {}]   ;;  %s9694_s3 = inlined_call_operand.hbm [shape: bf16[128,768], index: 3, kind: input, shape index: {}]   ;;  %s9695_s4 = inlined_call_operand.vmem [shape: f32[1,768], index: 4, kind: input, shape index: {}]   ;;  %s9696_s5 = inlined_call_operand.vmem [shape: f32[1,128], index: 5, kind: input, shape index: {}]   ;;  %s9697_s6 = inlined_call_operand.hbm [shape: bf16[128,512], index: 6, kind: input, shape index: {}]   ;;  %s9698_s7 = inlined_call_operand.hbm [shape: bf16[7,8,128], index: 7, kind: output, shape index: {}]  }
   0x1   :  { %10000 = sst [smem:[#allocation228_spill]] %s9693_s2 }
   0x2   :  { %12 = vsyncpa [#allocation8], 0 }
   0x3   :  { %14 = vsyncpa [#allocation8 + $0x1], 0 }
   0x4   :  { %15 = vsyncpa [#allocation11], 0 }
   0x5   :  { %16 = vsyncpa [#allocation9], 0 }
   0x6   :  { %18 = vsyncpa [#allocation9 + $0x1], 0  ;;  %s6554_s24 = smov 0   ;;  %s6556_s25 = smov 0  }
   0x7   :  { %s6558_s26 = smov 0   ;;  %s6560_s27 = smov 0  }
   0x8 LB: > { %s6575_s28 = sadd.s32 4294967295, %s6499_s27   ;;  %s5695_s29 = sadd.s32 4294967294, %s6499_s27   ;;  %s6499_s27 = sphi %s6560_s27, %s10720_s27   ;;  %s6495_s26 = sphi %s6558_s26, %s10719_s26   ;;  %s6491_s25 = sphi %s6556_s25, %s10718_s25   ;;  %s6487_s24 = sphi %s6554_s24, %s10717_s24  }
   0x9   : > { %p44_p0 = scmp.ne.s32.totalorder %s6491_s25, %s6487_s24  ;;  %p9699_p1 = scmp.eq.s32.totalorder %s6575_s28, 0 }
   0xa   : > { %p158_p3 = scmp.eq.s32.totalorder %s5695_s29, 6  ;;  %p5696_p5 = scmp.ge.s32.totalorder %s6499_s27, 1 }
   0xb   : > { %p6584_p4 = por %p9699_p1, %p44_p0  ;;  %p165_p7 = scmp.lt.s32.totalorder %s6499_s27, 8 }
   0xc   : > { %p6589_p6 = por %p158_p3, %p44_p0  ;;  %s6501_s10 = smov [#allocation10]  }
   0xd   : > { %s10001_s30 = scalar_select %p6584_p4, 1, 0 }
   0xe   : > { %s10002_s8 = scalar_select %p6589_p6, 1, 0 }
   0xf   : > { %p6595_p9 = pnand %p5696_p5, %p165_p7  ;;  %s177_s11 = sshll.u32 %s6501_s10, 4  ;;  %s178_s11 = int_to_ptr.vmem [resolvable:$true] %s177_s11 }
  0x10   : > { %s6502_s13 = smov [#allocation12]   ;;  %s6295_s17 = scalar_lea.hbm %s9694_s3, 6144 }
  0x11   : > { %s10003_s9 = scalar_select %p6595_p9, 1, 0 }
  0x12   : > { %p5829_p10 = pneg %p6595_p9  ;;  %s196_s14 = sshll.u32 %s6502_s13, 4  ;;  %s6607_s14 = int_to_ptr.vmem [resolvable:$true] %s196_s14 }
  0x13   : > { %p6296_p12 = scmp.ne.s32.totalorder %s9694_s3, %s6295_s17  ;;  %p6302_p5 = scmp.lt.u32.totalorder %s6295_s17, %s9694_s3 }
  0x14   : > { %p6603_p11 = pnand %p5829_p10, %p9699_p1 }
  0x16   : > { %p6297_p13 = pneg %p6603_p11 }
  0x18   : > { %p6298_p0 = pnand %p6297_p13, %p6296_p12 }
  0x1a   : > { %p6299_p3 = pneg %p6298_p0 }
  0x1c   : > { %p6304_p7 = pnand %p6302_p5, %p6299_p3 }
  0x1e   : > { %6307 = shalt.err (!%p6304_p7)
}
  0x1f   : > { %s6308_s22 = scalar_lea.vmem %s178_s11, 6144  ;;  %p6316_p2 = scmp.lt.s32.totalorder %s178_s11, %s178_s11 }
  0x20   : > { %p6309_p10 = scmp.ne.s32.totalorder %s178_s11, %s6308_s22  ;;  %p6317_p6 = scmp.lt.s32.totalorder %s6308_s22, %s6308_s22 }
  0x22   : > { %p6311_p8 = pnand %p6309_p10, %p6297_p13  ;;  %p6318_p4 = por %p6317_p6, %p6316_p2 }
  0x24   : > { %p6312_p1 = pneg %p6311_p8 }
  0x26   : > { %p6319_p9 = pnand %p6318_p4, %p6312_p1 }
  0x28   : > { %6322 = shalt.err (!%p6319_p9)
}
  0x29   : > { %s6503_s23 = smov 384   ;;  %s6504_s29 = smov 24  }
  0x2a   : > { %5832 = dma.hbm_to_vmem [thread:$0]  (!%p6603_p11), %s9694_s3, 6144, %s178_s11, [#allocation11], %s6503_s23, %s6503_s23, %s6504_s29  }
  0x2b   : > { %s6323_s17 = scalar_lea.hbm %s9697_s6, 4096 }
  0x2c   : > { %p6324_p8 = scmp.ne.s32.totalorder %s9697_s6, %s6323_s17  ;;  %p6330_p4 = scmp.lt.u32.totalorder %s6323_s17, %s9697_s6 }
  0x2e   : > { %p6326_p1 = pnand %p6324_p8, %p6297_p13 }
  0x30   : > { %p6327_p2 = pneg %p6326_p1 }
  0x32   : > { %p6332_p6 = pnand %p6330_p4, %p6327_p2 }
  0x34   : > { %6335 = shalt.err (!%p6332_p6)
}
  0x35   : > { %s6336_s11 = scalar_lea.vmem %s6607_s14, 4096  ;;  %p6344_p3 = scmp.lt.s32.totalorder %s6607_s14, %s6607_s14 }
  0x36   : > { %p6337_p9 = scmp.ne.s32.totalorder %s6607_s14, %s6336_s11  ;;  %p6345_p5 = scmp.lt.s32.totalorder %s6336_s11, %s6336_s11 }
  0x38   : > { %p6339_p12 = pnand %p6337_p9, %p6297_p13  ;;  %p6346_p7 = por %p6345_p5, %p6344_p3 }
  0x3a   : > { %p6340_p0 = pneg %p6339_p12 }
  0x3c   : > { %p6347_p10 = pnand %p6346_p7, %p6340_p0 }
  0x3e   : > { %6350 = shalt.err (!%p6347_p10)
}
  0x3f   : > { %s6505_s22 = smov 256   ;;  %s6506_s23 = smov 16  }
  0x40   : > { %5835 = dma.hbm_to_vmem [thread:$0]  (!%p6603_p11), %s9697_s6, 4096, %s6607_s14, [#allocation11], %s6505_s22, %s6505_s22, %s6506_s23  }
  0x41   : > { %s6657_s13 = sadd.s32 1, %s6499_s27   ;;  %s31_s16 = sadd.s32 1, %s6495_s26 }
  0x42   : > { %s28_s15 = ssub.s32 %s6499_s27, %s6657_s13  ;;  %p38_p8 = scmp.ne.s32.totalorder %s6495_s26, %s6491_s25 }
  0x43   : > { %p29_p13 = scmp.eq.s32.totalorder %s28_s15, 0  ;;  %p39_p1 = scmp.eq.s32.totalorder %s6499_s27, 0 }
  0x44   : > { %p10005_p4 = scmp.eq.s32.totalorder %s6575_s28, 6  ;;  %p5846_p9 = scmp.lt.s32.totalorder %s6499_s27, 7 }
  0x45   : > { %s6666_s17 = scalar_select %p29_p13, %s6495_s26, %s31_s16  }
  0x46   : > { %p40_p2 = por %p39_p1, %p38_p8  ;;  %p6670_p6 = por %p10005_p4, %p38_p8 }
  0x47   : > { %s210_s12 = sand.u32 1, %s6495_s26   ;;  %s5800_s14 = sshll.u32 %s6499_s27, 9 }
  0x48   : > { %s5700_s19 = sshll.u32 %s210_s12, 5  ;;  %s10007_s2 = sld [smem:[#allocation228_spill]] }
  0x49   : > { %s214_s22 = scalar_lea.vmem [#allocation7], %s5700_s19  ;;  %p6684_p11 = pnand %p5846_p9, %p40_p2 }
  0x4a   : > { %s222_s23 = sshll.u32 %s214_s22, 4  ;;  %s211_s10 = scalar_lea.sflag [#allocation8], %s210_s12  ;;  %s6682_s23 = int_to_ptr.vmem [resolvable:$true] %s222_s23 }
  0x4b   : > { %p6353_p0 = pneg %p6684_p11 }
  0x4e   : > { %s6680_s11 = scalar_lea.hbm %s10007_s2, %s5800_s14  ;;  %s6356_s14 = scalar_lea.hbm %s10007_s2, 3584 }
  0x4f   : > { %s6351_s15 = scalar_lea.hbm %s6680_s11, 512  ;;  %p6357_p7 = scmp.lt.u32.totalorder %s6680_s11, %s10007_s2 }
  0x50   : > { %p6352_p12 = scmp.ne.s32.totalorder %s6680_s11, %s6351_s15  ;;  %p6358_p10 = scmp.lt.u32.totalorder %s6356_s14, %s6351_s15 }
  0x51   : > { %p6360_p8 = scmp.lt.u32.totalorder %s6351_s15, %s6680_s11 }
  0x52   : > { %p6354_p3 = pnand %p6353_p0, %p6352_p12  ;;  %p6359_p13 = por %p6358_p10, %p6357_p7 }
  0x54   : > { %p6355_p5 = pneg %p6354_p3  ;;  %p6361_p1 = por %p6360_p8, %p6359_p13 }
  0x56   : > { %p6362_p2 = pnand %p6361_p1, %p6355_p5 }
  0x58   : > { %6365 = shalt.err (!%p6362_p2)
}
  0x59   : > { %s6366_s12 = scalar_lea.vmem %s6682_s23, 512  ;;  %s6507_s22 = smov [#allocation7]  }
  0x5a   : > { %p6367_p4 = scmp.ne.s32.totalorder %s6682_s23, %s6366_s12  ;;  %s6371_s16 = sshll.u32 %s6507_s22, 4  ;;  %s6372_s16 = int_to_ptr.vmem [resolvable:$false] %s6371_s16 }
  0x5b   : > { %s6373_s19 = scalar_lea.vmem %s6372_s16, 1024  ;;  %p6374_p3 = scmp.lt.s32.totalorder %s6682_s23, %s6372_s16 }
  0x5c   : > { %p6369_p9 = pnand %p6367_p4, %p6353_p0  ;;  %p6375_p7 = scmp.lt.s32.totalorder %s6373_s19, %s6366_s12 }
  0x5e   : > { %p6370_p12 = pneg %p6369_p9  ;;  %p6376_p10 = por %p6375_p7, %p6374_p3 }
  0x60   : > { %p6377_p13 = pnand %p6376_p10, %p6370_p12 }
  0x62   : > { %6380 = shalt.err (!%p6377_p13)
}
  0x63   : > { %5839 = dma.hbm_to_vmem [thread:$0]  (!%p6684_p11), %s6680_s11, 512, %s6682_s23, %s211_s10  }
  0x64   : > { %p10009_p5 = scmp.ne.s32.totalorder %s10003_s9, 0 }
  0x66   : > { %231 = sbr.rel (%p10009_p5) target bundleno = 2229 (0x8b5), region = 40 }
  0x6d   : > { %s6716_s15 = sand.u32 1, %s6491_s25   ;;  %p10010_p0 = scmp.ne.s32.totalorder %s10001_s30, 0 }
  0x6e   : > { %s5704_s14 = sshll.u32 %s6716_s15, 5  ;;  %s234_s20 = scalar_lea.sflag [#allocation8], %s6716_s15 }
  0x6f   : > { %s6720_s21 = scalar_lea.vmem [#allocation7], %s5704_s14 }
  0x70   : > { %6470 = dma.done.wait (%p10010_p0), %s234_s20, 512  }
  0x71   : > { %6472 = vsyncadd (%p10010_p0), %s234_s20, 4294966784  ;;  %p10011_p11 = scmp.eq.s32.totalorder %s6575_s28, 0 }
  0x73   : > { %6474 = dma.done.wait (%p10011_p11), [#allocation11], 10240   ;;  %p10012_p8 = pmov %p10011_p11 }
  0x74   : > { %s5707_s9 = sshll.u32 %s6716_s15, 2  ;;  %p10013_p1 = scmp.ne.s32.totalorder %s6575_s28, 0 }
  0x75   : > { %6476 = vsyncadd (%p10012_p8), [#allocation11], 4294957056  ;;  %s6731_s11 = scalar_lea.vmem [#allocation13], %s5707_s9  ;;  %s6508_s23 = smov (!%p10013_p1), [#allocation4]   ;;  %v6509_v0 = vmov (!%p10013_p1), 0.0  }
  0x76   : > { %276 = sbr.rel (%p10013_p1) target bundleno = 154 (0x9a), region = 56  ;;  %s286_s29 = sshll.u32 (!%p10013_p1), %s6508_s23, 4  ;;  %277 = vst [vmem:[#allocation2] sm:$0xff] (!%p10013_p1), %v6509_v0  ;;  %278 = vst [vmem:[#allocation3] sm:$0xff] (!%p10013_p1), %v6509_v0  ;;  %s287_s29 = int_to_ptr.vmem [resolvable:$true] %s286_s29 }
  0x77   : > { %s6510_s30 = smov (!%p10013_p1), [#allocation5]   ;;  %s6381_s16 = scalar_lea.hbm (!%p10013_p1), %s9691_s0, 16384 }
  0x78   : > { %s298_s10 = sshll.u32 (!%p10013_p1), %s6510_s30, 4  ;;  %p6382_p2 = scmp.ne.s32.totalorder (!%p10013_p1), %s9691_s0, %s6381_s16  ;;  %s299_s10 = int_to_ptr.vmem [resolvable:$true] %s298_s10 }
  0x79   : > { %p6385_p4 = scmp.lt.u32.totalorder (!%p10013_p1), %s6381_s16, %s9691_s0 }
  0x7b   : > { %p6387_p9 = pnand (!%p10013_p1), %p6385_p4, %p6382_p2 }
  0x7d   : > { %6390 = shalt.err (!%p6387_p9)  }
  0x7e   : > { %s6391_s23 = scalar_lea.vmem %s287_s29, 16384  ;;  %p6396_p3 = scmp.lt.s32.totalorder %s287_s29, %s287_s29 }
  0x7f   : > { %p6392_p12 = scmp.ne.s32.totalorder %s287_s29, %s6391_s23  ;;  %p6397_p7 = scmp.lt.s32.totalorder %s6391_s23, %s6391_s23 }
  0x81   : > { %p6398_p10 = por %p6397_p7, %p6396_p3 }
  0x83   : > { %p6399_p13 = pnand %p6398_p10, %p6392_p12 }
  0x85   : > { %6402 = shalt.err (!%p6399_p13)  }
  0x86   : > { %289 = dma.hbm_to_vmem [thread:$0]  %s9691_s0, 16384, %s287_s29, [#allocation6] }
  0x87   : > { %s6403_s14 = scalar_lea.hbm %s9692_s1, 16384 }
  0x88   : > { %p6404_p5 = scmp.ne.s32.totalorder %s9692_s1, %s6403_s14  ;;  %p6407_p0 = scmp.lt.u32.totalorder %s6403_s14, %s9692_s1 }
  0x8a   : > { %p6409_p11 = pnand %p6407_p0, %p6404_p5 }
  0x8c   : > { %6412 = shalt.err (!%p6409_p11)  }
  0x8d   : > { %s6413_s23 = scalar_lea.vmem %s299_s10, 16384  ;;  %p6418_p1 = scmp.lt.s32.totalorder %s299_s10, %s299_s10 }
  0x8e   : > { %p6414_p8 = scmp.ne.s32.totalorder %s299_s10, %s6413_s23  ;;  %p6419_p2 = scmp.lt.s32.totalorder %s6413_s23, %s6413_s23 }
  0x90   : > { %p6420_p4 = por %p6419_p2, %p6418_p1 }
  0x92   : > { %p6421_p9 = pnand %p6420_p4, %p6414_p8 }
  0x94   : > { %6424 = shalt.err (!%p6421_p9)  }
  0x95   : > { %301 = dma.hbm_to_vmem [thread:$0]  %s9692_s1, 16384, %s299_s10, [#allocation6 + $0x1] }
  0x96   : > { %6477 = dma.done.wait [#allocation6], 16384 }
  0x97   : > { %6478 = vsyncadd [#allocation6], 4294950912 }
  0x98   : > { %6479 = dma.done.wait [#allocation6 + $0x1], 16384 }
  0x99   : > { %6480 = vsyncadd [#allocation6 + $0x1], 4294950912 }
  0x9a PF: > { %v5895_v1 = vld [vmem:[#allocation10 + $0x4] ss:$24 sps:$4 sm:$0xff]   ;;  %v5897_v2 = vld [vmem:[#allocation10] ss:$24 sps:$4 sm:$0xff]   ;;  %v9702_v3 = vmov 0   ;;  %v308_v18 = vld [vmem:[#allocation2] sm:$0xff]  ;;  %v9704_v20 = vlaneseq }
  0x9b   : > { %663 = vmatprep.mubr.bf16.mxu0 %v9702_v3  ;;  %5894 = vset.pattern.permute.xlu0 %v9702_v3  ;;  %v5898_v4 = vld [vmem:[#allocation10 + $0x34] ss:$24 sps:$4 sm:$0xff]   ;;  %v5900_v5 = vld [vmem:[#allocation10 + $0x30] ss:$24 sps:$4 sm:$0xff]   ;;  %v5901_v6 = vld [vmem:[#allocation10 + $0x64] ss:$24 sps:$4 sm:$0xff]   ;;  %v6763_v19 = vpack.c.bf16 %v308_v18, %v308_v18 }
  0x9c   : > { %631 = vmatprep.subr.bf16.mxu0 %v5895_v1  ;;  %5893 = vset.pattern.permute.xlu1 %v9702_v3  ;;  %v5903_v7 = vld [vmem:[#allocation10 + $0x60] ss:$24 sps:$4 sm:$0xff]   ;;  %v5904_v8 = vld [vmem:[#allocation10 + $0x94] ss:$24 sps:$4 sm:$0xff]   ;;  %v5906_v9 = vld [vmem:[#allocation10 + $0x90] ss:$24 sps:$4 sm:$0xff]  }
  0x9d   : > { %632 = vmatpush1.bf16.msra.mxu0 %v5897_v2  ;;  %704 = vmatprep.mubr.bf16.mxu1 %v9702_v3  ;;  %v5907_v10 = vld [vmem:[#allocation10 + $0xc4] ss:$24 sps:$4 sm:$0xff]   ;;  %v5909_v11 = vld [vmem:[#allocation10 + $0xc0] ss:$24 sps:$4 sm:$0xff]   ;;  %v5910_v12 = vld [vmem:[#allocation10 + $0xf4] ss:$24 sps:$4 sm:$0xff]  }
  0x9e   : > { %633 = vmatprep.subr.bf16.mxu0 %v5898_v4  ;;  %v5912_v13 = vld [vmem:[#allocation10 + $0xf0] ss:$24 sps:$4 sm:$0xff]   ;;  %v5913_v14 = vld [vmem:[#allocation10 + $0x124] ss:$24 sps:$4 sm:$0xff]   ;;  %v5915_v15 = vld [vmem:[#allocation10 + $0x120] ss:$24 sps:$4 sm:$0xff]  }
  0x9f   : > { %v5916_v16 = vld [vmem:[#allocation10 + $0x154] ss:$24 sps:$4 sm:$0xff]   ;;  %v5918_v17 = vld [vmem:[#allocation10 + $0x150] ss:$24 sps:$4 sm:$0xff]   ;;  %10014 = vst [vmem:[#allocation25_spill] sm:$0xff] %v6763_v19  ;;  %v6768_v21 = vshrl.u32 %v9704_v20, 7 }
  0xa0   : > { %v6512_v22 = vmov 1966171168   ;;  %v359_v25 = vld [vmem:[%s9695_s4] sm:$0x3f]  ;;  %v754_v41 = vld [vmem:[#allocation5] sm:$0xff]  ;;  %v757_v44 = vld [vmem:[#allocation5 + $0x18] sm:$0xff] }
  0xa1   : > { %634 = vmatpush1.bf16.msra.mxu0 %v5900_v5  ;;  %10015 = vst [vmem:[#allocation26_spill] sm:$0xff] %v6768_v21  ;;  %v885_v23 = vunpack.c.l.s4 %v6512_v22  ;;  %v6771_v24 = vsub.s32 0, %v6768_v21  ;;  %v756_v40 = vld [vmem:[#allocation5 + $0x10] sm:$0xff]  ;;  %v755_v45 = vld [vmem:[#allocation5 + $0x8] sm:$0xff]  ;;  %v758_v49 = vld [vmem:[#allocation5 + $0x20] sm:$0xff]  ;;  %vm1758_vm0 = vcmask 130112  }
  0xa2   : > { %635 = vmatprep.subr.bf16.mxu0 %v5901_v6  ;;  %v759_v48 = vld [vmem:[#allocation5 + $0x28] sm:$0xff]  ;;  %v6805_v50 = vld [vmem:[%s9696_s5] ss:$0 sm:$0xff]  ;;  %v761_v61 = vld [vmem:[#allocation5 + $0x38] sm:$0xff]  ;;  %vm1765_vm1 = vcmask 195712   ;;  %vm1772_vm2 = vcmask 261312  }
  0xa3   : > { %10016 = vst [vmem:[#allocation27_spill] sm:$0xff] %v6771_v24  ;;  %v886_v26 = vunpack.c.0.s8 %v885_v23  ;;  %v364_v27 = vrot.slane %v359_v25, %v6771_v24  ;;  %v760_v62 = vld [vmem:[#allocation5 + $0x30] sm:$0xff]  ;;  %v763_v6 = vld [vmem:[#allocation5 + $0x48] sm:$0xff]  ;;  %vm1779_vm3 = vcmask 326912   ;;  %vm1786_vm4 = vcmask 392512   ;;  %s5593_s9 = sshll.u32 %s6731_s11, 4  ;;  %s9649_s9 = int_to_ptr.vmem [resolvable:$true] %s5593_s9 }
  0xa4   : > { %vm1793_vm5 = vcmask 458112   ;;  %vm1800_vm6 = vcmask 523712   ;;  %vm1807_vm7 = vcmask 589312   ;;  %vm9844_vm8 = vcmask 654912   ;;  %s5580_s2 = scalar_lea.sflag [#allocation9], %s6716_s15  ;;  %s6425_s10 = scalar_lea.vmem %s9649_s9, 64 }
  0xa5   : > { %636 = vmatpush1.bf16.msra.mxu0 %v5903_v7  ;;  %v6778_v28 = vsub.s32 %v886_v26, %v6768_v21  ;;  %v762_v7 = vld [vmem:[#allocation5 + $0x40] sm:$0xff]  ;;  %vm9845_vm9 = vcmask 720512   ;;  %vm1828_vm10 = vcmask 786112   ;;  %vm9847_vm11 = vcmask 851712   ;;  %p6426_p12 = scmp.ne.s32.totalorder %s9649_s9, %s6425_s10 }
  0xa6   : > { %637 = vmatprep.subr.bf16.mxu0 %v5904_v8  ;;  %vm1842_vm12 = vcmask 917312   ;;  %vm1849_vm13 = vcmask 982912   ;;  %vm1856_vm14 = vcmask 1048512   ;;  %vm9823_vm15 = vcmask 1041409  }
  0xa7   : > { %p6427_p3 = pnand %p6426_p12, %p6670_p6 }
  0xa9   : > { %638 = vmatpush1.bf16.msra.mxu0 %v5906_v9  ;;  %p6428_p7 = pneg %p6427_p3 }
  0xaa   : > { %639 = vmatprep.subr.bf16.mxu0 %v5907_v10 }
  0xad   : > { %640 = vmatpush1.bf16.msra.mxu0 %v5909_v11 }
  0xae   : > { %641 = vmatprep.subr.bf16.mxu0 %v5910_v12 }
  0xb1   : > { %642 = vmatpush1.bf16.msra.mxu0 %v5912_v13 }
  0xb2   : > { %643 = vmatprep.subr.bf16.mxu0 %v5913_v14  ;;  %v765_v14 = vld [vmem:[#allocation5 + $0x58] sm:$0xff] }
  0xb5   : > { %644 = vmatpush1.bf16.msra.mxu0 %v5915_v15  ;;  %v764_v15 = vld [vmem:[#allocation5 + $0x50] sm:$0xff] }
  0xb6   : > { %645 = vmatprep.subr.bf16.mxu0 %v5916_v16 }
  0xb9   : > { %646 = vmatpush1.bf16.msra.mxu0 %v5918_v17 }
  0xbc   : > { %664 = vmatmul.mubr.bf16.vlgmr.msra.gmra.mrb[0].mxu0 %v6763_v19 }
  0xbd   : > { %745 = vmatprep.mubr.bf16.mxu0 %v9702_v3 }
 0x18f   : > { %v665_v29 = vpop.f32.mrb[0].mxu0 }
 0x190   : > { %v666_v30 = vadd.f32 %v665_v29, %v364_v27  ;;  %v6780_v31 = vpop.f32.mrb[1].mxu0  ;;  %v767_v27 = vld [vmem:[#allocation5 + $0x68] sm:$0xff]  ;;  %v766_v29 = vld [vmem:[#allocation5 + $0x60] sm:$0xff] }
 0x191   : > { %10017 = vst [vmem:[#allocation28_spill] sm:$0xff] %v6780_v31  ;;  %v669_v32 = vpop.f32.mrb[2].mxu0 }
 0x192   : > { %v883_v33 = vcombine.high %v666_v30, %v666_v30  ;;  %v6783_v34 = vrot.slane %v666_v30, %v6778_v28  ;;  %v670_v35 = vpop.f32.mrb[3].mxu0 }
 0x194   : > { %v897_v36 = vrot.slane %v883_v33, %v6778_v28  ;;  %v6788_v37 = vrot.slane %v6783_v34, %v6778_v28  ;;  %v898_v16 = vcombine.high %v6783_v34, %v6783_v34 }
 0x196   : > { %v899_v38 = vcombine.high %v897_v36, %v897_v36  ;;  %v6791_v39 = vrot.slane %v897_v36, %v6778_v28  ;;  %v6795_v42 = vrot.slane %v6788_v37, %v6771_v24  ;;  %v6828_v30 = vrot.slane %v898_v16, %v6778_v28 }
 0x198   : > { %v6798_v43 = vrot.slane %v899_v38, %v6778_v28  ;;  %v974_v46 = vadd.f32 %v6795_v42, %v756_v40  ;;  %v972_v47 = vadd.f32 %v6795_v42, %v754_v41  ;;  %v975_v53 = vadd.f32 %v6795_v42, %v757_v44  ;;  %v769_v40 = vld [vmem:[#allocation5 + $0x78] sm:$0xff]  ;;  %v768_v41 = vld [vmem:[#allocation5 + $0x70] sm:$0xff] }
 0x199   : > { %v973_v54 = vadd.f32 %v6795_v42, %v755_v45  ;;  %v977_v55 = vadd.f32 %v6795_v42, %v759_v48  ;;  %v976_v56 = vadd.f32 %v6795_v42, %v758_v49  ;;  %v979_v0 = vadd.f32 %v6795_v42, %v761_v61 }
 0x19a   : > { %v1102_v51 = vmax.f32 %v974_v46, 0.0  ;;  %v1100_v52 = vmax.f32 %v972_v47, 0.0  ;;  %v1103_v59 = vmax.f32 %v975_v53, 0.0  ;;  %v978_v5 = vadd.f32 %v6795_v42, %v760_v62 }
 0x19b   : > { %v1101_v60 = vmax.f32 %v973_v54, 0.0  ;;  %v1105_v63 = vmax.f32 %v977_v55, 0.0  ;;  %v1104_v4 = vmax.f32 %v976_v56, 0.0  ;;  %v1107_v8 = vmax.f32 %v979_v0, 0.0 }
 0x19c   : > { %v1237_v57 = vmul.f32 %v6805_v50, %v1102_v51  ;;  %v1235_v58 = vmul.f32 %v6805_v50, %v1100_v52  ;;  %v1238_v1 = vmul.f32 %v6805_v50, %v1103_v59  ;;  %v981_v9 = vadd.f32 %v6795_v42, %v763_v6  ;;  %v771_v51 = vld [vmem:[#allocation5 + $0x88] sm:$0xff]  ;;  %v770_v52 = vld [vmem:[#allocation5 + $0x80] sm:$0xff]  ;;  %v773_v59 = vld [vmem:[#allocation5 + $0x98] sm:$0xff] }
 0x19d   : > { %v1236_v2 = vmul.f32 %v6805_v50, %v1101_v60  ;;  %v1240_v10 = vmul.f32 %v6805_v50, %v1105_v63  ;;  %v1239_v11 = vmul.f32 %v6805_v50, %v1104_v4  ;;  %v1106_v12 = vmax.f32 %v978_v5, 0.0  ;;  %v772_v60 = vld [vmem:[#allocation5 + $0x90] sm:$0xff]  ;;  %v774_v4 = vld [vmem:[#allocation5 + $0xa0] sm:$0xff] }
 0x19e   : > { %1367 = vadd.xlane.f32.xlu1 %v1237_v57  ;;  %1363 = vadd.xlane.f32.xlu0 %v1235_v58  ;;  %v980_v13 = vadd.f32 %v6795_v42, %v762_v7  ;;  %v1242_v17 = vmul.f32 %v6805_v50, %v1107_v8  ;;  %v1109_v18 = vmax.f32 %v981_v9, 0.0  ;;  %v983_v25 = vadd.f32 %v6795_v42, %v765_v14 }
 0x19f   : > { %v1241_v22 = vmul.f32 %v6805_v50, %v1106_v12  ;;  %v982_v26 = vadd.f32 %v6795_v42, %v764_v15  ;;  %v985_v32 = vadd.f32 %v6795_v42, %v767_v27  ;;  %v984_v33 = vadd.f32 %v6795_v42, %v766_v29  ;;  %v776_v12 = vld [vmem:[#allocation5 + $0xb0] sm:$0xff] }
 0x1a0   : > { %v1108_v23 = vmax.f32 %v980_v13, 0.0  ;;  %v1244_v34 = vmul.f32 %v6805_v50, %v1109_v18  ;;  %v1111_v36 = vmax.f32 %v983_v25, 0.0  ;;  %v6836_v44 = vrot.slane %v6828_v30, %v6771_v24 }
 0x1a1   : > { %v1110_v38 = vmax.f32 %v982_v26, 0.0  ;;  %v1113_v28 = vmax.f32 %v985_v32, 0.0  ;;  %v1112_v45 = vmax.f32 %v984_v33, 0.0  ;;  %v987_v48 = vadd.f32 %v6795_v42, %v769_v40 }
 0x1a2   : > { %1369 = vadd.xlane.f32.xlu1 %v1238_v1  ;;  %1365 = vadd.xlane.f32.xlu0 %v1236_v2  ;;  %v1243_v35 = vmul.f32 %v6805_v50, %v1108_v23  ;;  %v1246_v46 = vmul.f32 %v6805_v50, %v1111_v36  ;;  %v986_v49 = vadd.f32 %v6795_v42, %v768_v41  ;;  %v775_v2 = vld [vmem:[#allocation5 + $0xa8] sm:$0xff]  ;;  %v778_v23 = vld [vmem:[#allocation5 + $0xc0] sm:$0xff] }
 0x1a3   : > { %v1245_v47 = vmul.f32 %v6805_v50, %v1110_v38  ;;  %v1248_v53 = vmul.f32 %v6805_v50, %v1113_v28  ;;  %v989_v54 = vadd.f32 %v6836_v44, %v771_v51  ;;  %v1247_v55 = vmul.f32 %v6805_v50, %v1112_v45 }
 0x1a4   : > { %v1115_v56 = vmax.f32 %v987_v48, 0.0  ;;  %v1114_v57 = vmax.f32 %v986_v49, 0.0  ;;  %v988_v58 = vadd.f32 %v6836_v44, %v770_v52  ;;  %v991_v42 = vadd.f32 %v6836_v44, %v773_v59 }
 0x1a5   : > { %v1117_v61 = vmax.f32 %v989_v54, 0.0  ;;  %v990_v1 = vadd.f32 %v6836_v44, %v772_v60  ;;  %v993_v5 = vadd.f32 %v6836_v44, %v775_v2  ;;  %v992_v6 = vadd.f32 %v6836_v44, %v774_v4 }
 0x1a6   : > { %1373 = vadd.xlane.f32.xlu1 %v1240_v10  ;;  %1371 = vadd.xlane.f32.xlu0 %v1239_v11  ;;  %v1250_v62 = vmul.f32 %v6805_v50, %v1115_v56  ;;  %v1249_v63 = vmul.f32 %v6805_v50, %v1114_v57  ;;  %v1116_v0 = vmax.f32 %v988_v58, 0.0  ;;  %v1119_v9 = vmax.f32 %v991_v42, 0.0  ;;  %v777_v11 = vld [vmem:[#allocation5 + $0xb8] sm:$0xff]  ;;  %v784_v57 = vld [vmem:[#allocation5 + $0xf0] sm:$0xff] }
 0x1a7   : > { %v1252_v7 = vmul.f32 %v6805_v50, %v1117_v61  ;;  %v1118_v10 = vmax.f32 %v990_v1, 0.0  ;;  %v1121_v13 = vmax.f32 %v993_v5, 0.0  ;;  %v995_v14 = vadd.f32 %v6836_v44, %v777_v11  ;;  %v785_v56 = vld [vmem:[#allocation5 + $0xf8] sm:$0xff] }
 0x1a8   : > { %v1251_v8 = vmul.f32 %v6805_v50, %v1116_v0  ;;  %v1254_v15 = vmul.f32 %v6805_v50, %v1119_v9  ;;  %v994_v18 = vadd.f32 %v6836_v44, %v776_v12  ;;  %v996_v33 = vadd.f32 %v6836_v44, %v778_v23  ;;  %v786_v0 = vld [vmem:[#allocation5 + $0x100] sm:$0xff]  ;;  %v788_v9 = vld [vmem:[#allocation5 + $0x110] sm:$0xff] }
 0x1a9   : > { %v1253_v16 = vmul.f32 %v6805_v50, %v1118_v10  ;;  %v1256_v25 = vmul.f32 %v6805_v50, %v1121_v13  ;;  %v1123_v26 = vmax.f32 %v995_v14, 0.0  ;;  %v928_v48 = vcombine.high %v6788_v37, %v6788_v37 }
 0x1aa   : > { %1377 = vadd.xlane.f32.xlu1 %v1242_v17  ;;  %1375 = vadd.xlane.f32.xlu0 %v1241_v22  ;;  %v1120_v17 = vmax.f32 %v992_v6, 0.0  ;;  %v779_v22 = vld [vmem:[#allocation5 + $0xc8] sm:$0xff]  ;;  %v1122_v29 = vmax.f32 %v994_v18, 0.0  ;;  %v1124_v28 = vmax.f32 %v996_v33, 0.0  ;;  %v1003_v37 = vadd.f32 %v6836_v44, %v785_v56 }
 0x1ab   : > { %v997_v32 = vadd.f32 %v6836_v44, %v779_v22  ;;  %v1258_v36 = vmul.f32 %v6805_v50, %v1123_v26  ;;  %v6873_v58 = vrot.slane %v928_v48, %v6771_v24 }
 0x1ac   : > { %v1255_v27 = vmul.f32 %v6805_v50, %v1120_v17  ;;  %v1257_v40 = vmul.f32 %v6805_v50, %v1122_v29  ;;  %v1131_v2 = vmax.f32 %v1003_v37, 0.0  ;;  %v792_v29 = vld [vmem:[#allocation5 + $0x130] sm:$0xff]  ;;  %v799_v37 = vld [vmem:[#allocation5 + $0x168] sm:$0xff] }
 0x1ad   : > { %v1125_v41 = vmax.f32 %v997_v32, 0.0  ;;  %v1006_v14 = vadd.f32 %v6873_v58, %v788_v9 }
 0x1ae   : > { %1381 = vadd.xlane.f32.xlu1 %v1244_v34  ;;  %1379 = vadd.xlane.f32.xlu0 %v1243_v35  ;;  %v781_v34 = vld [vmem:[#allocation5 + $0xd8] sm:$0xff]  ;;  %v780_v35 = vld [vmem:[#allocation5 + $0xd0] sm:$0xff] }
 0x1af   : > { %v999_v38 = vadd.f32 %v6836_v44, %v781_v34  ;;  %v998_v45 = vadd.f32 %v6836_v44, %v780_v35  ;;  %v1260_v52 = vmul.f32 %v6805_v50, %v1125_v41  ;;  %v1134_v26 = vmax.f32 %v1006_v14, 0.0  ;;  %v794_v41 = vld [vmem:[#allocation5 + $0x140] sm:$0xff] }
 0x1b1   : > { %v1127_v54 = vmax.f32 %v999_v38, 0.0  ;;  %v1269_v35 = vmul.f32 %v6805_v50, %v1134_v26  ;;  %v1010_v38 = vadd.f32 %v6873_v58, %v792_v29 }
 0x1b2   : > { %1385 = vadd.xlane.f32.xlu1 %v1246_v46  ;;  %1383 = vadd.xlane.f32.xlu0 %v1245_v47  ;;  %v783_v46 = vld [vmem:[#allocation5 + $0xe8] sm:$0xff]  ;;  %v782_v47 = vld [vmem:[#allocation5 + $0xe0] sm:$0xff] }
 0x1b3   : > { %v1001_v49 = vadd.f32 %v6836_v44, %v783_v46  ;;  %v1000_v51 = vadd.f32 %v6836_v44, %v782_v47  ;;  %v1262_v60 = vmul.f32 %v6805_v50, %v1127_v54  ;;  %v1138_v47 = vmax.f32 %v1010_v38, 0.0 }
 0x1b5   : > { %v1129_v59 = vmax.f32 %v1001_v49, 0.0  ;;  %v1128_v42 = vmax.f32 %v1000_v51, 0.0  ;;  %v1012_v49 = vadd.f32 %v6873_v58, %v794_v41  ;;  %v797_v51 = vld [vmem:[#allocation5 + $0x158] sm:$0xff] }
 0x1b6   : > { %1389 = vadd.xlane.f32.xlu1 %v1248_v53  ;;  %1387 = vadd.xlane.f32.xlu0 %v1247_v55  ;;  %v1259_v53 = vmul.f32 %v6805_v50, %v1124_v28  ;;  %v1126_v55 = vmax.f32 %v998_v45, 0.0  ;;  %v1015_v54 = vadd.f32 %v6873_v58, %v797_v51 }
 0x1b7   : > { %v1264_v1 = vmul.f32 %v6805_v50, %v1129_v59  ;;  %v1263_v4 = vmul.f32 %v6805_v50, %v1128_v42 }
 0x1b8   : > { %v1261_v61 = vmul.f32 %v6805_v50, %v1126_v55  ;;  %v1273_v55 = vmul.f32 %v6805_v50, %v1138_v47 }
 0x1ba   : > { %1393 = vadd.xlane.f32.xlu1 %v1250_v62  ;;  %1391 = vadd.xlane.f32.xlu0 %v1249_v63  ;;  %v1002_v62 = vadd.f32 %v6836_v44, %v784_v57  ;;  %v787_v63 = vld [vmem:[#allocation5 + $0x108] sm:$0xff]  ;;  %v1266_v44 = vmul.f32 %v6805_v50, %v1131_v2  ;;  %v1140_v57 = vmax.f32 %v1012_v49, 0.0  ;;  %v801_v2 = vld [vmem:[#allocation5 + $0x178] sm:$0xff] }
 0x1bb   : > { %v1005_v6 = vadd.f32 %v6873_v58, %v787_v63 }
 0x1bc   : > { %v1130_v5 = vmax.f32 %v1002_v62, 0.0  ;;  %v1275_v63 = vmul.f32 %v6805_v50, %v1140_v57 }
 0x1bd   : > { %v1133_v12 = vmax.f32 %v1005_v6, 0.0 }
 0x1be   : > { %1397 = vadd.xlane.f32.xlu1 %v1252_v7  ;;  %1395 = vadd.xlane.f32.xlu0 %v1251_v8  ;;  %v1004_v7 = vadd.f32 %v6873_v58, %v786_v0  ;;  %v789_v8 = vld [vmem:[#allocation5 + $0x118] sm:$0xff]  ;;  %v1265_v11 = vmul.f32 %v6805_v50, %v1130_v5  ;;  %v1143_v0 = vmax.f32 %v1015_v54, 0.0  ;;  %v6909_v5 = vrot.slane %v6791_v39, %v6771_v24  ;;  %v827_v54 = vld [vmem:[#allocation5 + $0x248] sm:$0xff] }
 0x1bf   : > { %v1007_v10 = vadd.f32 %v6873_v58, %v789_v8  ;;  %v1268_v22 = vmul.f32 %v6805_v50, %v1133_v12  ;;  %v818_v12 = vld [vmem:[#allocation5 + $0x200] sm:$0xff] }
 0x1c0   : > { %v1132_v13 = vmax.f32 %v1004_v7, 0.0  ;;  %v1019_v7 = vadd.f32 %v6873_v58, %v801_v2  ;;  %v1278_v8 = vmul.f32 %v6805_v50, %v1143_v0 }
 0x1c2   : > { %1401 = vadd.xlane.f32.xlu1 %v1254_v15  ;;  %1399 = vadd.xlane.f32.xlu0 %v1253_v16  ;;  %v791_v15 = vld [vmem:[#allocation5 + $0x128] sm:$0xff]  ;;  %v790_v16 = vld [vmem:[#allocation5 + $0x120] sm:$0xff]  ;;  %v1267_v23 = vmul.f32 %v6805_v50, %v1132_v13  ;;  %v1147_v14 = vmax.f32 %v1019_v7, 0.0 }
 0x1c3   : > { %v1009_v17 = vadd.f32 %v6873_v58, %v791_v15  ;;  %v1008_v18 = vadd.f32 %v6873_v58, %v790_v16  ;;  %v831_v7 = vld [vmem:[#allocation5 + $0x268] sm:$0xff] }
 0x1c5   : > { %v1137_v32 = vmax.f32 %v1009_v17, 0.0 }
 0x1c6   : > { %1405 = vadd.xlane.f32.xlu1 %v1256_v25  ;;  %1403 = vadd.xlane.f32.xlu0 %v1255_v27  ;;  %v1135_v25 = vmax.f32 %v1007_v10, 0.0  ;;  %v793_v27 = vld [vmem:[#allocation5 + $0x138] sm:$0xff] }
 0x1c7   : > { %v1011_v33 = vadd.f32 %v6873_v58, %v793_v27  ;;  %v1272_v28 = vmul.f32 %v6805_v50, %v1137_v32 }
 0x1c8   : > { %v1270_v34 = vmul.f32 %v6805_v50, %v1135_v25 }
 0x1c9   : > { %v1139_v45 = vmax.f32 %v1011_v33, 0.0  ;;  %v823_v33 = vld [vmem:[#allocation5 + $0x228] sm:$0xff] }
 0x1ca   : > { %1409 = vadd.xlane.f32.xlu1 %v1258_v36  ;;  %1407 = vadd.xlane.f32.xlu0 %v1257_v40  ;;  %v1136_v36 = vmax.f32 %v1008_v18, 0.0  ;;  %v795_v40 = vld [vmem:[#allocation5 + $0x148] sm:$0xff]  ;;  %v1036_v18 = vadd.f32 %v6909_v5, %v818_v12 }
 0x1cb   : > { %v1013_v48 = vadd.f32 %v6873_v58, %v795_v40 }
 0x1cc   : > { %v1271_v46 = vmul.f32 %v6805_v50, %v1136_v36  ;;  %v1164_v29 = vmax.f32 %v1036_v18, 0.0 }
 0x1cd   : > { %v1141_v56 = vmax.f32 %v1013_v48, 0.0 }
 0x1ce   : > { %1413 = vadd.xlane.f32.xlu1 %v1260_v52  ;;  %1411 = vadd.xlane.f32.xlu0 %v1259_v53  ;;  %v796_v52 = vld [vmem:[#allocation5 + $0x150] sm:$0xff]  ;;  %v1274_v53 = vmul.f32 %v6805_v50, %v1139_v45  ;;  %v1299_v40 = vmul.f32 %v6805_v50, %v1164_v29  ;;  %v825_v45 = vld [vmem:[#allocation5 + $0x238] sm:$0xff] }
 0x1cf   : > { %v1014_v59 = vadd.f32 %v6873_v58, %v796_v52  ;;  %v1276_v62 = vmul.f32 %v6805_v50, %v1141_v56  ;;  %v1043_v48 = vadd.f32 %v6909_v5, %v825_v45 }
 0x1d1   : > { %v1171_v57 = vmax.f32 %v1043_v48, 0.0  ;;  %v807_v48 = vld [vmem:[#allocation5 + $0x1a8] sm:$0xff] }
 0x1d2   : > { %1417 = vadd.xlane.f32.xlu1 %v1262_v60  ;;  %1415 = vadd.xlane.f32.xlu0 %v1261_v61  ;;  %v798_v60 = vld [vmem:[#allocation5 + $0x160] sm:$0xff]  ;;  %v1017_v61 = vadd.f32 %v6873_v58, %v799_v37 }
 0x1d3   : > { %v1016_v42 = vadd.f32 %v6873_v58, %v798_v60  ;;  %v1045_v60 = vadd.f32 %v6909_v5, %v827_v54 }
 0x1d4   : > { %v1145_v6 = vmax.f32 %v1017_v61, 0.0 }
 0x1d5   : > { %v1173_v2 = vmax.f32 %v1045_v60, 0.0 }
 0x1d6   : > { %1421 = vadd.xlane.f32.xlu1 %v1264_v1  ;;  %1419 = vadd.xlane.f32.xlu0 %v1263_v4  ;;  %v1142_v1 = vmax.f32 %v1014_v59, 0.0  ;;  %v800_v4 = vld [vmem:[#allocation5 + $0x170] sm:$0xff]  ;;  %v1280_v13 = vmul.f32 %v6805_v50, %v1145_v6 }
 0x1d7   : > { %v1018_v10 = vadd.f32 %v6873_v58, %v800_v4  ;;  %v1282_v58 = vmul.f32 %v6805_v50, %v1147_v14 }
 0x1d8   : > { %v1277_v9 = vmul.f32 %v6805_v50, %v1142_v1 }
 0x1d9   : > { %v1146_v16 = vmax.f32 %v1018_v10, 0.0 }
 0x1da   : > { %1425 = vadd.xlane.f32.xlu1 %v1266_v44  ;;  %1423 = vadd.xlane.f32.xlu0 %v1265_v11  ;;  %v1144_v44 = vmax.f32 %v1016_v42, 0.0  ;;  %v819_v11 = vld [vmem:[#allocation5 + $0x208] sm:$0xff]  ;;  %v829_v42 = vld [vmem:[#allocation5 + $0x258] sm:$0xff] }
 0x1db   : > { %v1037_v17 = vadd.f32 %v6909_v5, %v819_v11  ;;  %v1281_v26 = vmul.f32 %v6805_v50, %v1146_v16  ;;  %v1047_v0 = vadd.f32 %v6909_v5, %v829_v42  ;;  %v1308_v11 = vmul.f32 %v6805_v50, %v1173_v2  ;;  %v832_v16 = vld [vmem:[#allocation5 + $0x270] sm:$0xff] }
 0x1dc   : > { %v1279_v15 = vmul.f32 %v6805_v50, %v1144_v44  ;;  %v1049_v44 = vadd.f32 %v6909_v5, %v831_v7 }
 0x1dd   : > { %v1165_v27 = vmax.f32 %v1037_v17, 0.0 }
 0x1de   : > { %1429 = vadd.xlane.f32.xlu1 %v1268_v22  ;;  %1427 = vadd.xlane.f32.xlu0 %v1267_v23  ;;  %v821_v22 = vld [vmem:[#allocation5 + $0x218] sm:$0xff]  ;;  %v820_v23 = vld [vmem:[#allocation5 + $0x210] sm:$0xff]  ;;  %v1177_v18 = vmax.f32 %v1049_v44, 0.0 }
 0x1df   : > { %v1039_v25 = vadd.f32 %v6909_v5, %v821_v22  ;;  %v1038_v32 = vadd.f32 %v6909_v5, %v820_v23  ;;  %v1300_v38 = vmul.f32 %v6805_v50, %v1165_v27  ;;  %v802_v27 = vld [vmem:[#allocation5 + $0x180] sm:$0xff]  ;;  %v813_v44 = vld [vmem:[#allocation5 + $0x1d8] sm:$0xff] }
 0x1e0   : > { %v1312_v29 = vmul.f32 %v6805_v50, %v1177_v18  ;;  %v815_v18 = vld [vmem:[#allocation5 + $0x1e8] sm:$0xff] }
 0x1e1   : > { %v1167_v41 = vmax.f32 %v1039_v25, 0.0  ;;  %v1050_v25 = vadd.f32 %v6909_v5, %v832_v16 }
 0x1e2   : > { %1433 = vadd.xlane.f32.xlu1 %v1270_v34  ;;  %1431 = vadd.xlane.f32.xlu0 %v1269_v35  ;;  %v822_v34 = vld [vmem:[#allocation5 + $0x220] sm:$0xff]  ;;  %v1041_v35 = vadd.f32 %v6909_v5, %v823_v33 }
 0x1e3   : > { %v1040_v36 = vadd.f32 %v6909_v5, %v822_v34  ;;  %v1302_v49 = vmul.f32 %v6805_v50, %v1167_v41  ;;  %v1178_v34 = vmax.f32 %v1050_v25, 0.0 }
 0x1e4   : > { %v1169_v47 = vmax.f32 %v1041_v35, 0.0 }
 0x1e5   : > { %v1168_v52 = vmax.f32 %v1040_v36, 0.0 }
 0x1e6   : > { %1437 = vadd.xlane.f32.xlu1 %v1272_v28  ;;  %1435 = vadd.xlane.f32.xlu0 %v1271_v46  ;;  %v1166_v28 = vmax.f32 %v1038_v32, 0.0  ;;  %v824_v46 = vld [vmem:[#allocation5 + $0x230] sm:$0xff]  ;;  %v1304_v56 = vmul.f32 %v6805_v50, %v1169_v47 }
 0x1e7   : > { %v1303_v59 = vmul.f32 %v6805_v50, %v1168_v52 }
 0x1e8   : > { %v1301_v51 = vmul.f32 %v6805_v50, %v1166_v28  ;;  %v1313_v28 = vmul.f32 %v6805_v50, %v1178_v34  ;;  %v816_v34 = vld [vmem:[#allocation5 + $0x1f0] sm:$0xff] }
 0x1ea   : > { %1441 = vadd.xlane.f32.xlu1 %v1274_v53  ;;  %1439 = vadd.xlane.f32.xlu0 %v1273_v55  ;;  %v1042_v53 = vadd.f32 %v6909_v5, %v824_v46  ;;  %v826_v55 = vld [vmem:[#allocation5 + $0x240] sm:$0xff] }
 0x1eb   : > { %v1044_v61 = vadd.f32 %v6909_v5, %v826_v55 }
 0x1ec   : > { %v1170_v37 = vmax.f32 %v1042_v53, 0.0 }
 0x1ed   : > { %v1172_v4 = vmax.f32 %v1044_v61, 0.0 }
 0x1ee   : > { %1445 = vadd.xlane.f32.xlu1 %v1276_v62  ;;  %1443 = vadd.xlane.f32.xlu0 %v1275_v63  ;;  %v828_v62 = vld [vmem:[#allocation5 + $0x250] sm:$0xff]  ;;  %v1306_v63 = vmul.f32 %v6805_v50, %v1171_v57  ;;  %v1305_v1 = vmul.f32 %v6805_v50, %v1170_v37  ;;  %v809_v57 = vld [vmem:[#allocation5 + $0x1b8] sm:$0xff] }
 0x1ef   : > { %v1046_v6 = vadd.f32 %v6909_v5, %v828_v62  ;;  %v1307_v12 = vmul.f32 %v6805_v50, %v1172_v4 }
 0x1f1   : > { %v1174_v14 = vmax.f32 %v1046_v6, 0.0 }
 0x1f2   : > { %1449 = vadd.xlane.f32.xlu1 %v1278_v8  ;;  %1447 = vadd.xlane.f32.xlu0 %v1277_v9  ;;  %v830_v8 = vld [vmem:[#allocation5 + $0x260] sm:$0xff]  ;;  %v930_v9 = vcombine.high %v6828_v30, %v6828_v30 }
 0x1f3   : > { %v1048_v10 = vadd.f32 %v6909_v5, %v830_v8  ;;  %v1309_v23 = vmul.f32 %v6805_v50, %v1174_v14 }
 0x1f4   : > { %v6946_v17 = vrot.slane %v930_v9, %v6771_v24 }
 0x1f6   : > { %1453 = vadd.xlane.f32.xlu1 %v1280_v13  ;;  %1451 = vadd.xlane.f32.xlu0 %v1279_v15  ;;  %v1175_v13 = vmax.f32 %v1047_v0, 0.0  ;;  %v833_v15 = vld [vmem:[#allocation5 + $0x278] sm:$0xff]  ;;  %v1020_v36 = vadd.f32 %v6946_v17, %v802_v27  ;;  %v1027_v60 = vadd.f32 %v6946_v17, %v809_v57  ;;  %v811_v0 = vld [vmem:[#allocation5 + $0x1c8] sm:$0xff] }
 0x1f7   : > { %v1051_v30 = vadd.f32 %v6909_v5, %v833_v15  ;;  %v1029_v2 = vadd.f32 %v6946_v17, %v811_v0  ;;  %v1031_v15 = vadd.f32 %v6946_v17, %v813_v44  ;;  %v837_v57 = vld [vmem:[#allocation5 + $0x298] sm:$0xff] }
 0x1f8   : > { %v1310_v22 = vmul.f32 %v6805_v50, %v1175_v13  ;;  %v1148_v46 = vmax.f32 %v1020_v36, 0.0  ;;  %v1155_v8 = vmax.f32 %v1027_v60, 0.0 }
 0x1f9   : > { %v1179_v32 = vmax.f32 %v1051_v30, 0.0  ;;  %v814_v30 = vld [vmem:[#allocation5 + $0x1e0] sm:$0xff] }
 0x1fa   : > { %1457 = vadd.xlane.f32.xlu1 %v1282_v58  ;;  %1455 = vadd.xlane.f32.xlu0 %v1281_v26  ;;  %v1176_v58 = vmax.f32 %v1048_v10, 0.0  ;;  %v803_v26 = vld [vmem:[#allocation5 + $0x188] sm:$0xff]  ;;  %v1283_v54 = vmul.f32 %v6805_v50, %v1148_v46  ;;  %v812_v10 = vld [vmem:[#allocation5 + $0x1d0] sm:$0xff]  ;;  %v1290_v13 = vmul.f32 %v6805_v50, %v1155_v8 }
 0x1fb   : > { %v1021_v35 = vadd.f32 %v6946_v17, %v803_v26  ;;  %v1314_v5 = vmul.f32 %v6805_v50, %v1179_v32  ;;  %v1030_v16 = vadd.f32 %v6946_v17, %v812_v10  ;;  %v1159_v26 = vmax.f32 %v1031_v15, 0.0 }
 0x1fc   : > { %v1311_v33 = vmul.f32 %v6805_v50, %v1176_v58  ;;  %v1032_v32 = vadd.f32 %v6946_v17, %v814_v30 }
 0x1fd   : > { %v1149_v45 = vmax.f32 %v1021_v35, 0.0  ;;  %v1158_v27 = vmax.f32 %v1030_v16, 0.0  ;;  %v6986_v35 = vrot.slane %v6798_v43, %v6771_v24 }
 0x1fe   : > { %1493 = vadd.xlane.f32.xlu1 %v1300_v38  ;;  %1491 = vadd.xlane.f32.xlu0 %v1299_v40  ;;  %v805_v38 = vld [vmem:[#allocation5 + $0x198] sm:$0xff]  ;;  %v804_v40 = vld [vmem:[#allocation5 + $0x190] sm:$0xff]  ;;  %v1160_v46 = vmax.f32 %v1032_v32, 0.0  ;;  %v842_v32 = vld [vmem:[#allocation5 + $0x2c0] sm:$0xff] }
 0x1ff   : > { %v1023_v41 = vadd.f32 %v6946_v17, %v805_v38  ;;  %v1022_v47 = vadd.f32 %v6946_v17, %v804_v40  ;;  %v1284_v53 = vmul.f32 %v6805_v50, %v1149_v45  ;;  %v1055_v0 = vadd.f32 %v6986_v35, %v837_v57 }
 0x201   : > { %v1151_v55 = vmax.f32 %v1023_v41, 0.0  ;;  %v1294_v41 = vmul.f32 %v6805_v50, %v1159_v26 }
 0x202   : > { %1497 = vadd.xlane.f32.xlu1 %v1302_v49  ;;  %1495 = vadd.xlane.f32.xlu0 %v1301_v51  ;;  %v806_v49 = vld [vmem:[#allocation5 + $0x1a0] sm:$0xff]  ;;  %v1025_v51 = vadd.f32 %v6946_v17, %v807_v48 }
 0x203   : > { %v1024_v52 = vadd.f32 %v6946_v17, %v806_v49  ;;  %v1286_v61 = vmul.f32 %v6805_v50, %v1151_v55  ;;  %v834_v48 = vld [vmem:[#allocation5 + $0x280] sm:$0xff] }
 0x204   : > { %v1153_v37 = vmax.f32 %v1025_v51, 0.0 }
 0x205   : > { %v1152_v62 = vmax.f32 %v1024_v52, 0.0 }
 0x206   : > { %1501 = vadd.xlane.f32.xlu1 %v1304_v56  ;;  %1499 = vadd.xlane.f32.xlu0 %v1303_v59  ;;  %v1150_v56 = vmax.f32 %v1022_v47, 0.0  ;;  %v808_v59 = vld [vmem:[#allocation5 + $0x1b0] sm:$0xff]  ;;  %v1288_v6 = vmul.f32 %v6805_v50, %v1153_v37  ;;  %v835_v47 = vld [vmem:[#allocation5 + $0x288] sm:$0xff] }
 0x207   : > { %v1287_v7 = vmul.f32 %v6805_v50, %v1152_v62  ;;  %v1053_v55 = vadd.f32 %v6986_v35, %v835_v47  ;;  %v845_v47 = vld [vmem:[#allocation5 + $0x2d8] sm:$0xff] }
 0x208   : > { %v1285_v42 = vmul.f32 %v6805_v50, %v1150_v56  ;;  %v1052_v56 = vadd.f32 %v6986_v35, %v834_v48  ;;  %v844_v48 = vld [vmem:[#allocation5 + $0x2d0] sm:$0xff] }
 0x209   : > { %v1181_v62 = vmax.f32 %v1053_v55, 0.0 }
 0x20a   : > { %1505 = vadd.xlane.f32.xlu1 %v1306_v63  ;;  %1503 = vadd.xlane.f32.xlu0 %v1305_v1  ;;  %v1026_v63 = vadd.f32 %v6946_v17, %v808_v59  ;;  %v810_v1 = vld [vmem:[#allocation5 + $0x1c0] sm:$0xff]  ;;  %v836_v59 = vld [vmem:[#allocation5 + $0x290] sm:$0xff] }
 0x20b   : > { %v1028_v4 = vadd.f32 %v6946_v17, %v810_v1  ;;  %v1054_v1 = vadd.f32 %v6986_v35, %v836_v59  ;;  %v1316_v44 = vmul.f32 %v6805_v50, %v1181_v62  ;;  %v929_v62 = vcombine.high %v6791_v39, %v6791_v39 }
 0x20c   : > { %v1154_v9 = vmax.f32 %v1026_v63, 0.0  ;;  %v1180_v63 = vmax.f32 %v1052_v56, 0.0 }
 0x20d   : > { %v7055_v39 = vrot.slane %v929_v62, %v6771_v24  ;;  %v855_v62 = vld [vmem:[#allocation5 + $0x328] sm:$0xff] }
 0x20e   : > { %1509 = vadd.xlane.f32.xlu1 %v1308_v11  ;;  %1507 = vadd.xlane.f32.xlu0 %v1307_v12  ;;  %v1157_v11 = vmax.f32 %v1029_v2, 0.0  ;;  %v1156_v12 = vmax.f32 %v1028_v4, 0.0  ;;  %v1289_v14 = vmul.f32 %v6805_v50, %v1154_v9  ;;  %v839_v2 = vld [vmem:[#allocation5 + $0x2a8] sm:$0xff]  ;;  %v838_v4 = vld [vmem:[#allocation5 + $0x2a0] sm:$0xff]  ;;  %v1315_v10 = vmul.f32 %v6805_v50, %v1180_v63 }
 0x20f   : > { %v1057_v8 = vadd.f32 %v6986_v35, %v839_v2  ;;  %v1056_v9 = vadd.f32 %v6986_v35, %v838_v4 }
 0x210   : > { %v1292_v58 = vmul.f32 %v6805_v50, %v1157_v11  ;;  %v1291_v25 = vmul.f32 %v6805_v50, %v1156_v12  ;;  %v1183_v11 = vmax.f32 %v1055_v0, 0.0  ;;  %v1182_v12 = vmax.f32 %v1054_v1, 0.0 }
 0x211   : > { %v1184_v30 = vmax.f32 %v1056_v9, 0.0 }
 0x212   : > { %1513 = vadd.xlane.f32.xlu1 %v1310_v22  ;;  %1511 = vadd.xlane.f32.xlu0 %v1309_v23 }
 0x216   : > { %1517 = vadd.xlane.f32.xlu1 %v1312_v29  ;;  %1515 = vadd.xlane.f32.xlu0 %v1311_v33  ;;  %v1033_v29 = vadd.f32 %v6946_v17, %v815_v18  ;;  %v817_v33 = vld [vmem:[#allocation5 + $0x1f8] sm:$0xff]  ;;  %v1185_v18 = vmax.f32 %v1057_v8, 0.0 }
 0x217   : > { %v1035_v40 = vadd.f32 %v6946_v17, %v817_v33 }
 0x218   : > { %v1161_v45 = vmax.f32 %v1033_v29, 0.0  ;;  %v843_v29 = vld [vmem:[#allocation5 + $0x2c8] sm:$0xff] }
 0x219   : > { %v1163_v52 = vmax.f32 %v1035_v40, 0.0  ;;  %v1320_v40 = vmul.f32 %v6805_v50, %v1185_v18 }
 0x21a   : > { %1521 = vadd.xlane.f32.xlu1 %v1314_v5  ;;  %1519 = vadd.xlane.f32.xlu0 %v1313_v28  ;;  %v1034_v5 = vadd.f32 %v6946_v17, %v816_v34  ;;  %v1293_v28 = vmul.f32 %v6805_v50, %v1158_v27  ;;  %v1295_v17 = vmul.f32 %v6805_v50, %v1160_v46 }
 0x21b   : > { %v1060_v46 = vadd.f32 %v6986_v35, %v842_v32 }
 0x21d   : > { %v1188_v59 = vmax.f32 %v1060_v46, 0.0 }
 0x21e   : > { %1461 = vadd.xlane.f32.xlu1 %v1284_v53  ;;  %1459 = vadd.xlane.f32.xlu0 %v1283_v54  ;;  %v1162_v53 = vmax.f32 %v1034_v5, 0.0  ;;  %v1296_v54 = vmul.f32 %v6805_v50, %v1161_v45  ;;  %v1319_v5 = vmul.f32 %v6805_v50, %v1184_v30  ;;  %v1061_v45 = vadd.f32 %v6986_v35, %v843_v29  ;;  %v850_v29 = vld [vmem:[#allocation5 + $0x300] sm:$0xff] }
 0x21f   : > { %v1323_v8 = vmul.f32 %v6805_v50, %v1188_v59 }
 0x220   : > { %v1189_v57 = vmax.f32 %v1061_v45, 0.0 }
 0x222   : > { %1465 = vadd.xlane.f32.xlu1 %v1286_v61  ;;  %1463 = vadd.xlane.f32.xlu0 %v1285_v42  ;;  %v1298_v61 = vmul.f32 %v6805_v50, %v1163_v52  ;;  %v1297_v42 = vmul.f32 %v6805_v50, %v1162_v53  ;;  %v1324_v4 = vmul.f32 %v6805_v50, %v1189_v57 }
 0x226   : > { %1469 = vadd.xlane.f32.xlu1 %v1288_v6  ;;  %1467 = vadd.xlane.f32.xlu0 %v1287_v7 }
 0x22a   : > { %1473 = vadd.xlane.f32.xlu1 %v1290_v13  ;;  %1471 = vadd.xlane.f32.xlu0 %v1289_v14  ;;  %v841_v13 = vld [vmem:[#allocation5 + $0x2b8] sm:$0xff]  ;;  %v840_v14 = vld [vmem:[#allocation5 + $0x2b0] sm:$0xff] }
 0x22b   : > { %v6976_v22 = vpop.xlane.xlu1 %1367  ;;  %v6978_v23 = vpop.xlane.xlu0 %1363  ;;  %v1059_v26 = vadd.f32 %v6986_v35, %v841_v13  ;;  %v1058_v27 = vadd.f32 %v6986_v35, %v840_v14 }
 0x22c   : > { %10018 = vst [vmem:[#allocation29_spill] sm:$0xff] %v6976_v22  ;;  %10019 = vst [vmem:[#allocation30_spill] sm:$0xff] %v6978_v23 }
 0x22e   : > { %1477 = vadd.xlane.f32.xlu1 %v1292_v58  ;;  %1475 = vadd.xlane.f32.xlu0 %v1291_v25  ;;  %v1318_v58 = vmul.f32 %v6805_v50, %v1183_v11  ;;  %v1317_v25 = vmul.f32 %v6805_v50, %v1182_v12  ;;  %v848_v11 = vld [vmem:[#allocation5 + $0x2f0] sm:$0xff] }
 0x22f   : > { %v6988_v36 = vpop.xlane.xlu1 %1369  ;;  %v6990_v38 = vpop.xlane.xlu0 %1365 }
 0x230   : > { %10020 = vst [vmem:[#allocation31_spill] sm:$0xff] %v6988_v36  ;;  %10021 = vst [vmem:[#allocation32_spill] sm:$0xff] %v6990_v38 }
 0x232   : > { %1481 = vadd.xlane.f32.xlu1 %v1294_v41  ;;  %1479 = vadd.xlane.f32.xlu0 %v1293_v28  ;;  %v1187_v41 = vmax.f32 %v1059_v26, 0.0  ;;  %v1186_v28 = vmax.f32 %v1058_v27, 0.0  ;;  %v1066_v26 = vadd.f32 %v6986_v35, %v848_v11  ;;  %v851_v27 = vld [vmem:[#allocation5 + $0x308] sm:$0xff] }
 0x233   : > { %v6996_v49 = vpop.xlane.xlu1 %1373  ;;  %v6998_v51 = vpop.xlane.xlu0 %1371  ;;  %v1069_v46 = vadd.f32 %v7055_v39, %v851_v27 }
 0x234   : > { %10022 = vst [vmem:[#allocation33_spill] sm:$0xff] %v6996_v49  ;;  %10023 = vst [vmem:[#allocation34_spill] sm:$0xff] %v6998_v51  ;;  %v1322_v55 = vmul.f32 %v6805_v50, %v1187_v41  ;;  %v1321_v56 = vmul.f32 %v6805_v50, %v1186_v28  ;;  %v1194_v45 = vmax.f32 %v1066_v26, 0.0 }
 0x236   : > { %1485 = vadd.xlane.f32.xlu1 %v1296_v54  ;;  %1483 = vadd.xlane.f32.xlu0 %v1295_v17  ;;  %v1063_v54 = vadd.f32 %v6986_v35, %v845_v47  ;;  %v1062_v17 = vadd.f32 %v6986_v35, %v844_v48  ;;  %v1068_v47 = vadd.f32 %v7055_v39, %v850_v29  ;;  %v853_v48 = vld [vmem:[#allocation5 + $0x318] sm:$0xff] }
 0x237   : > { %v7004_v37 = vpop.xlane.xlu1 %1377  ;;  %v7006_v60 = vpop.xlane.xlu0 %1375 }
 0x238   : > { %10024 = vst [vmem:[#allocation35_spill] sm:$0xff] %v7004_v37  ;;  %10025 = vst [vmem:[#allocation36_spill] sm:$0xff] %v7006_v60  ;;  %v1191_v9 = vmax.f32 %v1063_v54, 0.0 }
 0x23a   : > { %1489 = vadd.xlane.f32.xlu1 %v1298_v61  ;;  %1487 = vadd.xlane.f32.xlu0 %v1297_v42  ;;  %v847_v61 = vld [vmem:[#allocation5 + $0x2e8] sm:$0xff]  ;;  %v846_v42 = vld [vmem:[#allocation5 + $0x2e0] sm:$0xff]  ;;  %v1326_v30 = vmul.f32 %v6805_v50, %v1191_v9 }
 0x23b   : > { %v7012_v6 = vpop.xlane.xlu1 %1381  ;;  %v7014_v7 = vpop.xlane.xlu0 %1379  ;;  %v1065_v1 = vadd.f32 %v6986_v35, %v847_v61  ;;  %v1064_v2 = vadd.f32 %v6986_v35, %v846_v42  ;;  %v1197_v61 = vmax.f32 %v1069_v46, 0.0  ;;  %v1196_v42 = vmax.f32 %v1068_v47, 0.0  ;;  %v858_v46 = vld [vmem:[#allocation5 + $0x340] sm:$0xff] }
 0x23c   : > { %10026 = vst [vmem:[#allocation37_spill] sm:$0xff] %v7012_v6 }
 0x23d   : > { %v1193_v14 = vmax.f32 %v1065_v1, 0.0  ;;  %v1192_v18 = vmax.f32 %v1064_v2, 0.0  ;;  %v854_v1 = vld [vmem:[#allocation5 + $0x320] sm:$0xff] }
 0x23e   : > { %1525 = vadd.xlane.f32.xlu1 %v1316_v44  ;;  %1523 = vadd.xlane.f32.xlu0 %v1315_v10  ;;  %v1190_v44 = vmax.f32 %v1062_v17, 0.0  ;;  %v849_v10 = vld [vmem:[#allocation5 + $0x2f8] sm:$0xff]  ;;  %v1072_v9 = vadd.f32 %v7055_v39, %v854_v1 }
 0x23f   : > { %v7020_v15 = vpop.xlane.xlu1 %1385  ;;  %v7022_v16 = vpop.xlane.xlu0 %1383  ;;  %v1327_v41 = vmul.f32 %v6805_v50, %v1192_v18  ;;  %v857_v18 = vld [vmem:[#allocation5 + $0x338] sm:$0xff] }
 0x240   : > { %10027 = vst [vmem:[#allocation38_spill] sm:$0xff] %v7020_v15  ;;  %v1200_v27 = vmax.f32 %v1072_v9, 0.0 }
 0x242   : > { %1529 = vadd.xlane.f32.xlu1 %v1318_v58  ;;  %1527 = vadd.xlane.f32.xlu0 %v1317_v25  ;;  %v1325_v58 = vmul.f32 %v6805_v50, %v1190_v44  ;;  %v1067_v25 = vadd.f32 %v6986_v35, %v849_v10  ;;  %v852_v35 = vld [vmem:[#allocation5 + $0x310] sm:$0xff] }
 0x243   : > { %v7028_v33 = vpop.xlane.xlu1 %1389  ;;  %v7030_v34 = vpop.xlane.xlu0 %1387 }
 0x244   : > { %10028 = vst [vmem:[#allocation39_spill] sm:$0xff] %v7028_v33  ;;  %v1195_v28 = vmax.f32 %v1067_v25, 0.0 }
 0x246   : > { %1533 = vadd.xlane.f32.xlu1 %v1320_v40  ;;  %1531 = vadd.xlane.f32.xlu0 %v1319_v5  ;;  %v1328_v5 = vmul.f32 %v6805_v50, %v1193_v14  ;;  %v7082_v50 = vld [vmem:[%s9696_s5] ss:$0 sm:$0xff] }
 0x247   : > { %v7036_v52 = vpop.xlane.xlu1 %1393  ;;  %v7038_v53 = vpop.xlane.xlu0 %1391  ;;  %v1330_v57 = vmul.f32 %v7082_v50, %v1195_v28  ;;  %v1329_v59 = vmul.f32 %v7082_v50, %v1194_v45  ;;  %v1332_v44 = vmul.f32 %v7082_v50, %v1197_v61  ;;  %v1331_v10 = vmul.f32 %v7082_v50, %v1196_v42  ;;  %v859_v45 = vld [vmem:[#allocation5 + $0x348] sm:$0xff]  ;;  %v861_v42 = vld [vmem:[#allocation5 + $0x358] sm:$0xff] }
 0x248   : > { %10029 = vst [vmem:[#allocation40_spill] sm:$0xff] %v7036_v52  ;;  %v1076_v61 = vadd.f32 %v7055_v39, %v858_v46  ;;  %v1079_v9 = vadd.f32 %v7055_v39, %v861_v42 }
 0x24a   : > { %1537 = vadd.xlane.f32.xlu1 %v1322_v55  ;;  %1535 = vadd.xlane.f32.xlu0 %v1321_v56  ;;  %v1071_v55 = vadd.f32 %v7055_v39, %v853_v48  ;;  %v1070_v56 = vadd.f32 %v7055_v39, %v852_v35 }
 0x24b   : > { %v7046_v63 = vpop.xlane.xlu1 %1397  ;;  %v7048_v0 = vpop.xlane.xlu0 %1395 }
 0x24c   : > { %10030 = vst [vmem:[#allocation41_spill] sm:$0xff] %v7046_v63  ;;  %10031 = vst [vmem:[#allocation42_spill] sm:$0xff] %v7048_v0  ;;  %v1199_v11 = vmax.f32 %v1071_v55, 0.0  ;;  %v1198_v14 = vmax.f32 %v1070_v56, 0.0  ;;  %v1335_v55 = vmul.f32 %v7082_v50, %v1200_v27  ;;  %v931_v27 = vcombine.high %v6798_v43, %v6798_v43 }
 0x24e   : > { %1541 = vadd.xlane.f32.xlu1 %v1324_v4  ;;  %1539 = vadd.xlane.f32.xlu0 %v1323_v8  ;;  %v1073_v8 = vadd.f32 %v7055_v39, %v855_v62  ;;  %v1334_v29 = vmul.f32 %v7082_v50, %v1199_v11  ;;  %v860_v62 = vld [vmem:[#allocation5 + $0x350] sm:$0xff]  ;;  %v7129_v43 = vrot.slane %v931_v27, %v6771_v24 }
 0x24f   : > { %v7057_v12 = vpop.xlane.xlu1 %1401  ;;  %v7059_v13 = vpop.xlane.xlu0 %1399 }
 0x250   : > { %10032 = vst [vmem:[#allocation43_spill] sm:$0xff] %v7057_v12  ;;  %10033 = vst [vmem:[#allocation44_spill] sm:$0xff] %v7059_v13  ;;  %v1201_v26 = vmax.f32 %v1073_v8, 0.0 }
 0x252   : > { %1545 = vadd.xlane.f32.xlu1 %v1326_v30  ;;  %1543 = vadd.xlane.f32.xlu0 %v1325_v58  ;;  %v856_v30 = vld [vmem:[#allocation5 + $0x330] sm:$0xff]  ;;  %v1336_v35 = vmul.f32 %v7082_v50, %v1201_v26  ;;  %v862_v26 = vld [vmem:[#allocation5 + $0x360] sm:$0xff] }
 0x253   : > { %v7065_v32 = vpop.xlane.xlu1 %1405  ;;  %v7067_v40 = vpop.xlane.xlu0 %1403  ;;  %v1074_v28 = vadd.f32 %v7055_v39, %v856_v30  ;;  %v863_v30 = vld [vmem:[#allocation5 + $0x368] sm:$0xff] }
 0x254   : > { %10034 = vst [vmem:[#allocation45_spill] sm:$0xff] %v7065_v32  ;;  %10035 = vst [vmem:[#allocation46_spill] sm:$0xff] %v7067_v40 }
 0x256   : > { %1549 = vadd.xlane.f32.xlu1 %v1328_v5  ;;  %1547 = vadd.xlane.f32.xlu0 %v1327_v41  ;;  %v1333_v5 = vmul.f32 %v7082_v50, %v1198_v14  ;;  %v1075_v41 = vadd.f32 %v7055_v39, %v857_v18  ;;  %v1204_v18 = vmax.f32 %v1076_v61, 0.0 }
 0x257   : > { %v7073_v54 = vpop.xlane.xlu1 %1409  ;;  %v7075_v17 = vpop.xlane.xlu0 %1407 }
 0x258   : > { %10036 = vst [vmem:[#allocation47_spill] sm:$0xff] %v7073_v54  ;;  %v1203_v56 = vmax.f32 %v1075_v41, 0.0  ;;  %v1081_v41 = vadd.f32 %v7055_v39, %v863_v30  ;;  %v1339_v46 = vmul.f32 %v7082_v50, %v1204_v18  ;;  %v866_v18 = vld [vmem:[#allocation5 + $0x380] sm:$0xff] }
 0x25a   : > { %1553 = vadd.xlane.f32.xlu1 %v1330_v57  ;;  %1551 = vadd.xlane.f32.xlu0 %v1329_v59  ;;  %v1202_v57 = vmax.f32 %v1074_v28, 0.0  ;;  %v1077_v59 = vadd.f32 %v7055_v39, %v859_v45  ;;  %v1080_v28 = vadd.f32 %v7055_v39, %v862_v26  ;;  %v1209_v42 = vmax.f32 %v1081_v41, 0.0 }
 0x25b   : > { %v7086_v2 = vpop.xlane.xlu1 %1413  ;;  %v7088_v4 = vpop.xlane.xlu0 %1411 }
 0x25c   : > { %10037 = vst [vmem:[#allocation48_spill] sm:$0xff] %v7086_v2  ;;  %v1337_v11 = vmul.f32 %v7082_v50, %v1202_v57  ;;  %v1205_v14 = vmax.f32 %v1077_v59, 0.0  ;;  %v864_v57 = vld [vmem:[#allocation5 + $0x370] sm:$0xff]  ;;  %v1344_v27 = vmul.f32 %v7082_v50, %v1209_v42 }
 0x25e   : > { %1557 = vadd.xlane.f32.xlu1 %v1332_v44  ;;  %1555 = vadd.xlane.f32.xlu0 %v1331_v10  ;;  %v1078_v44 = vadd.f32 %v7055_v39, %v860_v62  ;;  %v1338_v10 = vmul.f32 %v7082_v50, %v1203_v56  ;;  %v1340_v45 = vmul.f32 %v7082_v50, %v1205_v14  ;;  %v865_v56 = vld [vmem:[#allocation5 + $0x378] sm:$0xff]  ;;  %v1208_v62 = vmax.f32 %v1080_v28, 0.0  ;;  %v867_v14 = vld [vmem:[#allocation5 + $0x388] sm:$0xff] }
 0x25f   : > { %v7094_v58 = vpop.xlane.xlu1 %1417  ;;  %v7096_v25 = vpop.xlane.xlu0 %1415 }
 0x260   : > { %10038 = vst [vmem:[#allocation49_spill] sm:$0xff] %v7094_v58  ;;  %v1343_v41 = vmul.f32 %v7082_v50, %v1208_v62 }
 0x262   : > { %1561 = vadd.xlane.f32.xlu1 %v1334_v29  ;;  %1559 = vadd.xlane.f32.xlu0 %v1333_v5 }
 0x263   : > { %v7102_v47 = vpop.xlane.xlu1 %1421  ;;  %v7104_v48 = vpop.xlane.xlu0 %1419 }
 0x264   : > { %10039 = vst [vmem:[#allocation50_spill] sm:$0xff] %v7102_v47  ;;  %10040 = vst [vmem:[#allocation51_spill] sm:$0xff] %v7104_v48 }
 0x266   : > { %1565 = vadd.xlane.f32.xlu1 %v1336_v35  ;;  %1563 = vadd.xlane.f32.xlu0 %v1335_v55  ;;  %v1207_v35 = vmax.f32 %v1079_v9, 0.0  ;;  %v1206_v55 = vmax.f32 %v1078_v44, 0.0  ;;  %v1083_v9 = vadd.f32 %v7055_v39, %v865_v56  ;;  %v1082_v44 = vadd.f32 %v7055_v39, %v864_v57  ;;  %v868_v39 = vld [vmem:[#allocation5 + $0x390] sm:$0xff] }
 0x267   : > { %v7110_v1 = vpop.xlane.xlu1 %1425  ;;  %v7112_v8 = vpop.xlane.xlu0 %1423  ;;  %v1086_v42 = vadd.f32 %v7129_v43, %v868_v39 }
 0x268   : > { %10041 = vst [vmem:[#allocation52_spill] sm:$0xff] %v7110_v1  ;;  %10042 = vst [vmem:[#allocation53_spill] sm:$0xff] %v7112_v8  ;;  %v1211_v28 = vmax.f32 %v1083_v9, 0.0 }
 0x26a   : > { %1569 = vadd.xlane.f32.xlu1 %v1338_v10  ;;  %1567 = vadd.xlane.f32.xlu0 %v1337_v11  ;;  %v1342_v10 = vmul.f32 %v7082_v50, %v1207_v35  ;;  %v1341_v11 = vmul.f32 %v7082_v50, %v1206_v55  ;;  %v1084_v35 = vadd.f32 %v7129_v43, %v866_v18  ;;  %v869_v55 = vld [vmem:[#allocation5 + $0x398] sm:$0xff]  ;;  %v870_v18 = vld [vmem:[#allocation5 + $0x3a0] sm:$0xff] }
 0x26b   : > { %v7120_v29 = vpop.xlane.xlu1 %1429  ;;  %v7122_v5 = vpop.xlane.xlu0 %1427  ;;  %v1346_v62 = vmul.f32 %v7082_v50, %v1211_v28  ;;  %v1214_v28 = vmax.f32 %v1086_v42, 0.0 }
 0x26c   : > { %10043 = vst [vmem:[#allocation54_spill] sm:$0xff] %v7120_v29  ;;  %10044 = vst [vmem:[#allocation55_spill] sm:$0xff] %v7122_v5 }
 0x26e   : > { %1573 = vadd.xlane.f32.xlu1 %v1340_v45  ;;  %1571 = vadd.xlane.f32.xlu0 %v1339_v46  ;;  %v1210_v45 = vmax.f32 %v1082_v44, 0.0  ;;  %v1085_v46 = vadd.f32 %v7129_v43, %v867_v14  ;;  %v1212_v44 = vmax.f32 %v1084_v35, 0.0  ;;  %v871_v14 = vld [vmem:[#allocation5 + $0x3a8] sm:$0xff]  ;;  %v872_v35 = vld [vmem:[#allocation5 + $0x3b0] sm:$0xff] }
 0x26f   : > { %v7131_v59 = vpop.xlane.xlu1 %1433  ;;  %v7133_v61 = vpop.xlane.xlu0 %1431  ;;  %v1089_v20 = vadd.f32 %v7129_v43, %v871_v14  ;;  %v1349_v14 = vmul.f32 %v7082_v50, %v1214_v28  ;;  %v1090_v42 = vadd.f32 %v7129_v43, %v872_v35  ;;  %v876_v35 = vld [vmem:[#allocation5 + $0x3d0] sm:$0xff] }
 0x270   : > { %10045 = vst [vmem:[#allocation56_spill] sm:$0xff] %v7131_v59  ;;  %10046 = vst [vmem:[#allocation57_spill] sm:$0xff] %v7133_v61  ;;  %v1213_v9 = vmax.f32 %v1085_v46, 0.0  ;;  %v1347_v39 = vmul.f32 %v7082_v50, %v1212_v44  ;;  %v873_v46 = vld [vmem:[#allocation5 + $0x3b8] sm:$0xff]  ;;  %v875_v44 = vld [vmem:[#allocation5 + $0x3c8] sm:$0xff] }
 0x272   : > { %1577 = vadd.xlane.f32.xlu1 %v1342_v10  ;;  %1575 = vadd.xlane.f32.xlu0 %v1341_v11  ;;  %v1087_v10 = vadd.f32 %v7129_v43, %v869_v55  ;;  %v1345_v11 = vmul.f32 %v7082_v50, %v1210_v45  ;;  %v1348_v55 = vmul.f32 %v7082_v50, %v1213_v9 }
 0x273   : > { %v7139_v30 = vpop.xlane.xlu1 %1437  ;;  %v7141_v26 = vpop.xlane.xlu0 %1435  ;;  %v1088_v45 = vadd.f32 %v7129_v43, %v870_v18  ;;  %v1091_v9 = vadd.f32 %v7129_v43, %v873_v46  ;;  %v874_v18 = vld [vmem:[#allocation5 + $0x3c0] sm:$0xff] }
 0x274   : > { %10047 = vst [vmem:[#allocation58_spill] sm:$0xff] %v7139_v30  ;;  %10048 = vst [vmem:[#allocation59_spill] sm:$0xff] %v7141_v26  ;;  %v1215_v3 = vmax.f32 %v1087_v10, 0.0  ;;  %v1217_v10 = vmax.f32 %v1089_v20, 0.0  ;;  %v1092_v46 = vadd.f32 %v7129_v43, %v874_v18  ;;  %v878_v18 = vld [vmem:[#allocation5 + $0x3e0] sm:$0xff] }
 0x275   : > { %v1216_v19 = vmax.f32 %v1088_v45, 0.0  ;;  %v1219_v28 = vmax.f32 %v1091_v9, 0.0  ;;  %v1218_v45 = vmax.f32 %v1090_v42, 0.0 }
 0x276   : > { %1581 = vadd.xlane.f32.xlu1 %v1344_v27  ;;  %1579 = vadd.xlane.f32.xlu0 %v1343_v41  ;;  %v1350_v31 = vmul.f32 %v7082_v50, %v1215_v3  ;;  %v1352_v24 = vmul.f32 %v7082_v50, %v1217_v10  ;;  %v1093_v3 = vadd.f32 %v7129_v43, %v875_v44  ;;  %v1220_v42 = vmax.f32 %v1092_v46, 0.0  ;;  %v880_v46 = vld [vmem:[#allocation5 + $0x3f0] sm:$0xff] }
 0x277   : > { %v7147_v56 = vpop.xlane.xlu1 %1441  ;;  %v7149_v57 = vpop.xlane.xlu0 %1439  ;;  %v1351_v20 = vmul.f32 %v7082_v50, %v1216_v19  ;;  %v1094_v10 = vadd.f32 %v7129_v43, %v876_v35  ;;  %v1354_v44 = vmul.f32 %v7082_v50, %v1219_v28  ;;  %v1353_v19 = vmul.f32 %v7082_v50, %v1218_v45 }
 0x278   : > { %10049 = vst [vmem:[#allocation60_spill] sm:$0xff] %v7147_v56  ;;  %10050 = vst [vmem:[#allocation61_spill] sm:$0xff] %v7149_v57  ;;  %v1221_v9 = vmax.f32 %v1093_v3, 0.0  ;;  %v1355_v35 = vmul.f32 %v7082_v50, %v1220_v42  ;;  %v1096_v45 = vadd.f32 %v7129_v43, %v878_v18  ;;  %v881_v3 = vld [vmem:[#allocation5 + $0x3f8] sm:$0xff] }
 0x279   : > { %v1222_v28 = vmax.f32 %v1094_v10, 0.0  ;;  %v1098_v10 = vadd.f32 %v7129_v43, %v880_v46 }
 0x27a   : > { %1585 = vadd.xlane.f32.xlu1 %v1346_v62  ;;  %1583 = vadd.xlane.f32.xlu0 %v1345_v11  ;;  %v1224_v52 = vmax.f32 %v1096_v45, 0.0 }
 0x27b   : > { %v7155_v27 = vpop.xlane.xlu1 %1445  ;;  %v7157_v41 = vpop.xlane.xlu0 %1443 }
 0x27c   : > { %10051 = vst [vmem:[#allocation62_spill] sm:$0xff] %v7155_v27  ;;  %10052 = vst [vmem:[#allocation63_spill] sm:$0xff] %v7157_v41 }
 0x27e   : > { %1589 = vadd.xlane.f32.xlu1 %v1348_v55  ;;  %1587 = vadd.xlane.f32.xlu0 %v1347_v39 }
 0x27f   : > { %v7163_v62 = vpop.xlane.xlu1 %1449  ;;  %v7165_v11 = vpop.xlane.xlu0 %1447 }
 0x280   : > { %10053 = vst [vmem:[#allocation64_spill] sm:$0xff] %v7163_v62  ;;  %10054 = vst [vmem:[#allocation65_spill] sm:$0xff] %v7165_v11  ;;  %v877_v62 = vld [vmem:[#allocation5 + $0x3d8] sm:$0xff] }
 0x282   : > { %1593 = vadd.xlane.f32.xlu1 %v1350_v31  ;;  %1591 = vadd.xlane.f32.xlu0 %v1349_v14 }
 0x283   : > { %v7171_v55 = vpop.xlane.xlu1 %1453  ;;  %v7173_v39 = vpop.xlane.xlu0 %1451 }
 0x284   : > { %10055 = vst [vmem:[#allocation66_spill] sm:$0xff] %v7171_v55  ;;  %10056 = vst [vmem:[#allocation67_spill] sm:$0xff] %v7173_v39  ;;  %v1095_v55 = vadd.f32 %v7129_v43, %v877_v62  ;;  %v879_v39 = vld [vmem:[#allocation5 + $0x3e8] sm:$0xff]  ;;  %v1356_v62 = vmul.f32 %v7082_v50, %v1221_v9  ;;  %v1099_v9 = vadd.f32 %v7129_v43, %v881_v3 }
 0x286   : > { %1597 = vadd.xlane.f32.xlu1 %v1352_v24  ;;  %1595 = vadd.xlane.f32.xlu0 %v1351_v20  ;;  %v1227_v11 = vmax.f32 %v1099_v9, 0.0 }
 0x287   : > { %v7179_v31 = vpop.xlane.xlu1 %1457  ;;  %v7181_v14 = vpop.xlane.xlu0 %1455 }
 0x288   : > { %10057 = vst [vmem:[#allocation68_spill] sm:$0xff] %v7179_v31  ;;  %10058 = vst [vmem:[#allocation69_spill] sm:$0xff] %v7181_v14  ;;  %v1223_v31 = vmax.f32 %v1095_v55, 0.0  ;;  %v1097_v14 = vadd.f32 %v7129_v43, %v879_v39  ;;  %v1357_v39 = vmul.f32 %v7082_v50, %v1222_v28  ;;  %v1362_v43 = vmul.f32 %v7082_v50, %v1227_v11 }
 0x28a   : > { %1601 = vadd.xlane.f32.xlu1 %v1354_v44  ;;  %1599 = vadd.xlane.f32.xlu0 %v1353_v19  ;;  %v1358_v1 = vmul.f32 %v7082_v50, %v1223_v31  ;;  %v1225_v55 = vmax.f32 %v1097_v14, 0.0  ;;  %v1226_v31 = vmax.f32 %v1098_v10, 0.0 }
 0x28b   : > { %v7187_v24 = vpop.xlane.xlu1 %1493  ;;  %v7189_v20 = vpop.xlane.xlu0 %1491 }
 0x28c   : > { %10059 = vst [vmem:[#allocation70_spill] sm:$0xff] %v7187_v24  ;;  %10060 = vst [vmem:[#allocation71_spill] sm:$0xff] %v7189_v20 }
 0x28e   : > { %1605 = vadd.xlane.f32.xlu1 %v1356_v62  ;;  %1603 = vadd.xlane.f32.xlu0 %v1355_v35  ;;  %v1360_v62 = vmul.f32 %v7082_v50, %v1225_v55  ;;  %v1359_v35 = vmul.f32 %v7082_v50, %v1224_v52 }
 0x28f   : > { %v7195_v44 = vpop.xlane.xlu1 %1497  ;;  %v7197_v19 = vpop.xlane.xlu0 %1495 }
 0x290   : > { %10061 = vst [vmem:[#allocation72_spill] sm:$0xff] %v7195_v44  ;;  %10062 = vst [vmem:[#allocation73_spill] sm:$0xff] %v7197_v19 }
 0x292   : > { %1609 = vadd.xlane.f32.xlu1 %v1358_v1  ;;  %1607 = vadd.xlane.f32.xlu0 %v1357_v39  ;;  %v1361_v1 = vmul.f32 %v7082_v50, %v1226_v31 }
 0x293   : > { %v7203_v42 = vpop.xlane.xlu1 %1501  ;;  %v7205_v18 = vpop.xlane.xlu0 %1499 }
 0x294   : > { %10063 = vst [vmem:[#allocation74_spill] sm:$0xff] %v7203_v42  ;;  %10064 = vst [vmem:[#allocation75_spill] sm:$0xff] %v7205_v18 }
 0x296   : > { %1613 = vadd.xlane.f32.xlu1 %v1360_v62  ;;  %1611 = vadd.xlane.f32.xlu0 %v1359_v35 }
 0x297   : > { %v7209_v14 = vpop.xlane.xlu1 %1505  ;;  %v7211_v28 = vpop.xlane.xlu0 %1503 }
 0x298   : > { %10065 = vst [vmem:[#allocation76_spill] sm:$0xff] %v7209_v14  ;;  %10066 = vst [vmem:[#allocation77_spill] sm:$0xff] %v7211_v28 }
 0x29a   : > { %1617 = vadd.xlane.f32.xlu1 %v1362_v43  ;;  %1615 = vadd.xlane.f32.xlu0 %v1361_v1 }
 0x29b   : > { %v7215_v45 = vpop.xlane.xlu1 %1509  ;;  %v7217_v3 = vpop.xlane.xlu0 %1507 }
 0x29c   : > { %10067 = vst [vmem:[#allocation78_spill] sm:$0xff] %v7215_v45  ;;  %10068 = vst [vmem:[#allocation79_spill] sm:$0xff] %v7217_v3 }
 0x29f   : > { %v7219_v46 = vpop.xlane.xlu1 %1513  ;;  %v7221_v52 = vpop.xlane.xlu0 %1511 }
 0x2a0   : > { %10069 = vst [vmem:[#allocation80_spill] sm:$0xff] %v7219_v46  ;;  %10070 = vst [vmem:[#allocation81_spill] sm:$0xff] %v7221_v52 }
 0x2a3   : > { %v7223_v55 = vpop.xlane.xlu1 %1517  ;;  %v7225_v39 = vpop.xlane.xlu0 %1515 }
 0x2a4   : > { %10071 = vst [vmem:[#allocation82_spill] sm:$0xff] %v7223_v55  ;;  %10072 = vst [vmem:[#allocation83_spill] sm:$0xff] %v7225_v39 }
 0x2a7   : > { %v7227_v9 = vpop.xlane.xlu1 %1521  ;;  %v7229_v10 = vpop.xlane.xlu0 %1519 }
 0x2a8   : > { %10073 = vst [vmem:[#allocation84_spill] sm:$0xff] %v7227_v9  ;;  %10074 = vst [vmem:[#allocation85_spill] sm:$0xff] %v7229_v10 }
 0x2ab   : > { %v7231_v11 = vpop.xlane.xlu1 %1461  ;;  %v7233_v50 = vpop.xlane.xlu0 %1459 }
 0x2ac   : > { %10075 = vst [vmem:[#allocation86_spill] sm:$0xff] %v7231_v11  ;;  %10076 = vst [vmem:[#allocation87_spill] sm:$0xff] %v7233_v50 }
 0x2af   : > { %v7235_v62 = vpop.xlane.xlu1 %1465  ;;  %v7237_v35 = vpop.xlane.xlu0 %1463 }
 0x2b0   : > { %10077 = vst [vmem:[#allocation88_spill] sm:$0xff] %v7235_v62  ;;  %10078 = vst [vmem:[#allocation89_spill] sm:$0xff] %v7237_v35 }
 0x2b3   : > { %v7239_v31 = vpop.xlane.xlu1 %1469  ;;  %v7241_v43 = vpop.xlane.xlu0 %1467 }
 0x2b4   : > { %10079 = vst [vmem:[#allocation90_spill] sm:$0xff] %v7239_v31  ;;  %10080 = vst [vmem:[#allocation91_spill] sm:$0xff] %v7241_v43 }
 0x2b7   : > { %v7243_v1 = vpop.xlane.xlu1 %1473  ;;  %v7245_v55 = vpop.xlane.xlu0 %1471 }
 0x2b8   : > { %10081 = vst [vmem:[#allocation92_spill] sm:$0xff] %v7243_v1  ;;  %10082 = vst [vmem:[#allocation93_spill] sm:$0xff] %v7245_v55 }
 0x2bb   : > { %v7247_v39 = vpop.xlane.xlu1 %1477  ;;  %v7249_v9 = vpop.xlane.xlu0 %1475 }
 0x2bc   : > { %10083 = vst [vmem:[#allocation94_spill] sm:$0xff] %v7247_v39  ;;  %10084 = vst [vmem:[#allocation95_spill] sm:$0xff] %v7249_v9  ;;  %v10095_v9 = vlaneseq }
 0x2bf   : > { %v7251_v10 = vpop.xlane.xlu1 %1481  ;;  %v7253_v46 = vpop.xlane.xlu0 %1479 }
 0x2c0   : > { %10085 = vst [vmem:[#allocation96_spill] sm:$0xff] %v7251_v10  ;;  %10086 = vst [vmem:[#allocation97_spill] sm:$0xff] %v7253_v46  ;;  %v7272_v10 = vand.u32 127, %v10095_v9 }
 0x2c2   : > { %v1753_v46 = vadd.s32 4294967288, %v7272_v10  ;;  %v1767_v9 = vadd.s32 4294967272, %v7272_v10  ;;  %v1781_v3 = vadd.s32 4294967256, %v7272_v10 }
 0x2c3   : > { %v7255_v52 = vpop.xlane.xlu1 %1485  ;;  %v7257_v45 = vpop.xlane.xlu0 %1483 }
 0x2c4   : > { %10087 = vst [vmem:[#allocation98_spill] sm:$0xff] %v7255_v52  ;;  %10088 = vst [vmem:[#allocation99_spill] sm:$0xff] %v7257_v45  ;;  %v7306_v14 = vsub.s32 %v1767_v9, %v6768_v21  ;;  %v7321_v9 = vsub.s32 %v1781_v3, %v6768_v21 }
 0x2c6   : > { %10105 = vst [vmem:[#allocation115_spill] sm:$0xff] %v7306_v14  ;;  %10109 = vst [vmem:[#allocation119_spill] sm:$0xff] %v7321_v9 }
 0x2c7   : > { %v7259_v62 = vpop.xlane.xlu1 %1489  ;;  %v7261_v31 = vpop.xlane.xlu0 %1487 }
 0x2c8   : > { %10089 = vst [vmem:[#allocation100_spill] sm:$0xff] %v7259_v62  ;;  %10090 = vst [vmem:[#allocation101_spill] sm:$0xff] %v7261_v31  ;;  %v7280_v62 = vsub.s32 %v1753_v46, %v6768_v21  ;;  %v1760_v31 = vadd.s32 4294967280, %v7272_v10  ;;  %v1774_v46 = vadd.s32 4294967264, %v7272_v10 }
 0x2ca   : > { %10098 = vst [vmem:[#allocation108_spill] sm:$0xff] %v7280_v62  ;;  %v7312_v35 = vsub.s32 %v1774_v46, %v6768_v21  ;;  %v1802_v46 = vadd.s32 4294967232, %v7272_v10 }
 0x2cb   : > { %v7263_v43 = vpop.xlane.xlu1 %1525  ;;  %v7265_v1 = vpop.xlane.xlu0 %1523 }
 0x2cc   : > { %10091 = vst [vmem:[#allocation102_spill] sm:$0xff] %v7263_v43  ;;  %10092 = vst [vmem:[#allocation103_spill] sm:$0xff] %v7265_v1  ;;  %v1880_v28 = vrot.slane %v7067_v40, %v7312_v35 }
 0x2cd   : > { %10106 = vst [vmem:[#allocation116_spill] sm:$0xff] %v7312_v35 }
 0x2cf   : > { %v7267_v55 = vpop.xlane.xlu1 %1529  ;;  %v7269_v39 = vpop.xlane.xlu0 %1527 }
 0x2d0   : > { %10093 = vst [vmem:[#allocation104_spill] sm:$0xff] %v7267_v55  ;;  %10094 = vst [vmem:[#allocation105_spill] sm:$0xff] %v7269_v39  ;;  %v7289_v55 = vsub.s32 %v7272_v10, %v6768_v21 }
 0x2d2   : > { %10101 = vst [vmem:[#allocation111_spill] sm:$0xff] %v7289_v55 }
 0x2d3   : > { %v7275_v52 = vpop.xlane.xlu1 %1533  ;;  %v7277_v45 = vpop.xlane.xlu0 %1531 }
 0x2d4   : > { %10096 = vst [vmem:[#allocation106_spill] sm:$0xff] %v7275_v52  ;;  %10097 = vst [vmem:[#allocation107_spill] sm:$0xff] %v7277_v45  ;;  %v1757_v52 = vrot.slane %v6990_v38, %v7280_v62  ;;  %v7295_v45 = vsub.s32 %v1760_v31, %v6768_v21 }
 0x2d6   : > { %10102 = vst [vmem:[#allocation112_spill] sm:$0xff] %v7295_v45  ;;  %v1764_v31 = vrot.slane %v6976_v22, %v7295_v45  ;;  %v1865_v22 = vrot.slane %v7046_v63, %v7280_v62  ;;  %v1809_v63 = vadd.s32 4294967224, %v7272_v10 }
 0x2d7   : > { %v7283_v43 = vpop.xlane.xlu1 %1537  ;;  %v7285_v1 = vpop.xlane.xlu0 %1535 }
 0x2d8   : > { %10099 = vst [vmem:[#allocation109_spill] sm:$0xff] %v7283_v43  ;;  %10100 = vst [vmem:[#allocation110_spill] sm:$0xff] %v7285_v1  ;;  %v1752_v1 = vrot.slane %v6978_v23, %v7289_v55 }
 0x2da   : > { %v1759_v38 = vsel %vm1758_vm0, %v1757_v52, %v1752_v1  ;;  %v1795_v52 = vadd.s32 4294967240, %v7272_v10  ;;  %v1771_v1 = vrot.slane %v6988_v36, %v7306_v14 }
 0x2db   : > { %v7298_v39 = vpop.xlane.xlu1 %1541  ;;  %v7300_v43 = vpop.xlane.xlu0 %1539  ;;  %v1766_v23 = vsel %vm1765_vm1, %v1764_v31, %v1759_v38  ;;  %v1778_v38 = vrot.slane %v6998_v51, %v7312_v35  ;;  %v1870_v31 = vrot.slane %v7059_v13, %v7295_v45  ;;  %v1785_v51 = vrot.slane %v6996_v49, %v7321_v9 }
 0x2dc   : > { %10103 = vst [vmem:[#allocation113_spill] sm:$0xff] %v7298_v39  ;;  %10104 = vst [vmem:[#allocation114_spill] sm:$0xff] %v7300_v43  ;;  %v1788_v39 = vadd.s32 4294967248, %v7272_v10  ;;  %v1773_v11 = vsel %vm1772_vm2, %v1771_v1, %v1766_v23  ;;  %v7351_v13 = vsub.s32 %v1802_v46, %v6768_v21  ;;  %v1875_v23 = vrot.slane %v7057_v12, %v7306_v14 }
 0x2dd   : > { %v1780_v1 = vsel %vm1779_vm3, %v1778_v38, %v1773_v11  ;;  %v7367_v46 = vsub.s32 %v1809_v63, %v6768_v21  ;;  %v1885_v63 = vrot.slane %v7065_v32, %v7321_v9 }
 0x2de   : > { %v7334_v3 = vsub.s32 %v1788_v39, %v6768_v21  ;;  %v1816_v39 = vadd.s32 4294967216, %v7272_v10  ;;  %10114 = vst [vmem:[#allocation124_spill] sm:$0xff] %v7351_v13 }
 0x2df   : > { %v7315_v43 = vpop.xlane.xlu1 %1545  ;;  %v7317_v50 = vpop.xlane.xlu0 %1543  ;;  %10117 = vst [vmem:[#allocation127_spill] sm:$0xff] %v7367_v46 }
 0x2e0   : > { %10107 = vst [vmem:[#allocation117_spill] sm:$0xff] %v7315_v43  ;;  %10108 = vst [vmem:[#allocation118_spill] sm:$0xff] %v7317_v50  ;;  %v1861_v43 = vrot.slane %v7048_v0, %v7289_v55  ;;  %v7345_v0 = vsub.s32 %v1795_v52, %v6768_v21  ;;  %v1792_v52 = vrot.slane %v7006_v60, %v7334_v3 }
 0x2e1   : > { %10110 = vst [vmem:[#allocation120_spill] sm:$0xff] %v7334_v3  ;;  %v7371_v11 = vsub.s32 %v1816_v39, %v6768_v21  ;;  %v1806_v39 = vrot.slane %v7014_v7, %v7351_v13 }
 0x2e2   : > { %10113 = vst [vmem:[#allocation123_spill] sm:$0xff] %v7345_v0  ;;  %v1799_v38 = vrot.slane %v7004_v37, %v7345_v0 }
 0x2e3   : > { %v7338_v50 = vpop.xlane.xlu1 %1549  ;;  %v7340_v36 = vpop.xlane.xlu0 %1547  ;;  %10118 = vst [vmem:[#allocation128_spill] sm:$0xff] %v7371_v11  ;;  %v1820_v32 = vrot.slane %v7022_v16, %v7371_v11 }
 0x2e4   : > { %10111 = vst [vmem:[#allocation121_spill] sm:$0xff] %v7338_v50  ;;  %10112 = vst [vmem:[#allocation122_spill] sm:$0xff] %v7340_v36  ;;  %v1866_v50 = vsel %vm1758_vm0, %v1865_v22, %v1861_v43  ;;  %v1823_v22 = vadd.s32 4294967208, %v7272_v10  ;;  %v1830_v43 = vadd.s32 4294967200, %v7272_v10 }
 0x2e5   : > { %v1871_v36 = vsel %vm1765_vm1, %v1870_v31, %v1866_v50  ;;  %v1837_v50 = vadd.s32 4294967192, %v7272_v10  ;;  %v1787_v31 = vsel %vm1786_vm4, %v1785_v51, %v1780_v1 }
 0x2e6   : > { %v1876_v12 = vsel %vm1772_vm2, %v1875_v23, %v1871_v36  ;;  %v1794_v40 = vsel %vm1793_vm5, %v1792_v52, %v1787_v31  ;;  %v7392_v51 = vsub.s32 %v1823_v22, %v6768_v21  ;;  %v1944_v36 = vrot.slane %v7120_v29, %v7280_v62 }
 0x2e7   : > { %v7362_v42 = vpop.xlane.xlu1 %1553  ;;  %v7364_v49 = vpop.xlane.xlu0 %1551  ;;  %v1881_v60 = vsel %vm1779_vm3, %v1880_v28, %v1876_v12  ;;  %v1940_v23 = vrot.slane %v7122_v5, %v7289_v55  ;;  %v7399_v1 = vsub.s32 %v1837_v50, %v6768_v21  ;;  %v7402_v12 = vsub.s32 %v1830_v43, %v6768_v21 }
 0x2e8   : > { %10115 = vst [vmem:[#allocation125_spill] sm:$0xff] %v7362_v42  ;;  %10116 = vst [vmem:[#allocation126_spill] sm:$0xff] %v7364_v49  ;;  %v1890_v42 = vrot.slane %v7075_v17, %v7334_v3  ;;  %v1949_v28 = vrot.slane %v7133_v61, %v7295_v45  ;;  %v1813_v52 = vrot.slane %v7012_v6, %v7367_v46 }
 0x2e9   : > { %10121 = vst [vmem:[#allocation131_spill] sm:$0xff] %v7392_v51  ;;  %v1801_v22 = vsel %vm1800_vm6, %v1799_v38, %v1794_v40  ;;  %v1895_v31 = vrot.slane %v7073_v54, %v7345_v0  ;;  %v1886_v29 = vsel %vm1786_vm4, %v1885_v63, %v1881_v60  ;;  %v1900_v61 = vrot.slane %v7088_v4, %v7351_v13 }
 0x2ea   : > { %v1808_v50 = vsel %vm1807_vm7, %v1806_v39, %v1801_v22  ;;  %v1891_v43 = vsel %vm1793_vm5, %v1890_v42, %v1886_v29  ;;  %v1851_v40 = vadd.s32 4294967176, %v7272_v10  ;;  %v1945_v38 = vsel %vm1758_vm0, %v1944_v36, %v1940_v23 }
 0x2eb   : > { %v7387_v49 = vpop.xlane.xlu1 %1557  ;;  %v7389_v37 = vpop.xlane.xlu0 %1555  ;;  %v1954_v60 = vrot.slane %v7131_v59, %v7306_v14  ;;  %v1844_v63 = vadd.s32 4294967184, %v7272_v10  ;;  %v1950_v29 = vsel %vm1765_vm1, %v1949_v28, %v1945_v38  ;;  %v1959_v42 = vrot.slane %v7141_v26, %v7312_v35 }
 0x2ec   : > { %10119 = vst [vmem:[#allocation129_spill] sm:$0xff] %v7387_v49  ;;  %10120 = vst [vmem:[#allocation130_spill] sm:$0xff] %v7389_v37  ;;  %v1827_v39 = vrot.slane %v7020_v15, %v7392_v51  ;;  %v1815_v22 = vsel %vm9844_vm8, %v1813_v52, %v1808_v50  ;;  %v1905_v54 = vrot.slane %v7086_v2, %v7367_v46  ;;  %v10132_v2 = vld [vmem:[#allocation40_spill] sm:$0xff] }
 0x2ed   : > { %v1896_v36 = vsel %vm1800_vm6, %v1895_v31, %v1891_v43  ;;  %v1822_v23 = vsel %vm9845_vm9, %v1820_v32, %v1815_v22  ;;  %v1834_v10 = vrot.slane %v7030_v34, %v7402_v12  ;;  %v1910_v38 = vrot.slane %v7096_v25, %v7371_v11 }
 0x2ee   : > { %v1901_v28 = vsel %vm1807_vm7, %v1900_v61, %v1896_v36  ;;  %v1964_v52 = vrot.slane %v7139_v30, %v7321_v9  ;;  %v1955_v50 = vsel %vm1772_vm2, %v1954_v60, %v1950_v29  ;;  %v2102_v32 = vrot.slane %v7187_v24, %v7280_v62 }
 0x2ef   : > { %v7418_v5 = vpop.xlane.xlu1 %1561  ;;  %v7420_v6 = vpop.xlane.xlu0 %1559  ;;  %v2098_v31 = vrot.slane %v7189_v20, %v7289_v55  ;;  %v7454_v61 = vsub.s32 %v1851_v40, %v6768_v21  ;;  %v1960_v43 = vsel %vm1779_vm3, %v1959_v42, %v1955_v50  ;;  %v1969_v22 = vrot.slane %v7149_v57, %v7334_v3 }
 0x2f0   : > { %10122 = vst [vmem:[#allocation132_spill] sm:$0xff] %v7418_v5  ;;  %10123 = vst [vmem:[#allocation133_spill] sm:$0xff] %v7420_v6  ;;  %v2107_v36 = vrot.slane %v7197_v19, %v7295_v45  ;;  %v1829_v30 = vsel %vm1828_vm10, %v1827_v39, %v1822_v23  ;;  %v7463_v60 = vsub.s32 %v1844_v63, %v6768_v21 }
 0x2f1   : > { %10126 = vst [vmem:[#allocation136_spill] sm:$0xff] %v7454_v61  ;;  %v1915_v29 = vrot.slane %v7094_v58, %v7392_v51  ;;  %v1906_v24 = vsel %vm9844_vm8, %v1905_v54, %v1901_v28  ;;  %v1841_v40 = vrot.slane %v7028_v33, %v7399_v1  ;;  %v1836_v42 = vsel %vm9847_vm11, %v1834_v10, %v1829_v30 }
 0x2f2   : > { %v1911_v50 = vsel %vm9845_vm9, %v1910_v38, %v1906_v24  ;;  %v1920_v19 = vrot.slane %v7104_v48, %v7402_v12  ;;  %v1974_v63 = vrot.slane %v7147_v56, %v7345_v0  ;;  %v1965_v23 = vsel %vm1786_vm4, %v1964_v52, %v1960_v43 }
 0x2f3   : > { %v7442_v59 = vpop.xlane.xlu1 %1565  ;;  %v7444_v26 = vpop.xlane.xlu0 %1563  ;;  %v2103_v54 = vsel %vm1758_vm0, %v2102_v32, %v2098_v31  ;;  %v2112_v28 = vrot.slane %v7195_v44, %v7306_v14  ;;  %v1970_v30 = vsel %vm1793_vm5, %v1969_v22, %v1965_v23  ;;  %v1979_v24 = vrot.slane %v7157_v41, %v7351_v13 }
 0x2f4   : > { %10124 = vst [vmem:[#allocation134_spill] sm:$0xff] %v7442_v59  ;;  %10125 = vst [vmem:[#allocation135_spill] sm:$0xff] %v7444_v26  ;;  %v2108_v10 = vsel %vm1765_vm1, %v2107_v36, %v2103_v54  ;;  %v2117_v38 = vrot.slane %v7205_v18, %v7312_v35  ;;  %v1925_v52 = vrot.slane %v7102_v47, %v7399_v1  ;;  %v10131_v47 = vld [vmem:[#allocation77_spill] sm:$0xff] }
 0x2f5   : > { %v1916_v32 = vsel %vm1828_vm10, %v1915_v29, %v1911_v50  ;;  %v1843_v31 = vsel %vm1842_vm12, %v1841_v40, %v1836_v42  ;;  %v1848_v43 = vrot.slane %v7038_v53, %v7463_v60  ;;  %v1930_v36 = vrot.slane %v7112_v8, %v7463_v60  ;;  %v10129_v29 = vld [vmem:[#allocation74_spill] sm:$0xff] }
 0x2f6   : > { %v1921_v22 = vsel %vm9847_vm11, %v1920_v19, %v1916_v32  ;;  %v1984_v44 = vrot.slane %v7155_v27, %v7367_v46  ;;  %v1975_v18 = vsel %vm1800_vm6, %v1974_v63, %v1970_v30  ;;  %v2122_v40 = vrot.slane %v10129_v29, %v7321_v9  ;;  %v10130_v19 = vld [vmem:[#allocation65_spill] sm:$0xff]  ;;  %v10133_v30 = vld [vmem:[#allocation86_spill] sm:$0xff] }
 0x2f7   : > { %v7474_v20 = vpop.xlane.xlu1 %1569  ;;  %v7476_v39 = vpop.xlane.xlu0 %1567  ;;  %v2113_v42 = vsel %vm1772_vm2, %v2112_v28, %v2108_v10  ;;  %v1980_v50 = vsel %vm1807_vm7, %v1979_v24, %v1975_v18  ;;  %v1989_v32 = vrot.slane %v10130_v19, %v7371_v11  ;;  %v2127_v58 = vrot.slane %v10131_v47, %v7334_v3  ;;  %v10134_v28 = vld [vmem:[#allocation87_spill] sm:$0xff]  ;;  %v10135_v24 = vld [vmem:[#allocation52_spill] sm:$0xff] }
 0x2f8   : > { %10127 = vst [vmem:[#allocation137_spill] sm:$0xff] %v7474_v20  ;;  %v2118_v56 = vsel %vm1779_vm3, %v2117_v38, %v2113_v42  ;;  %v1855_v27 = vrot.slane %v10132_v2, %v7454_v61  ;;  %v1926_v63 = vsel %vm1842_vm12, %v1925_v52, %v1921_v22  ;;  %v2023_v29 = vrot.slane %v10133_v30, %v7280_v62  ;;  %v10136_v42 = vld [vmem:[#allocation89_spill] sm:$0xff]  ;;  %v10138_v52 = vld [vmem:[#allocation64_spill] sm:$0xff]  ;;  %v10141_v2 = vld [vmem:[#allocation79_spill] sm:$0xff] }
 0x2f9   : > { %v2019_v10 = vrot.slane %v10134_v28, %v7289_v55  ;;  %v1850_v18 = vsel %vm1849_vm13, %v1848_v43, %v1843_v31  ;;  %v1935_v19 = vrot.slane %v10135_v24, %v7454_v61  ;;  %v1931_v38 = vsel %vm1849_vm13, %v1930_v36, %v1926_v63  ;;  %v10139_v28 = vld [vmem:[#allocation76_spill] sm:$0xff]  ;;  %v10140_v36 = vld [vmem:[#allocation67_spill] sm:$0xff] }
 0x2fa   : > { %v2028_v47 = vrot.slane %v10136_v42, %v7295_v45  ;;  %v1994_v22 = vrot.slane %v10138_v52, %v7392_v51  ;;  %v1985_v30 = vsel %vm9844_vm8, %v1984_v44, %v1980_v50  ;;  %v2132_v31 = vrot.slane %v10139_v28, %v7345_v0  ;;  %v10142_v52 = vld [vmem:[#allocation88_spill] sm:$0xff] }
 0x2fb   : > { %v7499_v23 = vpop.xlane.xlu1 %1573  ;;  %v7501_v54 = vpop.xlane.xlu0 %1571  ;;  %v2123_v43 = vsel %vm1786_vm4, %v2122_v40, %v2118_v56  ;;  %v1990_v24 = vsel %vm9845_vm9, %v1989_v32, %v1985_v30  ;;  %v1999_v63 = vrot.slane %v10140_v36, %v7402_v12  ;;  %v2137_v8 = vrot.slane %v10141_v2, %v7351_v13  ;;  %v10143_v40 = vld [vmem:[#allocation91_spill] sm:$0xff]  ;;  %v10148_v36 = vld [vmem:[#allocation90_spill] sm:$0xff] }
 0x2fc   : > { %10128 = vst [vmem:[#allocation138_spill] sm:$0xff] %v7499_v23  ;;  %v2128_v42 = vsel %vm1793_vm5, %v2127_v58, %v2123_v43  ;;  %v2024_v33 = vsel %vm1758_vm0, %v2023_v29, %v2019_v10  ;;  %v2033_v44 = vrot.slane %v10142_v52, %v7306_v14  ;;  %v1857_v50 = vsel %vm1856_vm14, %v1855_v27, %v1850_v18  ;;  %v10145_v29 = vld [vmem:[#allocation78_spill] sm:$0xff]  ;;  %v10147_v52 = vld [vmem:[#allocation81_spill] sm:$0xff] }
 0x2fd   : > { %v2029_v56 = vsel %vm1765_vm1, %v2028_v47, %v2024_v33  ;;  %v2038_v32 = vrot.slane %v10143_v40, %v7312_v35  ;;  %v1936_v58 = vsel %vm1856_vm14, %v1935_v19, %v1931_v38  ;;  %v1995_v43 = vsel %vm1828_vm10, %v1994_v22, %v1990_v24  ;;  %v10146_v27 = vld [vmem:[#allocation66_spill] sm:$0xff] }
 0x2fe   : > { %v2142_v10 = vrot.slane %v10145_v29, %v7367_v46  ;;  %v2133_v2 = vsel %vm1800_vm6, %v2132_v31, %v2128_v42  ;;  %v2004_v18 = vrot.slane %v10146_v27, %v7399_v1  ;;  %v2000_v33 = vsel %vm9847_vm11, %v1999_v63, %v1995_v43  ;;  %v10149_v38 = vld [vmem:[#allocation102_spill] sm:$0xff]  ;;  %v10150_v42 = vld [vmem:[#allocation103_spill] sm:$0xff]  ;;  %v10152_v43 = vld [vmem:[#allocation105_spill] sm:$0xff] }
 0x2ff   : > { %v7528_v41 = vpop.xlane.xlu1 %1577  ;;  %v7530_v57 = vpop.xlane.xlu0 %1575  ;;  %v2138_v47 = vsel %vm1807_vm7, %v2137_v8, %v2133_v2  ;;  %v2147_v40 = vrot.slane %v10147_v52, %v7371_v11  ;;  %v2043_v19 = vrot.slane %v10148_v36, %v7321_v9  ;;  %v2034_v24 = vsel %vm1772_vm2, %v2033_v44, %v2029_v56  ;;  %v10151_v2 = vld [vmem:[#allocation93_spill] sm:$0xff] }
 0x300   : > { %10137 = vst [vmem:[#allocation139_spill] sm:$0xff] %v7528_v41  ;;  %v2181_v22 = vrot.slane %v10149_v38, %v7280_v62  ;;  %v2177_v31 = vrot.slane %v10150_v42, %v7289_v55  ;;  %v7574_v29 = vsel %vm9823_vm15, %v1936_v58, %v1857_v50  ;;  %v2039_v63 = vsel %vm1779_vm3, %v2038_v32, %v2034_v24  ;;  %v10153_v56 = vld [vmem:[#allocation69_spill] sm:$0xff]  ;;  %v10154_v24 = vld [vmem:[#allocation80_spill] sm:$0xff] }
 0x301   : > { %v2048_v8 = vrot.slane %v10151_v2, %v7334_v3  ;;  %v2186_v52 = vrot.slane %v10152_v43, %v7295_v45  ;;  %v2009_v38 = vrot.slane %v10153_v56, %v7463_v60  ;;  %v2143_v42 = vsel %vm9844_vm8, %v2142_v10, %v2138_v47  ;;  %v10155_v56 = vld [vmem:[#allocation92_spill] sm:$0xff] }
 0x302   : > { %v2260_v50 = vrot.slane %v7387_v49, %v7280_v62  ;;  %v2256_v32 = vrot.slane %v7389_v37, %v7289_v55  ;;  %v2005_v58 = vsel %vm1842_vm12, %v2004_v18, %v2000_v33  ;;  %v2152_v43 = vrot.slane %v10154_v24, %v7392_v51  ;;  %v10156_v49 = vld [vmem:[#allocation104_spill] sm:$0xff]  ;;  %v10157_v33 = vld [vmem:[#allocation95_spill] sm:$0xff] }
 0x303   : > { %v7551_v30 = vpop.xlane.xlu1 %1581  ;;  %v7553_v28 = vpop.xlane.xlu0 %1579  ;;  %v2148_v27 = vsel %vm9845_vm9, %v2147_v40, %v2143_v42  ;;  %v2265_v2 = vrot.slane %v7420_v6, %v7295_v45  ;;  %v2053_v48 = vrot.slane %v10155_v56, %v7345_v0  ;;  %v2044_v10 = vsel %vm1786_vm4, %v2043_v19, %v2039_v63  ;;  %v10158_v42 = vld [vmem:[#allocation107_spill] sm:$0xff]  ;;  %v10161_v19 = vld [vmem:[#allocation68_spill] sm:$0xff] }
 0x304   : > { %10144 = vst [vmem:[#allocation140_spill] sm:$0xff] %v7551_v30  ;;  %v2182_v47 = vsel %vm1758_vm0, %v2181_v22, %v2177_v31  ;;  %v2191_v37 = vrot.slane %v10156_v49, %v7306_v14  ;;  %v2049_v18 = vsel %vm1793_vm5, %v2048_v8, %v2044_v10  ;;  %v2058_v24 = vrot.slane %v10157_v33, %v7351_v13 }
 0x305   : > { %v2187_v40 = vsel %vm1765_vm1, %v2186_v52, %v2182_v47  ;;  %v2196_v6 = vrot.slane %v10158_v42, %v7312_v35  ;;  %v7617_v31 = vsel %vm1849_vm13, %v2009_v38, %v2005_v58  ;;  %v2261_v63 = vsel %vm1758_vm0, %v2260_v50, %v2256_v32  ;;  %v10162_v50 = vld [vmem:[#allocation106_spill] sm:$0xff] }
 0x306   : > { %v2270_v8 = vrot.slane %v7418_v5, %v7306_v14  ;;  %v2266_v52 = vsel %vm1765_vm1, %v2265_v2, %v2261_v63  ;;  %v2275_v10 = vrot.slane %v7444_v26, %v7312_v35  ;;  %v2153_v22 = vsel %vm1828_vm10, %v2152_v43, %v2148_v27  ;;  %v10163_v2 = vld [vmem:[#allocation94_spill] sm:$0xff] }
 0x307   : > { %v7581_v36 = vpop.xlane.xlu1 %1585  ;;  %v7583_v44 = vpop.xlane.xlu0 %1583  ;;  %v2054_v38 = vsel %vm1800_vm6, %v2053_v48, %v2049_v18  ;;  %v2201_v32 = vrot.slane %v10162_v50, %v7321_v9  ;;  %v2192_v58 = vsel %vm1772_vm2, %v2191_v37, %v2187_v40  ;;  %v2063_v63 = vrot.slane %v10163_v2, %v7367_v46  ;;  %v10167_v48 = vld [vmem:[#allocation97_spill] sm:$0xff] }
 0x308   : > { %v2059_v5 = vsel %vm1807_vm7, %v2058_v24, %v2054_v38  ;;  %v2197_v26 = vsel %vm1779_vm3, %v2196_v6, %v2192_v58  ;;  %v2068_v43 = vrot.slane %v10167_v48, %v7371_v11  ;;  %v2280_v37 = vrot.slane %v7442_v59, %v7321_v9  ;;  %v10169_v59 = vld [vmem:[#allocation109_spill] sm:$0xff] }
 0x309   : > { %v2271_v18 = vsel %vm1772_vm2, %v2270_v8, %v2266_v52  ;;  %v2285_v40 = vrot.slane %v7476_v39, %v7334_v3  ;;  %v2202_v8 = vsel %vm1786_vm4, %v2201_v32, %v2197_v26  ;;  %v2290_v26 = vrot.slane %v7474_v20, %v7345_v0 }
 0x30a   : > { %v2276_v6 = vsel %vm1779_vm3, %v2275_v10, %v2271_v18  ;;  %v10170_v10 = vld [vmem:[#allocation96_spill] sm:$0xff]  ;;  %vm9846_vm15 = vcmask 1042434  }
 0x30b   : > { %v7610_v15 = vpop.xlane.xlu1 %1589  ;;  %v7612_v56 = vpop.xlane.xlu0 %1587  ;;  %v2073_v18 = vrot.slane %v10170_v10, %v7392_v51  ;;  %v2281_v32 = vsel %vm1786_vm4, %v2280_v37, %v2276_v6 }
 0x30c   : > { %10159 = vst [vmem:[#allocation95_spill] sm:$0xff] %v7610_v15  ;;  %10160 = vst [vmem:[#allocation107_spill] sm:$0xff] %v7612_v56  ;;  %v2339_v47 = vrot.slane %v7610_v15, %v7280_v62  ;;  %v2335_v49 = vrot.slane %v7612_v56, %v7289_v55  ;;  %v10164_v62 = vld [vmem:[#allocation110_spill] sm:$0xff]  ;;  %v10168_v56 = vld [vmem:[#allocation83_spill] sm:$0xff] }
 0x30d   : > { %v2206_v15 = vrot.slane %v10164_v62, %v7334_v3  ;;  %v2157_v50 = vrot.slane %v10168_v56, %v7402_v12  ;;  %v2211_v62 = vrot.slane %v10169_v59, %v7345_v0 }
 0x30e   : > { %v2340_v38 = vsel %vm1758_vm0, %v2339_v47, %v2335_v49  ;;  %v10171_v47 = vld [vmem:[#allocation114_spill] sm:$0xff] }
 0x30f   : > { %v7640_v55 = vpop.xlane.xlu1 %1593  ;;  %v7642_v27 = vpop.xlane.xlu0 %1591  ;;  %v2207_v49 = vsel %vm1793_vm5, %v2206_v15, %v2202_v8  ;;  %v2295_v15 = vrot.slane %v7501_v54, %v7351_v13  ;;  %v10175_v8 = vld [vmem:[#allocation113_spill] sm:$0xff] }
 0x310   : > { %10165 = vst [vmem:[#allocation68_spill] sm:$0xff] %v7640_v55  ;;  %10166 = vst [vmem:[#allocation94_spill] sm:$0xff] %v7642_v27  ;;  %v2344_v24 = vrot.slane %v7642_v27, %v7295_v45  ;;  %v2349_v58 = vrot.slane %v7640_v55, %v7306_v14  ;;  %v2064_v45 = vsel %vm9844_vm8, %v2063_v63, %v2059_v5 }
 0x311   : > { %v2216_v14 = vrot.slane %v10171_v47, %v7351_v13  ;;  %v2069_v59 = vsel %vm9845_vm9, %v2068_v43, %v2064_v45  ;;  %v2286_v5 = vsel %vm1793_vm5, %v2285_v40, %v2281_v32  ;;  %v10174_v45 = vld [vmem:[#allocation82_spill] sm:$0xff]  ;;  %v2221_v20 = vrot.slane %v10175_v8, %v7367_v46  ;;  %v10176_v32 = vld [vmem:[#allocation99_spill] sm:$0xff] }
 0x312   : > { %v2345_v52 = vsel %vm1765_vm1, %v2344_v24, %v2340_v38  ;;  %v2162_v43 = vrot.slane %v10174_v45, %v7399_v1  ;;  %v2212_v37 = vsel %vm1800_vm6, %v2211_v62, %v2207_v49  ;;  %v2158_v40 = vsel %vm9847_vm11, %v2157_v50, %v2153_v22 }
 0x313   : > { %v7669_v55 = vpop.xlane.xlu1 %1597  ;;  %v7671_v27 = vpop.xlane.xlu0 %1595  ;;  %v2350_v38 = vsel %vm1772_vm2, %v2349_v58, %v2345_v52  ;;  %v2074_v8 = vsel %vm1828_vm10, %v2073_v18, %v2069_v59  ;;  %v2300_v62 = vrot.slane %v7499_v23, %v7367_v46  ;;  %v2291_v49 = vsel %vm1800_vm6, %v2290_v26, %v2286_v5  ;;  %v10180_v59 = vld [vmem:[#allocation98_spill] sm:$0xff] }
 0x314   : > { %10172 = vst [vmem:[#allocation97_spill] sm:$0xff] %v7669_v55  ;;  %10173 = vst [vmem:[#allocation83_spill] sm:$0xff] %v7671_v27  ;;  %v2354_v24 = vrot.slane %v7671_v27, %v7312_v35  ;;  %v2359_v63 = vrot.slane %v7669_v55, %v7321_v9  ;;  %v2078_v35 = vrot.slane %v10176_v32, %v7402_v12  ;;  %v10177_v9 = vld [vmem:[#allocation118_spill] sm:$0xff] }
 0x315   : > { %v2217_v27 = vsel %vm1807_vm7, %v2216_v14, %v2212_v37  ;;  %v2226_v58 = vrot.slane %v10177_v9, %v7371_v11  ;;  %v2296_v50 = vsel %vm1807_vm7, %v2295_v15, %v2291_v49  ;;  %v2305_v14 = vrot.slane %v7530_v57, %v7371_v11  ;;  %v10181_v37 = vld [vmem:[#allocation117_spill] sm:$0xff] }
 0x316   : > { %v2355_v6 = vsel %vm1779_vm3, %v2354_v24, %v2350_v38  ;;  %v2083_v18 = vrot.slane %v10180_v59, %v7399_v1  ;;  %v2231_v26 = vrot.slane %v10181_v37, %v7392_v51  ;;  %v2222_v5 = vsel %vm9844_vm8, %v2221_v20, %v2217_v27  ;;  %v10182_v49 = vld [vmem:[#allocation101_spill] sm:$0xff] }
 0x317   : > { %v7697_v52 = vpop.xlane.xlu1 %1601  ;;  %v7699_v55 = vpop.xlane.xlu0 %1599  ;;  %v2360_v38 = vsel %vm1786_vm4, %v2359_v63, %v2355_v6  ;;  %v2079_v15 = vsel %vm9847_vm11, %v2078_v35, %v2074_v8  ;;  %v2088_v23 = vrot.slane %v10182_v49, %v7463_v60  ;;  %v10183_v63 = vld [vmem:[#allocation122_spill] sm:$0xff]  ;;  %v2163_v37 = vsel %vm1842_vm12, %v2162_v43, %v2158_v40  ;;  %v10186_v43 = vld [vmem:[#allocation85_spill] sm:$0xff] }
 0x318   : > { %10178 = vst [vmem:[#allocation96_spill] sm:$0xff] %v7697_v52  ;;  %10179 = vst [vmem:[#allocation114_spill] sm:$0xff] %v7699_v55  ;;  %v2364_v22 = vrot.slane %v7699_v55, %v7334_v3  ;;  %v2369_v24 = vrot.slane %v7697_v52, %v7345_v0  ;;  %v2227_v0 = vsel %vm9845_vm9, %v2226_v58, %v2222_v5 }
 0x319   : > { %v2236_v6 = vrot.slane %v10183_v63, %v7402_v12  ;;  %v2310_v20 = vrot.slane %v7528_v41, %v7392_v51  ;;  %v2301_v27 = vsel %vm9844_vm8, %v2300_v62, %v2296_v50  ;;  %v2315_v58 = vrot.slane %v7553_v28, %v7402_v12  ;;  %v10188_v41 = vld [vmem:[#allocation121_spill] sm:$0xff] }
 0x31a   : > { %v2365_v3 = vsel %vm1793_vm5, %v2364_v22, %v2360_v38  ;;  %v2306_v8 = vsel %vm9845_vm9, %v2305_v14, %v2301_v27  ;;  %v2167_v40 = vrot.slane %v10186_v43, %v7463_v60  ;;  %v2084_v5 = vsel %vm1842_vm12, %v2083_v18, %v2079_v15  ;;  %v10190_v18 = vld [vmem:[#allocation126_spill] sm:$0xff] }
 0x31b   : > { %v7725_v52 = vpop.xlane.xlu1 %1605  ;;  %v7727_v55 = vpop.xlane.xlu0 %1603  ;;  %v2370_v38 = vsel %vm1800_vm6, %v2369_v24, %v2365_v3  ;;  %v2232_v62 = vsel %vm1828_vm10, %v2231_v26, %v2227_v0  ;;  %v2089_v27 = vsel %vm1849_vm13, %v2088_v23, %v2084_v5  ;;  %v2246_v15 = vrot.slane %v10190_v18, %v7463_v60 }
 0x31c   : > { %10184 = vst [vmem:[#allocation82_spill] sm:$0xff] %v7725_v52  ;;  %10185 = vst [vmem:[#allocation99_spill] sm:$0xff] %v7727_v55  ;;  %v2374_v35 = vrot.slane %v7727_v55, %v7351_v13  ;;  %v2379_v22 = vrot.slane %v7725_v52, %v7367_v46  ;;  %v10187_v13 = vld [vmem:[#allocation100_spill] sm:$0xff]  ;;  %v2241_v55 = vrot.slane %v10188_v41, %v7399_v1 }
 0x31d   : > { %v2093_v14 = vrot.slane %v10187_v13, %v7454_v61  ;;  %v2237_v46 = vsel %vm9847_vm11, %v2236_v6, %v2232_v62  ;;  %v2320_v0 = vrot.slane %v7551_v30, %v7399_v1  ;;  %v2311_v26 = vsel %vm1828_vm10, %v2310_v20, %v2306_v8  ;;  %v10192_v20 = vld [vmem:[#allocation84_spill] sm:$0xff]  ;;  %v10193_v30 = vld [vmem:[#allocation125_spill] sm:$0xff] }
 0x31e   : > { %v2375_v50 = vsel %vm1807_vm7, %v2374_v35, %v2370_v38  ;;  %v2316_v35 = vsel %vm9847_vm11, %v2315_v58, %v2311_v26  ;;  %v2325_v6 = vrot.slane %v7583_v44, %v7463_v60  ;;  %v10191_v62 = vrot.slane %v10161_v19, %v7454_v61 }
 0x31f   : > { %v7752_v3 = vpop.xlane.xlu1 %1609  ;;  %v7754_v24 = vpop.xlane.xlu0 %1607  ;;  %v2380_v5 = vsel %vm9844_vm8, %v2379_v22, %v2375_v50  ;;  %v2172_v8 = vrot.slane %v10192_v20, %v7454_v61  ;;  %v2094_v26 = vsel %vm1856_vm14, %v2093_v14, %v2089_v27  ;;  %v2242_v22 = vsel %vm1842_vm12, %v2241_v55, %v2237_v46 }
 0x320   : > { %10189 = vst [vmem:[#allocation118_spill] sm:$0xff] %v7752_v3  ;;  %v2384_v23 = vrot.slane %v7754_v24, %v7371_v11  ;;  %v2389_v38 = vrot.slane %v7752_v3, %v7392_v51  ;;  %v2015_v52 = vsel %vm1856_vm14, %v10191_v62, %v7617_v31  ;;  %v2168_v11 = vsel %vm1849_vm13, %v2167_v40, %v2163_v37 }
 0x321   : > { %v2251_v51 = vrot.slane %v10193_v30, %v7454_v61  ;;  %vm9848_vm8 = vcmask 1043459   ;;  %v2247_v31 = vsel %vm1849_vm13, %v2246_v15, %v2242_v22  ;;  %v2330_v62 = vrot.slane %v7581_v36, %v7454_v61 }
 0x322   : > { %v2385_v58 = vsel %vm9845_vm9, %v2384_v23, %v2380_v5  ;;  %v2321_v37 = vsel %vm1842_vm12, %v2320_v0, %v2316_v35  ;;  %v2414_v14 = vsel %vm9846_vm15, %v2015_v52, %v7574_v29  ;;  %vm2417_vm9 = vcmask 1044484  }
 0x323   : > { %v7782_v50 = vpop.xlane.xlu1 %1613  ;;  %v7784_v3 = vpop.xlane.xlu0 %1611  ;;  %v2326_v55 = vsel %vm1849_vm13, %v2325_v6, %v2321_v37  ;;  %v2390_v27 = vsel %vm1828_vm10, %v2389_v38, %v2385_v58  ;;  %v2416_v23 = vsel %vm9848_vm8, %v2094_v26, %v2414_v14  ;;  %v2173_v0 = vsel %vm1856_vm14, %v2172_v8, %v2168_v11  ;;  %v10195_v14 = vld [vmem:[#allocation32_spill] sm:$0xff] }
 0x324   : > { %v2394_v40 = vrot.slane %v7784_v3, %v7402_v12  ;;  %v2399_v46 = vrot.slane %v7782_v50, %v7399_v1  ;;  %v2252_v29 = vsel %vm1856_vm14, %v2251_v51, %v2247_v31  ;;  %vm9999_vm15 = vcmask 1045509  }
 0x325   : > { %v2331_v38 = vsel %vm1856_vm14, %v2330_v62, %v2326_v55  ;;  %v2418_v11 = vsel %vm2417_vm9, %v2173_v0, %v2416_v23  ;;  %vm9997_vm8 = vcmask 1047559   ;;  %v10194_v62 = vld [vmem:[#allocation27_spill] sm:$0xff]  ;;  %v10197_v23 = vld [vmem:[#allocation29_spill] sm:$0xff] }
 0x326   : > { %v2395_v15 = vsel %vm9847_vm11, %v2394_v40, %v2390_v27  ;;  %vm9998_vm11 = vcmask 1046534   ;;  %v2420_v26 = vsel %vm9999_vm15, %v2252_v29, %v2418_v11  ;;  %v10198_v11 = vld [vmem:[#allocation31_spill] sm:$0xff] }
 0x327   : > { %v7801_v35 = vpop.xlane.xlu1 %1617  ;;  %v7803_v5 = vpop.xlane.xlu0 %1615  ;;  %v2400_v58 = vsel %vm1842_vm12, %v2399_v46, %v2395_v15  ;;  %v2422_v22 = vsel %vm9998_vm11, %v2331_v38, %v2420_v26  ;;  %v10196_v46 = vld [vmem:[#allocation30_spill] sm:$0xff]  ;;  %v7837_v26 = vsub.s32 1, %v6768_v21  ;;  %vm10487_vm11 = vcmask 654912  }
 0x328   : > { %v2409_v52 = vrot.slane %v7801_v35, %v7454_v61  ;;  %v2404_v6 = vrot.slane %v7803_v5, %v7463_v60 }
 0x329   : > { %10199 = vst [vmem:[#allocation98_spill] sm:$0xff] %v7837_v26 }
 0x32a   : > { %v2405_v8 = vsel %vm1849_vm13, %v2404_v6, %v2400_v58 }
 0x32b   : > { %v2410_v51 = vsel %vm1856_vm14, %v2409_v52, %v2405_v8 }
 0x32c   : > { %v2424_v31 = vsel %vm9997_vm8, %v2410_v51, %v2422_v22  ;;  %vm10483_vm8 = vcmask 654912  }
 0x32d   : > { %2426 = vmax.xlane.f32.xlu0 %v2424_v31 }
 0x3ba   : > { %v7818_v37 = vpop.xlane.xlu0 %2426 }
 0x3bb   : > { %v7822_v40 = vrot.slane %v7818_v37, %v10194_v62 }
 0x3bd   : > { %v2470_v55 = vsub.f32 %v10195_v14, %v7822_v40  ;;  %v2469_v27 = vsub.f32 %v10196_v46, %v7822_v40  ;;  %v2479_v15 = vsub.f32 %v7022_v16, %v7822_v40  ;;  %v2471_v0 = vsub.f32 %v10197_v23, %v7822_v40  ;;  %v10201_v46 = vld [vmem:[#allocation42_spill] sm:$0xff]  ;;  %v10202_v23 = vld [vmem:[#allocation33_spill] sm:$0xff] }
 0x3be   : > { %v2481_v38 = vsub.f32 %v7030_v34, %v7822_v40  ;;  %v2472_v8 = vsub.f32 %v10198_v11, %v7822_v40  ;;  %v7841_v16 = vrot.slane %v7818_v37, %v7837_v26  ;;  %v2483_v22 = vsub.f32 %v7038_v53, %v7822_v40  ;;  %v10200_v34 = vld [vmem:[#allocation34_spill] sm:$0xff]  ;;  %v10206_v11 = vld [vmem:[#allocation36_spill] sm:$0xff] }
 0x3bf   : > { %v2599_v29 = vmul.f32 1.442695, %v2470_v55  ;;  %v2597_v52 = vmul.f32 1.442695, %v2469_v27  ;;  %v2617_v6 = vmul.f32 1.442695, %v2479_v15  ;;  %v2473_v14 = vsub.f32 %v10200_v34, %v7822_v40 }
 0x3c0   : > { %v2601_v58 = vmul.f32 1.442695, %v2471_v0  ;;  %v2621_v51 = vmul.f32 1.442695, %v2481_v38  ;;  %v2603_v31 = vmul.f32 1.442695, %v2472_v8  ;;  %v2485_v27 = vsub.f32 %v10201_v46, %v7841_v16 }
 0x3c1   : > { %6015 = vpow2.f32 %v2599_v29  ;;  %v2625_v55 = vmul.f32 1.442695, %v2483_v22  ;;  %v2605_v15 = vmul.f32 1.442695, %v2473_v14  ;;  %v2474_v0 = vsub.f32 %v10202_v23, %v7822_v40  ;;  %v10209_v34 = vld [vmem:[#allocation46_spill] sm:$0xff]  ;;  %v10210_v46 = vld [vmem:[#allocation35_spill] sm:$0xff] }
 0x3c2   : > { %6017 = vpow2.f32 %v2597_v52  ;;  %v2629_v53 = vmul.f32 1.442695, %v2485_v27  ;;  %v2475_v8 = vsub.f32 %v10206_v11, %v7822_v40  ;;  %v2489_v14 = vsub.f32 %v10209_v34, %v7841_v16  ;;  %v10215_v34 = vld [vmem:[#allocation37_spill] sm:$0xff] }
 0x3c3   : > { %6019 = vpow2.f32 %v2617_v6  ;;  %v10205_v6 = vld [vmem:[#allocation44_spill] sm:$0xff]  ;;  %v2476_v27 = vsub.f32 %v10210_v46, %v7822_v40 }
 0x3c4   : > { %6021 = vpow2.f32 %v2601_v58  ;;  %v2487_v38 = vsub.f32 %v10205_v6, %v7841_v16  ;;  %v2607_v58 = vmul.f32 1.442695, %v2474_v0  ;;  %v2637_v0 = vmul.f32 1.442695, %v2489_v14 }
 0x3c5   : > { %6023 = vpow2.f32 %v2621_v51  ;;  %v2611_v6 = vmul.f32 1.442695, %v2476_v27  ;;  %v2478_v14 = vsub.f32 %v10215_v34, %v7822_v40  ;;  %v2495_v27 = vsub.f32 %v7096_v25, %v7841_v16  ;;  %v10222_v25 = vld [vmem:[#allocation51_spill] sm:$0xff] }
 0x3c6   : > { %6025 = vpow2.f32 %v2603_v31  ;;  %v2633_v31 = vmul.f32 1.442695, %v2487_v38  ;;  %v2477_v38 = vsub.f32 %v7014_v7, %v7822_v40  ;;  %v7907_v34 = vsub.s32 2, %v6768_v21 }
 0x3c7   : > { %6027 = vpow2.f32 %v2625_v55  ;;  %v2609_v55 = vmul.f32 1.442695, %v2475_v8 }
 0x3c8   : > { %6029 = vpow2.f32 %v2605_v15  ;;  %10221 = vst [vmem:[#allocation34_spill] sm:$0xff] %v7907_v34 }
 0x3c9   : > { %6031 = vpow2.f32 %v2629_v53  ;;  %v2491_v53 = vsub.f32 %v7075_v17, %v7841_v16  ;;  %v2613_v17 = vmul.f32 1.442695, %v2477_v38 }
 0x3ca   : > { %6033 = vpow2.f32 %v2607_v58 }
 0x3cb   : > { %v7851_v29 = vpop.eup %6015  ;;  %6035 = vpow2.f32 %v2633_v31  ;;  %v2641_v8 = vmul.f32 1.442695, %v2491_v53  ;;  %v2493_v31 = vsub.f32 %v7088_v4, %v7841_v16  ;;  %v2615_v4 = vmul.f32 1.442695, %v2478_v14  ;;  %v10223_v14 = vld [vmem:[#allocation39_spill] sm:$0xff] }
 0x3cc   : > { %10203 = vst [vmem:[#allocation101_spill] sm:$0xff] %v7851_v29  ;;  %v7853_v52 = vpop.eup %6017  ;;  %2985 = vperm.xlu0 %5894, %v7851_v29   ;;  %6037 = vpow2.f32 %v2609_v55 }
 0x3cd   : > { %10204 = vst [vmem:[#allocation122_spill] sm:$0xff] %v7853_v52  ;;  %2982 = vperm.xlu1 %5893, %v7853_v52   ;;  %v7861_v51 = vpop.eup %6019  ;;  %6039 = vpow2.f32 %v2637_v0  ;;  %v2645_v46 = vmul.f32 1.442695, %v2493_v31  ;;  %v10218_v0 = vld [vmem:[#allocation38_spill] sm:$0xff]  ;;  %v2497_v31 = vsub.f32 %v10222_v25, %v7841_v16  ;;  %v10227_v25 = vld [vmem:[#allocation40_spill] sm:$0xff] }
 0x3ce   : > { %10207 = vst [vmem:[#allocation85_spill] sm:$0xff] %v7861_v51  ;;  %v7863_v22 = vpop.eup %6021  ;;  %6041 = vpow2.f32 %v2611_v6  ;;  %v2480_v53 = vsub.f32 %v10218_v0, %v7822_v40  ;;  %v2482_v0 = vsub.f32 %v10223_v14, %v7822_v40  ;;  %v2484_v14 = vsub.f32 %v10227_v25, %v7822_v40 }
 0x3cf   : > { %10208 = vst [vmem:[#allocation100_spill] sm:$0xff] %v7863_v22  ;;  %v7871_v15 = vpop.eup %6023  ;;  %6043 = vpow2.f32 %v2641_v8  ;;  %v2649_v8 = vmul.f32 1.442695, %v2495_v27  ;;  %v10226_v27 = vld [vmem:[#allocation53_spill] sm:$0xff] }
 0x3d0   : > { %3012 = vperm.xlu0 %5894, %v7861_v51   ;;  %10211 = vst [vmem:[#allocation121_spill] sm:$0xff] %v7871_v15  ;;  %v7873_v23 = vpop.eup %6025  ;;  %6045 = vpow2.f32 %v2613_v17  ;;  %v2619_v17 = vmul.f32 1.442695, %v2480_v53  ;;  %v2623_v53 = vmul.f32 1.442695, %v2482_v0 }
 0x3d1   : > { %2988 = vperm.xlu1 %5893, %v7863_v22   ;;  %10212 = vst [vmem:[#allocation126_spill] sm:$0xff] %v7873_v23  ;;  %v7881_v58 = vpop.eup %6027  ;;  %6047 = vpow2.f32 %v2645_v46  ;;  %v2653_v46 = vmul.f32 1.442695, %v2497_v31 }
 0x3d2   : > { %10213 = vst [vmem:[#allocation84_spill] sm:$0xff] %v7881_v58  ;;  %v7883_v11 = vpop.eup %6029  ;;  %6049 = vpow2.f32 %v2615_v4  ;;  %v2499_v4 = vsub.f32 %v10226_v27, %v7841_v16  ;;  %v2627_v27 = vmul.f32 1.442695, %v2484_v14 }
 0x3d3   : > { %10214 = vst [vmem:[#allocation125_spill] sm:$0xff] %v7883_v11  ;;  %v7891_v55 = vpop.eup %6031  ;;  %6051 = vpow2.f32 %v2649_v8  ;;  %v10230_v8 = vld [vmem:[#allocation55_spill] sm:$0xff] }
 0x3d4   : > { %3018 = vperm.xlu0 %5894, %v7871_v15   ;;  %10216 = vst [vmem:[#allocation32_spill] sm:$0xff] %v7891_v55  ;;  %v7893_v7 = vpop.eup %6033  ;;  %6053 = vpow2.f32 %v2619_v17  ;;  %v10231_v17 = vld [vmem:[#allocation41_spill] sm:$0xff] }
 0x3d5   : > { %2991 = vperm.xlu1 %5893, %v7873_v23   ;;  %10217 = vst [vmem:[#allocation30_spill] sm:$0xff] %v7893_v7  ;;  %v7901_v6 = vpop.eup %6035  ;;  %6055 = vpow2.f32 %v2653_v46  ;;  %v2486_v0 = vsub.f32 %v10231_v17, %v7841_v16  ;;  %v10234_v46 = vld [vmem:[#allocation57_spill] sm:$0xff] }
 0x3d6   : > { %10219 = vst [vmem:[#allocation29_spill] sm:$0xff] %v7901_v6  ;;  %v7903_v38 = vpop.eup %6037  ;;  %6057 = vpow2.f32 %v2623_v53  ;;  %v10235_v53 = vld [vmem:[#allocation43_spill] sm:$0xff] }
 0x3d7   : > { %10220 = vst [vmem:[#allocation31_spill] sm:$0xff] %v7903_v38  ;;  %v7914_v15 = vpop.eup %6039  ;;  %v2488_v14 = vsub.f32 %v10235_v53, %v7841_v16 }
 0x3d8   : > { %3024 = vperm.xlu0 %5894, %v7881_v58   ;;  %10224 = vst [vmem:[#allocation42_spill] sm:$0xff] %v7914_v15  ;;  %v7916_v51 = vpop.eup %6041 }
 0x3d9   : > { %2994 = vperm.xlu1 %5893, %v7883_v11   ;;  %10225 = vst [vmem:[#allocation33_spill] sm:$0xff] %v7916_v51 }
 0x3dc   : > { %3030 = vperm.xlu0 %5894, %v7891_v55  }
 0x3dd   : > { %2997 = vperm.xlu1 %5893, %v7893_v7   ;;  %v7921_v7 = vrot.slane %v7818_v37, %v7907_v34  ;;  %v2657_v34 = vmul.f32 1.442695, %v2499_v4 }
 0x3df   : > { %v2501_v31 = vsub.f32 %v10230_v8, %v7921_v7  ;;  %6059 = vpow2.f32 %v2657_v34  ;;  %v2503_v4 = vsub.f32 %v10234_v46, %v7921_v7  ;;  %v2631_v8 = vmul.f32 1.442695, %v2486_v0  ;;  %v10238_v34 = vld [vmem:[#allocation59_spill] sm:$0xff] }
 0x3e0   : > { %3036 = vperm.xlu0 %5894, %v7901_v6   ;;  %6061 = vpow2.f32 %v2627_v27  ;;  %v2635_v46 = vmul.f32 1.442695, %v2488_v14  ;;  %v10239_v27 = vld [vmem:[#allocation45_spill] sm:$0xff] }
 0x3e1   : > { %3000 = vperm.xlu1 %5893, %v7903_v38   ;;  %v7928_v38 = vpop.eup %6043  ;;  %v2661_v25 = vmul.f32 1.442695, %v2501_v31  ;;  %v2505_v31 = vsub.f32 %v10238_v34, %v7921_v7  ;;  %v2490_v0 = vsub.f32 %v10239_v27, %v7841_v16 }
 0x3e2   : > { %10228 = vst [vmem:[#allocation44_spill] sm:$0xff] %v7928_v38  ;;  %v7930_v11 = vpop.eup %6045 }
 0x3e3   : > { %10229 = vst [vmem:[#allocation36_spill] sm:$0xff] %v7930_v11  ;;  %6063 = vpow2.f32 %v2661_v25  ;;  %v10242_v25 = vld [vmem:[#allocation61_spill] sm:$0xff]  ;;  %v2639_v34 = vmul.f32 1.442695, %v2490_v0 }
 0x3e4   : > { %3042 = vperm.xlu0 %5894, %v7914_v15   ;;  %6065 = vpow2.f32 %v2631_v8  ;;  %v10243_v8 = vld [vmem:[#allocation47_spill] sm:$0xff] }
 0x3e5   : > { %3003 = vperm.xlu1 %5893, %v7916_v51   ;;  %v7938_v51 = vpop.eup %6047  ;;  %v2492_v14 = vsub.f32 %v10243_v8, %v7841_v16 }
 0x3e6   : > { %10232 = vst [vmem:[#allocation46_spill] sm:$0xff] %v7938_v51  ;;  %v7940_v40 = vpop.eup %6049 }
 0x3e7   : > { %10233 = vst [vmem:[#allocation35_spill] sm:$0xff] %v7940_v40 }
 0x3e8   : > { %3048 = vperm.xlu0 %5894, %v7928_v38   ;;  %v7948_v38 = vpop.eup %6051 }
 0x3e9   : > { %3006 = vperm.xlu1 %5893, %v7930_v11   ;;  %10236 = vst [vmem:[#allocation37_spill] sm:$0xff] %v7948_v38  ;;  %v7950_v17 = vpop.eup %6053 }
 0x3ea   : > { %10237 = vst [vmem:[#allocation38_spill] sm:$0xff] %v7950_v17 }
 0x3ec   : > { %3054 = vperm.xlu0 %5894, %v7938_v51   ;;  %v7958_v51 = vpop.eup %6055 }
 0x3ed   : > { %3009 = vperm.xlu1 %5893, %v7940_v40   ;;  %v2665_v40 = vmul.f32 1.442695, %v2503_v4  ;;  %10240 = vst [vmem:[#allocation51_spill] sm:$0xff] %v7958_v51  ;;  %v7960_v53 = vpop.eup %6057  ;;  %v2507_v4 = vsub.f32 %v10242_v25, %v7921_v7  ;;  %v2643_v25 = vmul.f32 1.442695, %v2492_v14 }
 0x3ee   : > { %10241 = vst [vmem:[#allocation39_spill] sm:$0xff] %v7960_v53 }
 0x3ef   : > { %6067 = vpow2.f32 %v2665_v40  ;;  %v10246_v40 = vld [vmem:[#allocation63_spill] sm:$0xff] }
 0x3f0   : > { %3060 = vperm.xlu0 %5894, %v7948_v38   ;;  %6069 = vpow2.f32 %v2635_v46  ;;  %v7968_v38 = vpop.eup %6059  ;;  %v10247_v46 = vld [vmem:[#allocation48_spill] sm:$0xff] }
 0x3f1   : > { %3015 = vperm.xlu1 %5893, %v7950_v17   ;;  %v2669_v17 = vmul.f32 1.442695, %v2505_v31  ;;  %10244 = vst [vmem:[#allocation53_spill] sm:$0xff] %v7968_v38  ;;  %v7970_v27 = vpop.eup %6061  ;;  %v2509_v31 = vsub.f32 %v10246_v40, %v7921_v7  ;;  %v2494_v0 = vsub.f32 %v10247_v46, %v7841_v16 }
 0x3f2   : > { %10245 = vst [vmem:[#allocation40_spill] sm:$0xff] %v7970_v27 }
 0x3f3   : > { %6071 = vpow2.f32 %v2669_v17  ;;  %v10250_v17 = vld [vmem:[#allocation65_spill] sm:$0xff]  ;;  %v2647_v40 = vmul.f32 1.442695, %v2494_v0 }
 0x3f4   : > { %3066 = vperm.xlu0 %5894, %v7958_v51   ;;  %6073 = vpow2.f32 %v2639_v34  ;;  %v7978_v51 = vpop.eup %6063  ;;  %v10251_v34 = vld [vmem:[#allocation49_spill] sm:$0xff] }
 0x3f5   : > { %3021 = vperm.xlu1 %5893, %v7960_v53   ;;  %v2673_v53 = vmul.f32 1.442695, %v2507_v4  ;;  %10248 = vst [vmem:[#allocation55_spill] sm:$0xff] %v7978_v51  ;;  %v7980_v8 = vpop.eup %6065  ;;  %v2511_v4 = vsub.f32 %v10250_v17, %v7921_v7  ;;  %v2496_v14 = vsub.f32 %v10251_v34, %v7841_v16  ;;  %v10256_v17 = vld [vmem:[#allocation50_spill] sm:$0xff] }
 0x3f6   : > { %10249 = vst [vmem:[#allocation41_spill] sm:$0xff] %v7980_v8  ;;  %v2498_v34 = vsub.f32 %v10256_v17, %v7841_v16 }
 0x3f7   : > { %6075 = vpow2.f32 %v2673_v53  ;;  %v2681_v53 = vmul.f32 1.442695, %v2511_v4  ;;  %v2651_v0 = vmul.f32 1.442695, %v2496_v14  ;;  %v10259_v4 = vld [vmem:[#allocation69_spill] sm:$0xff] }
 0x3f8   : > { %3072 = vperm.xlu0 %5894, %v7968_v38   ;;  %6077 = vpow2.f32 %v2643_v25  ;;  %v2655_v14 = vmul.f32 1.442695, %v2498_v34 }
 0x3f9   : > { %3027 = vperm.xlu1 %5893, %v7970_v27   ;;  %v2677_v27 = vmul.f32 1.442695, %v2509_v31  ;;  %v7988_v38 = vpop.eup %6067  ;;  %v10255_v31 = vld [vmem:[#allocation67_spill] sm:$0xff] }
 0x3fa   : > { %10252 = vst [vmem:[#allocation57_spill] sm:$0xff] %v7988_v38  ;;  %v7990_v46 = vpop.eup %6069  ;;  %v2513_v25 = vsub.f32 %v10255_v31, %v7921_v7  ;;  %v10260_v31 = vld [vmem:[#allocation52_spill] sm:$0xff] }
 0x3fb   : > { %10253 = vst [vmem:[#allocation43_spill] sm:$0xff] %v7990_v46  ;;  %6079 = vpow2.f32 %v2677_v27  ;;  %v2500_v17 = vsub.f32 %v10260_v31, %v7841_v16 }
 0x3fc   : > { %3078 = vperm.xlu0 %5894, %v7978_v51   ;;  %v7994_v51 = vsub.s32 3, %v6768_v21  ;;  %6081 = vpow2.f32 %v2647_v40  ;;  %v2685_v27 = vmul.f32 1.442695, %v2513_v25  ;;  %v2515_v40 = vsub.f32 %v10259_v4, %v7921_v7 }
 0x3fd   : > { %3033 = vperm.xlu1 %5893, %v7980_v8   ;;  %v8001_v8 = vpop.eup %6071  ;;  %6083 = vpow2.f32 %v2681_v53  ;;  %v10263_v53 = vld [vmem:[#allocation87_spill] sm:$0xff]  ;;  %v2659_v4 = vmul.f32 1.442695, %v2500_v17 }
 0x3fe   : > { %10254 = vst [vmem:[#allocation59_spill] sm:$0xff] %v7994_v51  ;;  %10257 = vst [vmem:[#allocation45_spill] sm:$0xff] %v8001_v8  ;;  %v8003_v15 = vpop.eup %6073  ;;  %6085 = vpow2.f32 %v2651_v0  ;;  %v10264_v0 = vld [vmem:[#allocation54_spill] sm:$0xff] }
 0x3ff   : > { %10258 = vst [vmem:[#allocation61_spill] sm:$0xff] %v8003_v15  ;;  %6087 = vpow2.f32 %v2685_v27  ;;  %v2502_v34 = vsub.f32 %v10264_v0, %v7921_v7  ;;  %v10267_v27 = vld [vmem:[#allocation89_spill] sm:$0xff] }
 0x400   : > { %3084 = vperm.xlu0 %5894, %v7988_v38   ;;  %v8008_v38 = vrot.slane %v7818_v37, %v7994_v51  ;;  %6089 = vpow2.f32 %v2655_v14  ;;  %v10268_v14 = vld [vmem:[#allocation56_spill] sm:$0xff] }
 0x401   : > { %3039 = vperm.xlu1 %5893, %v7990_v46   ;;  %v8015_v46 = vpop.eup %6075  ;;  %v2504_v17 = vsub.f32 %v10268_v14, %v7921_v7 }
 0x402   : > { %10261 = vst [vmem:[#allocation47_spill] sm:$0xff] %v8015_v46  ;;  %v8017_v23 = vpop.eup %6077  ;;  %v2517_v25 = vsub.f32 %v10263_v53, %v8008_v38  ;;  %v2663_v53 = vmul.f32 1.442695, %v2502_v34 }
 0x403   : > { %10262 = vst [vmem:[#allocation63_spill] sm:$0xff] %v8017_v23 }
 0x404   : > { %3090 = vperm.xlu0 %5894, %v8001_v8   ;;  %v2689_v8 = vmul.f32 1.442695, %v2515_v40  ;;  %v2693_v31 = vmul.f32 1.442695, %v2517_v25  ;;  %v2519_v40 = vsub.f32 %v10267_v27, %v8008_v38  ;;  %v2667_v27 = vmul.f32 1.442695, %v2504_v17 }
 0x405   : > { %3045 = vperm.xlu1 %5893, %v8003_v15   ;;  %v8025_v15 = vpop.eup %6079 }
 0x406   : > { %10265 = vst [vmem:[#allocation48_spill] sm:$0xff] %v8025_v15  ;;  %v8027_v16 = vpop.eup %6081  ;;  %6091 = vpow2.f32 %v2689_v8  ;;  %v10271_v8 = vld [vmem:[#allocation91_spill] sm:$0xff] }
 0x407   : > { %10266 = vst [vmem:[#allocation65_spill] sm:$0xff] %v8027_v16  ;;  %6093 = vpow2.f32 %v2659_v4  ;;  %v2521_v25 = vsub.f32 %v10271_v8, %v8008_v38  ;;  %v10272_v4 = vld [vmem:[#allocation58_spill] sm:$0xff] }
 0x408   : > { %3096 = vperm.xlu0 %5894, %v8015_v46   ;;  %v8035_v46 = vpop.eup %6083  ;;  %6095 = vpow2.f32 %v2693_v31  ;;  %v2506_v34 = vsub.f32 %v10272_v4, %v7921_v7  ;;  %v10275_v31 = vld [vmem:[#allocation93_spill] sm:$0xff] }
 0x409   : > { %3051 = vperm.xlu1 %5893, %v8017_v23   ;;  %10269 = vst [vmem:[#allocation49_spill] sm:$0xff] %v8035_v46  ;;  %v8037_v0 = vpop.eup %6085  ;;  %6097 = vpow2.f32 %v2663_v53  ;;  %v10276_v53 = vld [vmem:[#allocation60_spill] sm:$0xff] }
 0x40a   : > { %10270 = vst [vmem:[#allocation67_spill] sm:$0xff] %v8037_v0  ;;  %v2671_v8 = vmul.f32 1.442695, %v2506_v34  ;;  %v2508_v17 = vsub.f32 %v10276_v53, %v7921_v7 }
 0x40c   : > { %3102 = vperm.xlu0 %5894, %v8025_v15   ;;  %v2697_v15 = vmul.f32 1.442695, %v2519_v40  ;;  %v2523_v40 = vsub.f32 %v10275_v31, %v8008_v38 }
 0x40d   : > { %3057 = vperm.xlu1 %5893, %v8027_v16   ;;  %v8045_v16 = vpop.eup %6087 }
 0x40e   : > { %10273 = vst [vmem:[#allocation50_spill] sm:$0xff] %v8045_v16  ;;  %v8047_v14 = vpop.eup %6089  ;;  %6099 = vpow2.f32 %v2697_v15  ;;  %v2525_v15 = vsub.f32 %v10157_v33, %v8008_v38 }
 0x40f   : > { %10274 = vst [vmem:[#allocation69_spill] sm:$0xff] %v8047_v14  ;;  %6101 = vpow2.f32 %v2667_v27  ;;  %v10279_v27 = vld [vmem:[#allocation62_spill] sm:$0xff] }
 0x410   : > { %3108 = vperm.xlu0 %5894, %v8035_v46   ;;  %v2701_v46 = vmul.f32 1.442695, %v2521_v25  ;;  %v2675_v25 = vmul.f32 1.442695, %v2508_v17  ;;  %v2510_v34 = vsub.f32 %v10279_v27, %v7921_v7 }
 0x411   : > { %3063 = vperm.xlu1 %5893, %v8037_v0   ;;  %v8055_v0 = vpop.eup %6091 }
 0x412   : > { %10277 = vst [vmem:[#allocation52_spill] sm:$0xff] %v8055_v0  ;;  %v8057_v4 = vpop.eup %6093  ;;  %6103 = vpow2.f32 %v2701_v46  ;;  %v2527_v46 = vsub.f32 %v10167_v48, %v8008_v38  ;;  %v2679_v33 = vmul.f32 1.442695, %v2510_v34  ;;  %v2529_v48 = vsub.f32 %v10176_v32, %v8008_v38 }
 0x413   : > { %10278 = vst [vmem:[#allocation87_spill] sm:$0xff] %v8057_v4  ;;  %6105 = vpow2.f32 %v2671_v8  ;;  %v8065_v31 = vpop.eup %6095  ;;  %v2531_v32 = vsub.f32 %v10182_v49, %v8008_v38 }
 0x414   : > { %3114 = vperm.xlu0 %5894, %v8045_v16   ;;  %v2705_v16 = vmul.f32 1.442695, %v2523_v40  ;;  %10280 = vst [vmem:[#allocation54_spill] sm:$0xff] %v8065_v31  ;;  %v8067_v53 = vpop.eup %6097  ;;  %v10282_v40 = vld [vmem:[#allocation64_spill] sm:$0xff] }
 0x415   : > { %3069 = vperm.xlu1 %5893, %v8047_v14   ;;  %10281 = vst [vmem:[#allocation89_spill] sm:$0xff] %v8067_v53  ;;  %v2512_v8 = vsub.f32 %v10282_v40, %v7921_v7 }
 0x416   : > { %6107 = vpow2.f32 %v2705_v16  ;;  %v2713_v16 = vmul.f32 1.442695, %v2527_v46 }
 0x417   : > { %6109 = vpow2.f32 %v2675_v25  ;;  %v10286_v25 = vld [vmem:[#allocation66_spill] sm:$0xff] }
 0x418   : > { %3120 = vperm.xlu0 %5894, %v8055_v0   ;;  %v2709_v0 = vmul.f32 1.442695, %v2525_v15  ;;  %v8075_v17 = vpop.eup %6099  ;;  %v2683_v15 = vmul.f32 1.442695, %v2512_v8  ;;  %v2514_v34 = vsub.f32 %v10286_v25, %v7921_v7 }
 0x419   : > { %3075 = vperm.xlu1 %5893, %v8057_v4   ;;  %10283 = vst [vmem:[#allocation56_spill] sm:$0xff] %v8075_v17  ;;  %v8077_v27 = vpop.eup %6101  ;;  %v8081_v4 = vsub.s32 4, %v6768_v21 }
 0x41a   : > { %10284 = vst [vmem:[#allocation91_spill] sm:$0xff] %v8077_v27  ;;  %6111 = vpow2.f32 %v2709_v0  ;;  %v2717_v0 = vmul.f32 1.442695, %v2529_v48  ;;  %v2687_v46 = vmul.f32 1.442695, %v2514_v34 }
 0x41b   : > { %10285 = vst [vmem:[#allocation58_spill] sm:$0xff] %v8081_v4  ;;  %6113 = vpow2.f32 %v2679_v33  ;;  %v2516_v33 = vsub.f32 %v10161_v19, %v7921_v7 }
 0x41c   : > { %3126 = vperm.xlu0 %5894, %v8065_v31   ;;  %v8088_v40 = vpop.eup %6103  ;;  %6115 = vpow2.f32 %v2713_v16  ;;  %v10291_v16 = vld [vmem:[#allocation71_spill] sm:$0xff] }
 0x41d   : > { %3081 = vperm.xlu1 %5893, %v8067_v53   ;;  %10287 = vst [vmem:[#allocation93_spill] sm:$0xff] %v8088_v40  ;;  %v8090_v53 = vpop.eup %6105  ;;  %6117 = vpow2.f32 %v2683_v15  ;;  %v2691_v49 = vmul.f32 1.442695, %v2516_v33  ;;  %v10292_v15 = vld [vmem:[#allocation86_spill] sm:$0xff] }
 0x41e   : > { %10288 = vst [vmem:[#allocation60_spill] sm:$0xff] %v8090_v53  ;;  %6119 = vpow2.f32 %v2717_v0  ;;  %v2518_v34 = vsub.f32 %v10292_v15, %v8008_v38  ;;  %v10295_v0 = vld [vmem:[#allocation73_spill] sm:$0xff] }
 0x41f   : > { %6121 = vpow2.f32 %v2687_v46  ;;  %v10296_v46 = vld [vmem:[#allocation88_spill] sm:$0xff] }
 0x420   : > { %3132 = vperm.xlu0 %5894, %v8075_v17   ;;  %v8095_v17 = vrot.slane %v7818_v37, %v8081_v4  ;;  %v8102_v8 = vpop.eup %6107  ;;  %v2520_v33 = vsub.f32 %v10296_v46, %v8008_v38 }
 0x421   : > { %3087 = vperm.xlu1 %5893, %v8077_v27   ;;  %10289 = vst [vmem:[#allocation62_spill] sm:$0xff] %v8102_v8  ;;  %v8104_v25 = vpop.eup %6109 }
 0x422   : > { %10290 = vst [vmem:[#allocation64_spill] sm:$0xff] %v8104_v25  ;;  %v2533_v48 = vsub.f32 %v10291_v16, %v8095_v17  ;;  %v2695_v16 = vmul.f32 1.442695, %v2518_v34 }
 0x424   : > { %3138 = vperm.xlu0 %5894, %v8088_v40   ;;  %v2721_v40 = vmul.f32 1.442695, %v2531_v32  ;;  %v2725_v7 = vmul.f32 1.442695, %v2533_v48  ;;  %v2535_v32 = vsub.f32 %v10295_v0, %v8095_v17  ;;  %v2699_v0 = vmul.f32 1.442695, %v2520_v33 }
 0x425   : > { %3093 = vperm.xlu1 %5893, %v8090_v53   ;;  %v8112_v53 = vpop.eup %6111 }
 0x426   : > { %10293 = vst [vmem:[#allocation66_spill] sm:$0xff] %v8112_v53  ;;  %v8114_v19 = vpop.eup %6113  ;;  %6123 = vpow2.f32 %v2721_v40  ;;  %v10299_v40 = vld [vmem:[#allocation75_spill] sm:$0xff] }
 0x427   : > { %10294 = vst [vmem:[#allocation71_spill] sm:$0xff] %v8114_v19  ;;  %6125 = vpow2.f32 %v2691_v49  ;;  %v2537_v48 = vsub.f32 %v10299_v40, %v8095_v17  ;;  %v10300_v49 = vld [vmem:[#allocation90_spill] sm:$0xff] }
 0x428   : > { %3144 = vperm.xlu0 %5894, %v8102_v8   ;;  %v8122_v8 = vpop.eup %6115  ;;  %6127 = vpow2.f32 %v2725_v7  ;;  %v2522_v34 = vsub.f32 %v10300_v49, %v8008_v38  ;;  %v10303_v7 = vld [vmem:[#allocation77_spill] sm:$0xff] }
 0x429   : > { %3099 = vperm.xlu1 %5893, %v8104_v25   ;;  %10297 = vst [vmem:[#allocation86_spill] sm:$0xff] %v8122_v8  ;;  %v8124_v15 = vpop.eup %6117  ;;  %6129 = vpow2.f32 %v2695_v16  ;;  %v10304_v16 = vld [vmem:[#allocation92_spill] sm:$0xff] }
 0x42a   : > { %10298 = vst [vmem:[#allocation73_spill] sm:$0xff] %v8124_v15  ;;  %v2703_v40 = vmul.f32 1.442695, %v2522_v34  ;;  %v2524_v33 = vsub.f32 %v10304_v16, %v8008_v38 }
 0x42c   : > { %3150 = vperm.xlu0 %5894, %v8112_v53   ;;  %v2729_v53 = vmul.f32 1.442695, %v2535_v32  ;;  %v2539_v32 = vsub.f32 %v10303_v7, %v8095_v17  ;;  %v2707_v7 = vmul.f32 1.442695, %v2524_v33 }
 0x42d   : > { %3105 = vperm.xlu1 %5893, %v8114_v19   ;;  %v8132_v19 = vpop.eup %6119 }
 0x42e   : > { %10301 = vst [vmem:[#allocation88_spill] sm:$0xff] %v8132_v19  ;;  %v8134_v46 = vpop.eup %6121  ;;  %6131 = vpow2.f32 %v2729_v53  ;;  %v10307_v53 = vld [vmem:[#allocation79_spill] sm:$0xff] }
 0x42f   : > { %10302 = vst [vmem:[#allocation75_spill] sm:$0xff] %v8134_v46  ;;  %6133 = vpow2.f32 %v2699_v0  ;;  %v2526_v0 = vsub.f32 %v10163_v2, %v8008_v38 }
 0x430   : > { %3156 = vperm.xlu0 %5894, %v8122_v8   ;;  %v2733_v8 = vmul.f32 1.442695, %v2537_v48  ;;  %v2541_v48 = vsub.f32 %v10307_v53, %v8095_v17 }
 0x431   : > { %3111 = vperm.xlu1 %5893, %v8124_v15   ;;  %v8142_v15 = vpop.eup %6123  ;;  %v2711_v53 = vmul.f32 1.442695, %v2526_v0 }
 0x432   : > { %10305 = vst [vmem:[#allocation90_spill] sm:$0xff] %v8142_v15  ;;  %v8144_v49 = vpop.eup %6125  ;;  %6135 = vpow2.f32 %v2733_v8  ;;  %v10310_v8 = vld [vmem:[#allocation81_spill] sm:$0xff] }
 0x433   : > { %10306 = vst [vmem:[#allocation77_spill] sm:$0xff] %v8144_v49  ;;  %6137 = vpow2.f32 %v2703_v40  ;;  %v8152_v34 = vpop.eup %6127  ;;  %v2528_v40 = vsub.f32 %v10170_v10, %v8008_v38  ;;  %v2530_v10 = vsub.f32 %v10180_v59, %v8008_v38  ;;  %v2532_v59 = vsub.f32 %v10187_v13, %v8008_v38 }
 0x434   : > { %3162 = vperm.xlu0 %5894, %v8132_v19   ;;  %v2737_v19 = vmul.f32 1.442695, %v2539_v32  ;;  %10308 = vst [vmem:[#allocation92_spill] sm:$0xff] %v8152_v34  ;;  %v8154_v16 = vpop.eup %6129  ;;  %v2543_v32 = vsub.f32 %v10310_v8, %v8095_v17 }
 0x435   : > { %3117 = vperm.xlu1 %5893, %v8134_v46   ;;  %10309 = vst [vmem:[#allocation79_spill] sm:$0xff] %v8154_v16 }
 0x436   : > { %6139 = vpow2.f32 %v2737_v19  ;;  %v2745_v19 = vmul.f32 1.442695, %v2543_v32  ;;  %v2719_v32 = vmul.f32 1.442695, %v2530_v10 }
 0x437   : > { %6141 = vpow2.f32 %v2707_v7  ;;  %v2715_v7 = vmul.f32 1.442695, %v2528_v40 }
 0x438   : > { %3168 = vperm.xlu0 %5894, %v8142_v15   ;;  %v2741_v15 = vmul.f32 1.442695, %v2541_v48  ;;  %v8162_v33 = vpop.eup %6131  ;;  %v2545_v48 = vsub.f32 %v10168_v56, %v8095_v17  ;;  %v2547_v56 = vsub.f32 %v10186_v43, %v8095_v17  ;;  %v2723_v43 = vmul.f32 1.442695, %v2532_v59 }
 0x439   : > { %3123 = vperm.xlu1 %5893, %v8144_v49   ;;  %10311 = vst [vmem:[#allocation81_spill] sm:$0xff] %v8162_v33  ;;  %v8164_v2 = vpop.eup %6133  ;;  %v8168_v49 = vsub.s32 5, %v6768_v21 }
 0x43a   : > { %10312 = vst [vmem:[#allocation141_spill] sm:$0xff] %v8164_v2  ;;  %6143 = vpow2.f32 %v2741_v15  ;;  %v2749_v15 = vmul.f32 1.442695, %v2545_v48 }
 0x43b   : > { %10313 = vst [vmem:[#allocation142_spill] sm:$0xff] %v8168_v49  ;;  %6145 = vpow2.f32 %v2711_v53  ;;  %v8182_v46 = vrot.slane %v7818_v37, %v8168_v49 }
 0x43c   : > { %3174 = vperm.xlu0 %5894, %v8152_v34   ;;  %v8175_v0 = vpop.eup %6135  ;;  %6147 = vpow2.f32 %v2745_v19  ;;  %v10318_v19 = vld [vmem:[#allocation103_spill] sm:$0xff] }
 0x43d   : > { %3129 = vperm.xlu1 %5893, %v8154_v16   ;;  %10314 = vst [vmem:[#allocation143_spill] sm:$0xff] %v8175_v0  ;;  %v8177_v8 = vpop.eup %6137  ;;  %6149 = vpow2.f32 %v2715_v7  ;;  %v2549_v48 = vsub.f32 %v10318_v19, %v8182_v46  ;;  %v10319_v7 = vld [vmem:[#allocation70_spill] sm:$0xff]  ;;  %v10323_v19 = vld [vmem:[#allocation72_spill] sm:$0xff] }
 0x43e   : > { %10315 = vst [vmem:[#allocation144_spill] sm:$0xff] %v8177_v8  ;;  %6151 = vpow2.f32 %v2749_v15  ;;  %v2534_v10 = vsub.f32 %v10319_v7, %v8095_v17  ;;  %v2536_v7 = vsub.f32 %v10323_v19, %v8095_v17 }
 0x43f   : > { %6153 = vpow2.f32 %v2719_v32  ;;  %v2757_v15 = vmul.f32 1.442695, %v2549_v48  ;;  %v2553_v48 = vsub.f32 %v10158_v42, %v8182_v46  ;;  %v10329_v42 = vld [vmem:[#allocation110_spill] sm:$0xff] }
 0x440   : > { %3180 = vperm.xlu0 %5894, %v8162_v33   ;;  %v8189_v53 = vpop.eup %6139  ;;  %v2727_v59 = vmul.f32 1.442695, %v2534_v10  ;;  %v10326_v10 = vld [vmem:[#allocation74_spill] sm:$0xff] }
 0x441   : > { %3135 = vperm.xlu1 %5893, %v8164_v2   ;;  %10316 = vst [vmem:[#allocation145_spill] sm:$0xff] %v8189_v53  ;;  %v8191_v40 = vpop.eup %6141 }
 0x442   : > { %10317 = vst [vmem:[#allocation146_spill] sm:$0xff] %v8191_v40 }
 0x444   : > { %3186 = vperm.xlu0 %5894, %v8175_v0   ;;  %v8199_v0 = vpop.eup %6143 }
 0x445   : > { %3141 = vperm.xlu1 %5893, %v8177_v8   ;;  %v2753_v8 = vmul.f32 1.442695, %v2547_v56  ;;  %10320 = vst [vmem:[#allocation103_spill] sm:$0xff] %v8199_v0  ;;  %v8203_v38 = vpop.eup %6145  ;;  %v10322_v56 = vld [vmem:[#allocation105_spill] sm:$0xff] }
 0x446   : > { %10321 = vst [vmem:[#allocation70_spill] sm:$0xff] %v8203_v38  ;;  %v2551_v32 = vsub.f32 %v10322_v56, %v8182_v46  ;;  %v2538_v56 = vsub.f32 %v10326_v10, %v8095_v17 }
 0x447   : > { %6155 = vpow2.f32 %v2753_v8 }
 0x448   : > { %3192 = vperm.xlu0 %5894, %v8189_v53   ;;  %6157 = vpow2.f32 %v2723_v43  ;;  %v2761_v8 = vmul.f32 1.442695, %v2551_v32  ;;  %v2731_v43 = vmul.f32 1.442695, %v2536_v7  ;;  %v2555_v32 = vsub.f32 %v10329_v42, %v8182_v46  ;;  %v10330_v7 = vld [vmem:[#allocation76_spill] sm:$0xff] }
 0x449   : > { %3147 = vperm.xlu1 %5893, %v8191_v40   ;;  %v8213_v40 = vpop.eup %6147  ;;  %6159 = vpow2.f32 %v2757_v15  ;;  %v2765_v15 = vmul.f32 1.442695, %v2553_v48  ;;  %v2540_v10 = vsub.f32 %v10330_v7, %v8095_v17  ;;  %v2557_v48 = vsub.f32 %v10171_v47, %v8182_v46 }
 0x44a   : > { %10324 = vst [vmem:[#allocation105_spill] sm:$0xff] %v8213_v40  ;;  %v8217_v33 = vpop.eup %6149  ;;  %6161 = vpow2.f32 %v2727_v59  ;;  %v2735_v59 = vmul.f32 1.442695, %v2538_v56  ;;  %v10333_v56 = vld [vmem:[#allocation78_spill] sm:$0xff]  ;;  %v2559_v47 = vsub.f32 %v10177_v9, %v8182_v46 }
 0x44b   : > { %v8201_v13 = vpop.permute.xlu0 %2985  ;;  %10325 = vst [vmem:[#allocation72_spill] sm:$0xff] %v8217_v33  ;;  %v8227_v19 = vpop.eup %6151  ;;  %6163 = vpow2.f32 %v2761_v8  ;;  %v2769_v8 = vmul.f32 1.442695, %v2555_v32  ;;  %v2542_v42 = vsub.f32 %v10333_v56, %v8095_v17 }
 0x44c   : > { %v8205_v25 = vpop.permute.xlu1 %2982  ;;  %3198 = vperm.xlu0 %5894, %v8199_v0   ;;  %10327 = vst [vmem:[#allocation74_spill] sm:$0xff] %v8227_v19  ;;  %v8231_v0 = vpop.eup %6153  ;;  %6165 = vpow2.f32 %v2731_v43  ;;  %v2739_v43 = vmul.f32 1.442695, %v2540_v10  ;;  %v2777_v9 = vmul.f32 1.442695, %v2559_v47 }
 0x44d   : > { %3153 = vperm.xlu1 %5893, %v8203_v38   ;;  %10328 = vst [vmem:[#allocation147_spill] sm:$0xff] %v8231_v0  ;;  %6167 = vpow2.f32 %v2765_v15  ;;  %v2773_v15 = vmul.f32 1.442695, %v2557_v48  ;;  %v2743_v32 = vmul.f32 1.442695, %v2542_v42  ;;  %v2561_v48 = vsub.f32 %v10183_v63, %v8182_v46 }
 0x44e   : > { %6169 = vpow2.f32 %v2735_v59  ;;  %v10336_v59 = vld [vmem:[#allocation80_spill] sm:$0xff]  ;;  %v2546_v42 = vsub.f32 %v10174_v45, %v8095_v17  ;;  %v2563_v45 = vsub.f32 %v10190_v18, %v8182_v46  ;;  %v10343_v18 = vld [vmem:[#allocation130_spill] sm:$0xff] }
 0x44f   : > { %v8215_v53 = vpop.permute.xlu0 %3012  ;;  %6171 = vpow2.f32 %v2769_v8  ;;  %v2544_v10 = vsub.f32 %v10336_v59, %v8095_v17  ;;  %v9921_v8 = vsub.s32 6, %v6768_v21  ;;  %v2781_v63 = vmul.f32 1.442695, %v2561_v48 }
 0x450   : > { %v8219_v34 = vpop.permute.xlu1 %2988  ;;  %3204 = vperm.xlu0 %5894, %v8213_v40   ;;  %6173 = vpow2.f32 %v2739_v43  ;;  %v2751_v47 = vmul.f32 1.442695, %v2546_v42 }
 0x451   : > { %3159 = vperm.xlu1 %5893, %v8217_v33   ;;  %v8241_v33 = vpop.eup %6155  ;;  %6175 = vpow2.f32 %v2773_v15  ;;  %v2747_v43 = vmul.f32 1.442695, %v2544_v10  ;;  %v8296_v15 = vrot.slane %v7818_v37, %v9921_v8 }
 0x452   : > { %10331 = vst [vmem:[#allocation110_spill] sm:$0xff] %v8241_v33  ;;  %v8245_v14 = vpop.eup %6157  ;;  %6177 = vpow2.f32 %v2743_v32  ;;  %v2548_v32 = vsub.f32 %v10192_v20, %v8095_v17  ;;  %v10344_v20 = vld [vmem:[#allocation102_spill] sm:$0xff] }
 0x453   : > { %v8229_v38 = vpop.permute.xlu0 %3018  ;;  %10332 = vst [vmem:[#allocation76_spill] sm:$0xff] %v8245_v14  ;;  %v8255_v7 = vpop.eup %6159  ;;  %6179 = vpow2.f32 %v2777_v9  ;;  %v2785_v9 = vmul.f32 1.442695, %v2563_v45  ;;  %v2565_v48 = vsub.f32 %v10343_v18, %v8296_v15  ;;  %v2550_v17 = vsub.f32 %v10344_v20, %v8182_v46  ;;  %v10347_v45 = vld [vmem:[#allocation133_spill] sm:$0xff]  ;;  %v10348_v18 = vld [vmem:[#allocation104_spill] sm:$0xff] }
 0x454   : > { %v8233_v16 = vpop.permute.xlu1 %2991  ;;  %3210 = vperm.xlu0 %5894, %v8227_v19   ;;  %10334 = vst [vmem:[#allocation78_spill] sm:$0xff] %v8255_v7  ;;  %v8259_v19 = vpop.eup %6161  ;;  %6181 = vpow2.f32 %v2747_v43  ;;  %v2755_v43 = vmul.f32 1.442695, %v2548_v32  ;;  %v2552_v20 = vsub.f32 %v10348_v18, %v8182_v46 }
 0x455   : > { %3165 = vperm.xlu1 %5893, %v8231_v0   ;;  %10335 = vst [vmem:[#allocation148_spill] sm:$0xff] %v8259_v19  ;;  %v8269_v56 = vpop.eup %6163  ;;  %6183 = vpow2.f32 %v2781_v63  ;;  %v2789_v63 = vmul.f32 1.442695, %v2565_v48  ;;  %v2759_v32 = vmul.f32 1.442695, %v2550_v17  ;;  %v10351_v48 = vld [vmem:[#allocation135_spill] sm:$0xff] }
 0x456   : > { %10337 = vst [vmem:[#allocation80_spill] sm:$0xff] %v8269_v56  ;;  %6185 = vpow2.f32 %v2751_v47  ;;  %v2567_v47 = vsub.f32 %v10347_v45, %v8296_v15  ;;  %v2763_v17 = vmul.f32 1.442695, %v2552_v20  ;;  %v10352_v45 = vld [vmem:[#allocation106_spill] sm:$0xff]  ;;  %v10355_v20 = vld [vmem:[#allocation109_spill] sm:$0xff] }
 0x457   : > { %v8243_v40 = vpop.permute.xlu0 %3024  ;;  %6187 = vpow2.f32 %v2785_v9  ;;  %v2554_v18 = vsub.f32 %v10352_v45, %v8182_v46 }
 0x458   : > { %v8247_v23 = vpop.permute.xlu1 %2994  ;;  %3216 = vperm.xlu0 %5894, %v8241_v33   ;;  %v8273_v33 = vpop.eup %6165  ;;  %6189 = vpow2.f32 %v2755_v43  ;;  %v2793_v9 = vmul.f32 1.442695, %v2567_v47  ;;  %v2569_v43 = vsub.f32 %v10351_v48, %v8296_v15  ;;  %v2571_v47 = vsub.f32 %v7476_v39, %v8296_v15 }
 0x459   : > { %3171 = vperm.xlu1 %5893, %v8245_v14   ;;  %10338 = vst [vmem:[#allocation149_spill] sm:$0xff] %v8273_v33  ;;  %v8284_v59 = vpop.eup %6167  ;;  %6191 = vpow2.f32 %v2789_v63  ;;  %v2556_v48 = vsub.f32 %v10355_v20, %v8182_v46  ;;  %v2573_v39 = vsub.f32 %v7501_v54, %v8296_v15  ;;  %v2575_v54 = vsub.f32 %v7530_v57, %v8296_v15 }
 0x45a   : > { %10339 = vst [vmem:[#allocation150_spill] sm:$0xff] %v8284_v59  ;;  %v8288_v49 = vpop.eup %6169  ;;  %6193 = vpow2.f32 %v2759_v32  ;;  %v2797_v63 = vmul.f32 1.442695, %v2569_v43  ;;  %v2767_v32 = vmul.f32 1.442695, %v2554_v18 }
 0x45b   : > { %v8257_v0 = vpop.permute.xlu0 %3030  ;;  %10340 = vst [vmem:[#allocation151_spill] sm:$0xff] %v8288_v49  ;;  %v8303_v10 = vpop.eup %6171  ;;  %6195 = vpow2.f32 %v2793_v9  ;;  %v2801_v9 = vmul.f32 1.442695, %v2571_v47  ;;  %v2771_v43 = vmul.f32 1.442695, %v2556_v48 }
 0x45c   : > { %v8261_v2 = vpop.permute.xlu1 %2997  ;;  %3222 = vperm.xlu0 %5894, %v8255_v7   ;;  %10341 = vst [vmem:[#allocation152_spill] sm:$0xff] %v8303_v10  ;;  %6197 = vpow2.f32 %v2763_v17  ;;  %v10360_v17 = vld [vmem:[#allocation113_spill] sm:$0xff]  ;;  %v2809_v57 = vmul.f32 1.442695, %v2575_v54 }
 0x45d   : > { %3177 = vperm.xlu1 %5893, %v8259_v19   ;;  %6199 = vpow2.f32 %v2797_v63  ;;  %v2558_v18 = vsub.f32 %v10360_v17, %v8182_v46  ;;  %v2805_v63 = vmul.f32 1.442695, %v2573_v39  ;;  %v2577_v39 = vsub.f32 %v7553_v28, %v8296_v15 }
 0x45e   : > { %6201 = vpow2.f32 %v2767_v32  ;;  %v10363_v32 = vld [vmem:[#allocation117_spill] sm:$0xff] }
 0x45f   : > { %v8271_v14 = vpop.permute.xlu0 %3036  ;;  %6203 = vpow2.f32 %v2801_v9  ;;  %v2775_v47 = vmul.f32 1.442695, %v2558_v18  ;;  %v2560_v48 = vsub.f32 %v10363_v32, %v8182_v46  ;;  %v9950_v9 = vsub.s32 7, %v6768_v21 }
 0x460   : > { %v8275_v27 = vpop.permute.xlu1 %3000  ;;  %3228 = vperm.xlu0 %5894, %v8269_v56   ;;  %v2562_v18 = vsub.f32 %v10188_v41, %v8182_v46  ;;  %v2813_v28 = vmul.f32 1.442695, %v2577_v39  ;;  %v2579_v41 = vsub.f32 %v7583_v44, %v8296_v15  ;;  %v10370_v44 = vld [vmem:[#allocation107_spill] sm:$0xff] }
 0x461   : > { %3183 = vperm.xlu1 %5893, %v8273_v33  }
 0x462   : > { %v2783_v54 = vmul.f32 1.442695, %v2562_v18 }
 0x463   : > { %v8286_v7 = vpop.permute.xlu0 %3042 }
 0x464   : > { %v8290_v56 = vpop.permute.xlu1 %3003  ;;  %3234 = vperm.xlu0 %5894, %v8284_v59   ;;  %v8307_v59 = vpop.eup %6173  ;;  %6205 = vpow2.f32 %v2771_v43  ;;  %v2779_v43 = vmul.f32 1.442695, %v2560_v48 }
 0x465   : > { %3189 = vperm.xlu1 %5893, %v8288_v49   ;;  %10342 = vst [vmem:[#allocation153_spill] sm:$0xff] %v8307_v59  ;;  %v8317_v42 = vpop.eup %6175  ;;  %6207 = vpow2.f32 %v2805_v63  ;;  %v8414_v63 = vrot.slane %v7818_v37, %v9950_v9 }
 0x466   : > { %10345 = vst [vmem:[#allocation130_spill] sm:$0xff] %v8317_v42  ;;  %v8321_v19 = vpop.eup %6177  ;;  %6209 = vpow2.f32 %v2775_v47  ;;  %v2564_v47 = vsub.f32 %v10193_v30, %v8182_v46  ;;  %v10371_v30 = vld [vmem:[#allocation129_spill] sm:$0xff] }
 0x467   : > { %v8305_v33 = vpop.permute.xlu0 %3048  ;;  %10346 = vst [vmem:[#allocation102_spill] sm:$0xff] %v8321_v19  ;;  %v2581_v39 = vsub.f32 %v10370_v44, %v8414_v63  ;;  %v2566_v46 = vsub.f32 %v10371_v30, %v8296_v15  ;;  %v10375_v44 = vld [vmem:[#allocation132_spill] sm:$0xff] }
 0x468   : > { %v8309_v8 = vpop.permute.xlu1 %3006  ;;  %3240 = vperm.xlu0 %5894, %v8303_v10   ;;  %v2568_v30 = vsub.f32 %v10375_v44, %v8296_v15 }
 0x469   : > { %3195 = vperm.xlu1 %5893, %v8307_v59   ;;  %v8331_v59 = vpop.eup %6179  ;;  %6211 = vpow2.f32 %v2809_v57  ;;  %v2817_v57 = vmul.f32 1.442695, %v2579_v41  ;;  %v10374_v41 = vld [vmem:[#allocation94_spill] sm:$0xff] }
 0x46a   : > { %10349 = vst [vmem:[#allocation133_spill] sm:$0xff] %v8331_v59  ;;  %v8335_v31 = vpop.eup %6181  ;;  %6213 = vpow2.f32 %v2779_v43  ;;  %v2787_v43 = vmul.f32 1.442695, %v2564_v47  ;;  %v2791_v47 = vmul.f32 1.442695, %v2566_v46 }
 0x46b   : > { %v8319_v49 = vpop.permute.xlu0 %3054  ;;  %10350 = vst [vmem:[#allocation104_spill] sm:$0xff] %v8335_v31  ;;  %v2795_v46 = vmul.f32 1.442695, %v2568_v30 }
 0x46c   : > { %v8323_v4 = vpop.permute.xlu1 %3009  ;;  %3246 = vperm.xlu0 %5894, %v8317_v42  }
 0x46d   : > { %3201 = vperm.xlu1 %5893, %v8321_v19   ;;  %v8345_v19 = vpop.eup %6183  ;;  %6215 = vpow2.f32 %v2813_v28  ;;  %v2821_v28 = vmul.f32 1.442695, %v2581_v39  ;;  %v10378_v39 = vld [vmem:[#allocation83_spill] sm:$0xff] }
 0x46e   : > { %10353 = vst [vmem:[#allocation135_spill] sm:$0xff] %v8345_v19  ;;  %v8349_v6 = vpop.eup %6185  ;;  %6217 = vpow2.f32 %v2783_v54  ;;  %v2583_v54 = vsub.f32 %v10374_v41, %v8414_v63  ;;  %v10379_v41 = vld [vmem:[#allocation134_spill] sm:$0xff] }
 0x46f   : > { %v8333_v10 = vpop.permute.xlu0 %3060  ;;  %10354 = vst [vmem:[#allocation106_spill] sm:$0xff] %v8349_v6  ;;  %v8359_v45 = vpop.eup %6187  ;;  %6219 = vpow2.f32 %v2817_v57  ;;  %v2570_v44 = vsub.f32 %v10379_v41, %v8296_v15 }
 0x470   : > { %v8337_v51 = vpop.permute.xlu1 %3015  ;;  %3252 = vperm.xlu0 %5894, %v8331_v59   ;;  %10356 = vst [vmem:[#allocation109_spill] sm:$0xff] %v8359_v45  ;;  %v8363_v59 = vpop.eup %6189  ;;  %6221 = vpow2.f32 %v2787_v43  ;;  %v2825_v57 = vmul.f32 1.442695, %v2583_v54  ;;  %v2585_v43 = vsub.f32 %v10378_v39, %v8414_v63  ;;  %v10383_v54 = vld [vmem:[#allocation114_spill] sm:$0xff]  ;;  %v10384_v39 = vld [vmem:[#allocation137_spill] sm:$0xff] }
 0x471   : > { %3207 = vperm.xlu1 %5893, %v8335_v31   ;;  %10358 = vst [vmem:[#allocation155_spill] sm:$0xff] %v8363_v59  ;;  %v8373_v20 = vpop.eup %6191  ;;  %6223 = vpow2.f32 %v2821_v28  ;;  %v2799_v30 = vmul.f32 1.442695, %v2570_v44  ;;  %v2572_v41 = vsub.f32 %v10384_v39, %v8296_v15 }
 0x472   : > { %10361 = vst [vmem:[#allocation113_spill] sm:$0xff] %v8373_v20  ;;  %v2829_v28 = vmul.f32 1.442695, %v2585_v43  ;;  %v10389_v43 = vld [vmem:[#allocation99_spill] sm:$0xff] }
 0x473   : > { %v8347_v42 = vpop.permute.xlu0 %3066  ;;  %v2803_v44 = vmul.f32 1.442695, %v2572_v41  ;;  %v10393_v41 = vld [vmem:[#allocation139_spill] sm:$0xff] }
 0x474   : > { %v8351_v22 = vpop.permute.xlu1 %3021  ;;  %3258 = vperm.xlu0 %5894, %v8345_v19   ;;  %v8377_v19 = vpop.eup %6193  ;;  %6225 = vpow2.f32 %v2791_v47  ;;  %v2587_v47 = vsub.f32 %v10383_v54, %v8414_v63  ;;  %v10390_v54 = vld [vmem:[#allocation138_spill] sm:$0xff] }
 0x475   : > { %3213 = vperm.xlu1 %5893, %v8349_v6   ;;  %10362 = vst [vmem:[#allocation157_spill] sm:$0xff] %v8377_v19  ;;  %v8387_v17 = vpop.eup %6195  ;;  %6227 = vpow2.f32 %v2825_v57  ;;  %v2574_v39 = vsub.f32 %v10390_v54, %v8296_v15 }
 0x476   : > { %10364 = vst [vmem:[#allocation117_spill] sm:$0xff] %v8387_v17  ;;  %v2833_v57 = vmul.f32 1.442695, %v2587_v47  ;;  %v2591_v47 = vsub.f32 %v7754_v24, %v8414_v63  ;;  %v2593_v24 = vsub.f32 %v7784_v3, %v8414_v63  ;;  %v2595_v3 = vsub.f32 %v7803_v5, %v8414_v63 }
 0x477   : > { %v8361_v31 = vpop.permute.xlu0 %3072 }
 0x478   : > { %10357 = vst [vmem:[#allocation154_spill] sm:$0xff] %v8361_v31  ;;  %v8365_v55 = vpop.permute.xlu1 %3027  ;;  %3264 = vperm.xlu0 %5894, %v8359_v45   ;;  %v8391_v45 = vpop.eup %6197  ;;  %6229 = vpow2.f32 %v2795_v46  ;;  %v2589_v46 = vsub.f32 %v10389_v43, %v8414_v63  ;;  %v2576_v43 = vsub.f32 %v10393_v41, %v8296_v15 }
 0x479   : > { %10359 = vst [vmem:[#allocation156_spill] sm:$0xff] %v8365_v55  ;;  %3219 = vperm.xlu1 %5893, %v8363_v59   ;;  %10365 = vst [vmem:[#allocation158_spill] sm:$0xff] %v8391_v45  ;;  %v8402_v32 = vpop.eup %6199  ;;  %6231 = vpow2.f32 %v2829_v28 }
 0x47a   : > { %10366 = vst [vmem:[#allocation159_spill] sm:$0xff] %v8402_v32  ;;  %v2837_v28 = vmul.f32 1.442695, %v2589_v46  ;;  %v2811_v46 = vmul.f32 1.442695, %v2576_v43 }
 0x47b   : > { %v8375_v6 = vpop.permute.xlu0 %3078 }
 0x47c   : > { %v8379_v26 = vpop.permute.xlu1 %3033  ;;  %3270 = vperm.xlu0 %5894, %v8373_v20   ;;  %v8406_v20 = vpop.eup %6201  ;;  %6233 = vpow2.f32 %v2799_v30  ;;  %v2807_v30 = vmul.f32 1.442695, %v2574_v39 }
 0x47d   : > { %3225 = vperm.xlu1 %5893, %v8377_v19   ;;  %10367 = vst [vmem:[#allocation160_spill] sm:$0xff] %v8406_v20  ;;  %v8421_v48 = vpop.eup %6203  ;;  %6235 = vpow2.f32 %v2833_v57  ;;  %v2841_v57 = vmul.f32 1.442695, %v2591_v47 }
 0x47e   : > { %10368 = vst [vmem:[#allocation161_spill] sm:$0xff] %v8421_v48 }
 0x47f   : > { %v8389_v59 = vpop.permute.xlu0 %3084 }
 0x480   : > { %v8393_v29 = vpop.permute.xlu1 %3039  ;;  %3276 = vperm.xlu0 %5894, %v8387_v17  }
 0x481   : > { %3231 = vperm.xlu1 %5893, %v8391_v45   ;;  %v8425_v45 = vpop.eup %6205  ;;  %6237 = vpow2.f32 %v2803_v44  ;;  %v10396_v44 = vld [vmem:[#allocation140_spill] sm:$0xff] }
 0x482   : > { %10369 = vst [vmem:[#allocation162_spill] sm:$0xff] %v8425_v45  ;;  %v8435_v18 = vpop.eup %6207  ;;  %6239 = vpow2.f32 %v2837_v28  ;;  %v2578_v39 = vsub.f32 %v10396_v44, %v8296_v15  ;;  %v2845_v28 = vmul.f32 1.442695, %v2593_v24  ;;  %v10402_v24 = vld [vmem:[#allocation95_spill] sm:$0xff] }
 0x483   : > { %v8404_v19 = vpop.permute.xlu0 %3090  ;;  %10372 = vst [vmem:[#allocation107_spill] sm:$0xff] %v8435_v18 }
 0x484   : > { %v8408_v17 = vpop.permute.xlu1 %3045  ;;  %3282 = vperm.xlu0 %5894, %v8402_v32   ;;  %v2815_v47 = vmul.f32 1.442695, %v2578_v39 }
 0x485   : > { %3237 = vperm.xlu1 %5893, %v8406_v20   ;;  %v8439_v20 = vpop.eup %6209  ;;  %6241 = vpow2.f32 %v2807_v30  ;;  %v2580_v30 = vsub.f32 %v7581_v36, %v8296_v15 }
 0x486   : > { %10373 = vst [vmem:[#allocation129_spill] sm:$0xff] %v8439_v20 }
 0x487   : > { %v8423_v32 = vpop.permute.xlu0 %3096  ;;  %v2819_v5 = vmul.f32 1.442695, %v2580_v30 }
 0x488   : > { %v8427_v37 = vpop.permute.xlu1 %3051  ;;  %3288 = vperm.xlu0 %5894, %v8421_v48  }
 0x489   : > { %3243 = vperm.xlu1 %5893, %v8425_v45   ;;  %v8449_v45 = vpop.eup %6211  ;;  %6243 = vpow2.f32 %v2841_v57  ;;  %v2849_v57 = vmul.f32 1.442695, %v2595_v3  ;;  %v10406_v3 = vld [vmem:[#allocation68_spill] sm:$0xff] }
 0x48a   : > { %10376 = vst [vmem:[#allocation94_spill] sm:$0xff] %v8449_v45  ;;  %v8453_v58 = vpop.eup %6213  ;;  %6245 = vpow2.f32 %v2811_v46  ;;  %v2582_v46 = vsub.f32 %v10402_v24, %v8414_v63 }
 0x48b   : > { %v8437_v9 = vpop.permute.xlu0 %3102  ;;  %10377 = vst [vmem:[#allocation132_spill] sm:$0xff] %v8453_v58 }
 0x48c   : > { %v8441_v21 = vpop.permute.xlu1 %3057  ;;  %3294 = vperm.xlu0 %5894, %v8435_v18  }
 0x48d   : > { %3249 = vperm.xlu1 %5893, %v8439_v20   ;;  %v8463_v20 = vpop.eup %6215  ;;  %6247 = vpow2.f32 %v2845_v28  ;;  %v2823_v28 = vmul.f32 1.442695, %v2582_v46 }
 0x48e   : > { %10380 = vst [vmem:[#allocation83_spill] sm:$0xff] %v8463_v20  ;;  %v8467_v11 = vpop.eup %6217  ;;  %6249 = vpow2.f32 %v2815_v47  ;;  %v2584_v47 = vsub.f32 %v10406_v3, %v8414_v63 }
 0x48f   : > { %v8451_v48 = vpop.permute.xlu0 %3108  ;;  %10382 = vst [vmem:[#allocation163_spill] sm:$0xff] %v8467_v11 }
 0x490   : > { %v8455_v52 = vpop.permute.xlu1 %3063  ;;  %3300 = vperm.xlu0 %5894, %v8449_v45  }
 0x491   : > { %3255 = vperm.xlu1 %5893, %v8453_v58   ;;  %v8477_v58 = vpop.eup %6219  ;;  %6251 = vpow2.f32 %v2849_v57  ;;  %v10410_v57 = vld [vmem:[#allocation97_spill] sm:$0xff] }
 0x492   : > { %10385 = vst [vmem:[#allocation114_spill] sm:$0xff] %v8477_v58  ;;  %v8481_v31 = vpop.eup %6221  ;;  %6253 = vpow2.f32 %v2819_v5  ;;  %v2586_v5 = vsub.f32 %v10410_v57, %v8414_v63 }
 0x493   : > { %v8465_v18 = vpop.permute.xlu0 %3114  ;;  %10387 = vst [vmem:[#allocation164_spill] sm:$0xff] %v8481_v31 }
 0x494   : > { %10381 = vst [vmem:[#allocation134_spill] sm:$0xff] %v8465_v18  ;;  %v8469_v62 = vpop.permute.xlu1 %3069  ;;  %3306 = vperm.xlu0 %5894, %v8463_v20  }
 0x495   : > { %3261 = vperm.xlu1 %5893, %v8467_v11   ;;  %v8491_v11 = vpop.eup %6223  ;;  %6255 = vpow2.f32 %v2823_v28  ;;  %v10415_v28 = vld [vmem:[#allocation96_spill] sm:$0xff] }
 0x496   : > { %10391 = vst [vmem:[#allocation99_spill] sm:$0xff] %v8491_v11 }
 0x497   : > { %v8479_v45 = vpop.permute.xlu0 %3120 }
 0x498   : > { %10386 = vst [vmem:[#allocation137_spill] sm:$0xff] %v8479_v45  ;;  %v8483_v18 = vpop.permute.xlu1 %3075  ;;  %3312 = vperm.xlu0 %5894, %v8477_v58   ;;  %v8495_v45 = vpop.eup %6225 }
 0x499   : > { %10388 = vst [vmem:[#allocation165_spill] sm:$0xff] %v8483_v18  ;;  %3267 = vperm.xlu1 %5893, %v8481_v31   ;;  %10392 = vst [vmem:[#allocation138_spill] sm:$0xff] %v8495_v45  ;;  %v8505_v54 = vpop.eup %6227 }
 0x49a   : > { %10394 = vst [vmem:[#allocation139_spill] sm:$0xff] %v8505_v54  ;;  %v8509_v31 = vpop.eup %6229 }
 0x49b   : > { %v8493_v20 = vpop.permute.xlu0 %3126  ;;  %10395 = vst [vmem:[#allocation166_spill] sm:$0xff] %v8509_v31  ;;  %v8519_v41 = vpop.eup %6231 }
 0x49c   : > { %v8497_v18 = vpop.permute.xlu1 %3081  ;;  %3318 = vperm.xlu0 %5894, %v8491_v11   ;;  %10397 = vst [vmem:[#allocation140_spill] sm:$0xff] %v8519_v41  ;;  %v8523_v11 = vpop.eup %6233 }
 0x49d   : > { %3273 = vperm.xlu1 %5893, %v8495_v45   ;;  %10398 = vst [vmem:[#allocation167_spill] sm:$0xff] %v8523_v11  ;;  %v8533_v43 = vpop.eup %6235 }
 0x49e   : > { %10399 = vst [vmem:[#allocation168_spill] sm:$0xff] %v8533_v43 }
 0x49f   : > { %v8507_v58 = vpop.permute.xlu0 %3132 }
 0x4a0   : > { %v8511_v55 = vpop.permute.xlu1 %3087  ;;  %3324 = vperm.xlu0 %5894, %v8505_v54   ;;  %v8537_v54 = vpop.eup %6237 }
 0x4a1   : > { %3279 = vperm.xlu1 %5893, %v8509_v31   ;;  %10401 = vst [vmem:[#allocation170_spill] sm:$0xff] %v8537_v54  ;;  %v8545_v36 = vpop.eup %6239 }
 0x4a2   : > { %10403 = vst [vmem:[#allocation95_spill] sm:$0xff] %v8545_v36  ;;  %v8549_v39 = vpop.eup %6241 }
 0x4a3   : > { %v8521_v45 = vpop.permute.xlu0 %3138  ;;  %10405 = vst [vmem:[#allocation172_spill] sm:$0xff] %v8549_v39  ;;  %v8557_v30 = vpop.eup %6243 }
 0x4a4   : > { %v8525_v61 = vpop.permute.xlu1 %3093  ;;  %3330 = vperm.xlu0 %5894, %v8519_v41   ;;  %10407 = vst [vmem:[#allocation68_spill] sm:$0xff] %v8557_v30 }
 0x4a5   : > { %3285 = vperm.xlu1 %5893, %v8523_v11  }
 0x4a7   : > { %v8535_v44 = vpop.permute.xlu0 %3144 }
 0x4a8   : > { %10400 = vst [vmem:[#allocation169_spill] sm:$0xff] %v8535_v44  ;;  %v8539_v31 = vpop.permute.xlu1 %3099  ;;  %3336 = vperm.xlu0 %5894, %v8533_v43   ;;  %v8561_v43 = vpop.eup %6245  ;;  %v10477_v44 = vld [vmem:[#allocation116_spill] sm:$0xff] }
 0x4a9   : > { %3291 = vperm.xlu1 %5893, %v8537_v54   ;;  %10409 = vst [vmem:[#allocation174_spill] sm:$0xff] %v8561_v43  ;;  %v8569_v46 = vpop.eup %6247 }
 0x4aa   : > { %10411 = vst [vmem:[#allocation97_spill] sm:$0xff] %v8569_v46 }
 0x4ab   : > { %v8547_v15 = vpop.permute.xlu0 %3150 }
 0x4ac   : > { %10404 = vst [vmem:[#allocation171_spill] sm:$0xff] %v8547_v15  ;;  %v8551_v41 = vpop.permute.xlu1 %3105  ;;  %3342 = vperm.xlu0 %5894, %v8545_v36   ;;  %v2827_v36 = vmul.f32 1.442695, %v2584_v47  ;;  %v2588_v47 = vsub.f32 %v10415_v28, %v8414_v63 }
 0x4ad   : > { %3297 = vperm.xlu1 %5893, %v8549_v39   ;;  %v8573_v39 = vpop.eup %6249 }
 0x4ae   : > { %10413 = vst [vmem:[#allocation176_spill] sm:$0xff] %v8573_v39  ;;  %6257 = vpow2.f32 %v2827_v36  ;;  %v10420_v36 = vld [vmem:[#allocation82_spill] sm:$0xff] }
 0x4af   : > { %v8559_v24 = vpop.permute.xlu0 %3156 }
 0x4b0   : > { %10408 = vst [vmem:[#allocation173_spill] sm:$0xff] %v8559_v24  ;;  %v8563_v54 = vpop.permute.xlu1 %3111  ;;  %3348 = vperm.xlu0 %5894, %v8557_v30   ;;  %v2831_v30 = vmul.f32 1.442695, %v2586_v5  ;;  %v2590_v5 = vsub.f32 %v10420_v36, %v8414_v63 }
 0x4b1   : > { %3303 = vperm.xlu1 %5893, %v8561_v43   ;;  %v8581_v43 = vpop.eup %6251 }
 0x4b2   : > { %10416 = vst [vmem:[#allocation96_spill] sm:$0xff] %v8581_v43  ;;  %v8585_v24 = vpop.eup %6253  ;;  %6259 = vpow2.f32 %v2831_v30 }
 0x4b3   : > { %v8571_v3 = vpop.permute.xlu0 %3162  ;;  %10418 = vst [vmem:[#allocation179_spill] sm:$0xff] %v8585_v24  ;;  %v8595_v28 = vpop.eup %6255 }
 0x4b4   : > { %10412 = vst [vmem:[#allocation175_spill] sm:$0xff] %v8571_v3  ;;  %v8575_v11 = vpop.permute.xlu1 %3117  ;;  %3354 = vperm.xlu0 %5894, %v8569_v46   ;;  %v2835_v46 = vmul.f32 1.442695, %v2588_v47  ;;  %10422 = vst [vmem:[#allocation181_spill] sm:$0xff] %v8595_v28 }
 0x4b5   : > { %10414 = vst [vmem:[#allocation177_spill] sm:$0xff] %v8575_v11  ;;  %3309 = vperm.xlu1 %5893, %v8573_v39  }
 0x4b6   : > { %6261 = vpow2.f32 %v2835_v46 }
 0x4b7   : > { %v8583_v57 = vpop.permute.xlu0 %3168 }
 0x4b8   : > { %10417 = vst [vmem:[#allocation178_spill] sm:$0xff] %v8583_v57  ;;  %v8587_v3 = vpop.permute.xlu1 %3123  ;;  %3360 = vperm.xlu0 %5894, %v8581_v43   ;;  %v2839_v57 = vmul.f32 1.442695, %v2590_v5  ;;  %v8604_v30 = vpop.eup %6257 }
 0x4b9   : > { %10419 = vst [vmem:[#allocation180_spill] sm:$0xff] %v8587_v3  ;;  %3315 = vperm.xlu1 %5893, %v8585_v24   ;;  %v10423_v3 = vld [vmem:[#allocation118_spill] sm:$0xff]  ;;  %10425 = vst [vmem:[#allocation182_spill] sm:$0xff] %v8604_v30  ;;  %v2594_v24 = vsub.f32 %v7782_v50, %v8414_v63 }
 0x4ba   : > { %v2592_v43 = vsub.f32 %v10423_v3, %v8414_v63  ;;  %6263 = vpow2.f32 %v2839_v57 }
 0x4bb   : > { %v8593_v39 = vpop.permute.xlu0 %3174  ;;  %v2847_v3 = vmul.f32 1.442695, %v2594_v24 }
 0x4bc   : > { %10421 = vst [vmem:[#allocation82_spill] sm:$0xff] %v8593_v39  ;;  %v8597_v15 = vpop.permute.xlu1 %3129  ;;  %v2843_v36 = vmul.f32 1.442695, %v2592_v43  ;;  %v8613_v46 = vpop.eup %6259 }
 0x4bd   : > { %3321 = vperm.xlu1 %5893, %v8595_v28   ;;  %10427 = vst [vmem:[#allocation184_spill] sm:$0xff] %v8613_v46  ;;  %v2596_v28 = vsub.f32 %v7801_v35, %v8414_v63 }
 0x4be   : > { %6265 = vpow2.f32 %v2843_v36 }
 0x4bf   : > { %v8602_v11 = vpop.permute.xlu0 %3180  ;;  %6267 = vpow2.f32 %v2847_v3  ;;  %v2851_v50 = vmul.f32 1.442695, %v2596_v28 }
 0x4c0   : > { %10424 = vst [vmem:[#allocation118_spill] sm:$0xff] %v8602_v11  ;;  %v8606_v47 = vpop.permute.xlu1 %3135  ;;  %v8622_v57 = vpop.eup %6261 }
 0x4c1   : > { %3327 = vperm.xlu1 %5893, %v8604_v30   ;;  %10429 = vst [vmem:[#allocation186_spill] sm:$0xff] %v8622_v57  ;;  %6269 = vpow2.f32 %v2851_v50 }
 0x4c3   : > { %v8611_v39 = vpop.permute.xlu0 %3186 }
 0x4c4   : > { %10426 = vst [vmem:[#allocation183_spill] sm:$0xff] %v8611_v39  ;;  %v8615_v5 = vpop.permute.xlu1 %3141  ;;  %v8629_v39 = vpop.eup %6263 }
 0x4c5   : > { %3333 = vperm.xlu1 %5893, %v8613_v46   ;;  %10432 = vst [vmem:[#allocation189_spill] sm:$0xff] %v8629_v39 }
 0x4c7   : > { %v8620_v11 = vpop.permute.xlu0 %3192 }
 0x4c8   : > { %10428 = vst [vmem:[#allocation185_spill] sm:$0xff] %v8620_v11  ;;  %v8624_v43 = vpop.permute.xlu1 %3147  ;;  %v8636_v63 = vpop.eup %6265 }
 0x4c9   : > { %10430 = vst [vmem:[#allocation187_spill] sm:$0xff] %v8624_v43  ;;  %3339 = vperm.xlu1 %5893, %v8622_v57   ;;  %10435 = vst [vmem:[#allocation192_spill] sm:$0xff] %v8636_v63  ;;  %v8643_v28 = vpop.eup %6267 }
 0x4ca   : > { %10438 = vst [vmem:[#allocation195_spill] sm:$0xff] %v8643_v28 }
 0x4cb   : > { %v8627_v30 = vpop.permute.xlu0 %3198 }
 0x4cc   : > { %10431 = vst [vmem:[#allocation188_spill] sm:$0xff] %v8627_v30  ;;  %v8631_v46 = vpop.permute.xlu1 %3153 }
 0x4cd   : > { %10433 = vst [vmem:[#allocation190_spill] sm:$0xff] %v8631_v46  ;;  %3345 = vperm.xlu1 %5893, %v8629_v39   ;;  %v8650_v39 = vpop.eup %6269 }
 0x4ce   : > { %10441 = vst [vmem:[#allocation198_spill] sm:$0xff] %v8650_v39 }
 0x4cf   : > { %v8634_v35 = vpop.permute.xlu0 %3204 }
 0x4d0   : > { %10434 = vst [vmem:[#allocation191_spill] sm:$0xff] %v8634_v35  ;;  %v8638_v24 = vpop.permute.xlu1 %3159 }
 0x4d1   : > { %10436 = vst [vmem:[#allocation193_spill] sm:$0xff] %v8638_v24  ;;  %3351 = vperm.xlu1 %5893, %v8636_v63  }
 0x4d3   : > { %v8641_v36 = vpop.permute.xlu0 %3210 }
 0x4d4   : > { %10437 = vst [vmem:[#allocation194_spill] sm:$0xff] %v8641_v36  ;;  %v8645_v3 = vpop.permute.xlu1 %3165 }
 0x4d5   : > { %10439 = vst [vmem:[#allocation196_spill] sm:$0xff] %v8645_v3  ;;  %3357 = vperm.xlu1 %5893, %v8643_v28  }
 0x4d7   : > { %v8648_v57 = vpop.permute.xlu0 %3216 }
 0x4d8   : > { %10440 = vst [vmem:[#allocation197_spill] sm:$0xff] %v8648_v57  ;;  %v8652_v50 = vpop.permute.xlu1 %3171 }
 0x4d9   : > { %10442 = vst [vmem:[#allocation199_spill] sm:$0xff] %v8652_v50  ;;  %3363 = vperm.xlu1 %5893, %v8650_v39  }
 0x4db   : > { %v8655_v35 = vpop.permute.xlu0 %3222 }
 0x4dc   : > { %10443 = vst [vmem:[#allocation200_spill] sm:$0xff] %v8655_v35  ;;  %v8657_v30 = vpop.permute.xlu1 %3177 }
 0x4dd   : > { %10444 = vst [vmem:[#allocation201_spill] sm:$0xff] %v8657_v30 }
 0x4df   : > { %v8659_v63 = vpop.permute.xlu0 %3228 }
 0x4e0   : > { %10445 = vst [vmem:[#allocation202_spill] sm:$0xff] %v8659_v63  ;;  %v8661_v36 = vpop.permute.xlu1 %3183 }
 0x4e1   : > { %10446 = vst [vmem:[#allocation203_spill] sm:$0xff] %v8661_v36 }
 0x4e3   : > { %v8663_v11 = vpop.permute.xlu0 %3234 }
 0x4e4   : > { %10447 = vst [vmem:[#allocation204_spill] sm:$0xff] %v8663_v11  ;;  %v8665_v3 = vpop.permute.xlu1 %3189 }
 0x4e5   : > { %10448 = vst [vmem:[#allocation205_spill] sm:$0xff] %v8665_v3 }
 0x4e7   : > { %v8667_v28 = vpop.permute.xlu0 %3240 }
 0x4e8   : > { %10449 = vst [vmem:[#allocation206_spill] sm:$0xff] %v8667_v28  ;;  %v8669_v57 = vpop.permute.xlu1 %3195 }
 0x4e9   : > { %10450 = vst [vmem:[#allocation207_spill] sm:$0xff] %v8669_v57 }
 0x4eb   : > { %v8671_v24 = vpop.permute.xlu0 %3246 }
 0x4ec   : > { %10451 = vst [vmem:[#allocation208_spill] sm:$0xff] %v8671_v24  ;;  %v8673_v50 = vpop.permute.xlu1 %3201 }
 0x4ed   : > { %10452 = vst [vmem:[#allocation209_spill] sm:$0xff] %v8673_v50 }
 0x4ef   : > { %v8675_v39 = vpop.permute.xlu0 %3252 }
 0x4f0   : > { %10453 = vst [vmem:[#allocation210_spill] sm:$0xff] %v8675_v39  ;;  %v8677_v35 = vpop.permute.xlu1 %3207 }
 0x4f1   : > { %10454 = vst [vmem:[#allocation211_spill] sm:$0xff] %v8677_v35 }
 0x4f3   : > { %v8679_v30 = vpop.permute.xlu0 %3258 }
 0x4f4   : > { %10455 = vst [vmem:[#allocation212_spill] sm:$0xff] %v8679_v30  ;;  %v8681_v63 = vpop.permute.xlu1 %3213 }
 0x4f5   : > { %10456 = vst [vmem:[#allocation213_spill] sm:$0xff] %v8681_v63 }
 0x4f7   : > { %v8683_v36 = vpop.permute.xlu0 %3264 }
 0x4f8   : > { %10457 = vst [vmem:[#allocation214_spill] sm:$0xff] %v8683_v36  ;;  %v8685_v11 = vpop.permute.xlu1 %3219 }
 0x4f9   : > { %10458 = vst [vmem:[#allocation215_spill] sm:$0xff] %v8685_v11 }
 0x4fb   : > { %v8687_v3 = vpop.permute.xlu0 %3270 }
 0x4fc   : > { %10459 = vst [vmem:[#allocation216_spill] sm:$0xff] %v8687_v3  ;;  %v8689_v28 = vpop.permute.xlu1 %3225 }
 0x4fd   : > { %10460 = vst [vmem:[#allocation217_spill] sm:$0xff] %v8689_v28  ;;  %v10471_v28 = vld [vmem:[#allocation108_spill] sm:$0xff] }
 0x4ff   : > { %v8693_v24 = vpop.permute.xlu0 %3276 }
 0x500   : > { %v8691_v57 = vpop.permute.xlu1 %3231  ;;  %10462 = vst [vmem:[#allocation219_spill] sm:$0xff] %v8693_v24  ;;  %v10472_v24 = vld [vmem:[#allocation111_spill] sm:$0xff] }
 0x501   : > { %10461 = vst [vmem:[#allocation218_spill] sm:$0xff] %v8691_v57  ;;  %v3451_v57 = vrot.slane %v8379_v26, %v10471_v28  ;;  %v10475_v26 = vld [vmem:[#allocation115_spill] sm:$0xff] }
 0x502   : > { %v3461_v46 = vrot.slane %v8393_v29, %v10475_v26 }
 0x503   : > { %v8697_v39 = vpop.permute.xlu0 %3282 }
 0x504   : > { %v8695_v50 = vpop.permute.xlu1 %3237  ;;  %10464 = vst [vmem:[#allocation221_spill] sm:$0xff] %v8697_v39  ;;  %v3368_v39 = vrot.slane %v8205_v25, %v10472_v24  ;;  %v3382_v25 = vrot.slane %v8233_v16, %v10475_v26  ;;  %v3540_v16 = vrot.slane %v8511_v55, %v10475_v26  ;;  %v3466_v55 = vrot.slane %v8286_v7, %v10477_v44 }
 0x505   : > { %10463 = vst [vmem:[#allocation220_spill] sm:$0xff] %v8695_v50  ;;  %v3372_v50 = vrot.slane %v8201_v13, %v10471_v28 }
 0x507   : > { %v8703_v63 = vpop.permute.xlu0 %3288 }
 0x508   : > { %v8699_v35 = vpop.permute.xlu1 %3243  ;;  %10467 = vst [vmem:[#allocation224_spill] sm:$0xff] %v8703_v63 }
 0x509   : > { %10465 = vst [vmem:[#allocation222_spill] sm:$0xff] %v8699_v35  ;;  %v10473_v35 = vld [vmem:[#allocation112_spill] sm:$0xff] }
 0x50a   : > { %v3377_v63 = vrot.slane %v8219_v34, %v10473_v35  ;;  %v3526_v34 = vrot.slane %v8375_v6, %v10472_v24  ;;  %v3535_v6 = vrot.slane %v8389_v59, %v10473_v35 }
 0x50b   : > { %v8707_v11 = vpop.permute.xlu0 %3294 }
 0x50c   : > { %v8701_v30 = vpop.permute.xlu1 %3249  ;;  %10469 = vst [vmem:[#allocation226_spill] sm:$0xff] %v8707_v11 }
 0x50d   : > { %10466 = vst [vmem:[#allocation223_spill] sm:$0xff] %v8701_v30  ;;  %v3447_v30 = vrot.slane %v8257_v0, %v10472_v24  ;;  %v3456_v0 = vrot.slane %v8271_v14, %v10473_v35  ;;  %v10478_v14 = vld [vmem:[#allocation119_spill] sm:$0xff] }
 0x50e   : > { %v3392_v43 = vrot.slane %v8261_v2, %v10478_v14 }
 0x50f   : > { %v8728_v13 = vpop.permute.xlu0 %3300 }
 0x510   : > { %v8705_v36 = vpop.permute.xlu1 %3255  ;;  %10476 = vst [vmem:[#allocation111_spill] sm:$0xff] %v8728_v13 }
 0x511   : > { %10468 = vst [vmem:[#allocation225_spill] sm:$0xff] %v8705_v36  ;;  %v3530_v36 = vrot.slane %v8497_v18, %v10471_v28  ;;  %v3373_v18 = vsel %vm1758_vm0, %v3372_v50, %v3368_v39 }
 0x514   : > { %v8709_v3 = vpop.permute.xlu1 %3261 }
 0x515   : > { %10470 = vst [vmem:[#allocation227_spill] sm:$0xff] %v8709_v3  ;;  %v3452_v3 = vsel %vm1758_vm0, %v3451_v57, %v3447_v30  ;;  %v3378_v30 = vsel %vm1765_vm1, %v3377_v63, %v3373_v18  ;;  %v3531_v57 = vsel %vm1758_vm0, %v3530_v36, %v3526_v34  ;;  %v8762_v34 = vpop.permute.xlu0 %3306 }
 0x516   : > { %v3457_v29 = vsel %vm1765_vm1, %v3456_v0, %v3452_v3  ;;  %v3383_v63 = vsel %vm1772_vm2, %v3382_v25, %v3378_v30  ;;  %v10479_v3 = vld [vmem:[#allocation120_spill] sm:$0xff]  ;;  %v10480_v0 = vld [vmem:[#allocation123_spill] sm:$0xff]  ;;  %v3536_v59 = vsel %vm1765_vm1, %v3535_v6, %v3531_v57 }
 0x517   : > { %v3462_v39 = vsel %vm1772_vm2, %v3461_v46, %v3457_v29  ;;  %v3397_v36 = vrot.slane %v8275_v27, %v10479_v3  ;;  %v3402_v2 = vrot.slane %v8290_v56, %v10480_v0  ;;  %v10481_v46 = vld [vmem:[#allocation124_spill] sm:$0xff]  ;;  %v3541_v18 = vsel %vm1772_vm2, %v3540_v16, %v3536_v59  ;;  %v10482_v16 = vld [vmem:[#allocation127_spill] sm:$0xff] }
 0x518   : > { %v8723_v11 = vpop.permute.xlu1 %3267  ;;  %v3467_v25 = vsel %vm1779_vm3, %v3466_v55, %v3462_v39  ;;  %v3550_v27 = vrot.slane %v8525_v61, %v10478_v14  ;;  %v3545_v56 = vrot.slane %v8404_v19, %v10477_v44  ;;  %v3481_v29 = vrot.slane %v8427_v37, %v10480_v0  ;;  %v10484_v59 = vld [vmem:[#allocation131_spill] sm:$0xff] }
 0x519   : > { %10474 = vst [vmem:[#allocation108_spill] sm:$0xff] %v8723_v11  ;;  %v3387_v11 = vrot.slane %v8247_v23, %v10477_v44  ;;  %v3471_v23 = vrot.slane %v8408_v17, %v10478_v14  ;;  %v3407_v17 = vrot.slane %v8309_v8, %v10481_v46  ;;  %v3476_v57 = vrot.slane %v8305_v33, %v10479_v3 }
 0x51a   : > { %v3412_v61 = vrot.slane %v8323_v4, %v10482_v16  ;;  %v3609_v19 = vrot.slane %v8597_v15, %v10471_v28  ;;  %v3555_v4 = vrot.slane %v8423_v32, %v10479_v3  ;;  %v3491_v55 = vrot.slane %v8441_v21, %v10482_v16 }
 0x51b   : > { %v3388_v50 = vsel %vm1779_vm3, %v3387_v11, %v3383_v63  ;;  %v3472_v30 = vsel %vm1786_vm4, %v3471_v23, %v3467_v25  ;;  %v3560_v63 = vrot.slane %v8539_v31, %v10480_v0  ;;  %v3605_v15 = vrot.slane %v8493_v20, %v10472_v24  ;;  %v10485_v25 = vld [vmem:[#allocation128_spill] sm:$0xff] }
 0x51c   : > { %v8744_v13 = vpop.permute.xlu1 %3273  ;;  %v3393_v11 = vsel %vm1786_vm4, %v3392_v43, %v3388_v50  ;;  %v3546_v43 = vsel %vm1779_vm3, %v3545_v56, %v3541_v18  ;;  %v3477_v23 = vsel %vm1793_vm5, %v3476_v57, %v3472_v30  ;;  %v8801_v50 = vpop.permute.xlu0 %3312  ;;  %v3417_v32 = vrot.slane %v8215_v53, %v10485_v25 }
 0x51d   : > { %v3398_v8 = vsel %vm1793_vm5, %v3397_v36, %v3393_v11  ;;  %v3551_v37 = vsel %vm1786_vm4, %v3550_v27, %v3546_v43  ;;  %v3482_v36 = vsel %vm1800_vm6, %v3481_v29, %v3477_v23  ;;  %v3610_v21 = vsel %vm1758_vm0, %v3609_v19, %v3605_v15  ;;  %v10492_v15 = vld [vmem:[#allocation187_spill] sm:$0xff] }
 0x51e   : > { %v3403_v6 = vsel %vm1800_vm6, %v3402_v2, %v3398_v8  ;;  %v3486_v2 = vrot.slane %v8319_v49, %v10481_v46  ;;  %v3556_v18 = vsel %vm1793_vm5, %v3555_v4, %v3551_v37  ;;  %v3619_v20 = vrot.slane %v8606_v47, %v10475_v26 }
 0x51f   : > { %v3408_v39 = vsel %vm1807_vm7, %v3407_v17, %v3403_v6  ;;  %v3422_v17 = vrot.slane %v8337_v51, %v10484_v59  ;;  %v3614_v49 = vrot.slane %v8507_v58, %v10473_v35  ;;  %v3561_v11 = vsel %vm1800_vm6, %v3560_v63, %v3556_v18 }
 0x520   : > { %v8770_v7 = vpop.permute.xlu1 %3279  ;;  %v3413_v31 = vsel %vm10483_vm8, %v3412_v61, %v3408_v39  ;;  %v3487_v27 = vsel %vm1807_vm7, %v3486_v2, %v3482_v36  ;;  %v3570_v51 = vrot.slane %v8551_v41, %v10482_v16  ;;  %vm10486_vm8 = vcmask 720512   ;;  %v8840_v43 = vpop.permute.xlu0 %3318 }
 0x521   : > { %v3418_v53 = vsel %vm10486_vm8, %v3417_v32, %v3413_v31  ;;  %v3565_v30 = vrot.slane %v8437_v9, %v10481_v46  ;;  %v3492_v29 = vsel %vm10487_vm11, %v3491_v55, %v3487_v27  ;;  %v3501_v47 = vrot.slane %v8455_v52, %v10484_v59  ;;  %vm10488_vm11 = vmmov %vm10486_vm8 }
 0x522   : > { %v3427_v58 = vrot.slane %v8229_v38, %v7402_v12  ;;  %v3496_v8 = vrot.slane %v8333_v10, %v10485_v25  ;;  %v3423_v41 = vsel %vm1828_vm10, %v3422_v17, %v3418_v53  ;;  %v3615_v57 = vsel %vm1765_vm1, %v3614_v49, %v3610_v21  ;;  %v10495_v17 = vld [vmem:[#allocation177_spill] sm:$0xff]  ;;  %v10496_v21 = vld [vmem:[#allocation136_spill] sm:$0xff]  ;;  %v10498_v49 = vld [vmem:[#allocation134_spill] sm:$0xff] }
 0x523   : > { %v3432_v61 = vrot.slane %v8351_v22, %v7399_v1  ;;  %v3566_v9 = vsel %vm1807_vm7, %v3565_v30, %v3561_v11  ;;  %v3620_v6 = vsel %vm1772_vm2, %v3619_v20, %v3615_v57  ;;  %v3629_v52 = vrot.slane %v8615_v5, %v10478_v14  ;;  %v10497_v20 = vld [vmem:[#allocation156_spill] sm:$0xff]  ;;  %v10499_v53 = vld [vmem:[#allocation165_spill] sm:$0xff] }
 0x524   : > { %v8792_v33 = vpop.permute.xlu1 %3285  ;;  %v3497_v38 = vsel %vm10488_vm11, %v3496_v8, %v3492_v29  ;;  %v3624_v10 = vrot.slane %v8521_v45, %v10477_v44  ;;  %vm10489_vm8 = vcmask 654912   ;;  %v3580_v39 = vrot.slane %v8563_v54, %v10484_v59  ;;  %v8881_v29 = vpop.permute.xlu0 %3324 }
 0x525   : > { %v3571_v19 = vsel %vm10489_vm8, %v3570_v51, %v3566_v9  ;;  %v3575_v23 = vrot.slane %v8451_v48, %v10485_v25  ;;  %v3502_v37 = vsel %vm1828_vm10, %v3501_v47, %v3497_v38  ;;  %v3511_v5 = vrot.slane %v8469_v62, %v7399_v1  ;;  %v10500_v47 = vld [vmem:[#allocation154_spill] sm:$0xff]  ;;  %v10503_v38 = vld [vmem:[#allocation171_spill] sm:$0xff] }
 0x526   : > { %v3437_v63 = vrot.slane %v8243_v40, %v7463_v60  ;;  %v3506_v45 = vrot.slane %v8347_v42, %v7402_v12  ;;  %vm10490_vm11 = vcmask 851712   ;;  %v3625_v54 = vsel %vm1779_vm3, %v3624_v10, %v3620_v6  ;;  %v10494_v40 = vld [vmem:[#allocation169_spill] sm:$0xff]  ;;  %v10502_v9 = vld [vmem:[#allocation190_spill] sm:$0xff] }
 0x527   : > { %v3428_v4 = vsel %vm10490_vm11, %v3427_v58, %v3423_v41  ;;  %vm10491_vm8 = vcmask 720512   ;;  %v3630_v48 = vsel %vm1786_vm4, %v3629_v52, %v3625_v54  ;;  %v3639_v2 = vrot.slane %v10492_v15, %v10480_v0  ;;  %vm10493_vm15 = vmmov %vm10490_vm11  ;;  %v10506_v54 = vld [vmem:[#allocation173_spill] sm:$0xff]  ;;  %v10508_v15 = vld [vmem:[#allocation178_spill] sm:$0xff] }
 0x528   : > { %v8820_v56 = vpop.permute.xlu1 %3291  ;;  %v3433_v36 = vsel %vm1842_vm12, %v3432_v61, %v3428_v4  ;;  %v3576_v55 = vsel %vm10491_vm8, %v3575_v23, %v3571_v19  ;;  %v3507_v62 = vsel %vm10493_vm15, %v3506_v45, %v3502_v37  ;;  %v3634_v31 = vrot.slane %v10494_v40, %v10479_v3  ;;  %vm10501_vm15 = vmmov %vm10490_vm11  ;;  %v10509_v40 = vld [vmem:[#allocation201_spill] sm:$0xff] }
 0x529   : > { %v3581_v42 = vsel %vm1828_vm10, %v3580_v39, %v3576_v55  ;;  %v3590_v32 = vrot.slane %v10495_v17, %v7399_v1  ;;  %v3442_v27 = vrot.slane %v10497_v20, %v10496_v21  ;;  %v3585_v11 = vrot.slane %v10498_v49, %v7402_v12  ;;  %v10504_v39 = vld [vmem:[#allocation180_spill] sm:$0xff]  ;;  %v10507_v55 = vld [vmem:[#allocation175_spill] sm:$0xff] }
 0x52a   : > { %v3512_v51 = vsel %vm1842_vm12, %v3511_v5, %v3507_v62  ;;  %v3521_v30 = vrot.slane %v10499_v53, %v10496_v21  ;;  %v3516_v58 = vrot.slane %v10500_v47, %v7463_v60  ;;  %v3635_v8 = vsel %vm1793_vm5, %v3634_v31, %v3630_v48  ;;  %v10513_v53 = vld [vmem:[#allocation82_spill] sm:$0xff] }
 0x52b   : > { %v3438_v41 = vsel %vm1849_vm13, %v3437_v63, %v3433_v36  ;;  %v3586_v57 = vsel %vm10501_vm15, %v3585_v11, %v3581_v42  ;;  %v3640_v61 = vsel %vm1800_vm6, %v3639_v2, %v3635_v8  ;;  %v3649_v6 = vrot.slane %v10502_v9, %v10482_v16  ;;  %v10505_v63 = vld [vmem:[#allocation137_spill] sm:$0xff]  ;;  %v8922_v11 = vpop.permute.xlu0 %3330  ;;  %v10514_v47 = vld [vmem:[#allocation118_spill] sm:$0xff] }
 0x52c   : > { %v8848_v22 = vpop.permute.xlu1 %3297  ;;  %v3517_v52 = vsel %vm1849_vm13, %v3516_v58, %v3512_v51  ;;  %v3644_v10 = vrot.slane %v10503_v38, %v10481_v46  ;;  %v3591_v19 = vsel %vm1842_vm12, %v3590_v32, %v3586_v57  ;;  %v3600_v23 = vrot.slane %v10504_v39, %v10496_v21  ;;  %v10511_v32 = vld [vmem:[#allocation193_spill] sm:$0xff]  ;;  %v10515_v57 = vld [vmem:[#allocation183_spill] sm:$0xff] }
 0x52d   : > { %v8900_v5 = vsel %vm1856_vm14, %v3442_v27, %v3438_v41  ;;  %v3595_v45 = vrot.slane %v10505_v63, %v7463_v60  ;;  %v8905_v4 = vsel %vm1856_vm14, %v3521_v30, %v3517_v52  ;;  %v3654_v36 = vrot.slane %v10506_v54, %v10485_v25  ;;  %v10512_v27 = vld [vmem:[#allocation217_spill] sm:$0xff]  ;;  %v10517_v52 = vld [vmem:[#allocation188_spill] sm:$0xff] }
 0x52e   : > { %v3664_v48 = vrot.slane %v10507_v55, %v7402_v12  ;;  %v3674_v2 = vrot.slane %v10508_v15, %v7463_v60  ;;  %v3645_v62 = vsel %vm1807_vm7, %v3644_v10, %v3640_v61  ;;  %v3688_v31 = vrot.slane %v10509_v40, %v10471_v28  ;;  %v10516_v9 = vld [vmem:[#allocation185_spill] sm:$0xff]  ;;  %v10518_v10 = vld [vmem:[#allocation200_spill] sm:$0xff]  ;;  %v10521_v55 = vld [vmem:[#allocation191_spill] sm:$0xff] }
 0x52f   : > { %v3596_v42 = vsel %vm1849_vm13, %v3595_v45, %v3591_v19  ;;  %vm10510_vm11 = vcmask 654912   ;;  %v3659_v20 = vrot.slane %v10511_v32, %v10484_v59  ;;  %v3767_v49 = vrot.slane %v10512_v27, %v10471_v28  ;;  %v10520_v45 = vld [vmem:[#allocation216_spill] sm:$0xff]  ;;  %v10522_v32 = vld [vmem:[#allocation218_spill] sm:$0xff] }
 0x530   : > { %v8872_v18 = vpop.permute.xlu1 %3303  ;;  %v3650_v17 = vsel %vm10510_vm11, %v3649_v6, %v3645_v62  ;;  %v8925_v51 = vsel %vm1856_vm14, %v3600_v23, %v3596_v42  ;;  %v3684_v30 = vrot.slane %v10513_v53, %v10472_v24  ;;  %v3693_v58 = vrot.slane %v10514_v47, %v10473_v35 }
 0x531   : > { %v3846_v8 = vrot.slane %v8744_v13, %v10471_v28  ;;  %v3703_v61 = vrot.slane %v10515_v57, %v10477_v44  ;;  %v3713_v6 = vrot.slane %v10516_v9, %v10479_v3  ;;  %v3723_v38 = vrot.slane %v10517_v52, %v10481_v46  ;;  %v10519_v13 = vld [vmem:[#allocation203_spill] sm:$0xff]  ;;  %v10543_v52 = vld [vmem:[#allocation225_spill] sm:$0xff] }
 0x532   : > { %v3763_v19 = vrot.slane %v10518_v10, %v10472_v24  ;;  %v3655_v39 = vsel %vm10491_vm8, %v3654_v36, %v3650_v17  ;;  %v3689_v23 = vsel %vm1758_vm0, %v3688_v31, %v3684_v30  ;;  %v3698_v63 = vrot.slane %v10519_v13, %v10475_v26  ;;  %v10523_v36 = vld [vmem:[#allocation194_spill] sm:$0xff] }
 0x533   : > { %v3842_v54 = vrot.slane %v10520_v45, %v10472_v24  ;;  %v3733_v62 = vrot.slane %v10521_v55, %v10485_v25  ;;  %v3660_v40 = vsel %vm1828_vm10, %v3659_v20, %v3655_v39  ;;  %v3777_v27 = vrot.slane %v10522_v32, %v10475_v26  ;;  %v10524_v31 = vld [vmem:[#allocation202_spill] sm:$0xff]  ;;  %v10525_v20 = vld [vmem:[#allocation219_spill] sm:$0xff] }
 0x534   : > { %v8897_v37 = vpop.permute.xlu1 %3309  ;;  %v3768_v42 = vsel %vm1758_vm0, %v3767_v49, %v3763_v19  ;;  %v3743_v17 = vrot.slane %v10523_v36, %v7402_v12  ;;  %v3772_v53 = vrot.slane %v10524_v31, %v10473_v35  ;;  %v3856_v47 = vrot.slane %v8770_v7, %v10475_v26  ;;  %v3337_v19 = vpop.permute.xlu0 %3336  ;;  %v10550_v55 = vld [vmem:[#allocation227_spill] sm:$0xff]  ;;  %v10559_v36 = vld [vmem:[#allocation108_spill] sm:$0xff] }
 0x535   : > { %v3847_v30 = vsel %vm1758_vm0, %v3846_v8, %v3842_v54  ;;  %v3694_v9 = vsel %vm1765_vm1, %v3693_v58, %v3689_v23  ;;  %v3851_v49 = vrot.slane %v10525_v20, %v10473_v35  ;;  %v3921_v10 = vrot.slane %v8840_v43, %v10472_v24  ;;  %v10526_v8 = vld [vmem:[#allocation205_spill] sm:$0xff]  ;;  %v10527_v23 = vld [vmem:[#allocation220_spill] sm:$0xff] }
 0x536   : > { %v3665_v13 = vsel %vm10501_vm15, %v3664_v48, %v3660_v40  ;;  %v3699_v45 = vsel %vm1772_vm2, %v3698_v63, %v3694_v9  ;;  %v3708_v54 = vrot.slane %v10526_v8, %v10478_v14  ;;  %v3773_v7 = vsel %vm1765_vm1, %v3772_v53, %v3768_v42 }
 0x537   : > { %v3778_v58 = vsel %vm1772_vm2, %v3777_v27, %v3773_v7  ;;  %v3787_v32 = vrot.slane %v10527_v23, %v10478_v14  ;;  %v3852_v31 = vsel %vm1765_vm1, %v3851_v49, %v3847_v30  ;;  %v3930_v48 = vrot.slane %v8881_v29, %v10473_v35  ;;  %v10529_v27 = vld [vmem:[#allocation196_spill] sm:$0xff]  ;;  %v10530_v30 = vld [vmem:[#allocation221_spill] sm:$0xff]  ;;  %v10531_v35 = vld [vmem:[#allocation207_spill] sm:$0xff] }
 0x538   : > { %v8933_v41 = vpop.permute.xlu1 %3315  ;;  %v3857_v63 = vsel %vm1772_vm2, %v3856_v47, %v3852_v31  ;;  %v3866_v40 = vrot.slane %v8792_v33, %v10478_v14  ;;  %v3669_v53 = vrot.slane %v10529_v27, %v7399_v1  ;;  %v3861_v9 = vrot.slane %v10530_v30, %v10477_v44  ;;  %v10535_v27 = vld [vmem:[#allocation209_spill] sm:$0xff] }
 0x539   : > { %v3718_v29 = vrot.slane %v10531_v35, %v10480_v0  ;;  %v3940_v23 = vrot.slane %v8922_v11, %v10477_v44  ;;  %v3876_v31 = vrot.slane %v8820_v56, %v10480_v0 }
 0x53c   : > { %v3322_v57 = vpop.permute.xlu1 %3321 }
 0x53d   : > { %v3925_v39 = vrot.slane %v3322_v57, %v10471_v28  ;;  %v10528_v28 = vld [vmem:[#allocation204_spill] sm:$0xff]  ;;  %v3704_v57 = vsel %vm1779_vm3, %v3703_v61, %v3699_v45  ;;  %v3862_v61 = vsel %vm1779_vm3, %v3861_v9, %v3857_v63  ;;  %v3343_v45 = vpop.permute.xlu0 %3342  ;;  %v3950_v9 = vrot.slane %v3337_v19, %v10479_v3 }
 0x53e   : > { %v3782_v43 = vrot.slane %v10528_v28, %v10477_v44  ;;  %v3709_v49 = vsel %vm1786_vm4, %v3708_v54, %v3704_v57  ;;  %v3728_v44 = vrot.slane %v10535_v27, %v10482_v16  ;;  %v10547_v27 = vld [vmem:[#allocation111_spill] sm:$0xff] }
 0x53f   : > { %v3926_v24 = vsel %vm1758_vm0, %v3925_v39, %v3921_v10  ;;  %v10532_v39 = vld [vmem:[#allocation222_spill] sm:$0xff]  ;;  %v3714_v28 = vsel %vm1793_vm5, %v3713_v6, %v3709_v49  ;;  %v3886_v49 = vrot.slane %v8848_v22, %v10482_v16  ;;  %vm10540_vm0 = vmmov %vm10510_vm11 }
 0x540   : > { %v3328_v42 = vpop.permute.xlu1 %3327  ;;  %v3783_v47 = vsel %vm1779_vm3, %v3782_v43, %v3778_v58  ;;  %v3931_v33 = vsel %vm1765_vm1, %v3930_v48, %v3926_v24  ;;  %v3797_v8 = vrot.slane %v10532_v39, %v10480_v0  ;;  %v3867_v58 = vsel %vm1786_vm4, %v3866_v40, %v3862_v61  ;;  %v10534_v43 = vld [vmem:[#allocation224_spill] sm:$0xff]  ;;  %v10541_v61 = vld [vmem:[#allocation211_spill] sm:$0xff]  ;;  %vm10542_vm1 = vmmov %vm10540_vm0 }
 0x541   : > { %v3935_v20 = vrot.slane %v3328_v42, %v10475_v26  ;;  %v3788_v10 = vsel %vm1786_vm4, %v3787_v32, %v3783_v47  ;;  %v10533_v26 = vld [vmem:[#allocation206_spill] sm:$0xff]  ;;  %v3670_v24 = vsel %vm1842_vm12, %v3669_v53, %v3665_v13  ;;  %v3871_v48 = vrot.slane %v10534_v43, %v10479_v3  ;;  %v10536_v13 = vld [vmem:[#allocation223_spill] sm:$0xff] }
 0x542   : > { %v3792_v54 = vrot.slane %v10533_v26, %v10479_v3  ;;  %v3719_v42 = vsel %vm1800_vm6, %v3718_v29, %v3714_v28  ;;  %v3807_v53 = vrot.slane %v10536_v13, %v10482_v16  ;;  %v10538_v29 = vld [vmem:[#allocation197_spill] sm:$0xff]  ;;  %v3738_v22 = vrot.slane %v10541_v61, %v10484_v59 }
 0x543   : > { %v3936_v7 = vsel %vm1772_vm2, %v3935_v20, %v3931_v33  ;;  %v3872_v6 = vsel %vm1793_vm5, %v3871_v48, %v3867_v58  ;;  %v3753_v47 = vrot.slane %v10538_v29, %v7463_v60  ;;  %v3724_v33 = vsel %vm1807_vm7, %v3723_v38, %v3719_v42  ;;  %vm10545_vm2 = vmmov %vm10540_vm0 }
 0x544   : > { %v3334_v32 = vpop.permute.xlu1 %3333  ;;  %v3793_v11 = vsel %vm1793_vm5, %v3792_v54, %v3788_v10  ;;  %v3941_v40 = vsel %vm1779_vm3, %v3940_v23, %v3936_v7  ;;  %v3877_v20 = vsel %vm1800_vm6, %v3876_v31, %v3872_v6  ;;  %v10539_v10 = vld [vmem:[#allocation226_spill] sm:$0xff]  ;;  %v3729_v19 = vsel %vm10540_vm0, %v3728_v44, %v3724_v33  ;;  %vm10546_vm3 = vmmov %vm10491_vm8  ;;  %v10556_v33 = vld [vmem:[#allocation215_spill] sm:$0xff] }
 0x545   : > { %v3945_v63 = vrot.slane %v3334_v32, %v10478_v14  ;;  %v3798_v56 = vsel %vm1800_vm6, %v3797_v8, %v3793_v11  ;;  %v10537_v14 = vld [vmem:[#allocation208_spill] sm:$0xff]  ;;  %v3881_v39 = vrot.slane %v10539_v10, %v10481_v46  ;;  %v3349_v8 = vpop.permute.xlu0 %3348  ;;  %v3817_v38 = vrot.slane %v10543_v52, %v10484_v59  ;;  %vm10558_vm8 = vmmov %vm10546_vm3 }
 0x546   : > { %v3802_v30 = vrot.slane %v10537_v14, %v10481_v46  ;;  %v3960_v32 = vrot.slane %v3343_v45, %v10481_v46  ;;  %v3896_v43 = vrot.slane %v8872_v18, %v10484_v59  ;;  %v3734_v42 = vsel %vm10546_vm3, %v3733_v62, %v3729_v19  ;;  %v10548_v18 = vld [vmem:[#allocation213_spill] sm:$0xff] }
 0x547   : > { %v3946_v57 = vsel %vm1786_vm4, %v3945_v63, %v3941_v40  ;;  %v3882_v23 = vsel %vm1807_vm7, %v3881_v39, %v3877_v20  ;;  %v3675_v63 = vsel %vm1849_vm13, %v3674_v2, %v3670_v24  ;;  %v3891_v44 = vrot.slane %v10547_v27, %v10485_v25  ;;  %vm10549_vm4 = vmmov %vm10546_vm3 }
 0x548   : > { %v3340_v35 = vpop.permute.xlu1 %3339  ;;  %v3803_v7 = vsel %vm1807_vm7, %v3802_v30, %v3798_v56  ;;  %v3951_v26 = vsel %vm1793_vm5, %v3950_v9, %v3946_v57  ;;  %v3887_v28 = vsel %vm10545_vm2, %v3886_v49, %v3882_v23  ;;  %v3739_v45 = vsel %vm1828_vm10, %v3738_v22, %v3734_v42  ;;  %vm10551_vm5 = vmmov %vm10546_vm3  ;;  %v10554_v9 = vld [vmem:[#allocation199_spill] sm:$0xff] }
 0x549   : > { %v3955_v3 = vrot.slane %v3340_v35, %v10480_v0  ;;  %v3808_v54 = vsel %vm10542_vm1, %v3807_v53, %v3803_v7  ;;  %v10544_v0 = vld [vmem:[#allocation210_spill] sm:$0xff]  ;;  %v3748_v11 = vrot.slane %v10548_v18, %v7399_v1  ;;  %v3827_v24 = vrot.slane %v10550_v55, %v7399_v1  ;;  %v3355_v56 = vpop.permute.xlu0 %3354  ;;  %v10569_v18 = vld [vmem:[#allocation27_spill] sm:$0xff]  ;;  %v10572_v55 = vld [vmem:[#allocation84_spill] sm:$0xff] }
 0x54a   : > { %v3812_v31 = vrot.slane %v10544_v0, %v10485_v25  ;;  %v3892_v62 = vsel %vm10551_vm5, %v3891_v44, %v3887_v28  ;;  %v3970_v6 = vrot.slane %v3349_v8, %v10485_v25  ;;  %v3906_v14 = vrot.slane %v8897_v37, %v7399_v1 }
 0x54b   : > { %v3956_v58 = vsel %vm1800_vm6, %v3955_v3, %v3951_v26  ;;  %vm10552_vm6 = vmmov %vm10540_vm0  ;;  %v3897_v57 = vsel %vm1828_vm10, %v3896_v43, %v3892_v62  ;;  %v3679_v20 = vrot.slane %v10554_v9, %v10496_v21  ;;  %v3901_v35 = vrot.slane %v8762_v34, %v7402_v12  ;;  %v10573_v62 = vld [vmem:[#allocation101_spill] sm:$0xff] }
 0x54c   : > { %v3346_v48 = vpop.permute.xlu1 %3345  ;;  %v3813_v40 = vsel %vm10549_vm4, %v3812_v31, %v3808_v54  ;;  %v3961_v15 = vsel %vm1807_vm7, %v3960_v32, %v3956_v58  ;;  %vm10555_vm7 = vmmov %vm10501_vm15  ;;  %v3758_v10 = vrot.slane %v10556_v33, %v10496_v21  ;;  %v3837_v3 = vrot.slane %v10559_v36, %v10496_v21  ;;  %v10583_v36 = vld [vmem:[#allocation46_spill] sm:$0xff] }
 0x54d   : > { %v3965_v46 = vrot.slane %v3346_v48, %v10482_v16  ;;  %v3818_v2 = vsel %vm1828_vm10, %v3817_v38, %v3813_v40  ;;  %v10553_v16 = vld [vmem:[#allocation212_spill] sm:$0xff]  ;;  %v3744_v49 = vsel %vm10555_vm7, %v3743_v17, %v3739_v45  ;;  %vm10557_vm11 = vmmov %vm10555_vm7  ;;  %v3980_v61 = vrot.slane %v3355_v56, %v7402_v12  ;;  %v3361_v23 = vpop.permute.xlu0 %3360 }
 0x54e   : > { %v3822_v53 = vrot.slane %v10553_v16, %v7402_v12  ;;  %v3749_v25 = vsel %vm1842_vm12, %v3748_v11, %v3744_v49  ;;  %vm10560_vm15 = vmmov %vm10555_vm7  ;;  %v3916_v7 = vrot.slane %v8933_v41, %v10496_v21  ;;  %v3680_v54 = vsel %vm1856_vm14, %v3679_v20, %v3675_v63  ;;  %v10570_v11 = vld [vmem:[#allocation36_spill] sm:$0xff]  ;;  %v10578_v20 = vld [vmem:[#allocation126_spill] sm:$0xff] }
 0x54f   : > { %v3966_v13 = vsel %vm10552_vm6, %v3965_v46, %v3961_v15  ;;  %v3902_v17 = vsel %vm10560_vm15, %v3901_v35, %v3897_v57  ;;  %v3754_v52 = vsel %vm1849_vm13, %v3753_v47, %v3749_v25  ;;  %v3911_v38 = vrot.slane %v8801_v50, %v7463_v60  ;;  %vm10563_vm0 = vmmov %vm10555_vm7  ;;  %v10571_v15 = vld [vmem:[#allocation122_spill] sm:$0xff]  ;;  %v10576_v57 = vld [vmem:[#allocation100_spill] sm:$0xff] }
 0x550   : > { %v3352_v30 = vpop.permute.xlu1 %3351  ;;  %v3823_v37 = vsel %vm10557_vm11, %v3822_v53, %v3818_v2  ;;  %v3971_v39 = vsel %vm10558_vm8, %v3970_v6, %v3966_v13  ;;  %v3907_v22 = vsel %vm1842_vm12, %v3906_v14, %v3902_v17  ;;  %v3759_v0 = vsel %vm1856_vm14, %v3758_v10, %v3754_v52  ;;  %v10574_v13 = vld [vmem:[#allocation98_spill] sm:$0xff]  ;;  %v10575_v53 = vld [vmem:[#allocation32_spill] sm:$0xff]  ;;  %v10580_v25 = vld [vmem:[#allocation125_spill] sm:$0xff] }
 0x551   : > { %v3975_v29 = vrot.slane %v3352_v30, %v10484_v59  ;;  %v3828_v8 = vsel %vm1842_vm12, %v3827_v24, %v3823_v37  ;;  %v10561_v59 = vld [vmem:[#allocation214_spill] sm:$0xff]  ;;  %vm10564_vm1 = vcmask 1042434   ;;  %v3912_v28 = vsel %vm1849_vm13, %v3911_v38, %v3907_v22  ;;  %v10577_v30 = vld [vmem:[#allocation29_spill] sm:$0xff]  ;;  %v10581_v10 = vld [vmem:[#allocation44_spill] sm:$0xff] }
 0x552   : > { %v3832_v19 = vrot.slane %v10561_v59, %v7463_v60  ;;  %vm10565_vm2 = vcmask 1043459   ;;  %v3990_v43 = vrot.slane %v3361_v23, %v7463_v60  ;;  %vm10566_vm3 = vcmask 1045509   ;;  %v10579_v35 = vld [vmem:[#allocation42_spill] sm:$0xff]  ;;  %v10584_v17 = vld [vmem:[#allocation31_spill] sm:$0xff]  ;;  %v10585_v59 = vld [vmem:[#allocation37_spill] sm:$0xff] }
 0x553   : > { %v3976_v34 = vsel %vm1828_vm10, %v3975_v29, %v3971_v39  ;;  %vm10562_vm10 = vcmask 1041409   ;;  %vm10568_vm4 = vcmask 1047559   ;;  %v10582_v39 = vld [vmem:[#allocation30_spill] sm:$0xff]  ;;  %v10589_v38 = vld [vmem:[#allocation53_spill] sm:$0xff]  ;;  %vm10711_vm5 = vmmov %vm10565_vm2 }
 0x554   : > { %v3358_v26 = vpop.permute.xlu1 %3357  ;;  %v3997_v12 = vsel %vm10562_vm10, %v8905_v4, %v8900_v5  ;;  %v3833_v31 = vsel %vm1849_vm13, %v3832_v19, %v3828_v8  ;;  %v3981_v41 = vsel %vm10563_vm0, %v3980_v61, %v3976_v34  ;;  %v3917_v4 = vsel %vm1856_vm14, %v3916_v7, %v3912_v28  ;;  %v10586_v61 = vld [vmem:[#allocation33_spill] sm:$0xff]  ;;  %v10587_v7 = vld [vmem:[#allocation51_spill] sm:$0xff]  ;;  %vm10712_vm6 = vmmov %vm10566_vm3 }
 0x555   : > { %v3985_v58 = vrot.slane %v3358_v26, %v7399_v1  ;;  %v3998_v32 = vsel %vm10564_vm1, %v8925_v51, %v3997_v12  ;;  %v3838_v47 = vsel %vm1856_vm14, %v3837_v3, %v3833_v31  ;;  %v10594_v28 = vld [vmem:[#allocation59_spill] sm:$0xff] }
 0x556   : > { %v3999_v1 = vsel %vm10565_vm2, %v3680_v54, %v3998_v32  ;;  %v10588_v54 = vld [vmem:[#allocation35_spill] sm:$0xff] }
 0x557   : > { %v3986_v50 = vsel %vm1842_vm12, %v3985_v58, %v3981_v41  ;;  %v4000_v63 = vsel %vm2417_vm9, %v3759_v0, %v3999_v1  ;;  %vm10567_vm12 = vcmask 1046534   ;;  %v10590_v58 = vld [vmem:[#allocation85_spill] sm:$0xff]  ;;  %v10591_v0 = vld [vmem:[#allocation34_spill] sm:$0xff]  ;;  %v10592_v41 = vld [vmem:[#allocation55_spill] sm:$0xff] }
 0x558   : > { %v3364_v5 = vpop.permute.xlu1 %3363  ;;  %v3991_v42 = vsel %vm1849_vm13, %v3990_v43, %v3986_v50  ;;  %v4001_v51 = vsel %vm10566_vm3, %v3838_v47, %v4000_v63  ;;  %v10593_v47 = vld [vmem:[#allocation38_spill] sm:$0xff]  ;;  %v10597_v63 = vld [vmem:[#allocation57_spill] sm:$0xff]  ;;  %vm10708_vm13 = vmmov %vm10562_vm10 }
 0x559   : > { %v3995_v48 = vrot.slane %v3364_v5, %v10496_v21  ;;  %v4002_v44 = vsel %vm10567_vm12, %v3917_v4, %v4001_v51  ;;  %v10595_v43 = vld [vmem:[#allocation54_spill] sm:$0xff]  ;;  %v10596_v4 = vld [vmem:[#allocation121_spill] sm:$0xff]  ;;  %v10598_v51 = vld [vmem:[#allocation39_spill] sm:$0xff] }
 0x55a   : > { %vm10713_vm7 = vmmov %vm10567_vm12 }
 0x55b   : > { %v3996_v27 = vsel %vm1856_vm14, %v3995_v48, %v3991_v42  ;;  %vm10709_vm14 = vmmov %vm10564_vm1 }
 0x55c   : > { %v4003_v46 = vsel %vm10568_vm4, %v3996_v27, %v4002_v44  ;;  %v10599_v44 = vld [vmem:[#allocation58_spill] sm:$0xff] }
 0x55d   : > { %4005 = vadd.xlane.f32.xlu0 %v4003_v46 }
 0x5ea   : > { %v4006_v45 = vpop.xlane.xlu0 %4005 }
 0x5eb   : > { %6271 = vrcp.f32 %v4006_v45  ;;  %v10600_v45 = vld [vmem:[#allocation148_spill] sm:$0xff] }
 0x5f5   : > { %v9132_v60 = vpop.eup %6271 }
 0x5f6   : > { %v4012_v21 = vrot.slane %v9132_v60, %v10569_v18  ;;  %v9142_v16 = vrot.slane %v9132_v60, %v10574_v13  ;;  %v9170_v31 = vrot.slane %v9132_v60, %v10591_v0  ;;  %v9177_v1 = vrot.slane %v9132_v60, %v10594_v28 }
 0x5f7   : > { %v9187_v46 = vrot.slane %v9132_v60, %v10599_v44 }
 0x5f8   : > { %v4057_v40 = vmul.f32 %v10570_v11, %v4012_v21  ;;  %v4049_v2 = vmul.f32 %v10571_v15, %v4012_v21  ;;  %v4063_v24 = vmul.f32 %v10572_v55, %v4012_v21  ;;  %v4050_v56 = vmul.f32 %v10573_v62, %v4012_v21  ;;  %v10601_v11 = vld [vmem:[#allocation40_spill] sm:$0xff]  ;;  %v10602_v15 = vld [vmem:[#allocation142_spill] sm:$0xff]  ;;  %v10604_v62 = vld [vmem:[#allocation41_spill] sm:$0xff] }
 0x5f9   : > { %v4065_v6 = vmul.f32 %v10575_v53, %v9142_v16  ;;  %v4051_v14 = vmul.f32 %v10576_v57, %v4012_v21  ;;  %v4067_v9 = vmul.f32 %v10577_v30, %v9142_v16  ;;  %v4052_v49 = vmul.f32 %v10578_v20, %v4012_v21  ;;  %v10603_v55 = vld [vmem:[#allocation78_spill] sm:$0xff]  ;;  %v10605_v53 = vld [vmem:[#allocation91_spill] sm:$0xff]  ;;  %v10609_v20 = vld [vmem:[#allocation113_spill] sm:$0xff] }
 0x5fa   : > { %4347 = vperm.xlu0 %5894, %v4057_v40   ;;  %4307 = vperm.xlu1 %5893, %v4049_v2   ;;  %v4069_v29 = vmul.f32 %v10579_v35, %v9142_v16  ;;  %v4053_v33 = vmul.f32 %v10580_v25, %v4012_v21  ;;  %v4071_v37 = vmul.f32 %v10581_v10, %v9142_v16  ;;  %v10606_v57 = vld [vmem:[#allocation43_spill] sm:$0xff]  ;;  %v10610_v35 = vld [vmem:[#allocation61_spill] sm:$0xff] }
 0x5fb   : > { %v4054_v8 = vmul.f32 %v10582_v39, %v4012_v21  ;;  %v4073_v3 = vmul.f32 %v10583_v36, %v9142_v16  ;;  %v4055_v34 = vmul.f32 %v10584_v17, %v4012_v21  ;;  %v4075_v19 = vmul.f32 %v10585_v59, %v9142_v16  ;;  %v10611_v25 = vld [vmem:[#allocation141_spill] sm:$0xff]  ;;  %v10612_v10 = vld [vmem:[#allocation63_spill] sm:$0xff] }
 0x5fc   : > { %v4056_v22 = vmul.f32 %v10586_v61, %v4012_v21  ;;  %v4077_v26 = vmul.f32 %v10587_v7, %v9142_v16  ;;  %v4058_v52 = vmul.f32 %v10588_v54, %v4012_v21  ;;  %v4079_v23 = vmul.f32 %v10589_v38, %v9142_v16  ;;  %v10614_v36 = vld [vmem:[#allocation99_spill] sm:$0xff]  ;;  %v10615_v17 = vld [vmem:[#allocation65_spill] sm:$0xff] }
 0x5fd   : > { %v4059_v12 = vmul.f32 %v10590_v58, %v4012_v21  ;;  %v4081_v32 = vmul.f32 %v10592_v41, %v9170_v31  ;;  %v4060_v50 = vmul.f32 %v10593_v47, %v4012_v21  ;;  %v4097_v5 = vmul.f32 %v10595_v43, %v9177_v1  ;;  %v10616_v59 = vld [vmem:[#allocation45_spill] sm:$0xff]  ;;  %v10617_v61 = vld [vmem:[#allocation67_spill] sm:$0xff] }
 0x5fe   : > { %4377 = vperm.xlu0 %5894, %v4063_v24   ;;  %4312 = vperm.xlu1 %5893, %v4050_v56   ;;  %v4061_v48 = vmul.f32 %v10596_v4, %v4012_v21  ;;  %v4083_v42 = vmul.f32 %v10597_v63, %v9170_v31  ;;  %v4062_v27 = vmul.f32 %v10598_v51, %v4012_v21  ;;  %v10627_v63 = vld [vmem:[#allocation92_spill] sm:$0xff]  ;;  %v10628_v51 = vld [vmem:[#allocation47_spill] sm:$0xff] }
 0x5ff   : > { %v4114_v18 = vmul.f32 %v10600_v45, %v9187_v46  ;;  %v4064_v40 = vmul.f32 %v10601_v11, %v4012_v21  ;;  %v9194_v2 = vrot.slane %v9132_v60, %v10602_v15  ;;  %v4066_v56 = vmul.f32 %v10604_v62, %v9142_v16  ;;  %v10629_v45 = vld [vmem:[#allocation56_spill] sm:$0xff]  ;;  %v10630_v11 = vld [vmem:[#allocation159_spill] sm:$0xff] }
 0x600   : > { %v4068_v21 = vmul.f32 %v10606_v57, %v9142_v16  ;;  %v10632_v62 = vld [vmem:[#allocation160_spill] sm:$0xff] }
 0x601   : > { %v4129_v24 = vmul.f32 %v10603_v55, %v9194_v2  ;;  %v10631_v55 = vld [vmem:[#allocation157_spill] sm:$0xff]  ;;  %v10634_v57 = vld [vmem:[#allocation64_spill] sm:$0xff] }
 0x602   : > { %4387 = vperm.xlu0 %5894, %v4065_v6   ;;  %4317 = vperm.xlu1 %5893, %v4051_v14   ;;  %v4084_v6 = vmul.f32 %v10605_v53, %v9170_v31  ;;  %v10607_v14 = vld [vmem:[#allocation26_spill] sm:$0xff]  ;;  %v10633_v53 = vld [vmem:[#allocation81_spill] sm:$0xff] }
 0x603   : > { %v10608_v30 = vsub.s32 6, %v10607_v14  ;;  %v10613_v39 = vsub.s32 7, %v10607_v14  ;;  %v10635_v14 = vld [vmem:[#allocation138_spill] sm:$0xff] }
 0x606   : > { %4397 = vperm.xlu0 %5894, %v4067_v9   ;;  %4322 = vperm.xlu1 %5893, %v4052_v49   ;;  %v9207_v9 = vrot.slane %v9132_v60, %v10608_v30 }
 0x608   : > { %v4145_v49 = vmul.f32 %v10609_v20, %v9207_v9  ;;  %v4146_v30 = vmul.f32 %v10635_v14, %v9207_v9  ;;  %v10636_v20 = vld [vmem:[#allocation167_spill] sm:$0xff] }
 0x60a   : > { %4407 = vperm.xlu0 %5894, %v4069_v29   ;;  %4327 = vperm.xlu1 %5893, %v4053_v33   ;;  %v4070_v29 = vmul.f32 %v10610_v35, %v9142_v16  ;;  %v4100_v33 = vmul.f32 %v10611_v25, %v9177_v1  ;;  %v10637_v35 = vld [vmem:[#allocation80_spill] sm:$0xff] }
 0x60b   : > { %v10638_v25 = vld [vmem:[#allocation152_spill] sm:$0xff] }
 0x60e   : > { %4417 = vperm.xlu0 %5894, %v4071_v37   ;;  %4332 = vperm.xlu1 %5893, %v4054_v8   ;;  %v4072_v37 = vmul.f32 %v10612_v10, %v9142_v16  ;;  %v9220_v8 = vrot.slane %v9132_v60, %v10613_v39  ;;  %v10618_v60 = vld [vmem:[#allocation117_spill] sm:$0xff]  ;;  %v10640_v39 = vld [vmem:[#allocation48_spill] sm:$0xff] }
 0x60f   : > { %v4147_v7 = vmul.f32 %v10618_v60, %v9207_v9  ;;  %v10639_v10 = vld [vmem:[#allocation181_spill] sm:$0xff] }
 0x612   : > { %4427 = vperm.xlu0 %5894, %v4073_v3   ;;  %4337 = vperm.xlu1 %5893, %v4055_v34   ;;  %v4161_v3 = vmul.f32 %v10614_v36, %v9220_v8  ;;  %v4074_v34 = vmul.f32 %v10615_v17, %v9142_v16  ;;  %v4089_v36 = vmul.f32 %v10640_v39, %v9170_v31 }
 0x616   : > { %4437 = vperm.xlu0 %5894, %v4075_v19   ;;  %4342 = vperm.xlu1 %5893, %v4056_v22   ;;  %v4085_v19 = vmul.f32 %v10616_v59, %v9170_v31  ;;  %v4076_v22 = vmul.f32 %v10617_v61, %v9142_v16 }
 0x61a   : > { %4447 = vperm.xlu0 %5894, %v4077_v26   ;;  %4352 = vperm.xlu1 %5893, %v4058_v52   ;;  %v10619_v26 = vld [vmem:[#allocation69_spill] sm:$0xff]  ;;  %v10620_v52 = vld [vmem:[#allocation158_spill] sm:$0xff] }
 0x61b   : > { %v4078_v54 = vmul.f32 %v10619_v26, %v9142_v16  ;;  %v4132_v38 = vmul.f32 %v10620_v52, %v9194_v2 }
 0x61e   : > { %4457 = vperm.xlu0 %5894, %v4079_v23   ;;  %4357 = vperm.xlu1 %5893, %v4059_v12   ;;  %v10621_v23 = vld [vmem:[#allocation87_spill] sm:$0xff]  ;;  %v10622_v12 = vld [vmem:[#allocation60_spill] sm:$0xff] }
 0x61f   : > { %v4080_v58 = vmul.f32 %v10621_v23, %v9142_v16  ;;  %v4086_v41 = vmul.f32 %v10622_v12, %v9170_v31  ;;  %v10626_v16 = vld [vmem:[#allocation150_spill] sm:$0xff] }
 0x622   : > { %4467 = vperm.xlu0 %5894, %v4081_v32   ;;  %4362 = vperm.xlu1 %5893, %v4060_v50   ;;  %v10623_v32 = vld [vmem:[#allocation89_spill] sm:$0xff]  ;;  %v10624_v50 = vld [vmem:[#allocation166_spill] sm:$0xff] }
 0x623   : > { %v4082_v47 = vmul.f32 %v10623_v32, %v9170_v31  ;;  %v4148_v43 = vmul.f32 %v10624_v50, %v9207_v9 }
 0x626   : > { %4547 = vperm.xlu0 %5894, %v4097_v5   ;;  %4367 = vperm.xlu1 %5893, %v4061_v48   ;;  %v10625_v5 = vld [vmem:[#allocation79_spill] sm:$0xff]  ;;  %v4133_v48 = vmul.f32 %v10626_v16, %v9194_v2 }
 0x627   : > { %v4098_v4 = vmul.f32 %v10625_v5, %v9177_v1 }
 0x62a   : > { %4477 = vperm.xlu0 %5894, %v4083_v42   ;;  %4372 = vperm.xlu1 %5893, %v4062_v27   ;;  %v4113_v42 = vmul.f32 %v10627_v63, %v9187_v46  ;;  %v4087_v27 = vmul.f32 %v10628_v51, %v9170_v31 }
 0x62e   : > { %4632 = vperm.xlu0 %5894, %v4114_v18   ;;  %4382 = vperm.xlu1 %5893, %v4064_v40   ;;  %v4099_v18 = vmul.f32 %v10629_v45, %v9177_v1  ;;  %v4149_v40 = vmul.f32 %v10630_v11, %v9207_v9 }
 0x632   : > { %4707 = vperm.xlu0 %5894, %v4129_v24   ;;  %4392 = vperm.xlu1 %5893, %v4066_v56   ;;  %v4130_v24 = vmul.f32 %v10631_v55, %v9194_v2  ;;  %v4134_v56 = vmul.f32 %v10632_v62, %v9194_v2 }
 0x636   : > { %4482 = vperm.xlu0 %5894, %v4084_v6   ;;  %4402 = vperm.xlu1 %5893, %v4068_v21   ;;  %v4115_v6 = vmul.f32 %v10633_v53, %v9187_v46  ;;  %v4088_v21 = vmul.f32 %v10634_v57, %v9170_v31 }
 0x63a   : > { %4787 = vperm.xlu0 %5894, %v4145_v49   ;;  %4412 = vperm.xlu1 %5893, %v4070_v29   ;;  %v4150_v49 = vmul.f32 %v10636_v20, %v9207_v9  ;;  %v4131_v29 = vmul.f32 %v10637_v35, %v9194_v2 }
 0x63e   : > { %4562 = vperm.xlu0 %5894, %v4100_v33   ;;  %4422 = vperm.xlu1 %5893, %v4072_v37   ;;  %v4135_v33 = vmul.f32 %v10638_v25, %v9194_v2  ;;  %v4162_v37 = vmul.f32 %v10639_v10, %v9220_v8 }
 0x642   : > { %4867 = vperm.xlu0 %5894, %v4161_v3   ;;  %4432 = vperm.xlu1 %5893, %v4074_v34   ;;  %v10641_v3 = vld [vmem:[#allocation149_spill] sm:$0xff] }
 0x643   : > { %v4116_v17 = vmul.f32 %v10641_v3, %v9187_v46  ;;  %v10642_v34 = vld [vmem:[#allocation161_spill] sm:$0xff] }
 0x644   : > { %v4151_v59 = vmul.f32 %v10642_v34, %v9207_v9 }
 0x646   : > { %4487 = vperm.xlu0 %5894, %v4085_v19   ;;  %4442 = vperm.xlu1 %5893, %v4076_v22   ;;  %v10643_v19 = vld [vmem:[#allocation93_spill] sm:$0xff] }
 0x647   : > { %v4101_v61 = vmul.f32 %v10643_v19, %v9177_v1 }
 0x64a   : > { %4797 = vperm.xlu0 %5894, %v4147_v7   ;;  %4452 = vperm.xlu1 %5893, %v4078_v54   ;;  %v10644_v7 = vld [vmem:[#allocation162_spill] sm:$0xff]  ;;  %v10645_v54 = vld [vmem:[#allocation139_spill] sm:$0xff] }
 0x64b   : > { %v4136_v26 = vmul.f32 %v10644_v7, %v9194_v2  ;;  %v4163_v52 = vmul.f32 %v10645_v54, %v9220_v8 }
 0x64e   : > { %4722 = vperm.xlu0 %5894, %v4132_v38   ;;  %4462 = vperm.xlu1 %5893, %v4080_v58   ;;  %v10646_v58 = vld [vmem:[#allocation71_spill] sm:$0xff] }
 0x64f   : > { %v4090_v12 = vmul.f32 %v10646_v58, %v9170_v31 }
 0x652   : > { %4492 = vperm.xlu0 %5894, %v4086_v41   ;;  %4472 = vperm.xlu1 %5893, %v4082_v47   ;;  %v10647_v41 = vld [vmem:[#allocation143_spill] sm:$0xff] }
 0x653   : > { %v4117_v32 = vmul.f32 %v10647_v41, %v9187_v46 }
 0x656   : > { %4802 = vperm.xlu0 %5894, %v4148_v43   ;;  %4552 = vperm.xlu1 %5893, %v4098_v4   ;;  %v10648_v43 = vld [vmem:[#allocation170_spill] sm:$0xff]  ;;  %v10649_v4 = vld [vmem:[#allocation144_spill] sm:$0xff] }
 0x657   : > { %v4152_v5 = vmul.f32 %v10648_v43, %v9207_v9  ;;  %v4102_v16 = vmul.f32 %v10649_v4, %v9177_v1 }
 0x65a   : > { %4727 = vperm.xlu0 %5894, %v4133_v48   ;;  %4627 = vperm.xlu1 %5893, %v4113_v42   ;;  %v10650_v42 = vld [vmem:[#allocation130_spill] sm:$0xff] }
 0x65b   : > { %v4137_v51 = vmul.f32 %v10650_v42, %v9194_v2 }
 0x65e   : > { %4497 = vperm.xlu0 %5894, %v4087_v27   ;;  %4557 = vperm.xlu1 %5893, %v4099_v18   ;;  %v10651_v27 = vld [vmem:[#allocation182_spill] sm:$0xff] }
 0x65f   : > { %v4164_v45 = vmul.f32 %v10651_v27, %v9220_v8 }
 0x662   : > { %4807 = vperm.xlu0 %5894, %v4149_v40   ;;  %4712 = vperm.xlu1 %5893, %v4130_v24   ;;  %v10652_v40 = vld [vmem:[#allocation49_spill] sm:$0xff]  ;;  %v10653_v24 = vld [vmem:[#allocation151_spill] sm:$0xff] }
 0x663   : > { %v4091_v55 = vmul.f32 %v10652_v40, %v9170_v31  ;;  %v4118_v62 = vmul.f32 %v10653_v24, %v9187_v46 }
 0x666   : > { %4732 = vperm.xlu0 %5894, %v4134_v56   ;;  %4637 = vperm.xlu1 %5893, %v4115_v6   ;;  %v10654_v6 = vld [vmem:[#allocation107_spill] sm:$0xff] }
 0x667   : > { %v4153_v57 = vmul.f32 %v10654_v6, %v9207_v9 }
 0x66a   : > { %4502 = vperm.xlu0 %5894, %v4088_v21   ;;  %4792 = vperm.xlu1 %5893, %v4146_v30   ;;  %v10655_v21 = vld [vmem:[#allocation62_spill] sm:$0xff] }
 0x66b   : > { %v4103_v14 = vmul.f32 %v10655_v21, %v9177_v1 }
 0x66e   : > { %4812 = vperm.xlu0 %5894, %v4150_v49   ;;  %4717 = vperm.xlu1 %5893, %v4131_v29   ;;  %v10656_v49 = vld [vmem:[#allocation129_spill] sm:$0xff]  ;;  %v10657_v29 = vld [vmem:[#allocation140_spill] sm:$0xff] }
 0x66f   : > { %v4138_v35 = vmul.f32 %v10656_v49, %v9194_v2  ;;  %v4165_v25 = vmul.f32 %v10657_v29, %v9220_v8 }
 0x672   : > { %4737 = vperm.xlu0 %5894, %v4135_v33   ;;  %4872 = vperm.xlu1 %5893, %v4162_v37   ;;  %v10658_v37 = vld [vmem:[#allocation73_spill] sm:$0xff] }
 0x673   : > { %v4092_v39 = vmul.f32 %v10658_v37, %v9170_v31  ;;  %v4194_v37 = vld [vmem:[#allocation4 + $0x88] sm:$0xff] }
 0x676   : > { %4507 = vperm.xlu0 %5894, %v4089_v36   ;;  %4642 = vperm.xlu1 %5893, %v4116_v17   ;;  %v10659_v36 = vld [vmem:[#allocation145_spill] sm:$0xff] }
 0x677   : > { %v4119_v3 = vmul.f32 %v10659_v36, %v9187_v46 }
 0x679   : > { %v9282_v22 = vpop.permute.xlu0 %4347  ;;  %v9284_v60 = vpop.permute.xlu1 %4307 }
 0x67a   : > { %4817 = vperm.xlu0 %5894, %v4151_v59   ;;  %4567 = vperm.xlu1 %5893, %v4101_v61   ;;  %v10660_v59 = vld [vmem:[#allocation172_spill] sm:$0xff]  ;;  %v10661_v61 = vld [vmem:[#allocation146_spill] sm:$0xff] }
 0x67b   : > { %v4154_v19 = vmul.f32 %v10660_v59, %v9207_v9  ;;  %v4104_v7 = vmul.f32 %v10661_v61, %v9177_v1 }
 0x67d   : > { %v9290_v38 = vpop.permute.xlu0 %4377  ;;  %v9292_v23 = vpop.permute.xlu1 %4312 }
 0x67e   : > { %4742 = vperm.xlu0 %5894, %v4136_v26   ;;  %4877 = vperm.xlu1 %5893, %v4163_v52   ;;  %v10662_v52 = vld [vmem:[#allocation133_spill] sm:$0xff] }
 0x67f   : > { %v4139_v58 = vmul.f32 %v10662_v52, %v9194_v2 }
 0x681   : > { %v9298_v47 = vpop.permute.xlu0 %4387  ;;  %v9300_v50 = vpop.permute.xlu1 %4317 }
 0x682   : > { %4512 = vperm.xlu0 %5894, %v4090_v12   ;;  %4647 = vperm.xlu1 %5893, %v4117_v32   ;;  %v10663_v12 = vld [vmem:[#allocation184_spill] sm:$0xff] }
 0x683   : > { %v4166_v41 = vmul.f32 %v10663_v12, %v9220_v8  ;;  %v4196_v12 = vld [vmem:[#allocation4 + $0x98] sm:$0xff] }
 0x685   : > { %v9306_v48 = vpop.permute.xlu0 %4397  ;;  %v9308_v63 = vpop.permute.xlu1 %4322 }
 0x686   : > { %4822 = vperm.xlu0 %5894, %v4152_v5   ;;  %4572 = vperm.xlu1 %5893, %v4102_v16   ;;  %v10664_v5 = vld [vmem:[#allocation50_spill] sm:$0xff]  ;;  %v10665_v16 = vld [vmem:[#allocation153_spill] sm:$0xff] }
 0x687   : > { %v4093_v4 = vmul.f32 %v10664_v5, %v9170_v31  ;;  %v4120_v42 = vmul.f32 %v10665_v16, %v9187_v46 }
 0x689   : > { %v9314_v18 = vpop.permute.xlu0 %4407  ;;  %v9316_v11 = vpop.permute.xlu1 %4327 }
 0x68a   : > { %4747 = vperm.xlu0 %5894, %v4137_v51   ;;  %4882 = vperm.xlu1 %5893, %v4164_v45   ;;  %v10666_v45 = vld [vmem:[#allocation94_spill] sm:$0xff] }
 0x68b   : > { %v4155_v40 = vmul.f32 %v10666_v45, %v9207_v9 }
 0x68d   : > { %v9322_v56 = vpop.permute.xlu0 %4417  ;;  %v9324_v53 = vpop.permute.xlu1 %4332 }
 0x68e   : > { %4517 = vperm.xlu0 %5894, %v4091_v55   ;;  %4652 = vperm.xlu1 %5893, %v4118_v62   ;;  %v10667_v55 = vld [vmem:[#allocation66_spill] sm:$0xff] }
 0x68f   : > { %v4105_v24 = vmul.f32 %v10667_v55, %v9177_v1 }
 0x691   : > { %v9330_v30 = vpop.permute.xlu0 %4427  ;;  %v9332_v20 = vpop.permute.xlu1 %4337 }
 0x692   : > { %4827 = vperm.xlu0 %5894, %v4153_v57   ;;  %4577 = vperm.xlu1 %5893, %v4103_v14   ;;  %v10668_v57 = vld [vmem:[#allocation132_spill] sm:$0xff] }
 0x693   : > { %v4140_v21 = vmul.f32 %v10668_v57, %v9194_v2  ;;  %v10669_v14 = vld [vmem:[#allocation168_spill] sm:$0xff] }
 0x694   : > { %v4167_v49 = vmul.f32 %v10669_v14, %v9220_v8 }
 0x695   : > { %v9338_v33 = vpop.permute.xlu0 %4437  ;;  %v9340_v10 = vpop.permute.xlu1 %4342 }
 0x696   : > { %4752 = vperm.xlu0 %5894, %v4138_v35   ;;  %4887 = vperm.xlu1 %5893, %v4165_v25   ;;  %v4193_v25 = vld [vmem:[#allocation4 + $0x80] sm:$0xff] }
 0x697   : > { %v4961_v52 = vmul.f32 %v9298_v47, %v4193_v25  ;;  %v4198_v47 = vld [vmem:[#allocation4 + $0xa8] sm:$0xff] }
 0x699   : > { %v9346_v17 = vpop.permute.xlu0 %4447  ;;  %v9348_v34 = vpop.permute.xlu1 %4352 }
 0x69a   : > { %4522 = vperm.xlu0 %5894, %v4092_v39   ;;  %4657 = vperm.xlu1 %5893, %v4119_v3   ;;  %v10670_v39 = vld [vmem:[#allocation75_spill] sm:$0xff] }
 0x69b   : > { %v4094_v36 = vmul.f32 %v10670_v39, %v9170_v31  ;;  %v10671_v3 = vld [vmem:[#allocation103_spill] sm:$0xff] }
 0x69c   : > { %v4121_v59 = vmul.f32 %v10671_v3, %v9187_v46 }
 0x69d   : > { %v9354_v26 = vpop.permute.xlu0 %4457  ;;  %v9356_v54 = vpop.permute.xlu1 %4357 }
 0x69e   : > { %4832 = vperm.xlu0 %5894, %v4154_v19   ;;  %4582 = vperm.xlu1 %5893, %v4104_v7   ;;  %v4195_v19 = vld [vmem:[#allocation4 + $0x90] sm:$0xff] }
 0x6a1   : > { %v9362_v32 = vpop.permute.xlu0 %4467  ;;  %v9364_v43 = vpop.permute.xlu1 %4362 }
 0x6a2   : > { %4757 = vperm.xlu0 %5894, %v4139_v58   ;;  %4892 = vperm.xlu1 %5893, %v4166_v41   ;;  %v4963_v41 = vmul.f32 %v9306_v48, %v4195_v19  ;;  %v10674_v48 = vld [vmem:[#allocation135_spill] sm:$0xff] }
 0x6a3   : > { %v4141_v25 = vmul.f32 %v10674_v48, %v9194_v2 }
 0x6a5   : > { %v9370_v51 = vpop.permute.xlu0 %4547  ;;  %v9372_v27 = vpop.permute.xlu1 %4367 }
 0x6a6   : > { %4527 = vperm.xlu0 %5894, %v4093_v4   ;;  %4662 = vperm.xlu1 %5893, %v4120_v42   ;;  %v10672_v4 = vld [vmem:[#allocation174_spill] sm:$0xff] }
 0x6a7   : > { %v4156_v16 = vmul.f32 %v10672_v4, %v9207_v9  ;;  %v10673_v42 = vld [vmem:[#allocation70_spill] sm:$0xff] }
 0x6a8   : > { %v4106_v45 = vmul.f32 %v10673_v42, %v9177_v1 }
 0x6a9   : > { %v9378_v62 = vpop.permute.xlu0 %4477  ;;  %v9380_v6 = vpop.permute.xlu1 %4372 }
 0x6aa   : > { %4837 = vperm.xlu0 %5894, %v4155_v40   ;;  %4587 = vperm.xlu1 %5893, %v4105_v24   ;;  %v4197_v40 = vld [vmem:[#allocation4 + $0xa0] sm:$0xff] }
 0x6ab   : > { %v4965_v14 = vmul.f32 %v9314_v18, %v4197_v40  ;;  %v10676_v18 = vld [vmem:[#allocation52_spill] sm:$0xff] }
 0x6ad   : > { %v9386_v35 = vpop.permute.xlu0 %4632  ;;  %v9388_v29 = vpop.permute.xlu1 %4382 }
 0x6ae   : > { %4762 = vperm.xlu0 %5894, %v4140_v21   ;;  %4897 = vperm.xlu1 %5893, %v4167_v49  }
 0x6b1   : > { %v9394_v61 = vpop.permute.xlu0 %4707  ;;  %v4393_v7 = vpop.permute.xlu1 %4392 }
 0x6b2   : > { %v4962_v58 = vmul.f32 %v4393_v7, %v4194_v37  ;;  %4532 = vperm.xlu0 %5894, %v4094_v36   ;;  %4667 = vperm.xlu1 %5893, %v4121_v59   ;;  %v10675_v37 = vld [vmem:[#allocation186_spill] sm:$0xff] }
 0x6b3   : > { %v4168_v39 = vmul.f32 %v10675_v37, %v9220_v8  ;;  %v4199_v36 = vld [vmem:[#allocation4 + $0xb0] sm:$0xff] }
 0x6b4   : > { %v5094_v5 = vadd.f32 %v4962_v58, %v4961_v52  ;;  %v4200_v52 = vld [vmem:[#allocation4 + $0xb8] sm:$0xff]  ;;  %v4967_v58 = vmul.f32 %v9322_v56, %v4199_v36 }
 0x6b5   : > { %v9402_v55 = vpop.permute.xlu0 %4482  ;;  %v4403_v24 = vpop.permute.xlu1 %4402  ;;  %v10678_v56 = vld [vmem:[#allocation83_spill] sm:$0xff] }
 0x6b6   : > { %v5095_v57 = vadd.f32 %v5094_v5, %v4963_v41  ;;  %v4964_v21 = vmul.f32 %v4403_v24, %v4196_v12  ;;  %4842 = vperm.xlu0 %5894, %v4156_v16   ;;  %4592 = vperm.xlu1 %5893, %v4106_v45   ;;  %v4095_v41 = vmul.f32 %v10676_v18, %v9170_v31  ;;  %v10677_v5 = vld [vmem:[#allocation102_spill] sm:$0xff]  ;;  %v4201_v16 = vld [vmem:[#allocation4 + $0xc0] sm:$0xff] }
 0x6b7   : > { %v4122_v4 = vmul.f32 %v10677_v5, %v9187_v46 }
 0x6b8   : > { %v5096_v49 = vadd.f32 %v5095_v57, %v4964_v21  ;;  %v4202_v57 = vld [vmem:[#allocation4 + $0xc8] sm:$0xff]  ;;  %v4969_v21 = vmul.f32 %v9330_v30, %v4201_v16  ;;  %v10680_v30 = vld [vmem:[#allocation163_spill] sm:$0xff] }
 0x6b9   : > { %v9409_v3 = vpop.permute.xlu0 %4787  ;;  %v4413_v59 = vpop.permute.xlu1 %4412 }
 0x6ba   : > { %v5097_v19 = vadd.f32 %v5096_v49, %v4965_v14  ;;  %v4966_v7 = vmul.f32 %v4413_v59, %v4198_v47  ;;  %4767 = vperm.xlu0 %5894, %v4141_v25   ;;  %4902 = vperm.xlu1 %5893, %v4168_v39   ;;  %v4157_v14 = vmul.f32 %v10678_v56, %v9207_v9  ;;  %v10679_v49 = vld [vmem:[#allocation86_spill] sm:$0xff] }
 0x6bb   : > { %v4107_v48 = vmul.f32 %v10679_v49, %v9177_v1  ;;  %v4203_v25 = vld [vmem:[#allocation4 + $0xd0] sm:$0xff] }
 0x6bc   : > { %v5098_v12 = vadd.f32 %v5097_v19, %v4966_v7  ;;  %v4204_v19 = vld [vmem:[#allocation4 + $0xd8] sm:$0xff]  ;;  %v4971_v7 = vmul.f32 %v9338_v33, %v4203_v25  ;;  %v10682_v33 = vld [vmem:[#allocation77_spill] sm:$0xff] }
 0x6bd   : > { %v9416_v42 = vpop.permute.xlu0 %4562  ;;  %v4423_v45 = vpop.permute.xlu1 %4422 }
 0x6be   : > { %v5099_v40 = vadd.f32 %v5098_v12, %v4967_v58  ;;  %v4968_v24 = vmul.f32 %v4423_v45, %v4200_v52  ;;  %4537 = vperm.xlu0 %5894, %v4095_v41   ;;  %4672 = vperm.xlu1 %5893, %v4122_v4   ;;  %v4142_v58 = vmul.f32 %v10680_v30, %v9194_v2  ;;  %v10681_v12 = vld [vmem:[#allocation95_spill] sm:$0xff]  ;;  %v4205_v41 = vld [vmem:[#allocation4 + $0xe0] sm:$0xff] }
 0x6bf   : > { %v4169_v18 = vmul.f32 %v10681_v12, %v9220_v8 }
 0x6c0   : > { %v5100_v47 = vadd.f32 %v5099_v40, %v4968_v24  ;;  %v4206_v40 = vld [vmem:[#allocation4 + $0xe8] sm:$0xff]  ;;  %v4973_v24 = vmul.f32 %v9346_v17, %v4205_v41  ;;  %v10684_v17 = vld [vmem:[#allocation176_spill] sm:$0xff] }
 0x6c1   : > { %v9423_v37 = vpop.permute.xlu0 %4867  ;;  %v4433_v39 = vpop.permute.xlu1 %4432  ;;  %v4209_v41 = vld [vmem:[#allocation4 + $0x100] sm:$0xff] }
 0x6c2   : > { %v5101_v36 = vadd.f32 %v5100_v47, %v4969_v21  ;;  %v4970_v59 = vmul.f32 %v4433_v39, %v4202_v57  ;;  %4847 = vperm.xlu0 %5894, %v4157_v14   ;;  %4597 = vperm.xlu1 %5893, %v4107_v48   ;;  %v4096_v21 = vmul.f32 %v10682_v33, %v9170_v31  ;;  %v10683_v47 = vld [vmem:[#allocation105_spill] sm:$0xff]  ;;  %v4207_v14 = vld [vmem:[#allocation4 + $0xf0] sm:$0xff]  ;;  %v10685_v31 = vld [vmem:[#allocation72_spill] sm:$0xff] }
 0x6c3   : > { %v4123_v56 = vmul.f32 %v10683_v47, %v9187_v46  ;;  %v4977_v47 = vmul.f32 %v9362_v32, %v4209_v41 }
 0x6c4   : > { %v5102_v52 = vadd.f32 %v5101_v36, %v4970_v59  ;;  %v4208_v36 = vld [vmem:[#allocation4 + $0xf8] sm:$0xff]  ;;  %v4975_v59 = vmul.f32 %v9354_v26, %v4207_v14  ;;  %v10686_v26 = vld [vmem:[#allocation109_spill] sm:$0xff] }
 0x6c5   : > { %v4488_v5 = vpop.permute.xlu0 %4487  ;;  %v4443_v4 = vpop.permute.xlu1 %4442 }
 0x6c6   : > { %v5103_v16 = vadd.f32 %v5102_v52, %v4971_v7  ;;  %v4972_v45 = vmul.f32 %v4443_v4, %v4204_v19  ;;  %4772 = vperm.xlu0 %5894, %v4142_v58   ;;  %4907 = vperm.xlu1 %5893, %v4169_v18   ;;  %v4158_v7 = vmul.f32 %v10684_v17, %v9207_v9  ;;  %v4210_v4 = vld [vmem:[#allocation4 + $0x108] sm:$0xff]  ;;  %v10689_v17 = vld [vmem:[#allocation104_spill] sm:$0xff] }
 0x6c7   : > { %v4108_v52 = vmul.f32 %v10685_v31, %v9177_v1 }
 0x6c8   : > { %v5104_v57 = vadd.f32 %v5103_v16, %v4972_v45  ;;  %v4143_v45 = vmul.f32 %v10686_v26, %v9194_v2  ;;  %v4241_v26 = vld [vmem:[#allocation4 + $0x200] sm:$0xff] }
 0x6c9   : > { %v9435_v49 = vpop.permute.xlu0 %4797  ;;  %v4453_v48 = vpop.permute.xlu1 %4452 }
 0x6ca   : > { %v5105_v25 = vadd.f32 %v5104_v57, %v4973_v24  ;;  %v4974_v39 = vmul.f32 %v4453_v48, %v4206_v40  ;;  %4542 = vperm.xlu0 %5894, %v4096_v21   ;;  %4677 = vperm.xlu1 %5893, %v4123_v56   ;;  %v10687_v40 = vld [vmem:[#allocation189_spill] sm:$0xff]  ;;  %v4211_v57 = vld [vmem:[#allocation4 + $0x110] sm:$0xff]  ;;  %v4225_v56 = vld [vmem:[#allocation4 + $0x180] sm:$0xff] }
 0x6cb   : > { %v4170_v24 = vmul.f32 %v10687_v40, %v9220_v8  ;;  %v4212_v48 = vld [vmem:[#allocation4 + $0x118] sm:$0xff]  ;;  %v4993_v31 = vmul.f32 %v9370_v51, %v4225_v56  ;;  %v10691_v51 = vld [vmem:[#allocation88_spill] sm:$0xff] }
 0x6cc   : > { %v5106_v19 = vadd.f32 %v5105_v25, %v4974_v39  ;;  %v4226_v25 = vld [vmem:[#allocation4 + $0x188] sm:$0xff]  ;;  %v4979_v39 = vmul.f32 %v9378_v62, %v4211_v57 }
 0x6cd   : > { %v9442_v30 = vpop.permute.xlu0 %4722  ;;  %v4463_v58 = vpop.permute.xlu1 %4462  ;;  %v4214_v62 = vld [vmem:[#allocation4 + $0x128] sm:$0xff] }
 0x6ce   : > { %v5107_v12 = vadd.f32 %v5106_v19, %v4975_v59  ;;  %v4976_v18 = vmul.f32 %v4463_v58, %v4208_v36  ;;  %4852 = vperm.xlu0 %5894, %v4158_v7   ;;  %4602 = vperm.xlu1 %5893, %v4108_v52   ;;  %v10688_v59 = vld [vmem:[#allocation155_spill] sm:$0xff]  ;;  %v4124_v7 = vmul.f32 %v10689_v17, %v9187_v46  ;;  %v4213_v52 = vld [vmem:[#allocation4 + $0x120] sm:$0xff] }
 0x6cf   : > { %v4128_v19 = vmul.f32 %v10688_v59, %v9187_v46  ;;  %v4227_v59 = vld [vmem:[#allocation4 + $0x190] sm:$0xff] }
 0x6d0   : > { %v9444_v16 = vadd.f32 %v5107_v12, %v4976_v18  ;;  %v4242_v12 = vld [vmem:[#allocation4 + $0x208] sm:$0xff]  ;;  %v4980_v18 = vmul.f32 %v9402_v55, %v4212_v48 }
 0x6d1   : > { %v4493_v33 = vpop.permute.xlu0 %4492  ;;  %v4473_v21 = vpop.permute.xlu1 %4472  ;;  %v5010_v56 = vmul.f32 %v9386_v35, %v4242_v12 }
 0x6d2   : > { %v4978_v14 = vmul.f32 %v4473_v21, %v4210_v4  ;;  %4777 = vperm.xlu0 %5894, %v4143_v45   ;;  %4912 = vperm.xlu1 %5893, %v4170_v24   ;;  %v10690_v45 = vld [vmem:[#allocation164_spill] sm:$0xff]  ;;  %v4981_v24 = vmul.f32 %v4488_v5, %v4213_v52  ;;  %v4982_v48 = vmul.f32 %v4493_v33, %v4214_v62  ;;  %v10692_v5 = vld [vmem:[#allocation179_spill] sm:$0xff] }
 0x6d3   : > { %v4144_v40 = vmul.f32 %v10690_v45, %v9194_v2  ;;  %v4160_v17 = vmul.f32 %v10692_v5, %v9207_v9  ;;  %v4228_v52 = vld [vmem:[#allocation4 + $0x198] sm:$0xff]  ;;  %v4257_v33 = vld [vmem:[#allocation4 + $0x280] sm:$0xff]  ;;  %v10694_v45 = vld [vmem:[#allocation74_spill] sm:$0xff] }
 0x6d4   : > { %v5115_v36 = vadd.f32 %v4978_v14, %v4977_v47  ;;  %v4109_v47 = vmul.f32 %v10691_v51, %v9177_v1  ;;  %v5025_v51 = vmul.f32 %v9394_v61, %v4257_v33  ;;  %v4274_v5 = vld [vmem:[#allocation4 + $0x308] sm:$0xff]  ;;  %v10696_v61 = vld [vmem:[#allocation192_spill] sm:$0xff]  ;;  %v4276_v33 = vld [vmem:[#allocation4 + $0x318] sm:$0xff] }
 0x6d5   : > { %v9457_v58 = vpop.permute.xlu0 %4802  ;;  %v4553_v32 = vpop.permute.xlu1 %4552 }
 0x6d6   : > { %v5116_v41 = vadd.f32 %v5115_v36, %v4979_v39  ;;  %v4994_v4 = vmul.f32 %v4553_v32, %v4226_v25  ;;  %4702 = vperm.xlu0 %5894, %v4128_v19   ;;  %4682 = vperm.xlu1 %5893, %v4124_v7   ;;  %v4215_v36 = vld [vmem:[#allocation4 + $0x130] sm:$0xff]  ;;  %v10693_v7 = vld [vmem:[#allocation68_spill] sm:$0xff] }
 0x6d8   : > { %v5117_v57 = vadd.f32 %v5116_v41, %v4980_v18  ;;  %v5136_v21 = vadd.f32 %v4994_v4, %v4993_v31  ;;  %v4171_v31 = vmul.f32 %v10693_v7, %v9220_v8  ;;  %v4258_v41 = vld [vmem:[#allocation4 + $0x288] sm:$0xff]  ;;  %v4996_v4 = vmul.f32 %v9416_v42, %v4228_v52 }
 0x6d9   : > { %v9465_v14 = vpop.permute.xlu0 %4727  ;;  %v4628_v55 = vpop.permute.xlu1 %4627  ;;  %v4172_v7 = vmul.f32 %v10696_v61, %v9220_v8  ;;  %v5931_v61 = vld [vmem:[#allocation10 + $0x6c] ss:$24 sps:$4 sm:$0xff]  }
 0x6da   : > { %v5009_v25 = vmul.f32 %v4628_v55, %v4241_v26  ;;  %4782 = vperm.xlu0 %5894, %v4144_v40   ;;  %4607 = vperm.xlu1 %5893, %v4109_v47   ;;  %v5118_v39 = vadd.f32 %v5117_v57, %v4981_v24  ;;  %v4125_v40 = vmul.f32 %v10694_v45, %v9187_v46  ;;  %v4243_v55 = vld [vmem:[#allocation4 + $0x210] sm:$0xff]  ;;  %v5924_v45 = vld [vmem:[#allocation10 + $0x8] ss:$24 sps:$4 sm:$0xff]  }
 0x6dc   : > { %v5157_v19 = vadd.f32 %v5010_v56, %v5009_v25  ;;  %v5119_v2 = vadd.f32 %v5118_v39, %v4982_v48  ;;  %v10695_v25 = vld [vmem:[#allocation147_spill] sm:$0xff] }
 0x6dd   : > { %v4498_v35 = vpop.permute.xlu0 %4497  ;;  %v4558_v32 = vpop.permute.xlu1 %4557  ;;  %v4110_v39 = vmul.f32 %v10695_v25, %v9177_v1  ;;  %v4260_v25 = vld [vmem:[#allocation4 + $0x298] sm:$0xff] }
 0x6de   : > { %v4983_v12 = vmul.f32 %v4498_v35, %v4215_v36  ;;  %v4995_v18 = vmul.f32 %v4558_v32, %v4227_v59  ;;  %4862 = vperm.xlu0 %5894, %v4160_v17   ;;  %4917 = vperm.xlu1 %5893, %v4171_v31   ;;  %v4273_v59 = vld [vmem:[#allocation4 + $0x300] sm:$0xff]  ;;  %v4275_v31 = vld [vmem:[#allocation4 + $0x310] sm:$0xff] }
 0x6df   : > { %v5919_v32 = vld [vmem:[#allocation10 + $0xc] ss:$24 sps:$4 sm:$0xff]  }
 0x6e0   : > { %v5120_v62 = vadd.f32 %v5119_v2, %v4983_v12  ;;  %v5137_v26 = vadd.f32 %v5136_v21, %v4995_v18  ;;  %v4216_v2 = vld [vmem:[#allocation4 + $0x138] sm:$0xff]  ;;  %v5921_v12 = vld [vmem:[#allocation10 + $0x10] ss:$24 sps:$4 sm:$0xff]   ;;  %v5041_v18 = vmul.f32 %v9409_v3, %v4273_v59  ;;  %672 = vmatprep.subr.bf16.mxu1 %v5919_v32 }
 0x6e1   : > { %v4808_v24 = vpop.permute.xlu0 %4807  ;;  %v4713_v57 = vpop.permute.xlu1 %4712  ;;  %673 = vmatpush1.bf16.msra.mxu1 %v5924_v45  ;;  %v5930_v3 = vld [vmem:[#allocation10 + $0x38] ss:$24 sps:$4 sm:$0xff]  }
 0x6e2   : > { %v5026_v47 = vmul.f32 %v4713_v57, %v4258_v41  ;;  %4687 = vperm.xlu1 %5893, %v4125_v40   ;;  %v9475_v56 = vadd.f32 %v5137_v26, %v4996_v4  ;;  %v5923_v26 = vld [vmem:[#allocation10 + $0x14] ss:$24 sps:$4 sm:$0xff]  }
 0x6e3   : > { %v4259_v40 = vld [vmem:[#allocation4 + $0x290] sm:$0xff]  ;;  %713 = vmatprep.subr.bf16.mxu0 %v5923_v26  ;;  %v5028_v26 = vmul.f32 %v9442_v30, %v4260_v25  ;;  %v4217_v25 = vld [vmem:[#allocation4 + $0x140] sm:$0xff] }
 0x6e4   : > { %v5178_v48 = vadd.f32 %v5026_v47, %v5025_v51  ;;  %v5925_v51 = vld [vmem:[#allocation10 + $0x3c] ss:$24 sps:$4 sm:$0xff]   ;;  %714 = vmatpush1.bf16.msra.mxu0 %v5921_v12 }
 0x6e5   : > { %v9479_v36 = vpop.permute.xlu0 %4732  ;;  %v4638_v42 = vpop.permute.xlu1 %4637  ;;  %v5929_v47 = vld [vmem:[#allocation10 + $0x44] ss:$24 sps:$4 sm:$0xff]   ;;  %674 = vmatprep.subr.bf16.mxu1 %v5925_v51  ;;  %v5936_v51 = vld [vmem:[#allocation10 + $0x68] ss:$24 sps:$4 sm:$0xff]   ;;  %v4263_v30 = vld [vmem:[#allocation4 + $0x2b0] sm:$0xff] }
 0x6e6   : > { %v5011_v21 = vmul.f32 %v4638_v42, %v4243_v55  ;;  %4612 = vperm.xlu1 %5893, %v4110_v39   ;;  %v5043_v55 = vmul.f32 %v9435_v49, %v4275_v31  ;;  %715 = vmatprep.subr.bf16.mxu0 %v5929_v47  ;;  %v4290_v31 = vld [vmem:[#allocation4 + $0x388] sm:$0xff] }
 0x6e7   : > { %675 = vmatpush1.bf16.msra.mxu1 %v5930_v3  ;;  %v4244_v3 = vld [vmem:[#allocation4 + $0x218] sm:$0xff] }
 0x6e8   : > { %v9481_v17 = vadd.f32 %v5157_v19, %v5011_v21  ;;  %v10697_v19 = vld [vmem:[#allocation106_spill] sm:$0xff]  ;;  %v4277_v21 = vld [vmem:[#allocation4 + $0x320] sm:$0xff]  ;;  %676 = vmatprep.subr.bf16.mxu1 %v5931_v61 }
 0x6e9   : > { %v4503_v52 = vpop.permute.xlu0 %4502  ;;  %v4793_v35 = vpop.permute.xlu1 %4792  ;;  %v4126_v57 = vmul.f32 %v10697_v19, %v9187_v46  ;;  %v5045_v12 = vmul.f32 %v4808_v24, %v4277_v21 }
 0x6ea   : > { %v4984_v41 = vmul.f32 %v4503_v52, %v4216_v2  ;;  %v5042_v4 = vmul.f32 %v4793_v35, %v4274_v5  ;;  %4922 = vperm.xlu1 %5893, %v4172_v7   ;;  %v5927_v5 = vld [vmem:[#allocation10 + $0x40] ss:$24 sps:$4 sm:$0xff]   ;;  %v5044_v52 = vmul.f32 %v9457_v58, %v4276_v33 }
 0x6eb   : > { %v4289_v7 = vld [vmem:[#allocation4 + $0x380] sm:$0xff]  ;;  %716 = vmatpush1.bf16.msra.mxu0 %v5927_v5  ;;  %677 = vmatpush1.bf16.msra.mxu1 %v5936_v51  ;;  %v10700_v51 = vld [vmem:[#allocation110_spill] sm:$0xff] }
 0x6ec   : > { %v9489_v39 = vadd.f32 %v5120_v62, %v4984_v41  ;;  %v5199_v42 = vadd.f32 %v5042_v4, %v5041_v18  ;;  %v4261_v35 = vld [vmem:[#allocation4 + $0x2a0] sm:$0xff]  ;;  %v4278_v62 = vld [vmem:[#allocation4 + $0x328] sm:$0xff]  ;;  %v10698_v18 = vld [vmem:[#allocation90_spill] sm:$0xff]  ;;  %v5057_v58 = vmul.f32 %v9423_v37, %v4289_v7 }
 0x6ed   : > { %v4813_v59 = vpop.permute.xlu0 %4812  ;;  %v4718_v2 = vpop.permute.xlu1 %4717  ;;  %v4111_v41 = vmul.f32 %v10698_v18, %v9177_v1  ;;  %v5935_v4 = vld [vmem:[#allocation10 + $0x74] ss:$24 sps:$4 sm:$0xff]   ;;  %v5029_v33 = vmul.f32 %v9465_v14, %v4261_v35 }
 0x6ee   : > { %v5200_v32 = vadd.f32 %v5199_v42, %v5043_v55  ;;  %v5027_v49 = vmul.f32 %v4718_v2, %v4259_v40  ;;  %4692 = vperm.xlu1 %5893, %v4126_v57   ;;  %v4262_v40 = vld [vmem:[#allocation4 + $0x2a8] sm:$0xff]  ;;  %v5937_v42 = vld [vmem:[#allocation10 + $0x9c] ss:$24 sps:$4 sm:$0xff]   ;;  %v5046_v2 = vmul.f32 %v4813_v59, %v4278_v62  ;;  %717 = vmatprep.subr.bf16.mxu0 %v5935_v4 }
 0x6ef   : > { %v5933_v55 = vld [vmem:[#allocation10 + $0x70] ss:$24 sps:$4 sm:$0xff]   ;;  %v5030_v14 = vmul.f32 %v9479_v36, %v4262_v40  ;;  %678 = vmatprep.subr.bf16.mxu1 %v5937_v42  ;;  %v5943_v62 = vld [vmem:[#allocation10 + $0xcc] ss:$24 sps:$4 sm:$0xff]  }
 0x6f0   : > { %v5201_v45 = vadd.f32 %v5200_v32, %v5044_v52  ;;  %v5179_v19 = vadd.f32 %v5178_v48, %v5027_v49  ;;  %v5941_v48 = vld [vmem:[#allocation10 + $0xa4] ss:$24 sps:$4 sm:$0xff]   ;;  %v10699_v37 = vld [vmem:[#allocation97_spill] sm:$0xff]  ;;  %v5942_v52 = vld [vmem:[#allocation10 + $0x98] ss:$24 sps:$4 sm:$0xff]   ;;  %718 = vmatpush1.bf16.msra.mxu0 %v5933_v55 }
 0x6f1   : > { %v4738_v57 = vpop.permute.xlu0 %4737  ;;  %v4873_v47 = vpop.permute.xlu1 %4872  ;;  %v4173_v21 = vmul.f32 %v10699_v37, %v9220_v8  ;;  %v5939_v49 = vld [vmem:[#allocation10 + $0xa0] ss:$24 sps:$4 sm:$0xff]   ;;  %719 = vmatprep.subr.bf16.mxu0 %v5941_v48  ;;  %v5947_v4 = vld [vmem:[#allocation10 + $0xd4] ss:$24 sps:$4 sm:$0xff]   ;;  %679 = vmatpush1.bf16.msra.mxu1 %v5942_v52 }
 0x6f2   : > { %v5202_v18 = vadd.f32 %v5201_v45, %v5045_v12  ;;  %v5180_v44 = vadd.f32 %v5179_v19, %v5028_v26  ;;  %v5058_v24 = vmul.f32 %v4873_v47, %v4290_v31  ;;  %4617 = vperm.xlu1 %5893, %v4111_v41   ;;  %v5031_v59 = vmul.f32 %v4738_v57, %v4263_v30  ;;  %v4279_v12 = vld [vmem:[#allocation4 + $0x330] sm:$0xff]  ;;  %v4229_v36 = vld [vmem:[#allocation4 + $0x1a0] sm:$0xff]  ;;  %v4264_v30 = vld [vmem:[#allocation4 + $0x2b8] sm:$0xff] }
 0x6f3   : > { %680 = vmatprep.subr.bf16.mxu1 %v5943_v62  ;;  %v5945_v47 = vld [vmem:[#allocation10 + $0xd0] ss:$24 sps:$4 sm:$0xff]   ;;  %v5949_v55 = vld [vmem:[#allocation10 + $0xfc] ss:$24 sps:$4 sm:$0xff]  }
 0x6f4   : > { %v5203_v7 = vadd.f32 %v5202_v18, %v5046_v2  ;;  %v5181_v5 = vadd.f32 %v5180_v44, %v5029_v33  ;;  %v5220_v61 = vadd.f32 %v5058_v24, %v5057_v58  ;;  %v4127_v58 = vmul.f32 %v10700_v51, %v9187_v46  ;;  %v5948_v33 = vld [vmem:[#allocation10 + $0xc8] ss:$24 sps:$4 sm:$0xff]   ;;  %720 = vmatpush1.bf16.msra.mxu0 %v5939_v49  ;;  %v5953_v18 = vld [vmem:[#allocation10 + $0x104] ss:$24 sps:$4 sm:$0xff]  }
 0x6f5   : > { %v4508_v35 = vpop.permute.xlu0 %4507  ;;  %v4643_v32 = vpop.permute.xlu1 %4642  ;;  %721 = vmatprep.subr.bf16.mxu0 %v5947_v4  ;;  %v10701_v46 = vld [vmem:[#allocation76_spill] sm:$0xff]  ;;  %681 = vmatpush1.bf16.msra.mxu1 %v5948_v33  ;;  %v4218_v52 = vld [vmem:[#allocation4 + $0x148] sm:$0xff] }
 0x6f6   : > { %v5182_v31 = vadd.f32 %v5181_v5, %v5030_v14  ;;  %v4985_v41 = vmul.f32 %v4508_v35, %v4217_v25  ;;  %v5012_v26 = vmul.f32 %v4643_v32, %v4244_v3  ;;  %4927 = vperm.xlu1 %5893, %v4173_v21   ;;  %v4112_v48 = vmul.f32 %v10701_v46, %v9177_v1  ;;  %v5954_v25 = vld [vmem:[#allocation10 + $0xf8] ss:$24 sps:$4 sm:$0xff]   ;;  %v5959_v46 = vld [vmem:[#allocation10 + $0x134] ss:$24 sps:$4 sm:$0xff]  }
 0x6f7   : > { %682 = vmatprep.subr.bf16.mxu1 %v5949_v55  ;;  %v5951_v21 = vld [vmem:[#allocation10 + $0x100] ss:$24 sps:$4 sm:$0xff]  }
 0x6f8   : > { %v5183_v45 = vadd.f32 %v5182_v31, %v5031_v59  ;;  %v5122_v44 = vadd.f32 %v9489_v39, %v4985_v41  ;;  %v5159_v19 = vadd.f32 %v9481_v17, %v5012_v26  ;;  %v4291_v39 = vld [vmem:[#allocation4 + $0x390] sm:$0xff]  ;;  %722 = vmatpush1.bf16.msra.mxu0 %v5945_v47  ;;  %v4245_v59 = vld [vmem:[#allocation4 + $0x220] sm:$0xff]  ;;  %v4280_v41 = vld [vmem:[#allocation4 + $0x338] sm:$0xff] }
 0x6f9   : > { %v4818_v40 = vpop.permute.xlu0 %4817  ;;  %v4568_v57 = vpop.permute.xlu1 %4567  ;;  %723 = vmatprep.subr.bf16.mxu0 %v5953_v18  ;;  %683 = vmatpush1.bf16.msra.mxu1 %v5954_v25  ;;  %v4230_v26 = vld [vmem:[#allocation4 + $0x1a8] sm:$0xff] }
 0x6fa   : > { %v5047_v42 = vmul.f32 %v4818_v40, %v4279_v12  ;;  %v4997_v2 = vmul.f32 %v4568_v57, %v4229_v36  ;;  %4697 = vperm.xlu1 %5893, %v4127_v58   ;;  %v10703_v36 = vld [vmem:[#allocation114_spill] sm:$0xff]  ;;  %v4265_v40 = vld [vmem:[#allocation4 + $0x2c0] sm:$0xff]  ;;  %v4292_v57 = vld [vmem:[#allocation4 + $0x398] sm:$0xff] }
 0x6fb   : > { %v4159_v51 = vmul.f32 %v10703_v36, %v9207_v9  ;;  %v5957_v9 = vld [vmem:[#allocation10 + $0x130] ss:$24 sps:$4 sm:$0xff]  }
 0x6fc   : > { %v5204_v24 = vadd.f32 %v5203_v7, %v5047_v42  ;;  %v5139_v17 = vadd.f32 %v9475_v56, %v4997_v2  ;;  %v10702_v56 = vld [vmem:[#allocation195_spill] sm:$0xff]  ;;  %724 = vmatpush1.bf16.msra.mxu0 %v5951_v21  ;;  %v10704_v42 = vld [vmem:[#allocation96_spill] sm:$0xff]  ;;  %v4246_v25 = vld [vmem:[#allocation4 + $0x228] sm:$0xff] }
 0x6fd   : > { %v4743_v3 = vpop.permute.xlu0 %4742  ;;  %v4878_v37 = vpop.permute.xlu1 %4877  ;;  %v4174_v32 = vmul.f32 %v10702_v56, %v9220_v8  ;;  %v4175_v2 = vmul.f32 %v10704_v42, %v9220_v8  ;;  %725 = vmatprep.subr.bf16.mxu0 %v5959_v46  ;;  %v4231_v56 = vld [vmem:[#allocation4 + $0x1b0] sm:$0xff]  ;;  %v10706_v42 = vld [vmem:[#allocation25_spill] sm:$0xff]  ;;  %v4180_v46 = vld [vmem:[#allocation4 + $0x18] sm:$0xff] }
 0x6fe   : > { %v5032_v14 = vmul.f32 %v4743_v3, %v4264_v30  ;;  %v5059_v5 = vmul.f32 %v4878_v37, %v4291_v39  ;;  %4622 = vperm.xlu1 %5893, %v4112_v48   ;;  %v5955_v39 = vld [vmem:[#allocation10 + $0x12c] ss:$24 sps:$4 sm:$0xff]   ;;  %v4219_v48 = vld [vmem:[#allocation4 + $0x150] sm:$0xff]  ;;  %v5960_v3 = vld [vmem:[#allocation10 + $0x128] ss:$24 sps:$4 sm:$0xff]  }
 0x6ff   : > { %684 = vmatprep.subr.bf16.mxu1 %v5955_v39  ;;  %v4247_v39 = vld [vmem:[#allocation4 + $0x230] sm:$0xff] }
 0x700   : > { %v5184_v35 = vadd.f32 %v5183_v45, %v5032_v14  ;;  %v5221_v7 = vadd.f32 %v5220_v61, %v5059_v5  ;;  %685 = vmatpush1.bf16.msra.mxu1 %v5960_v3  ;;  %726 = vmatpush1.bf16.msra.mxu0 %v5957_v9  ;;  %v5978_v9 = vld [vmem:[#allocation12 + $0x2c] ss:$16 sps:$4 sm:$0xff]  }
 0x701   : > { %v4513_v1 = vpop.permute.xlu0 %4512  ;;  %v4648_v49 = vpop.permute.xlu1 %4647  ;;  %v5984_v3 = vld [vmem:[#allocation12 + $0x4c] ss:$16 sps:$4 sm:$0xff]  }
 0x702   : > { %v4986_v62 = vmul.f32 %v4513_v1, %v4218_v52  ;;  %v5013_v31 = vmul.f32 %v4648_v49, %v4245_v59  ;;  %4932 = vperm.xlu1 %5893, %v4174_v32   ;;  %v5961_v32 = vld [vmem:[#allocation10 + $0x15c] ss:$24 sps:$4 sm:$0xff]   ;;  %v5963_v1 = vld [vmem:[#allocation10 + $0x160] ss:$24 sps:$4 sm:$0xff]  }
 0x703   : > { %v5965_v49 = vld [vmem:[#allocation10 + $0x164] ss:$24 sps:$4 sm:$0xff]   ;;  %686 = vmatprep.subr.bf16.mxu1 %v5961_v32 }
 0x704   : > { %v5123_v4 = vadd.f32 %v5122_v44, %v4986_v62  ;;  %v5160_v12 = vadd.f32 %v5159_v19, %v5013_v31  ;;  %727 = vmatprep.subr.bf16.mxu0 %v5965_v49  ;;  %v4182_v49 = vld [vmem:[#allocation4 + $0x28] sm:$0xff] }
 0x705   : > { %v4823_v58 = vpop.permute.xlu0 %4822  ;;  %v4573_v45 = vpop.permute.xlu1 %4572  ;;  %728 = vmatpush1.bf16.msra.mxu0 %v5963_v1  ;;  %v4232_v1 = vld [vmem:[#allocation4 + $0x1b8] sm:$0xff] }
 0x706   : > { %v5048_v61 = vmul.f32 %v4823_v58, %v4280_v41  ;;  %v4998_v33 = vmul.f32 %v4573_v45, %v4230_v26  ;;  %4857 = vperm.xlu1 %5893, %v4159_v51   ;;  %v5969_v41 = vld [vmem:[#allocation12 + $0x4] ss:$16 sps:$4 sm:$0xff]   ;;  %v5972_v26 = vld [vmem:[#allocation12 + $0xc] ss:$16 sps:$4 sm:$0xff]   ;;  %v5967_v51 = vld [vmem:[#allocation12] ss:$16 sps:$4 sm:$0xff]  }
 0x707   : > { %v5970_v58 = vld [vmem:[#allocation12 + $0x8] ss:$16 sps:$4 sm:$0xff]   ;;  %v4293_v45 = vld [vmem:[#allocation4 + $0x3a0] sm:$0xff]  ;;  %5502 = vmatprep.subr.bf16.mxu0 %v5972_v26 }
 0x708   : > { %v9511_v47 = vadd.f32 %v5204_v24, %v5048_v61  ;;  %v5140_v55 = vadd.f32 %v5139_v17, %v4998_v33  ;;  %v10705_v24 = vld [vmem:[#allocation198_spill] sm:$0xff]  ;;  %v4178_v61 = vld [vmem:[#allocation4 + $0x8] sm:$0xff]  ;;  %v4177_v33 = vld [vmem:[#allocation4] sm:$0xff]  ;;  %746 = vmatmul.mubr.bf16.vlgmr.msra.gmra.mrb[4].mxu0 %v10706_v42 }
 0x709   : > { %v4748_v18 = vpop.permute.xlu0 %4747  ;;  %v4883_v30 = vpop.permute.xlu1 %4882  ;;  %v4176_v17 = vmul.f32 %v10705_v24, %v9220_v8  ;;  %5503 = vmatpush1.bf16.msra.mxu0 %v5970_v58  ;;  %v4945_v24 = vmul.f32 %v9284_v60, %v4177_v33  ;;  %v4950_v33 = vmul.f32 %v9324_v53, %v4182_v49 }
 0x70a   : > { %v5033_v44 = vmul.f32 %v4748_v18, %v4265_v40  ;;  %v5060_v19 = vmul.f32 %v4883_v30, %v4292_v57  ;;  %4937 = vperm.xlu1 %5893, %v4175_v2   ;;  %v5973_v18 = vld [vmem:[#allocation12 + $0x20] ss:$16 sps:$4 sm:$0xff]   ;;  %v5975_v30 = vld [vmem:[#allocation12 + $0x24] ss:$16 sps:$4 sm:$0xff]   ;;  %5504 = vmatprep.subr.bf16.mxu0 %v5978_v9  ;;  %v5994_v9 = vld [vmem:[#allocation12 + $0x88] ss:$16 sps:$4 sm:$0xff]  }
 0x70c   : > { %v9515_v37 = vadd.f32 %v5184_v35, %v5033_v44  ;;  %v5222_v21 = vadd.f32 %v5221_v7, %v5060_v19  ;;  %v5966_v7 = vld [vmem:[#allocation10 + $0x158] ss:$24 sps:$4 sm:$0xff]   ;;  %v4946_v19 = vmul.f32 %v9292_v23, %v4178_v61  ;;  %v4181_v23 = vld [vmem:[#allocation4 + $0x20] sm:$0xff] }
 0x70d   : > { %v4518_v14 = vpop.permute.xlu0 %4517  ;;  %v4653_v5 = vpop.permute.xlu1 %4652  ;;  %687 = vmatpush1.bf16.msra.mxu1 %v5966_v7  ;;  %v5976_v44 = vld [vmem:[#allocation12 + $0x28] ss:$16 sps:$4 sm:$0xff]   ;;  %v5987_v7 = vld [vmem:[#allocation12 + $0x64] ss:$16 sps:$4 sm:$0xff]  }
 0x70e   : > { %v4987_v52 = vmul.f32 %v4518_v14, %v4219_v48  ;;  %v5014_v59 = vmul.f32 %v4653_v5, %v4246_v25  ;;  %4942 = vperm.xlu1 %5893, %v4176_v17   ;;  %5461 = vmatprep.subr.bf16.mxu1 %v5969_v41  ;;  %v5981_v25 = vld [vmem:[#allocation12 + $0x44] ss:$16 sps:$4 sm:$0xff]   ;;  %v5073_v32 = vadd.f32 %v4946_v19, %v4945_v24  ;;  %v5988_v61 = vld [vmem:[#allocation12 + $0x68] ss:$16 sps:$4 sm:$0xff]  }
 0x70f   : > { %5505 = vmatpush1.bf16.msra.mxu0 %v5976_v44 }
 0x710   : > { %v9519_v62 = vadd.f32 %v5123_v4, %v4987_v52  ;;  %v5161_v35 = vadd.f32 %v5160_v12, %v5014_v59  ;;  %v4179_v12 = vld [vmem:[#allocation4 + $0x10] sm:$0xff]  ;;  %705 = vmatmul.mubr.bf16.vlgmr.msra.gmra.mrb[0].mxu1 %v10706_v42  ;;  %5506 = vmatprep.subr.bf16.mxu0 %v5984_v3  ;;  %v4184_v42 = vld [vmem:[#allocation4 + $0x38] sm:$0xff] }
 0x711   : > { %v9521_v31 = vpop.permute.xlu0 %4827  ;;  %v4578_v8 = vpop.permute.xlu1 %4577  ;;  %5462 = vmatpush1.bf16.msra.mxu1 %v5967_v51  ;;  %v4947_v17 = vmul.f32 %v9300_v50, %v4179_v12  ;;  %v5979_v59 = vld [vmem:[#allocation12 + $0x40] ss:$16 sps:$4 sm:$0xff]   ;;  %v4294_v12 = vld [vmem:[#allocation4 + $0x3a8] sm:$0xff]  ;;  %v4952_v53 = vmul.f32 %v9340_v10, %v4184_v42  ;;  %v6005_v10 = vld [vmem:[#allocation12 + $0xc4] ss:$16 sps:$4 sm:$0xff]  }
 0x712   : > { %v4999_v36 = vmul.f32 %v4578_v8, %v4231_v56  ;;  %5463 = vmatprep.subr.bf16.mxu1 %v5975_v30  ;;  %v5982_v56 = vld [vmem:[#allocation12 + $0x48] ss:$16 sps:$4 sm:$0xff]   ;;  %v4949_v8 = vmul.f32 %v9316_v11, %v4181_v23  ;;  %v4183_v51 = vld [vmem:[#allocation4 + $0x30] sm:$0xff]  ;;  %v6002_v3 = vld [vmem:[#allocation12 + $0xac] ss:$16 sps:$4 sm:$0xff]  }
 0x713   : > { %v5074_v50 = vadd.f32 %v5073_v32, %v4947_v17  ;;  %5507 = vmatpush1.bf16.msra.mxu0 %v5982_v56  ;;  %v4233_v32 = vld [vmem:[#allocation4 + $0x1c0] sm:$0xff] }
 0x714   : > { %v5141_v4 = vadd.f32 %v5140_v55, %v4999_v36  ;;  %v10707_v55 = vmov 0   ;;  %v5990_v36 = vld [vmem:[#allocation12 + $0x6c] ss:$16 sps:$4 sm:$0xff]   ;;  %v4189_v42 = vld [vmem:[#allocation4 + $0x60] sm:$0xff] }
 0x715   : > { %v9523_v40 = vpop.permute.xlu0 %4752  ;;  %v4888_v57 = vpop.permute.xlu1 %4887  ;;  %5493 = vmatprep.mubr.bf16.mxu1 %v10707_v55  ;;  %5534 = vmatprep.mubr.bf16.mxu0 %v10707_v55 }
 0x716   : > { %v5061_v2 = vmul.f32 %v4888_v57, %v4293_v45  ;;  %5464 = vmatpush1.bf16.msra.mxu1 %v5973_v18  ;;  %v5985_v45 = vld [vmem:[#allocation12 + $0x60] ss:$16 sps:$4 sm:$0xff]   ;;  %5508 = vmatprep.subr.bf16.mxu0 %v5990_v36  ;;  %v5996_v57 = vld [vmem:[#allocation12 + $0x8c] ss:$16 sps:$4 sm:$0xff]   ;;  %v4951_v18 = vmul.f32 %v9332_v20, %v4183_v51  ;;  %v6006_v51 = vld [vmem:[#allocation12 + $0xc8] ss:$16 sps:$4 sm:$0xff]  }
 0x717   : > { %5465 = vmatprep.subr.bf16.mxu1 %v5981_v25  ;;  %5509 = vmatpush1.bf16.msra.mxu0 %v5988_v61  ;;  %v5999_v25 = vld [vmem:[#allocation12 + $0xa4] ss:$16 sps:$4 sm:$0xff]   ;;  %v6003_v36 = vld [vmem:[#allocation12 + $0xc0] ss:$16 sps:$4 sm:$0xff]  }
 0x718   : > { %v5223_v48 = vadd.f32 %v5222_v21, %v5061_v2  ;;  %v4948_v21 = vmul.f32 %v9308_v63, %v4180_v46  ;;  %v4248_v46 = vld [vmem:[#allocation4 + $0x238] sm:$0xff]  ;;  %5510 = vmatprep.subr.bf16.mxu0 %v5996_v57  ;;  %v4295_v61 = vld [vmem:[#allocation4 + $0x3b0] sm:$0xff] }
 0x719   : > { %v9532_v14 = vpop.permute.xlu0 %4522  ;;  %v4658_v5 = vpop.permute.xlu1 %4657 }
 0x71a   : > { %v5015_v52 = vmul.f32 %v4658_v5, %v4247_v39  ;;  %5466 = vmatpush1.bf16.msra.mxu1 %v5979_v59  ;;  %v5075_v63 = vadd.f32 %v5074_v50, %v4948_v21  ;;  %v5991_v39 = vld [vmem:[#allocation12 + $0x80] ss:$16 sps:$4 sm:$0xff]   ;;  %v6000_v59 = vld [vmem:[#allocation12 + $0xa8] ss:$16 sps:$4 sm:$0xff]   ;;  %v6008_v21 = vld [vmem:[#allocation12 + $0xcc] ss:$16 sps:$4 sm:$0xff]  }
 0x71b   : > { %5467 = vmatprep.subr.bf16.mxu1 %v5987_v7  ;;  %v4185_v5 = vld [vmem:[#allocation4 + $0x40] sm:$0xff]  ;;  %5511 = vmatpush1.bf16.msra.mxu0 %v5994_v9  ;;  %v4190_v9 = vld [vmem:[#allocation4 + $0x68] sm:$0xff] }
 0x71c   : > { %v5162_v60 = vadd.f32 %v5161_v35, %v5015_v52  ;;  %v5993_v35 = vld [vmem:[#allocation12 + $0x84] ss:$16 sps:$4 sm:$0xff]   ;;  %v5076_v2 = vadd.f32 %v5075_v63, %v4949_v8  ;;  %v5997_v52 = vld [vmem:[#allocation12 + $0xa0] ss:$16 sps:$4 sm:$0xff]   ;;  %5512 = vmatprep.subr.bf16.mxu0 %v6002_v3 }
 0x71d   : > { %v9536_v41 = vpop.permute.xlu0 %4832  ;;  %v4583_v26 = vpop.permute.xlu1 %4582  ;;  %v4187_v8 = vld [vmem:[#allocation4 + $0x50] sm:$0xff] }
 0x71e   : > { %v5000_v58 = vmul.f32 %v4583_v26, %v4232_v1  ;;  %5468 = vmatpush1.bf16.msra.mxu1 %v5985_v45  ;;  %v5077_v55 = vadd.f32 %v5076_v2, %v4950_v33  ;;  %v4186_v1 = vld [vmem:[#allocation4 + $0x48] sm:$0xff]  ;;  %v6011_v63 = vld [vmem:[#allocation12 + $0xe4] ss:$16 sps:$4 sm:$0xff]  }
 0x71f   : > { %5469 = vmatprep.subr.bf16.mxu1 %v5993_v35  ;;  %5513 = vmatpush1.bf16.msra.mxu0 %v6000_v59  ;;  %v4954_v45 = vmul.f32 %v9348_v34, %v4186_v1  ;;  %v6014_v33 = vld [vmem:[#allocation12 + $0xec] ss:$16 sps:$4 sm:$0xff]   ;;  %v4191_v59 = vld [vmem:[#allocation4 + $0x70] sm:$0xff] }
 0x720   : > { %v5142_v11 = vadd.f32 %v5141_v4, %v5000_v58  ;;  %v5078_v24 = vadd.f32 %v5077_v55, %v4951_v18  ;;  %5514 = vmatprep.subr.bf16.mxu0 %v6008_v21  ;;  %v6009_v18 = vld [vmem:[#allocation12 + $0xe0] ss:$16 sps:$4 sm:$0xff]   ;;  %v4959_v21 = vmul.f32 %v9290_v38, %v4191_v59  ;;  %v5109_v38 = vrot.slane %v9444_v16, 4 }
 0x721   : > { %v9540_v30 = vpop.permute.xlu0 %4757  ;;  %v4893_v44 = vpop.permute.xlu1 %4892 }
 0x722   : > { %v5062_v19 = vmul.f32 %v4893_v44, %v4294_v12  ;;  %5470 = vmatpush1.bf16.msra.mxu1 %v5991_v39  ;;  %v5079_v56 = vadd.f32 %v5078_v24, %v4952_v53  ;;  %v6012_v44 = vld [vmem:[#allocation12 + $0xe8] ss:$16 sps:$4 sm:$0xff]   ;;  %v4249_v39 = vld [vmem:[#allocation4 + $0x240] sm:$0xff]  ;;  %v4958_v24 = vmul.f32 %v9380_v6, %v4190_v9 }
 0x723   : > { %5471 = vmatprep.subr.bf16.mxu1 %v5999_v25  ;;  %5515 = vmatpush1.bf16.msra.mxu0 %v6006_v51 }
 0x724   : > { %v5224_v4 = vadd.f32 %v5223_v48, %v5062_v19  ;;  %v4953_v48 = vmul.f32 %v9282_v22, %v4185_v5  ;;  %v4955_v22 = vmul.f32 %v9356_v54, %v4187_v8  ;;  %5516 = vmatprep.subr.bf16.mxu0 %v6014_v33  ;;  %v4957_v54 = vmul.f32 %v9372_v27, %v4189_v42  ;;  %v4250_v8 = vld [vmem:[#allocation4 + $0x248] sm:$0xff] }
 0x725   : > { %v9543_v17 = vpop.permute.xlu0 %4527  ;;  %v4663_v20 = vpop.permute.xlu1 %4662 }
 0x726   : > { %v5016_v23 = vmul.f32 %v4663_v20, %v4248_v46  ;;  %5472 = vmatpush1.bf16.msra.mxu1 %v5997_v52  ;;  %v5080_v58 = vadd.f32 %v5079_v56, %v4953_v48  ;;  %v4234_v20 = vld [vmem:[#allocation4 + $0x1c8] sm:$0xff] }
 0x727   : > { %5473 = vmatprep.subr.bf16.mxu1 %v6005_v10  ;;  %5517 = vmatpush1.bf16.msra.mxu0 %v6012_v44  ;;  %v4192_v10 = vld [vmem:[#allocation4 + $0x78] sm:$0xff] }
 0x728   : > { %v5163_v49 = vadd.f32 %v5162_v60, %v5016_v23  ;;  %v4188_v60 = vld [vmem:[#allocation4 + $0x58] sm:$0xff]  ;;  %v5081_v19 = vadd.f32 %v5080_v58, %v4954_v45 }
 0x729   : > { %v9546_v7 = vpop.permute.xlu0 %4837  ;;  %v4588_v50 = vpop.permute.xlu1 %4587  ;;  %v4956_v34 = vmul.f32 %v9364_v43, %v4188_v60 }
 0x72a   : > { %v5001_v26 = vmul.f32 %v4588_v50, %v4233_v32  ;;  %5474 = vmatpush1.bf16.msra.mxu1 %v6003_v36  ;;  %v4296_v32 = vld [vmem:[#allocation4 + $0x3b8] sm:$0xff] }
 0x72b   : > { %5475 = vmatprep.subr.bf16.mxu1 %v6011_v63  ;;  %v4220_v36 = vld [vmem:[#allocation4 + $0x158] sm:$0xff]  ;;  %v4221_v63 = vld [vmem:[#allocation4 + $0x160] sm:$0xff] }
 0x72c   : > { %v5143_v12 = vadd.f32 %v5142_v11, %v5001_v26  ;;  %v5082_v11 = vadd.f32 %v5081_v19, %v4955_v22  ;;  %v4988_v33 = vmul.f32 %v9532_v14, %v4220_v36  ;;  %v5110_v19 = vadd.f32 %v5109_v38, %v9444_v16  ;;  %v4267_v38 = vld [vmem:[#allocation4 + $0x2d0] sm:$0xff] }
 0x72d   : > { %v9550_v35 = vpop.permute.xlu0 %4762  ;;  %v4898_v57 = vpop.permute.xlu1 %4897 }
 0x72e   : > { %v5063_v2 = vmul.f32 %v4898_v57, %v4295_v61  ;;  %5476 = vmatpush1.bf16.msra.mxu1 %v6009_v18  ;;  %v5083_v3 = vadd.f32 %v5082_v11, %v4956_v34  ;;  %v5125_v18 = vadd.f32 %v9519_v62, %v4988_v33  ;;  %v4224_v11 = vld [vmem:[#allocation4 + $0x178] sm:$0xff] }
 0x730   : > { %v5225_v55 = vadd.f32 %v5224_v4, %v5063_v2  ;;  %v5084_v23 = vadd.f32 %v5083_v3, %v4957_v54  ;;  %v4223_v2 = vld [vmem:[#allocation4 + $0x170] sm:$0xff] }
 0x731   : > { %v4533_v53 = vpop.permute.xlu0 %4532  ;;  %v4668_v46 = vpop.permute.xlu1 %4667 }
 0x732   : > { %v5017_v25 = vmul.f32 %v4668_v46, %v4249_v39  ;;  %v5085_v4 = vadd.f32 %v5084_v23, %v4958_v24  ;;  %v5111_v46 = vrot.slane %v5110_v19, 2 }
 0x734   : > { %v5164_v5 = vadd.f32 %v5163_v49, %v5017_v25  ;;  %v5086_v6 = vadd.f32 %v5085_v4, %v4959_v21  ;;  %v4960_v49 = vmul.f32 %v9388_v29, %v4192_v10  ;;  %v4989_v29 = vmul.f32 %v9543_v17, %v4221_v63  ;;  %v4266_v63 = vld [vmem:[#allocation4 + $0x2c8] sm:$0xff] }
 0x735   : > { %v9555_v43 = vpop.permute.xlu0 %4842  ;;  %v4593_v52 = vpop.permute.xlu1 %4592  ;;  %v5112_v23 = vadd.f32 %v5111_v46, %v5110_v19  ;;  %v4271_v46 = vld [vmem:[#allocation4 + $0x2f0] sm:$0xff] }
 0x736   : > { %v5002_v56 = vmul.f32 %v4593_v52, %v4234_v20  ;;  %v5087_v61 = vadd.f32 %v5086_v6, %v4960_v49  ;;  %v5126_v39 = vadd.f32 %v5125_v18, %v4989_v29  ;;  %v4269_v18 = vld [vmem:[#allocation4 + $0x2e0] sm:$0xff] }
 0x737   : > { %v5113_v59 = vrot.slane %v5112_v23, 1 }
 0x738   : > { %v9557_v27 = vadd.f32 %v5143_v12, %v5002_v56  ;;  %v4222_v12 = vld [vmem:[#allocation4 + $0x168] sm:$0xff]  ;;  %v5088_v42 = vrot.slane %v5087_v61, 4 }
 0x739   : > { %v9560_v1 = vpop.permute.xlu0 %4767  ;;  %v4903_v48 = vpop.permute.xlu1 %4902  ;;  %v4990_v44 = vmul.f32 %v4533_v53, %v4222_v12  ;;  %v5114_v21 = vadd.f32 %v5113_v59, %v5112_v23  ;;  %v5034_v12 = vmul.f32 %v9523_v40, %v4266_v63  ;;  %v4235_v23 = vld [vmem:[#allocation4 + $0x1d0] sm:$0xff] }
 0x73a   : > { %v5064_v50 = vmul.f32 %v4903_v48, %v4296_v32 }
 0x73b   : > { %v5127_v54 = vadd.f32 %v5126_v39, %v4990_v44  ;;  %v5186_v19 = vadd.f32 %v9515_v37, %v5034_v12  ;;  %v4238_v12 = vld [vmem:[#allocation4 + $0x1e8] sm:$0xff] }
 0x73c   : > { %v9563_v26 = vadd.f32 %v5225_v55, %v5064_v50  ;;  %v5089_v55 = vadd.f32 %v5088_v42, %v5087_v61  ;;  %v4268_v42 = vld [vmem:[#allocation4 + $0x2d8] sm:$0xff] }
 0x73d   : > { %v4538_v51 = vpop.permute.xlu0 %4537  ;;  %v4673_v58 = vpop.permute.xlu1 %4672  ;;  %v5036_v39 = vmul.f32 %v9550_v35, %v4268_v42  ;;  %v4236_v35 = vld [vmem:[#allocation4 + $0x1d8] sm:$0xff] }
 0x73e   : > { %v5018_v45 = vmul.f32 %v4673_v58, %v4250_v8  ;;  %v4991_v9 = vmul.f32 %v4538_v51, %v4223_v2  ;;  %v5090_v20 = vrot.slane %v5089_v55, 2  ;;  %v5035_v2 = vmul.f32 %v9540_v30, %v4267_v38 }
 0x740   : > { %v9566_v60 = vadd.f32 %v5164_v5, %v5018_v45  ;;  %v5128_v24 = vadd.f32 %v5127_v54, %v4991_v9  ;;  %v5091_v52 = vadd.f32 %v5090_v20, %v5089_v55  ;;  %v4270_v55 = vld [vmem:[#allocation4 + $0x2e8] sm:$0xff]  ;;  %v5037_v54 = vmul.f32 %v9560_v1, %v4269_v18  ;;  %v4272_v20 = vld [vmem:[#allocation4 + $0x2f8] sm:$0xff] }
 0x741   : > { %v9569_v22 = vpop.permute.xlu0 %4847  ;;  %v9571_v57 = vpop.permute.xlu1 %4597 }
 0x742   : > { %v5092_v32 = vrot.slane %v5091_v52, 1  ;;  %v5003_v1 = vmul.f32 %v9571_v57, %v4235_v23  ;;  %v10710_v23 = vld [vmem:[#allocation28_spill] sm:$0xff] }
 0x744   : > { %v5093_v6 = vadd.f32 %v5092_v32, %v5091_v52  ;;  %v4252_v52 = vld [vmem:[#allocation4 + $0x258] sm:$0xff]  ;;  %v5145_v18 = vadd.f32 %v9557_v27, %v5003_v1 }
 0x745   : > { %v4773_v34 = vpop.permute.xlu0 %4772  ;;  %v9576_v14 = vpop.permute.xlu1 %4907 }
 0x746   : > { %v5255_v8 = vsel %vm10708_vm13, %v5114_v21, %v5093_v6  ;;  %v5038_v40 = vmul.f32 %v4773_v34, %v4270_v55  ;;  %v4237_v34 = vld [vmem:[#allocation4 + $0x1e0] sm:$0xff]  ;;  %v4254_v6 = vld [vmem:[#allocation4 + $0x268] sm:$0xff] }
 0x749   : > { %v4543_v25 = vpop.permute.xlu0 %4542  ;;  %v4678_v3 = vpop.permute.xlu1 %4677 }
 0x74a   : > { %v4992_v17 = vmul.f32 %v4543_v25, %v4224_v11  ;;  %v5187_v11 = vadd.f32 %v5186_v19, %v5035_v2  ;;  %v4283_v2 = vld [vmem:[#allocation4 + $0x350] sm:$0xff] }
 0x74c   : > { %v5129_v5 = vadd.f32 %v5128_v24, %v4992_v17  ;;  %v5188_v25 = vadd.f32 %v5187_v11, %v5036_v39  ;;  %v4251_v24 = vld [vmem:[#allocation4 + $0x250] sm:$0xff] }
 0x74d   : > { %v4603_v62 = vpop.permute.xlu1 %4602  ;;  %v9584_v58 = vpop.permute.xlu0 %4852  ;;  %v5019_v37 = vmul.f32 %v4678_v3, %v4251_v24  ;;  %v9606_v39 = vld [vmem:[%s9695_s4] sm:$0x3f] }
 0x74e   : > { %v5130_v53 = vrot.slane %v5129_v5, 4  ;;  %v5004_v63 = vmul.f32 %v4603_v62, %v4236_v35  ;;  %v4239_v62 = vld [vmem:[#allocation4 + $0x1f0] sm:$0xff] }
 0x750   : > { %v5131_v16 = vadd.f32 %v5130_v53, %v5129_v5  ;;  %v5189_v5 = vadd.f32 %v5188_v25, %v5037_v54  ;;  %v5146_v55 = vadd.f32 %v5145_v18, %v5004_v63  ;;  %v4256_v25 = vld [vmem:[#allocation4 + $0x278] sm:$0xff] }
 0x751   : > { %v9578_v56 = vpop.permute.xlu1 %4912  ;;  %v4778_v33 = vpop.permute.xlu0 %4777 }
 0x752   : > { %v5132_v4 = vrot.slane %v5131_v16, 2  ;;  %v5039_v53 = vmul.f32 %v4778_v33, %v4271_v46  ;;  %v4284_v46 = vld [vmem:[#allocation4 + $0x358] sm:$0xff] }
 0x754   : > { %v5133_v10 = vadd.f32 %v5132_v4, %v5131_v16  ;;  %v5190_v16 = vadd.f32 %v5189_v5, %v5038_v40  ;;  %v4253_v4 = vld [vmem:[#allocation4 + $0x260] sm:$0xff] }
 0x755   : > { %v4683_v48 = vpop.permute.xlu1 %4682  ;;  %v9590_v44 = vpop.permute.xlu0 %4702 }
 0x756   : > { %v5134_v50 = vrot.slane %v5133_v10, 1  ;;  %v5020_v21 = vmul.f32 %v4683_v48, %v4252_v52  ;;  %v4240_v52 = vld [vmem:[#allocation4 + $0x1f8] sm:$0xff] }
 0x758   : > { %v5135_v49 = vadd.f32 %v5134_v50, %v5133_v10  ;;  %v4281_v10 = vld [vmem:[#allocation4 + $0x340] sm:$0xff]  ;;  %v5191_v50 = vadd.f32 %v5190_v16, %v5039_v53  ;;  %v4298_v16 = vld [vmem:[#allocation4 + $0x3c8] sm:$0xff] }
 0x759   : > { %v4608_v36 = vpop.permute.xlu1 %4607  ;;  %v4783_v30 = vpop.permute.xlu0 %4782  ;;  %v5049_v33 = vmul.f32 %v9521_v31, %v4281_v10 }
 0x75a   : > { %v9582_v51 = vsel %vm10709_vm14, %v5135_v49, %v5255_v8  ;;  %v5040_v59 = vmul.f32 %v4783_v30, %v4272_v20  ;;  %v4282_v49 = vld [vmem:[#allocation4 + $0x348] sm:$0xff]  ;;  %v5166_v8 = vadd.f32 %v9566_v60, %v5019_v37  ;;  %v5005_v57 = vmul.f32 %v4608_v36, %v4237_v34 }
 0x75b   : > { %v368_v60 = vrot.slane %v9606_v39, %v10574_v13  ;;  %v5050_v31 = vmul.f32 %v9536_v41, %v4282_v49  ;;  %v5206_v27 = vadd.f32 %v9511_v47, %v5049_v33  ;;  %v5051_v36 = vmul.f32 %v9546_v7, %v4283_v2  ;;  %v4300_v2 = vld [vmem:[#allocation4 + $0x3d8] sm:$0xff] }
 0x75c   : > { %v5192_v3 = vadd.f32 %v5191_v50, %v5040_v59  ;;  %v5167_v19 = vadd.f32 %v5166_v8, %v5020_v21  ;;  %v5147_v20 = vadd.f32 %v5146_v55, %v5005_v57  ;;  %v5052_v37 = vmul.f32 %v9555_v43, %v4284_v46  ;;  %v4286_v21 = vld [vmem:[#allocation4 + $0x368] sm:$0xff] }
 0x75d   : > { %v9586_v45 = vpop.permute.xlu1 %4917  ;;  %v668_v41 = vadd.f32 %v10710_v23, %v368_v60  ;;  %v5207_v53 = vadd.f32 %v5206_v27, %v5050_v31  ;;  %v5024_v47 = vmul.f32 %v9590_v44, %v4256_v25  ;;  %v5066_v43 = vmul.f32 %v9578_v56, %v4298_v16  ;;  %v4287_v31 = vld [vmem:[#allocation4 + $0x370] sm:$0xff]  ;;  %v4288_v56 = vld [vmem:[#allocation4 + $0x378] sm:$0xff]  ;;  %v4302_v27 = vld [vmem:[#allocation4 + $0x3e8] sm:$0xff] }
 0x75e   : > { %v5193_v40 = vrot.slane %v5192_v3, 4  ;;  %v4304_v16 = vld [vmem:[#allocation4 + $0x3f8] sm:$0xff] }
 0x75f   : > { %v5208_v1 = vadd.f32 %v5207_v53, %v5051_v36  ;;  %v5758_v49 = vmul.f32 -1.442695, %v668_v41 }
 0x761   : > { %v4688_v61 = vpop.permute.xlu1 %4687  ;;  %v5209_v63 = vadd.f32 %v5208_v1, %v5052_v37  ;;  %6273 = vpow2.f32 %v5758_v49 }
 0x762   : > { %v5021_v38 = vmul.f32 %v4688_v61, %v4253_v4  ;;  %v4255_v61 = vld [vmem:[#allocation4 + $0x270] sm:$0xff]  ;;  %v5194_v4 = vadd.f32 %v5193_v40, %v5192_v3 }
 0x764   : > { %v5168_v11 = vadd.f32 %v5167_v19, %v5021_v38  ;;  %v5195_v3 = vrot.slane %v5194_v4, 2 }
 0x765   : > { %v4613_v29 = vpop.permute.xlu1 %4612 }
 0x766   : > { %v5006_v54 = vmul.f32 %v4613_v29, %v4238_v12  ;;  %v4285_v29 = vld [vmem:[#allocation4 + $0x360] sm:$0xff] }
 0x767   : > { %v5053_v8 = vmul.f32 %v9569_v22, %v4285_v29  ;;  %v4301_v22 = vld [vmem:[#allocation4 + $0x3e0] sm:$0xff] }
 0x768   : > { %v5148_v7 = vadd.f32 %v5147_v20, %v5006_v54 }
 0x769   : > { %v9594_v9 = vpop.permute.xlu1 %4922 }
 0x76d   : > { %v4693_v17 = vpop.permute.xlu1 %4692 }
 0x76e   : > { %v5022_v48 = vmul.f32 %v4693_v17, %v4254_v6  ;;  %v4297_v17 = vld [vmem:[#allocation4 + $0x3c0] sm:$0xff] }
 0x76f   : > { %v5065_v59 = vmul.f32 %v9576_v14, %v4297_v17  ;;  %v5054_v14 = vmul.f32 %v9584_v58, %v4286_v21  ;;  %v5196_v58 = vadd.f32 %v5195_v3, %v5194_v4  ;;  %v4303_v17 = vld [vmem:[#allocation4 + $0x3f0] sm:$0xff] }
 0x770   : > { %v5169_v30 = vadd.f32 %v5168_v11, %v5022_v48  ;;  %v5210_v48 = vadd.f32 %v5209_v63, %v5053_v8 }
 0x771   : > { %v4618_v32 = vpop.permute.xlu1 %4617  ;;  %v5227_v33 = vadd.f32 %v9563_v26, %v5065_v59  ;;  %v5197_v23 = vrot.slane %v5196_v58, 1 }
 0x772   : > { %v5007_v5 = vmul.f32 %v4618_v32, %v4239_v62  ;;  %v4299_v32 = vld [vmem:[#allocation4 + $0x3d0] sm:$0xff]  ;;  %v4863_v62 = vpop.permute.xlu0 %4862  ;;  %v5211_v11 = vadd.f32 %v5210_v48, %v5054_v14 }
 0x773   : > { %v5067_v12 = vmul.f32 %v9586_v45, %v4299_v32  ;;  %v5228_v60 = vadd.f32 %v5227_v33, %v5066_v43  ;;  %v5198_v59 = vadd.f32 %v5197_v23, %v5196_v58  ;;  %v384_v58 = vrot.slane %v9606_v39, %v10602_v15 }
 0x774   : > { %v5149_v50 = vadd.f32 %v5148_v7, %v5007_v5 }
 0x775   : > { %v9600_v42 = vpop.permute.xlu1 %4927  ;;  %v5229_v54 = vadd.f32 %v5228_v60, %v5067_v12 }
 0x776   : > { %v5069_v36 = vmul.f32 %v9600_v42, %v4301_v22  ;;  %v372_v22 = vrot.slane %v9606_v39, %v10591_v0 }
 0x779   : > { %v4698_v24 = vpop.permute.xlu1 %4697 }
 0x77a   : > { %v5023_v13 = vmul.f32 %v4698_v24, %v4255_v61  ;;  %v5068_v61 = vmul.f32 %v9594_v9, %v4300_v2  ;;  %v5056_v24 = vmul.f32 %v4863_v62, %v4288_v56  ;;  %v376_v56 = vrot.slane %v9606_v39, %v10594_v28  ;;  %v5265_v62 = vld [vmem:[%s6720_s21 + $0x8] sm:$0xff] }
 0x77c   : > { %v5170_v35 = vadd.f32 %v5169_v30, %v5023_v13  ;;  %v5230_v20 = vadd.f32 %v5229_v54, %v5068_v61 }
 0x77d   : > { %v4623_v10 = vpop.permute.xlu1 %4622 }
 0x77e   : > { %v5171_v34 = vadd.f32 %v5170_v35, %v5024_v47  ;;  %v5008_v6 = vmul.f32 %v4623_v10, %v4240_v52  ;;  %v5231_v53 = vadd.f32 %v5230_v20, %v5069_v36  ;;  %v6274_v35 = vpop.eup %6273 }
 0x780   : > { %v5172_v38 = vrot.slane %v5171_v34, 4  ;;  %v5150_v44 = vadd.f32 %v5149_v50, %v5008_v6  ;;  %v5244_v6 = vadd.f32 1.0, %v6274_v35 }
 0x781   : > { %v4933_v18 = vpop.permute.xlu1 %4932 }
 0x782   : > { %v5173_v19 = vadd.f32 %v5172_v38, %v5171_v34  ;;  %v5151_v57 = vrot.slane %v5150_v44, 4  ;;  %v5070_v5 = vmul.f32 %v4933_v18, %v4302_v27  ;;  %6275 = vrcp.f32 %v5244_v6 }
 0x784   : > { %v5174_v55 = vrot.slane %v5173_v19, 2  ;;  %v5152_v26 = vadd.f32 %v5151_v57, %v5150_v44  ;;  %v5232_v7 = vadd.f32 %v5231_v53, %v5070_v5 }
 0x785   : > { %v4858_v45 = vpop.permute.xlu1 %4857 }
 0x786   : > { %v5175_v46 = vadd.f32 %v5174_v55, %v5173_v19  ;;  %v5153_v25 = vrot.slane %v5152_v26, 2  ;;  %v5055_v40 = vmul.f32 %v4858_v45, %v4287_v31  ;;  %v5264_v31 = vld [vmem:[%s6720_s21] sm:$0xff]  ;;  %v5803_v55 = vadd.f32 %v5265_v62, %v376_v56  ;;  %v5267_v45 = vld [vmem:[%s6720_s21 + $0x18] sm:$0xff] }
 0x787   : > { %v5801_v61 = vadd.f32 %v5264_v31, %v372_v22  ;;  %v5807_v20 = vadd.f32 %v5267_v45, %v384_v58 }
 0x788   : > { %v5154_v30 = vadd.f32 %v5153_v25, %v5152_v26  ;;  %v5212_v13 = vadd.f32 %v5211_v11, %v5055_v40  ;;  %v5176_v9 = vrot.slane %v5175_v46, 1 }
 0x789   : > { %v4938_v41 = vpop.permute.xlu1 %4937 }
 0x78a   : > { %v5155_v52 = vrot.slane %v5154_v30, 1  ;;  %v5213_v37 = vadd.f32 %v5212_v13, %v5056_v24  ;;  %v5071_v29 = vmul.f32 %v4938_v41, %v4303_v17  ;;  %v5177_v4 = vadd.f32 %v5176_v9, %v5175_v46  ;;  %v5266_v13 = vld [vmem:[%s6720_s21 + $0x10] sm:$0xff]  ;;  %s5795_s21 = sshll.u32 %s6575_s28, 6  ;;  %s6513_s28 = smov [#allocation13]  }
 0x78b   : > { %s9647_s30 = scalar_lea.hbm %s9698_s7, %s5795_s21  ;;  %s6429_s12 = sshll.u32 %s6513_s28, 4  ;;  %s6430_s12 = int_to_ptr.vmem [resolvable:$false] %s6429_s12 }
 0x78c   : > { %v5156_v47 = vadd.f32 %v5155_v52, %v5154_v30  ;;  %v5214_v42 = vrot.slane %v5213_v37, 4  ;;  %v5233_v32 = vadd.f32 %v5232_v7, %v5071_v29  ;;  %v6276_v19 = vpop.eup %6275  ;;  %v10715_v30 = vld [vmem:[#allocation58_spill] sm:$0xff]  ;;  %v309_v7 = vld [vmem:[#allocation3] sm:$0xff]  ;;  %s6431_s22 = scalar_lea.vmem %s6430_s12, 128  ;;  %p6432_p10 = scmp.lt.s32.totalorder %s9649_s9, %s6430_s12 }
 0x78d   : > { %v4943_v10 = vpop.permute.xlu1 %4942  ;;  %v380_v5 = vrot.slane %v9606_v39, %v10715_v30  ;;  %p6433_p13 = scmp.lt.s32.totalorder %s6431_s22, %s6425_s10 }
 0x78e   : > { %v5257_v1 = vsel %vm10711_vm5, %v5156_v47, %v9582_v51  ;;  %v5215_v21 = vadd.f32 %v5214_v42, %v5213_v37  ;;  %v5072_v50 = vmul.f32 %v4943_v10, %v4304_v16 }
 0x78f   : > { %v5258_v34 = vsel %vm2417_vm9, %v5177_v4, %v5257_v1  ;;  %vm10714_vm9 = vmmov %vm10568_vm4  ;;  %v5805_v15 = vadd.f32 %v5266_v13, %v380_v5  ;;  %p6434_p5 = por %p6433_p13, %p6432_p10 }
 0x790   : > { %v5216_v49 = vrot.slane %v5215_v21, 2  ;;  %v5234_v8 = vadd.f32 %v5233_v32, %v5072_v50  ;;  %v5259_v43 = vsel %vm10712_vm6, %v5198_v59, %v5258_v34 }
 0x791   : > { %p6435_p0 = pnand %p6434_p5, %p6428_p7 }
 0x792   : > { %v5217_v63 = vadd.f32 %v5216_v49, %v5215_v21  ;;  %v5235_v38 = vrot.slane %v5234_v8, 4 }
 0x794   : > { %v5218_v44 = vrot.slane %v5217_v63, 1  ;;  %v5236_v33 = vadd.f32 %v5235_v38, %v5234_v8 }
 0x796   : > { %v5219_v14 = vadd.f32 %v5218_v44, %v5217_v63  ;;  %v5237_v3 = vrot.slane %v5236_v33, 2 }
 0x798   : > { %v5238_v51 = vadd.f32 %v5237_v3, %v5236_v33  ;;  %v5260_v12 = vsel %vm10713_vm7, %v5219_v14, %v5259_v43 }
 0x79a   : > { %v5239_v2 = vrot.slane %v5238_v51, 1 }
 0x79c   : > { %v5240_v18 = vadd.f32 %v5239_v2, %v5238_v51 }
 0x79e   : > { %v5261_v57 = vsel %vm10714_vm9, %v5240_v18, %v5260_v12 }
 0x79f   : > { %v5263_v48 = vmul.f32 %v6276_v19, %v5261_v57 }
 0x7a1   : > { %v5268_v60 = vpack.c.bf16 %v5263_v48, %v5263_v48 }
 0x7a3   : > { %5494 = vmatmul.mubr.bf16.vlgmr.msra.gmra.mrb[0].mxu1 %v5268_v60  ;;  %5535 = vmatmul.mubr.bf16.vlgmr.msra.gmra.mrb[4].mxu0 %v5268_v60 }
 0x876   : > { %v5495_v26 = vpop.f32.mrb[0].mxu1  ;;  %v5536_v11 = vpop.f32.mrb[4].mxu0 }
 0x877   : > { %v5802_v54 = vadd.f32 %v5801_v61, %v5495_v26  ;;  %v5497_v27 = vpop.f32.mrb[1].mxu1  ;;  %v5538_v36 = vpop.f32.mrb[5].mxu0  ;;  %v5806_v41 = vadd.f32 %v5805_v15, %v5536_v11 }
 0x878   : > { %v5804_v46 = vadd.f32 %v5803_v55, %v5497_v27  ;;  %v5499_v25 = vpop.f32.mrb[2].mxu1  ;;  %v5540_v0 = vpop.f32.mrb[6].mxu0  ;;  %v5808_v23 = vadd.f32 %v5807_v20, %v5538_v36 }
 0x879   : > { %v5791_v40 = vmul.f32 -1.442695, %v5802_v54  ;;  %v5500_v24 = vpop.f32.mrb[3].mxu1  ;;  %v5541_v17 = vpop.f32.mrb[7].mxu0 }
 0x87a   : > { %v5792_v28 = vmul.f32 -1.442695, %v5804_v46  ;;  %v5793_v9 = vmul.f32 -1.442695, %v5808_v23 }
 0x87b   : > { %6277 = vpow2.f32 %v5791_v40 }
 0x87c   : > { %6279 = vpow2.f32 %v5792_v28 }
 0x87d   : > { %6281 = vpow2.f32 %v5793_v9 }
 0x87e   : > { %6283 = vtanh.f32 %v5806_v41 }
 0x885   : > { %v6278_v53 = vpop.eup %6277 }
 0x886   : > { %v6280_v52 = vpop.eup %6279  ;;  %v5554_v37 = vadd.f32 1.0, %v6278_v53 }
 0x887   : > { %v5560_v29 = vadd.f32 1.0, %v6280_v52  ;;  %v6282_v16 = vpop.eup %6281 }
 0x888   : > { %6285 = vrcp.f32 %v5554_v37  ;;  %v6284_v47 = vpop.eup %6283  ;;  %v5567_v59 = vadd.f32 1.0, %v6282_v16 }
 0x889   : > { %6287 = vrcp.f32 %v5560_v29 }
 0x88a   : > { %6289 = vrcp.f32 %v5567_v59 }
 0x892   : > { %v6286_v39 = vpop.eup %6285 }
 0x893   : > { %v6288_v42 = vpop.eup %6287  ;;  %v5571_v35 = vmul.f32 %v6286_v39, %v6284_v47 }
 0x894   : > { %v5570_v4 = vmul.f32 %v6288_v42, %v309_v7  ;;  %v6290_v1 = vpop.eup %6289 }
 0x896   : > { %v5572_v10 = vadd.f32 %v5571_v35, %v5570_v4 }
 0x898   : > { %5576 = vst [vmem:[#allocation3] sm:$0xff] %v5572_v10  ;;  %6291 = vtanh.f32 %v5572_v10 }
 0x8a2   : > { %v6292_v21 = vpop.eup %6291 }
 0x8a3   : > { %v5574_v32 = vmul.f32 %v6292_v21, %v6290_v1 }
 0x8a5   : > { %5575 = vst [vmem:[#allocation2] sm:$0xff] %v5574_v32  ;;  %v5577_v50 = vpack.c.bf16 %v5574_v32, %v5574_v32 }
 0x8a7   : > { %5578 = vst [vmem:[%s6731_s11] sm:$0xf] %v5577_v50 }
 0x8a8   : > { %6438 = shalt.err (!%p6435_p0)
}
 0x8a9   : > { %s6439_s15 = scalar_lea.hbm %s9647_s30, 64  ;;  %s6443_s14 = scalar_lea.hbm %s9698_s7, 448 }
 0x8aa   : > { %p6440_p11 = scmp.ne.s32.totalorder %s9647_s30, %s6439_s15  ;;  %p6444_p2 = scmp.lt.u32.totalorder %s9647_s30, %s9698_s7 }
 0x8ab   : > { %p6445_p4 = scmp.lt.u32.totalorder %s6443_s14, %s6439_s15  ;;  %p6447_p12 = scmp.lt.u32.totalorder %s6439_s15, %s9647_s30 }
 0x8ac   : > { %p6441_p8 = pnand %p6440_p11, %p6670_p6 }
 0x8ad   : > { %p6446_p9 = por %p6445_p4, %p6444_p2 }
 0x8ae   : > { %p6442_p1 = pneg %p6441_p8 }
 0x8af   : > { %p6448_p3 = por %p6447_p12, %p6446_p9 }
 0x8b1   : > { %p6449_p7 = pnand %p6448_p3, %p6442_p1 }
 0x8b3   : > { %6452 = shalt.err (!%p6449_p7)
}
 0x8b4   : > { %5827 = dma.vmem_to_hbm [thread:$0]  (%p6670_p6), %s9649_s9, 64, %s9647_s30, %s5580_s2  }
 0x8b5 PF: > { %p5849_p10 = scmp.ge.s32.totalorder %s6499_s27, 2  ;;  %s5605_s21 = sand.u32 1, %s6487_s24  }
 0x8b6   : > { %p10716_p13 = scmp.ne.s32.totalorder %s10002_s8, 0  ;;  %s5606_s23 = scalar_lea.sflag [#allocation9], %s5605_s21 }
 0x8b8   : > { %p5841_p5 = pnand %p5849_p10, %p10716_p13 }
 0x8ba   : > { %6482 = dma.done.wait (!%p5841_p5), %s5606_s23, 64  }
 0x8bb   : > { %6484 = vsyncadd (!%p5841_p5), %s5606_s23, 4294967232  ;;  %p21_p0 = scmp.ge.s32.totalorder %s6657_s13, 9   ;;  %s10717_s24 = smov %s6491_s25 }
 0x8bc   : > { %s10718_s25 = smov %s6495_s26  ;;  %s10719_s26 = smov %s6666_s17 }
 0x8bd   : > { %s10720_s27 = smov %s6657_s13  ;;  %23 = sbr.rel (!%p21_p0) target bundleno = 8 (0x8), region = 107 }
 0x8c4   :  { %5611 = vsyncpa [#allocation8], 1 }
 0x8c5   :  { %5613 = vsyncpa [#allocation8 + $0x1], 1 }
 0x8c6   :  { %5614 = vsyncpa [#allocation11], 1 }
 0x8c7   :  { %5615 = vsyncpa [#allocation9], 1 }
 0x8c8   :  { %5617 = vsyncpa [#allocation9 + $0x1], 1 }
 0x8c9   :  { %5618 = vsyncmov [#allocation6] }
 0x8cc   :  { %s5619_s27 = vpop.sfrf %5618 }
 0x8cd   :  { %p5798_p6 = scmp.ne.s32.totalorder %s5619_s27, 0 }
 0x8cf   :  { %5623 = shalt.err (%p5798_p6)  }
 0x8d0   :  { %5625 = vsyncmov [#allocation6 + $0x1] }
 0x8d3   :  { %s5626_s8 = vpop.sfrf %5625 }
 0x8d4   :  { %p5799_p11 = scmp.ne.s32.totalorder %s5626_s8, 0 }
 0x8d6   :  { %5630 = shalt.err (%p5799_p11)  }

</bundles_post_ra>
